<compile_context>
chip_gen: v6e
topology: v6e:2x2x1
jax: 0.10.0
libtpu: 0.0.40
codegen_flags: <defaults>
</compile_context>

<pallas_src>
import math

import jax
import jax.numpy as jnp
from jax.experimental import pallas as pl
from jax.experimental.pallas import tpu as pltpu

# ---------------- model hyperparameters (small, synthetic) ----------------
C_IN = 3           # RGB
IMG = 16           # spatial size
PATCH = 4          # patch size
NP = (IMG // PATCH) ** 2          # 16 tokens per image
PATCH_DIM = C_IN * PATCH * PATCH  # 48
D = 32             # hidden size
NUM_HEADS = 2
HEAD_DIM = D // NUM_HEADS         # 16
FFN = 64           # MLP intermediate size
NUM_LAYERS = 2
NUM_CLASSES = 4
LN_EPS = 1e-12     # BEiT layer_norm_eps

LANE = 128         # TPU lane width; all activations / weight slabs padded to it
B = 16             # batch (number of images)
B_BLK = 8          # images per grid step -> T_BLK = 128 token rows
T_BLK = B_BLK * NP
assert T_BLK == LANE, "mask/pool slab packing below assumes T_BLK == 128"

QKV_SLABS = 3 * NUM_HEADS         # (q,k,v) x heads, each its own 128-lane slab

# ---- row offsets into the bf16 "main" weight slab (all 128-lane blocks) ----
_LAYER_MAIN_ROWS = (NUM_HEADS + 2) * LANE      # per layer: Wo per head, W1, W2
WP_OFF = 0


def _wo_off(l, hh):
    return LANE + l * _LAYER_MAIN_ROWS + hh * LANE


def _w1_off(l):
    return LANE + l * _LAYER_MAIN_ROWS + NUM_HEADS * LANE


def _w2_off(l):
    return LANE + l * _LAYER_MAIN_ROWS + (NUM_HEADS + 1) * LANE


WH_OFF = LANE + NUM_LAYERS * _LAYER_MAIN_ROWS
MAIN_ROWS = WH_OFF + LANE

# ---- row offsets into the f32 consts slab (mask, pool matrix, biases) ----
MASK_OFF = 0                       # (T_BLK, T_BLK) block-diagonal attention bias
POOL_OFF = T_BLK                   # (B_BLK, T_BLK) per-image mean-pool matrix
_BIAS0 = POOL_OFF + B_BLK
assert _BIAS0 % 8 == 0


def _bias_row(i):                  # each bias vector on its own 8-aligned row
    return _BIAS0 + 8 * i


BP_ROW = _bias_row(0)


def _bqkv_row(l, slab):
    return _bias_row(1 + l * 9 + slab)


def _bo_row(l):
    return _bias_row(1 + l * 9 + 6)


def _b1_row(l):
    return _bias_row(1 + l * 9 + 7)


def _b2_row(l):
    return _bias_row(1 + l * 9 + 8)


BH_ROW = _bias_row(1 + NUM_LAYERS * 9)
CONST_ROWS = BH_ROW + 8


def _ln_nogain(x):
    # Pure LayerNorm normalization over the first D lanes (affine folded into
    # the following matmul).  Relies on lanes D:128 of x being exactly zero so
    # sum(x)/D and sum(x*x)/D are the true first-D-lane statistics.
    mu = jnp.sum(x, axis=-1, keepdims=True) * (1.0 / D)
    ex2 = jnp.sum(x * x, axis=-1, keepdims=True) * (1.0 / D)
    var = jnp.maximum(ex2 - mu * mu, 0.0)
    return (x - mu) * jax.lax.rsqrt(var + LN_EPS)


def _gelu(x):
    # tanh approximation of GELU (EUP-friendly)
    c = math.sqrt(2.0 / math.pi)
    return 0.5 * x * (1.0 + jnp.tanh(c * (x + 0.044715 * x * x * x)))


def beit_forward_kernel(patches_ref, wmain_ref, wqkv_ref, consts_ref, logits_ref):
    bf16 = jnp.bfloat16
    f32 = jnp.float32

    # constants built once in the wrapper; constant index_map -> single DMA
    mask_bias = consts_ref[MASK_OFF:MASK_OFF + T_BLK, :]       # (T, T)
    pool_mat = consts_ref[POOL_OFF:POOL_OFF + B_BLK, :]        # (B_BLK, T)

    # ---- patch embedding (stride-P conv as matmul on unfolded patches) ----
    h = jnp.dot(patches_ref[...].astype(bf16),
                wmain_ref[WP_OFF:WP_OFF + LANE, :],
                preferred_element_type=f32)
    h = h + consts_ref[BP_ROW:BP_ROW + 1, :]                   # (T, 128)

    for l in range(NUM_LAYERS):
        # ---- self-attention (pre-LN; LN affine + score scale folded) ----
        y = _ln_nogain(h)
        qkv = jnp.dot(y.astype(bf16), wqkv_ref[l],
                      preferred_element_type=f32)              # (T, 6*128)
        for hh in range(NUM_HEADS):
            qs = (0 * NUM_HEADS + hh) * LANE
            ks = (1 * NUM_HEADS + hh) * LANE
            vs = (2 * NUM_HEADS + hh) * LANE
            bq_r = _bqkv_row(l, 0 * NUM_HEADS + hh)
            bk_r = _bqkv_row(l, 1 * NUM_HEADS + hh)
            bv_r = _bqkv_row(l, 2 * NUM_HEADS + hh)
            q = qkv[:, qs:qs + LANE] + consts_ref[bq_r:bq_r + 1, :]
            k = qkv[:, ks:ks + LANE] + consts_ref[bk_r:bk_r + 1, :]
            v = qkv[:, vs:vs + LANE] + consts_ref[bv_r:bv_r + 1, :]

            # scores: contract last dims on the MXU (no transpose);
            # 1/sqrt(HEAD_DIM) already folded into q weights/bias.
            s = jax.lax.dot_general(
                q.astype(bf16), k.astype(bf16),
                dimension_numbers=(((1,), (1,)), ((), ())),
                preferred_element_type=f32)
            s = s + mask_bias
            s = s - jnp.max(s, axis=-1, keepdims=True)
            p = jnp.exp(s)
            attn = p * pl.reciprocal(jnp.sum(p, axis=-1, keepdims=True),
                                     approx=True)
            ctx = jnp.dot(attn.astype(bf16), v.astype(bf16),
                          preferred_element_type=f32)          # (T, 128)

            # per-head output projection accumulated straight into the
            # residual stream (no ctx scratch / masked partial stores)
            h = h + jnp.dot(ctx.astype(bf16),
                            wmain_ref[_wo_off(l, hh):_wo_off(l, hh) + LANE, :],
                            preferred_element_type=f32)
        h = h + consts_ref[_bo_row(l):_bo_row(l) + 1, :]

        # ---- MLP (pre-LN; LN affine folded into W1 / b1) ----
        y = _ln_nogain(h)
        y = jnp.dot(y.astype(bf16),
                    wmain_ref[_w1_off(l):_w1_off(l) + LANE, :],
                    preferred_element_type=f32)
        y = _gelu(y + consts_ref[_b1_row(l):_b1_row(l) + 1, :])
        h = h + jnp.dot(y.astype(bf16),
                        wmain_ref[_w2_off(l):_w2_off(l) + LANE, :],
                        preferred_element_type=f32)
        h = h + consts_ref[_b2_row(l):_b2_row(l) + 1, :]

    # ---- per-image mean pool + pooler LN (affine folded into the head) ----
    pooled = jnp.dot(pool_mat, h, preferred_element_type=f32)  # (B_BLK, 128)
    pooled = _ln_nogain(pooled)

    # ---- classifier head, lane-dense (classes zero-padded to 128 lanes) ----
    logits = jnp.dot(pooled.astype(bf16),
                     wmain_ref[WH_OFF:WH_OFF + LANE, :],
                     preferred_element_type=f32)
    logits_ref[...] = logits + consts_ref[BH_ROW:BH_ROW + 1, :]


def pack_weights(params):
    """Fold LN affines / score scale and pack all weights into 3 slabs."""
    f32 = jnp.float32
    scale = 1.0 / math.sqrt(HEAD_DIM)

    # --- bf16 main slab: patch embed, per-head Wo, MLP, classifier head ---
    main = jnp.zeros((MAIN_ROWS, LANE), f32)
    main = main.at[WP_OFF:WP_OFF + PATCH_DIM, :D].set(params["wp"])
    for l in range(NUM_LAYERS):
        for hh in range(NUM_HEADS):
            main = main.at[_wo_off(l, hh):_wo_off(l, hh) + HEAD_DIM, :D].set(
                params["wo"][l, hh * HEAD_DIM:(hh + 1) * HEAD_DIM, :])
        w1f = params["ln2g"][l].reshape(D, 1) * params["w1"][l]   # fold LN2 gamma
        main = main.at[_w1_off(l):_w1_off(l) + D, :FFN].set(w1f)
        main = main.at[_w2_off(l):_w2_off(l) + FFN, :D].set(params["w2"][l])
    whf = params["lnpg"].reshape(D, 1) * params["wh"]             # fold pooler gamma
    main = main.at[WH_OFF:WH_OFF + D, :NUM_CLASSES].set(whf)
    main = main.astype(jnp.bfloat16)

    # --- bf16 fused QKV slab: each (q/k/v, head) in its own 128-lane slab ---
    wqkv = jnp.zeros((NUM_LAYERS, LANE, QKV_SLABS * LANE), f32)
    for l in range(NUM_LAYERS):
        g1 = params["ln1g"][l].reshape(D, 1)                      # fold LN1 gamma
        comps = (scale * g1 * params["wq"][l],                    # fold 1/sqrt(dh)
                 g1 * params["wk"][l],
                 g1 * params["wv"][l])
        for c, w in enumerate(comps):
            for hh in range(NUM_HEADS):
                s = c * NUM_HEADS + hh
                wqkv = wqkv.at[l, :D, s * LANE:s * LANE + HEAD_DIM].set(
                    w[:, hh * HEAD_DIM:(hh + 1) * HEAD_DIM])
    wqkv = wqkv.astype(jnp.bfloat16)

    # --- f32 consts slab: block-diag mask, pool matrix, all biases ---
    consts = jnp.zeros((CONST_ROWS, LANE), f32)
    img_r = jnp.arange(T_BLK)[:, None] // NP
    img_c = jnp.arange(T_BLK)[None, :] // NP
    mask = jnp.where(img_r == img_c, 0.0, -1e30).astype(f32)
    consts = consts.at[MASK_OFF:MASK_OFF + T_BLK, :].set(mask)
    pool = jnp.where(jnp.arange(B_BLK)[:, None] == img_c, 1.0 / NP, 0.0)
    consts = consts.at[POOL_OFF:POOL_OFF + B_BLK, :].set(pool.astype(f32))

    consts = consts.at[BP_ROW, :D].set(params["bp"].reshape(D))
    for l in range(NUM_LAYERS):
        b1ln = params["ln1b"][l].reshape(1, D)
        bq = scale * (b1ln @ params["wq"][l] + params["bq"][l].reshape(1, D))
        bk = b1ln @ params["wk"][l] + params["bk"][l].reshape(1, D)
        bv = b1ln @ params["wv"][l] + params["bv"][l].reshape(1, D)
        for c, bvec in enumerate((bq, bk, bv)):
            for hh in range(NUM_HEADS):
                r = _bqkv_row(l, c * NUM_HEADS + hh)
                consts = consts.at[r, :HEAD_DIM].set(
                    bvec[0, hh * HEAD_DIM:(hh + 1) * HEAD_DIM])
        consts = consts.at[_bo_row(l), :D].set(params["bo"][l].reshape(D))
        b2ln = params["ln2b"][l].reshape(1, D)
        b1f = b2ln @ params["w1"][l] + params["b1"][l].reshape(1, FFN)
        consts = consts.at[_b1_row(l), :FFN].set(b1f.reshape(FFN))
        consts = consts.at[_b2_row(l), :D].set(params["b2"][l].reshape(D))
    bhf = params["lnpb"].reshape(1, D) @ params["wh"] + params["bh"]
    consts = consts.at[BH_ROW, :NUM_CLASSES].set(bhf.reshape(NUM_CLASSES))
    return main, wqkv, consts


def beit_classify(images, params):
    """images: [B, C, H, W] float32 (NCHW).  Returns (labels [B] int32, logits [B, NUM_CLASSES])."""
    b, c, hgt, wid = images.shape
    assert (c, hgt, wid) == (C_IN, IMG, IMG)
    assert b % B_BLK == 0

    # im2col glue: NCHW -> [B*Np, PATCH_DIM] non-overlapping patches, lane-padded
    patches = images.reshape(b, c, hgt // PATCH, PATCH, wid // PATCH, PATCH)
    patches = patches.transpose(0, 2, 4, 1, 3, 5).reshape(b * NP, PATCH_DIM)
    patches = jnp.zeros((b * NP, LANE), jnp.float32).at[:, :PATCH_DIM].set(
        patches.astype(jnp.float32))

    w_main, w_qkv, consts = pack_weights(params)

    logits_pad = pl.pallas_call(
        beit_forward_kernel,
        out_shape=jax.ShapeDtypeStruct((b, LANE), jnp.float32),
        grid_spec=pltpu.PrefetchScalarGridSpec(
            num_scalar_prefetch=0,
            grid=(b // B_BLK,),
            in_specs=[
                pl.BlockSpec((T_BLK, LANE), lambda i: (i, 0)),
                pl.BlockSpec((MAIN_ROWS, LANE), lambda i: (0, 0)),
                pl.BlockSpec((NUM_LAYERS, LANE, QKV_SLABS * LANE),
                             lambda i: (0, 0, 0)),
                pl.BlockSpec((CONST_ROWS, LANE), lambda i: (0, 0)),
            ],
            out_specs=pl.BlockSpec((B_BLK, LANE), lambda i: (i, 0)),
        ),
        compiler_params=pltpu.CompilerParams(
            dimension_semantics=("parallel",),
        ),
    )(patches, w_main, w_qkv, consts)

    logits = logits_pad[:, :NUM_CLASSES]
    labels = jnp.argmax(logits, axis=-1).astype(jnp.int32)  # predicted_class_idx
    return labels, logits


def init_params(key):
    """Deterministic synthetic BEiT-style parameters."""
    ks = jax.random.split(key, 16)
    std = 0.02

    def nrm(k, shape):
        return (std * jax.random.normal(k, shape)).astype(jnp.float32)

    L = NUM_LAYERS
    params = {
        "wp": nrm(ks[0], (PATCH_DIM, D)),
        "bp": jnp.zeros((1, D), jnp.float32),
        "ln1g": jnp.ones((L, 1, D), jnp.float32),
        "ln1b": jnp.zeros((L, 1, D), jnp.float32),
        "wq": nrm(ks[1], (L, D, D)),
        "bq": jnp.zeros((L, 1, D), jnp.float32),
        "wk": nrm(ks[2], (L, D, D)),
        "bk": jnp.zeros((L, 1, D), jnp.float32),
        "wv": nrm(ks[3], (L, D, D)),
        "bv": jnp.zeros((L, 1, D), jnp.float32),
        "wo": nrm(ks[4], (L, D, D)),
        "bo": jnp.zeros((L, 1, D), jnp.float32),
        "ln2g": jnp.ones((L, 1, D), jnp.float32),
        "ln2b": jnp.zeros((L, 1, D), jnp.float32),
        "w1": nrm(ks[5], (L, D, FFN)),
        "b1": jnp.zeros((L, 1, FFN), jnp.float32),
        "w2": nrm(ks[6], (L, FFN, D)),
        "b2": jnp.zeros((L, 1, D), jnp.float32),
        "lnpg": jnp.ones((1, D), jnp.float32),
        "lnpb": jnp.zeros((1, D), jnp.float32),
        "wh": nrm(ks[7], (D, NUM_CLASSES)),
        "bh": jnp.zeros((1, NUM_CLASSES), jnp.float32),
    }
    return params


if __name__ == "__main__":
    key = jax.random.PRNGKey(0)
    k_img, k_par = jax.random.split(key)

    # "images" stand in for the decoded / preprocessed pixel_values the
    # HuggingFace image processor would produce (NCHW float).
    images = jax.random.normal(k_img, (B, C_IN, IMG, IMG), dtype=jnp.float32)
    params = init_params(k_par)

    labels, logits = jax.jit(beit_classify)(images, params)
    labels, logits = jax.block_until_ready((labels, logits))

    assert labels.shape == (B,)
    assert logits.shape == (B, NUM_CLASSES)
    assert bool(jnp.all(jnp.isfinite(logits)))
    print("KERNEL_OK")
</pallas_src>

<mosaic_0001>
module attributes {stable_mosaic.version = 11 : i64} {
  func.func @beit_forward_kernel(%arg0: i32, %arg1: memref<128x128xf32, #tpu.memory_space<vmem>>, %arg2: memref<1280x128xbf16, #tpu.memory_space<vmem>>, %arg3: memref<2x128x768xbf16, #tpu.memory_space<vmem>>, %arg4: memref<296x128xf32, #tpu.memory_space<vmem>>, %arg5: memref<8x128xf32, #tpu.memory_space<vmem>>) attributes {dimension_semantics = [#tpu.dimension_semantics<parallel>], iteration_bounds = array<i64: 2>, scalar_prefetch = 0 : i64, scratch_operands = 0 : i64, tpu.core_type = #tpu.core_type<tc>, window_params = [{transform_indices = @transform_0, window_bounds = array<i64: 128, 128>}, {pipeline_mode = #tpu.pipeline_mode<synchronous>, transform_indices = @transform_1, window_bounds = array<i64: 1280, 128>}, {pipeline_mode = #tpu.pipeline_mode<synchronous>, transform_indices = @transform_2, window_bounds = array<i64: 2, 128, 768>}, {pipeline_mode = #tpu.pipeline_mode<synchronous>, transform_indices = @transform_3, window_bounds = array<i64: 296, 128>}, {transform_indices = @transform_4, window_bounds = array<i64: 8, 128>}]} {
    %c0 = arith.constant 0 : index
    %c0_0 = arith.constant 0 : index
    %0 = vector.load %arg4[%c0, %c0_0] : memref<296x128xf32, #tpu.memory_space<vmem>>, vector<128x128xf32>
    %c128 = arith.constant 128 : index
    %c0_1 = arith.constant 0 : index
    %1 = vector.load %arg4[%c128, %c0_1] : memref<296x128xf32, #tpu.memory_space<vmem>>, vector<8x128xf32>
    %c0_2 = arith.constant 0 : index
    %c0_3 = arith.constant 0 : index
    %2 = vector.load %arg1[%c0_2, %c0_3] : memref<128x128xf32, #tpu.memory_space<vmem>>, vector<128x128xf32>
    %3 = arith.truncf %2 : vector<128x128xf32> to vector<128x128xbf16>
    %c0_4 = arith.constant 0 : index
    %c0_5 = arith.constant 0 : index
    %4 = vector.load %arg2[%c0_4, %c0_5] : memref<1280x128xbf16, #tpu.memory_space<vmem>>, vector<128x128xbf16>
    %cst = arith.constant dense<0.000000e+00> : vector<128x128xf32>
    %5 = tpu.matmul %3, %4, %cst {dimension_numbers = #tpu.dot_dimension_numbers<[1], [0], [0], [1], [0, 0, 1, 1], [], []>} : vector<128x128xbf16>, vector<128x128xbf16>, vector<128x128xf32> -> vector<128x128xf32>
    %c136 = arith.constant 136 : index
    %c0_6 = arith.constant 0 : index
    %6 = vector.load %arg4[%c136, %c0_6] : memref<296x128xf32, #tpu.memory_space<vmem>>, vector<1x128xf32>
    %7 = vector.broadcast %6 : vector<1x128xf32> to vector<128x128xf32>
    %8 = arith.addf %5, %7 : vector<128x128xf32>
    %cst_7 = arith.constant dense<0.000000e+00> : vector<128xf32>
    %9 = vector.multi_reduction <add>, %8, %cst_7 [1] : vector<128x128xf32> to vector<128xf32>
    %10 = vector.shape_cast %9 : vector<128xf32> to vector<128x1xf32>
    %cst_8 = arith.constant 3.125000e-02 : f32
    %11 = vector.broadcast %cst_8 : f32 to vector<128x1xf32>
    %12 = arith.mulf %10, %11 : vector<128x1xf32>
    %13 = arith.mulf %8, %8 : vector<128x128xf32>
    %cst_9 = arith.constant dense<0.000000e+00> : vector<128xf32>
    %14 = vector.multi_reduction <add>, %13, %cst_9 [1] : vector<128x128xf32> to vector<128xf32>
    %15 = vector.shape_cast %14 : vector<128xf32> to vector<128x1xf32>
    %cst_10 = arith.constant 3.125000e-02 : f32
    %16 = vector.broadcast %cst_10 : f32 to vector<128x1xf32>
    %17 = arith.mulf %15, %16 : vector<128x1xf32>
    %18 = arith.mulf %12, %12 : vector<128x1xf32>
    %19 = arith.subf %17, %18 : vector<128x1xf32>
    %cst_11 = arith.constant 0.000000e+00 : f32
    %20 = vector.broadcast %cst_11 : f32 to vector<128x1xf32>
    %21 = arith.maximumf %19, %20 : vector<128x1xf32>
    %22 = vector.broadcast %12 : vector<128x1xf32> to vector<128x128xf32>
    %23 = arith.subf %8, %22 : vector<128x128xf32>
    %cst_12 = arith.constant 9.99999996E-13 : f32
    %24 = vector.broadcast %cst_12 : f32 to vector<128x1xf32>
    %25 = arith.addf %21, %24 : vector<128x1xf32>
    %26 = math.rsqrt %25 : vector<128x1xf32>
    %27 = vector.broadcast %26 : vector<128x1xf32> to vector<128x128xf32>
    %28 = arith.mulf %23, %27 : vector<128x128xf32>
    %29 = arith.truncf %28 : vector<128x128xf32> to vector<128x128xbf16>
    %c0_13 = arith.constant 0 : index
    %c0_14 = arith.constant 0 : index
    %c0_15 = arith.constant 0 : index
    %30 = vector.load %arg3[%c0_13, %c0_14, %c0_15] : memref<2x128x768xbf16, #tpu.memory_space<vmem>>, vector<1x128x768xbf16>
    %31 = vector.shape_cast %30 : vector<1x128x768xbf16> to vector<128x768xbf16>
    %cst_16 = arith.constant dense<0.000000e+00> : vector<128x768xf32>
    %32 = tpu.matmul %29, %31, %cst_16 {dimension_numbers = #tpu.dot_dimension_numbers<[1], [0], [0], [1], [0, 0, 1, 1], [], []>} : vector<128x128xbf16>, vector<128x768xbf16>, vector<128x768xf32> -> vector<128x768xf32>
    %33 = vector.extract_strided_slice %32 {offsets = [0, 0], sizes = [128, 128], strides = [1, 1]} : vector<128x768xf32> to vector<128x128xf32>
    %c144 = arith.constant 144 : index
    %c0_17 = arith.constant 0 : index
    %34 = vector.load %arg4[%c144, %c0_17] : memref<296x128xf32, #tpu.memory_space<vmem>>, vector<1x128xf32>
    %35 = vector.broadcast %34 : vector<1x128xf32> to vector<128x128xf32>
    %36 = arith.addf %33, %35 : vector<128x128xf32>
    %37 = vector.extract_strided_slice %32 {offsets = [0, 256], sizes = [128, 128], strides = [1, 1]} : vector<128x768xf32> to vector<128x128xf32>
    %c160 = arith.constant 160 : index
    %c0_18 = arith.constant 0 : index
    %38 = vector.load %arg4[%c160, %c0_18] : memref<296x128xf32, #tpu.memory_space<vmem>>, vector<1x128xf32>
    %39 = vector.broadcast %38 : vector<1x128xf32> to vector<128x128xf32>
    %40 = arith.addf %37, %39 : vector<128x128xf32>
    %41 = vector.extract_strided_slice %32 {offsets = [0, 512], sizes = [128, 128], strides = [1, 1]} : vector<128x768xf32> to vector<128x128xf32>
    %c176 = arith.constant 176 : index
    %c0_19 = arith.constant 0 : index
    %42 = vector.load %arg4[%c176, %c0_19] : memref<296x128xf32, #tpu.memory_space<vmem>>, vector<1x128xf32>
    %43 = vector.broadcast %42 : vector<1x128xf32> to vector<128x128xf32>
    %44 = arith.addf %41, %43 : vector<128x128xf32>
    %45 = arith.truncf %36 : vector<128x128xf32> to vector<128x128xbf16>
    %46 = arith.truncf %40 : vector<128x128xf32> to vector<128x128xbf16>
    %cst_20 = arith.constant dense<0.000000e+00> : vector<128x128xf32>
    %47 = tpu.matmul %45, %46, %cst_20 {dimension_numbers = #tpu.dot_dimension_numbers<[1], [1], [0], [0], [0, 0, 1, 0], [], []>} : vector<128x128xbf16>, vector<128x128xbf16>, vector<128x128xf32> -> vector<128x128xf32>
    %48 = arith.addf %47, %0 : vector<128x128xf32>
    %cst_21 = arith.constant dense<0xFF800000> : vector<128xf32>
    %49 = vector.multi_reduction <maximumf>, %48, %cst_21 [1] : vector<128x128xf32> to vector<128xf32>
    %50 = vector.shape_cast %49 : vector<128xf32> to vector<128x1xf32>
    %51 = vector.broadcast %50 : vector<128x1xf32> to vector<128x128xf32>
    %52 = arith.subf %48, %51 : vector<128x128xf32>
    %53 = math.exp %52 : vector<128x128xf32>
    %cst_22 = arith.constant dense<0.000000e+00> : vector<128xf32>
    %54 = vector.multi_reduction <add>, %53, %cst_22 [1] : vector<128x128xf32> to vector<128xf32>
    %55 = vector.shape_cast %54 : vector<128xf32> to vector<128x1xf32>
    %56 = tpu.reciprocal %55 {approx = true} : vector<128x1xf32> -> vector<128x1xf32>
    %57 = vector.broadcast %56 : vector<128x1xf32> to vector<128x128xf32>
    %58 = arith.mulf %53, %57 : vector<128x128xf32>
    %59 = arith.truncf %58 : vector<128x128xf32> to vector<128x128xbf16>
    %60 = arith.truncf %44 : vector<128x128xf32> to vector<128x128xbf16>
    %cst_23 = arith.constant dense<0.000000e+00> : vector<128x128xf32>
    %61 = tpu.matmul %59, %60, %cst_23 {dimension_numbers = #tpu.dot_dimension_numbers<[1], [0], [0], [1], [0, 0, 1, 1], [], []>} : vector<128x128xbf16>, vector<128x128xbf16>, vector<128x128xf32> -> vector<128x128xf32>
    %62 = arith.truncf %61 : vector<128x128xf32> to vector<128x128xbf16>
    %c128_24 = arith.constant 128 : index
    %c0_25 = arith.constant 0 : index
    %63 = vector.load %arg2[%c128_24, %c0_25] : memref<1280x128xbf16, #tpu.memory_space<vmem>>, vector<128x128xbf16>
    %cst_26 = arith.constant dense<0.000000e+00> : vector<128x128xf32>
    %64 = tpu.matmul %62, %63, %cst_26 {dimension_numbers = #tpu.dot_dimension_numbers<[1], [0], [0], [1], [0, 0, 1, 1], [], []>} : vector<128x128xbf16>, vector<128x128xbf16>, vector<128x128xf32> -> vector<128x128xf32>
    %65 = arith.addf %8, %64 : vector<128x128xf32>
    %66 = vector.extract_strided_slice %32 {offsets = [0, 128], sizes = [128, 128], strides = [1, 1]} : vector<128x768xf32> to vector<128x128xf32>
    %c152 = arith.constant 152 : index
    %c0_27 = arith.constant 0 : index
    %67 = vector.load %arg4[%c152, %c0_27] : memref<296x128xf32, #tpu.memory_space<vmem>>, vector<1x128xf32>
    %68 = vector.broadcast %67 : vector<1x128xf32> to vector<128x128xf32>
    %69 = arith.addf %66, %68 : vector<128x128xf32>
    %70 = vector.extract_strided_slice %32 {offsets = [0, 384], sizes = [128, 128], strides = [1, 1]} : vector<128x768xf32> to vector<128x128xf32>
    %c168 = arith.constant 168 : index
    %c0_28 = arith.constant 0 : index
    %71 = vector.load %arg4[%c168, %c0_28] : memref<296x128xf32, #tpu.memory_space<vmem>>, vector<1x128xf32>
    %72 = vector.broadcast %71 : vector<1x128xf32> to vector<128x128xf32>
    %73 = arith.addf %70, %72 : vector<128x128xf32>
    %74 = vector.extract_strided_slice %32 {offsets = [0, 640], sizes = [128, 128], strides = [1, 1]} : vector<128x768xf32> to vector<128x128xf32>
    %c184 = arith.constant 184 : index
    %c0_29 = arith.constant 0 : index
    %75 = vector.load %arg4[%c184, %c0_29] : memref<296x128xf32, #tpu.memory_space<vmem>>, vector<1x128xf32>
    %76 = vector.broadcast %75 : vector<1x128xf32> to vector<128x128xf32>
    %77 = arith.addf %74, %76 : vector<128x128xf32>
    %78 = arith.truncf %69 : vector<128x128xf32> to vector<128x128xbf16>
    %79 = arith.truncf %73 : vector<128x128xf32> to vector<128x128xbf16>
    %cst_30 = arith.constant dense<0.000000e+00> : vector<128x128xf32>
    %80 = tpu.matmul %78, %79, %cst_30 {dimension_numbers = #tpu.dot_dimension_numbers<[1], [1], [0], [0], [0, 0, 1, 0], [], []>} : vector<128x128xbf16>, vector<128x128xbf16>, vector<128x128xf32> -> vector<128x128xf32>
    %81 = arith.addf %80, %0 : vector<128x128xf32>
    %cst_31 = arith.constant dense<0xFF800000> : vector<128xf32>
    %82 = vector.multi_reduction <maximumf>, %81, %cst_31 [1] : vector<128x128xf32> to vector<128xf32>
    %83 = vector.shape_cast %82 : vector<128xf32> to vector<128x1xf32>
    %84 = vector.broadcast %83 : vector<128x1xf32> to vector<128x128xf32>
    %85 = arith.subf %81, %84 : vector<128x128xf32>
    %86 = math.exp %85 : vector<128x128xf32>
    %cst_32 = arith.constant dense<0.000000e+00> : vector<128xf32>
    %87 = vector.multi_reduction <add>, %86, %cst_32 [1] : vector<128x128xf32> to vector<128xf32>
    %88 = vector.shape_cast %87 : vector<128xf32> to vector<128x1xf32>
    %89 = tpu.reciprocal %88 {approx = true} : vector<128x1xf32> -> vector<128x1xf32>
    %90 = vector.broadcast %89 : vector<128x1xf32> to vector<128x128xf32>
    %91 = arith.mulf %86, %90 : vector<128x128xf32>
    %92 = arith.truncf %91 : vector<128x128xf32> to vector<128x128xbf16>
    %93 = arith.truncf %77 : vector<128x128xf32> to vector<128x128xbf16>
    %cst_33 = arith.constant dense<0.000000e+00> : vector<128x128xf32>
    %94 = tpu.matmul %92, %93, %cst_33 {dimension_numbers = #tpu.dot_dimension_numbers<[1], [0], [0], [1], [0, 0, 1, 1], [], []>} : vector<128x128xbf16>, vector<128x128xbf16>, vector<128x128xf32> -> vector<128x128xf32>
    %95 = arith.truncf %94 : vector<128x128xf32> to vector<128x128xbf16>
    %c256 = arith.constant 256 : index
    %c0_34 = arith.constant 0 : index
    %96 = vector.load %arg2[%c256, %c0_34] : memref<1280x128xbf16, #tpu.memory_space<vmem>>, vector<128x128xbf16>
    %cst_35 = arith.constant dense<0.000000e+00> : vector<128x128xf32>
    %97 = tpu.matmul %95, %96, %cst_35 {dimension_numbers = #tpu.dot_dimension_numbers<[1], [0], [0], [1], [0, 0, 1, 1], [], []>} : vector<128x128xbf16>, vector<128x128xbf16>, vector<128x128xf32> -> vector<128x128xf32>
    %98 = arith.addf %65, %97 : vector<128x128xf32>
    %c192 = arith.constant 192 : index
    %c0_36 = arith.constant 0 : index
    %99 = vector.load %arg4[%c192, %c0_36] : memref<296x128xf32, #tpu.memory_space<vmem>>, vector<1x128xf32>
    %100 = vector.broadcast %99 : vector<1x128xf32> to vector<128x128xf32>
    %101 = arith.addf %98, %100 : vector<128x128xf32>
    %cst_37 = arith.constant dense<0.000000e+00> : vector<128xf32>
    %102 = vector.multi_reduction <add>, %101, %cst_37 [1] : vector<128x128xf32> to vector<128xf32>
    %103 = vector.shape_cast %102 : vector<128xf32> to vector<128x1xf32>
    %cst_38 = arith.constant 3.125000e-02 : f32
    %104 = vector.broadcast %cst_38 : f32 to vector<128x1xf32>
    %105 = arith.mulf %103, %104 : vector<128x1xf32>
    %106 = arith.mulf %101, %101 : vector<128x128xf32>
    %cst_39 = arith.constant dense<0.000000e+00> : vector<128xf32>
    %107 = vector.multi_reduction <add>, %106, %cst_39 [1] : vector<128x128xf32> to vector<128xf32>
    %108 = vector.shape_cast %107 : vector<128xf32> to vector<128x1xf32>
    %cst_40 = arith.constant 3.125000e-02 : f32
    %109 = vector.broadcast %cst_40 : f32 to vector<128x1xf32>
    %110 = arith.mulf %108, %109 : vector<128x1xf32>
    %111 = arith.mulf %105, %105 : vector<128x1xf32>
    %112 = arith.subf %110, %111 : vector<128x1xf32>
    %cst_41 = arith.constant 0.000000e+00 : f32
    %113 = vector.broadcast %cst_41 : f32 to vector<128x1xf32>
    %114 = arith.maximumf %112, %113 : vector<128x1xf32>
    %115 = vector.broadcast %105 : vector<128x1xf32> to vector<128x128xf32>
    %116 = arith.subf %101, %115 : vector<128x128xf32>
    %cst_42 = arith.constant 9.99999996E-13 : f32
    %117 = vector.broadcast %cst_42 : f32 to vector<128x1xf32>
    %118 = arith.addf %114, %117 : vector<128x1xf32>
    %119 = math.rsqrt %118 : vector<128x1xf32>
    %120 = vector.broadcast %119 : vector<128x1xf32> to vector<128x128xf32>
    %121 = arith.mulf %116, %120 : vector<128x128xf32>
    %122 = arith.truncf %121 : vector<128x128xf32> to vector<128x128xbf16>
    %c384 = arith.constant 384 : index
    %c0_43 = arith.constant 0 : index
    %123 = vector.load %arg2[%c384, %c0_43] : memref<1280x128xbf16, #tpu.memory_space<vmem>>, vector<128x128xbf16>
    %cst_44 = arith.constant dense<0.000000e+00> : vector<128x128xf32>
    %124 = tpu.matmul %122, %123, %cst_44 {dimension_numbers = #tpu.dot_dimension_numbers<[1], [0], [0], [1], [0, 0, 1, 1], [], []>} : vector<128x128xbf16>, vector<128x128xbf16>, vector<128x128xf32> -> vector<128x128xf32>
    %c200 = arith.constant 200 : index
    %c0_45 = arith.constant 0 : index
    %125 = vector.load %arg4[%c200, %c0_45] : memref<296x128xf32, #tpu.memory_space<vmem>>, vector<1x128xf32>
    %126 = vector.broadcast %125 : vector<1x128xf32> to vector<128x128xf32>
    %127 = arith.addf %124, %126 : vector<128x128xf32>
    %cst_46 = arith.constant 5.000000e-01 : f32
    %128 = vector.broadcast %cst_46 : f32 to vector<128x128xf32>
    %129 = arith.mulf %128, %127 : vector<128x128xf32>
    %cst_47 = arith.constant 4.471500e-02 : f32
    %130 = vector.broadcast %cst_47 : f32 to vector<128x128xf32>
    %131 = arith.mulf %130, %127 : vector<128x128xf32>
    %132 = arith.mulf %131, %127 : vector<128x128xf32>
    %133 = arith.mulf %132, %127 : vector<128x128xf32>
    %134 = arith.addf %127, %133 : vector<128x128xf32>
    %cst_48 = arith.constant 0.797884583 : f32
    %135 = vector.broadcast %cst_48 : f32 to vector<128x128xf32>
    %136 = arith.mulf %135, %134 : vector<128x128xf32>
    %137 = math.tanh %136 : vector<128x128xf32>
    %cst_49 = arith.constant 1.000000e+00 : f32
    %138 = vector.broadcast %cst_49 : f32 to vector<128x128xf32>
    %139 = arith.addf %138, %137 : vector<128x128xf32>
    %140 = arith.mulf %129, %139 : vector<128x128xf32>
    %141 = arith.truncf %140 : vector<128x128xf32> to vector<128x128xbf16>
    %c512 = arith.constant 512 : index
    %c0_50 = arith.constant 0 : index
    %142 = vector.load %arg2[%c512, %c0_50] : memref<1280x128xbf16, #tpu.memory_space<vmem>>, vector<128x128xbf16>
    %cst_51 = arith.constant dense<0.000000e+00> : vector<128x128xf32>
    %143 = tpu.matmul %141, %142, %cst_51 {dimension_numbers = #tpu.dot_dimension_numbers<[1], [0], [0], [1], [0, 0, 1, 1], [], []>} : vector<128x128xbf16>, vector<128x128xbf16>, vector<128x128xf32> -> vector<128x128xf32>
    %144 = arith.addf %101, %143 : vector<128x128xf32>
    %c208 = arith.constant 208 : index
    %c0_52 = arith.constant 0 : index
    %145 = vector.load %arg4[%c208, %c0_52] : memref<296x128xf32, #tpu.memory_space<vmem>>, vector<1x128xf32>
    %146 = vector.broadcast %145 : vector<1x128xf32> to vector<128x128xf32>
    %147 = arith.addf %144, %146 : vector<128x128xf32>
    %cst_53 = arith.constant dense<0.000000e+00> : vector<128xf32>
    %148 = vector.multi_reduction <add>, %147, %cst_53 [1] : vector<128x128xf32> to vector<128xf32>
    %149 = vector.shape_cast %148 : vector<128xf32> to vector<128x1xf32>
    %cst_54 = arith.constant 3.125000e-02 : f32
    %150 = vector.broadcast %cst_54 : f32 to vector<128x1xf32>
    %151 = arith.mulf %149, %150 : vector<128x1xf32>
    %152 = arith.mulf %147, %147 : vector<128x128xf32>
    %cst_55 = arith.constant dense<0.000000e+00> : vector<128xf32>
    %153 = vector.multi_reduction <add>, %152, %cst_55 [1] : vector<128x128xf32> to vector<128xf32>
    %154 = vector.shape_cast %153 : vector<128xf32> to vector<128x1xf32>
    %cst_56 = arith.constant 3.125000e-02 : f32
    %155 = vector.broadcast %cst_56 : f32 to vector<128x1xf32>
    %156 = arith.mulf %154, %155 : vector<128x1xf32>
    %157 = arith.mulf %151, %151 : vector<128x1xf32>
    %158 = arith.subf %156, %157 : vector<128x1xf32>
    %cst_57 = arith.constant 0.000000e+00 : f32
    %159 = vector.broadcast %cst_57 : f32 to vector<128x1xf32>
    %160 = arith.maximumf %158, %159 : vector<128x1xf32>
    %161 = vector.broadcast %151 : vector<128x1xf32> to vector<128x128xf32>
    %162 = arith.subf %147, %161 : vector<128x128xf32>
    %cst_58 = arith.constant 9.99999996E-13 : f32
    %163 = vector.broadcast %cst_58 : f32 to vector<128x1xf32>
    %164 = arith.addf %160, %163 : vector<128x1xf32>
    %165 = math.rsqrt %164 : vector<128x1xf32>
    %166 = vector.broadcast %165 : vector<128x1xf32> to vector<128x128xf32>
    %167 = arith.mulf %162, %166 : vector<128x128xf32>
    %168 = arith.truncf %167 : vector<128x128xf32> to vector<128x128xbf16>
    %c1 = arith.constant 1 : index
    %c0_59 = arith.constant 0 : index
    %c0_60 = arith.constant 0 : index
    %169 = vector.load %arg3[%c1, %c0_59, %c0_60] : memref<2x128x768xbf16, #tpu.memory_space<vmem>>, vector<1x128x768xbf16>
    %170 = vector.shape_cast %169 : vector<1x128x768xbf16> to vector<128x768xbf16>
    %cst_61 = arith.constant dense<0.000000e+00> : vector<128x768xf32>
    %171 = tpu.matmul %168, %170, %cst_61 {dimension_numbers = #tpu.dot_dimension_numbers<[1], [0], [0], [1], [0, 0, 1, 1], [], []>} : vector<128x128xbf16>, vector<128x768xbf16>, vector<128x768xf32> -> vector<128x768xf32>
    %172 = vector.extract_strided_slice %171 {offsets = [0, 0], sizes = [128, 128], strides = [1, 1]} : vector<128x768xf32> to vector<128x128xf32>
    %c216 = arith.constant 216 : index
    %c0_62 = arith.constant 0 : index
    %173 = vector.load %arg4[%c216, %c0_62] : memref<296x128xf32, #tpu.memory_space<vmem>>, vector<1x128xf32>
    %174 = vector.broadcast %173 : vector<1x128xf32> to vector<128x128xf32>
    %175 = arith.addf %172, %174 : vector<128x128xf32>
    %176 = vector.extract_strided_slice %171 {offsets = [0, 256], sizes = [128, 128], strides = [1, 1]} : vector<128x768xf32> to vector<128x128xf32>
    %c232 = arith.constant 232 : index
    %c0_63 = arith.constant 0 : index
    %177 = vector.load %arg4[%c232, %c0_63] : memref<296x128xf32, #tpu.memory_space<vmem>>, vector<1x128xf32>
    %178 = vector.broadcast %177 : vector<1x128xf32> to vector<128x128xf32>
    %179 = arith.addf %176, %178 : vector<128x128xf32>
    %180 = vector.extract_strided_slice %171 {offsets = [0, 512], sizes = [128, 128], strides = [1, 1]} : vector<128x768xf32> to vector<128x128xf32>
    %c248 = arith.constant 248 : index
    %c0_64 = arith.constant 0 : index
    %181 = vector.load %arg4[%c248, %c0_64] : memref<296x128xf32, #tpu.memory_space<vmem>>, vector<1x128xf32>
    %182 = vector.broadcast %181 : vector<1x128xf32> to vector<128x128xf32>
    %183 = arith.addf %180, %182 : vector<128x128xf32>
    %184 = arith.truncf %175 : vector<128x128xf32> to vector<128x128xbf16>
    %185 = arith.truncf %179 : vector<128x128xf32> to vector<128x128xbf16>
    %cst_65 = arith.constant dense<0.000000e+00> : vector<128x128xf32>
    %186 = tpu.matmul %184, %185, %cst_65 {dimension_numbers = #tpu.dot_dimension_numbers<[1], [1], [0], [0], [0, 0, 1, 0], [], []>} : vector<128x128xbf16>, vector<128x128xbf16>, vector<128x128xf32> -> vector<128x128xf32>
    %187 = arith.addf %186, %0 : vector<128x128xf32>
    %cst_66 = arith.constant dense<0xFF800000> : vector<128xf32>
    %188 = vector.multi_reduction <maximumf>, %187, %cst_66 [1] : vector<128x128xf32> to vector<128xf32>
    %189 = vector.shape_cast %188 : vector<128xf32> to vector<128x1xf32>
    %190 = vector.broadcast %189 : vector<128x1xf32> to vector<128x128xf32>
    %191 = arith.subf %187, %190 : vector<128x128xf32>
    %192 = math.exp %191 : vector<128x128xf32>
    %cst_67 = arith.constant dense<0.000000e+00> : vector<128xf32>
    %193 = vector.multi_reduction <add>, %192, %cst_67 [1] : vector<128x128xf32> to vector<128xf32>
    %194 = vector.shape_cast %193 : vector<128xf32> to vector<128x1xf32>
    %195 = tpu.reciprocal %194 {approx = true} : vector<128x1xf32> -> vector<128x1xf32>
    %196 = vector.broadcast %195 : vector<128x1xf32> to vector<128x128xf32>
    %197 = arith.mulf %192, %196 : vector<128x128xf32>
    %198 = arith.truncf %197 : vector<128x128xf32> to vector<128x128xbf16>
    %199 = arith.truncf %183 : vector<128x128xf32> to vector<128x128xbf16>
    %cst_68 = arith.constant dense<0.000000e+00> : vector<128x128xf32>
    %200 = tpu.matmul %198, %199, %cst_68 {dimension_numbers = #tpu.dot_dimension_numbers<[1], [0], [0], [1], [0, 0, 1, 1], [], []>} : vector<128x128xbf16>, vector<128x128xbf16>, vector<128x128xf32> -> vector<128x128xf32>
    %201 = arith.truncf %200 : vector<128x128xf32> to vector<128x128xbf16>
    %c640 = arith.constant 640 : index
    %c0_69 = arith.constant 0 : index
    %202 = vector.load %arg2[%c640, %c0_69] : memref<1280x128xbf16, #tpu.memory_space<vmem>>, vector<128x128xbf16>
    %cst_70 = arith.constant dense<0.000000e+00> : vector<128x128xf32>
    %203 = tpu.matmul %201, %202, %cst_70 {dimension_numbers = #tpu.dot_dimension_numbers<[1], [0], [0], [1], [0, 0, 1, 1], [], []>} : vector<128x128xbf16>, vector<128x128xbf16>, vector<128x128xf32> -> vector<128x128xf32>
    %204 = arith.addf %147, %203 : vector<128x128xf32>
    %205 = vector.extract_strided_slice %171 {offsets = [0, 128], sizes = [128, 128], strides = [1, 1]} : vector<128x768xf32> to vector<128x128xf32>
    %c224 = arith.constant 224 : index
    %c0_71 = arith.constant 0 : index
    %206 = vector.load %arg4[%c224, %c0_71] : memref<296x128xf32, #tpu.memory_space<vmem>>, vector<1x128xf32>
    %207 = vector.broadcast %206 : vector<1x128xf32> to vector<128x128xf32>
    %208 = arith.addf %205, %207 : vector<128x128xf32>
    %209 = vector.extract_strided_slice %171 {offsets = [0, 384], sizes = [128, 128], strides = [1, 1]} : vector<128x768xf32> to vector<128x128xf32>
    %c240 = arith.constant 240 : index
    %c0_72 = arith.constant 0 : index
    %210 = vector.load %arg4[%c240, %c0_72] : memref<296x128xf32, #tpu.memory_space<vmem>>, vector<1x128xf32>
    %211 = vector.broadcast %210 : vector<1x128xf32> to vector<128x128xf32>
    %212 = arith.addf %209, %211 : vector<128x128xf32>
    %213 = vector.extract_strided_slice %171 {offsets = [0, 640], sizes = [128, 128], strides = [1, 1]} : vector<128x768xf32> to vector<128x128xf32>
    %c256_73 = arith.constant 256 : index
    %c0_74 = arith.constant 0 : index
    %214 = vector.load %arg4[%c256_73, %c0_74] : memref<296x128xf32, #tpu.memory_space<vmem>>, vector<1x128xf32>
    %215 = vector.broadcast %214 : vector<1x128xf32> to vector<128x128xf32>
    %216 = arith.addf %213, %215 : vector<128x128xf32>
    %217 = arith.truncf %208 : vector<128x128xf32> to vector<128x128xbf16>
    %218 = arith.truncf %212 : vector<128x128xf32> to vector<128x128xbf16>
    %cst_75 = arith.constant dense<0.000000e+00> : vector<128x128xf32>
    %219 = tpu.matmul %217, %218, %cst_75 {dimension_numbers = #tpu.dot_dimension_numbers<[1], [1], [0], [0], [0, 0, 1, 0], [], []>} : vector<128x128xbf16>, vector<128x128xbf16>, vector<128x128xf32> -> vector<128x128xf32>
    %220 = arith.addf %219, %0 : vector<128x128xf32>
    %cst_76 = arith.constant dense<0xFF800000> : vector<128xf32>
    %221 = vector.multi_reduction <maximumf>, %220, %cst_76 [1] : vector<128x128xf32> to vector<128xf32>
    %222 = vector.shape_cast %221 : vector<128xf32> to vector<128x1xf32>
    %223 = vector.broadcast %222 : vector<128x1xf32> to vector<128x128xf32>
    %224 = arith.subf %220, %223 : vector<128x128xf32>
    %225 = math.exp %224 : vector<128x128xf32>
    %cst_77 = arith.constant dense<0.000000e+00> : vector<128xf32>
    %226 = vector.multi_reduction <add>, %225, %cst_77 [1] : vector<128x128xf32> to vector<128xf32>
    %227 = vector.shape_cast %226 : vector<128xf32> to vector<128x1xf32>
    %228 = tpu.reciprocal %227 {approx = true} : vector<128x1xf32> -> vector<128x1xf32>
    %229 = vector.broadcast %228 : vector<128x1xf32> to vector<128x128xf32>
    %230 = arith.mulf %225, %229 : vector<128x128xf32>
    %231 = arith.truncf %230 : vector<128x128xf32> to vector<128x128xbf16>
    %232 = arith.truncf %216 : vector<128x128xf32> to vector<128x128xbf16>
    %cst_78 = arith.constant dense<0.000000e+00> : vector<128x128xf32>
    %233 = tpu.matmul %231, %232, %cst_78 {dimension_numbers = #tpu.dot_dimension_numbers<[1], [0], [0], [1], [0, 0, 1, 1], [], []>} : vector<128x128xbf16>, vector<128x128xbf16>, vector<128x128xf32> -> vector<128x128xf32>
    %234 = arith.truncf %233 : vector<128x128xf32> to vector<128x128xbf16>
    %c768 = arith.constant 768 : index
    %c0_79 = arith.constant 0 : index
    %235 = vector.load %arg2[%c768, %c0_79] : memref<1280x128xbf16, #tpu.memory_space<vmem>>, vector<128x128xbf16>
    %cst_80 = arith.constant dense<0.000000e+00> : vector<128x128xf32>
    %236 = tpu.matmul %234, %235, %cst_80 {dimension_numbers = #tpu.dot_dimension_numbers<[1], [0], [0], [1], [0, 0, 1, 1], [], []>} : vector<128x128xbf16>, vector<128x128xbf16>, vector<128x128xf32> -> vector<128x128xf32>
    %237 = arith.addf %204, %236 : vector<128x128xf32>
    %c264 = arith.constant 264 : index
    %c0_81 = arith.constant 0 : index
    %238 = vector.load %arg4[%c264, %c0_81] : memref<296x128xf32, #tpu.memory_space<vmem>>, vector<1x128xf32>
    %239 = vector.broadcast %238 : vector<1x128xf32> to vector<128x128xf32>
    %240 = arith.addf %237, %239 : vector<128x128xf32>
    %cst_82 = arith.constant dense<0.000000e+00> : vector<128xf32>
    %241 = vector.multi_reduction <add>, %240, %cst_82 [1] : vector<128x128xf32> to vector<128xf32>
    %242 = vector.shape_cast %241 : vector<128xf32> to vector<128x1xf32>
    %cst_83 = arith.constant 3.125000e-02 : f32
    %243 = vector.broadcast %cst_83 : f32 to vector<128x1xf32>
    %244 = arith.mulf %242, %243 : vector<128x1xf32>
    %245 = arith.mulf %240, %240 : vector<128x128xf32>
    %cst_84 = arith.constant dense<0.000000e+00> : vector<128xf32>
    %246 = vector.multi_reduction <add>, %245, %cst_84 [1] : vector<128x128xf32> to vector<128xf32>
    %247 = vector.shape_cast %246 : vector<128xf32> to vector<128x1xf32>
    %cst_85 = arith.constant 3.125000e-02 : f32
    %248 = vector.broadcast %cst_85 : f32 to vector<128x1xf32>
    %249 = arith.mulf %247, %248 : vector<128x1xf32>
    %250 = arith.mulf %244, %244 : vector<128x1xf32>
    %251 = arith.subf %249, %250 : vector<128x1xf32>
    %cst_86 = arith.constant 0.000000e+00 : f32
    %252 = vector.broadcast %cst_86 : f32 to vector<128x1xf32>
    %253 = arith.maximumf %251, %252 : vector<128x1xf32>
    %254 = vector.broadcast %244 : vector<128x1xf32> to vector<128x128xf32>
    %255 = arith.subf %240, %254 : vector<128x128xf32>
    %cst_87 = arith.constant 9.99999996E-13 : f32
    %256 = vector.broadcast %cst_87 : f32 to vector<128x1xf32>
    %257 = arith.addf %253, %256 : vector<128x1xf32>
    %258 = math.rsqrt %257 : vector<128x1xf32>
    %259 = vector.broadcast %258 : vector<128x1xf32> to vector<128x128xf32>
    %260 = arith.mulf %255, %259 : vector<128x128xf32>
    %261 = arith.truncf %260 : vector<128x128xf32> to vector<128x128xbf16>
    %c896 = arith.constant 896 : index
    %c0_88 = arith.constant 0 : index
    %262 = vector.load %arg2[%c896, %c0_88] : memref<1280x128xbf16, #tpu.memory_space<vmem>>, vector<128x128xbf16>
    %cst_89 = arith.constant dense<0.000000e+00> : vector<128x128xf32>
    %263 = tpu.matmul %261, %262, %cst_89 {dimension_numbers = #tpu.dot_dimension_numbers<[1], [0], [0], [1], [0, 0, 1, 1], [], []>} : vector<128x128xbf16>, vector<128x128xbf16>, vector<128x128xf32> -> vector<128x128xf32>
    %c272 = arith.constant 272 : index
    %c0_90 = arith.constant 0 : index
    %264 = vector.load %arg4[%c272, %c0_90] : memref<296x128xf32, #tpu.memory_space<vmem>>, vector<1x128xf32>
    %265 = vector.broadcast %264 : vector<1x128xf32> to vector<128x128xf32>
    %266 = arith.addf %263, %265 : vector<128x128xf32>
    %cst_91 = arith.constant 5.000000e-01 : f32
    %267 = vector.broadcast %cst_91 : f32 to vector<128x128xf32>
    %268 = arith.mulf %267, %266 : vector<128x128xf32>
    %cst_92 = arith.constant 4.471500e-02 : f32
    %269 = vector.broadcast %cst_92 : f32 to vector<128x128xf32>
    %270 = arith.mulf %269, %266 : vector<128x128xf32>
    %271 = arith.mulf %270, %266 : vector<128x128xf32>
    %272 = arith.mulf %271, %266 : vector<128x128xf32>
    %273 = arith.addf %266, %272 : vector<128x128xf32>
    %cst_93 = arith.constant 0.797884583 : f32
    %274 = vector.broadcast %cst_93 : f32 to vector<128x128xf32>
    %275 = arith.mulf %274, %273 : vector<128x128xf32>
    %276 = math.tanh %275 : vector<128x128xf32>
    %cst_94 = arith.constant 1.000000e+00 : f32
    %277 = vector.broadcast %cst_94 : f32 to vector<128x128xf32>
    %278 = arith.addf %277, %276 : vector<128x128xf32>
    %279 = arith.mulf %268, %278 : vector<128x128xf32>
    %280 = arith.truncf %279 : vector<128x128xf32> to vector<128x128xbf16>
    %c1024 = arith.constant 1024 : index
    %c0_95 = arith.constant 0 : index
    %281 = vector.load %arg2[%c1024, %c0_95] : memref<1280x128xbf16, #tpu.memory_space<vmem>>, vector<128x128xbf16>
    %cst_96 = arith.constant dense<0.000000e+00> : vector<128x128xf32>
    %282 = tpu.matmul %280, %281, %cst_96 {dimension_numbers = #tpu.dot_dimension_numbers<[1], [0], [0], [1], [0, 0, 1, 1], [], []>} : vector<128x128xbf16>, vector<128x128xbf16>, vector<128x128xf32> -> vector<128x128xf32>
    %283 = arith.addf %240, %282 : vector<128x128xf32>
    %c280 = arith.constant 280 : index
    %c0_97 = arith.constant 0 : index
    %284 = vector.load %arg4[%c280, %c0_97] : memref<296x128xf32, #tpu.memory_space<vmem>>, vector<1x128xf32>
    %285 = vector.broadcast %284 : vector<1x128xf32> to vector<128x128xf32>
    %286 = arith.addf %283, %285 : vector<128x128xf32>
    %cst_98 = arith.constant dense<0.000000e+00> : vector<8x128xf32>
    %287 = tpu.matmul %1, %286, %cst_98 {dimension_numbers = #tpu.dot_dimension_numbers<[1], [0], [0], [1], [0, 0, 1, 1], [], []>} : vector<8x128xf32>, vector<128x128xf32>, vector<8x128xf32> -> vector<8x128xf32>
    %cst_99 = arith.constant dense<0.000000e+00> : vector<8xf32>
    %288 = vector.multi_reduction <add>, %287, %cst_99 [1] : vector<8x128xf32> to vector<8xf32>
    %289 = vector.shape_cast %288 : vector<8xf32> to vector<8x1xf32>
    %cst_100 = arith.constant 3.125000e-02 : f32
    %290 = vector.broadcast %cst_100 : f32 to vector<8x1xf32>
    %291 = arith.mulf %289, %290 : vector<8x1xf32>
    %292 = arith.mulf %287, %287 : vector<8x128xf32>
    %cst_101 = arith.constant dense<0.000000e+00> : vector<8xf32>
    %293 = vector.multi_reduction <add>, %292, %cst_101 [1] : vector<8x128xf32> to vector<8xf32>
    %294 = vector.shape_cast %293 : vector<8xf32> to vector<8x1xf32>
    %cst_102 = arith.constant 3.125000e-02 : f32
    %295 = vector.broadcast %cst_102 : f32 to vector<8x1xf32>
    %296 = arith.mulf %294, %295 : vector<8x1xf32>
    %297 = arith.mulf %291, %291 : vector<8x1xf32>
    %298 = arith.subf %296, %297 : vector<8x1xf32>
    %cst_103 = arith.constant 0.000000e+00 : f32
    %299 = vector.broadcast %cst_103 : f32 to vector<8x1xf32>
    %300 = arith.maximumf %298, %299 : vector<8x1xf32>
    %301 = vector.broadcast %291 : vector<8x1xf32> to vector<8x128xf32>
    %302 = arith.subf %287, %301 : vector<8x128xf32>
    %cst_104 = arith.constant 9.99999996E-13 : f32
    %303 = vector.broadcast %cst_104 : f32 to vector<8x1xf32>
    %304 = arith.addf %300, %303 : vector<8x1xf32>
    %305 = math.rsqrt %304 : vector<8x1xf32>
    %306 = vector.broadcast %305 : vector<8x1xf32> to vector<8x128xf32>
    %307 = arith.mulf %302, %306 : vector<8x128xf32>
    %308 = arith.truncf %307 : vector<8x128xf32> to vector<8x128xbf16>
    %c1152 = arith.constant 1152 : index
    %c0_105 = arith.constant 0 : index
    %309 = vector.load %arg2[%c1152, %c0_105] : memref<1280x128xbf16, #tpu.memory_space<vmem>>, vector<128x128xbf16>
    %cst_106 = arith.constant dense<0.000000e+00> : vector<8x128xf32>
    %310 = tpu.matmul %308, %309, %cst_106 {dimension_numbers = #tpu.dot_dimension_numbers<[1], [0], [0], [1], [0, 0, 1, 1], [], []>} : vector<8x128xbf16>, vector<128x128xbf16>, vector<8x128xf32> -> vector<8x128xf32>
    %c288 = arith.constant 288 : index
    %c0_107 = arith.constant 0 : index
    %311 = vector.load %arg4[%c288, %c0_107] : memref<296x128xf32, #tpu.memory_space<vmem>>, vector<1x128xf32>
    %312 = vector.broadcast %311 : vector<1x128xf32> to vector<8x128xf32>
    %313 = arith.addf %310, %312 : vector<8x128xf32>
    %c0_108 = arith.constant 0 : index
    %c0_109 = arith.constant 0 : index
    %314 = vector.load %arg5[%c0_108, %c0_109] : memref<8x128xf32, #tpu.memory_space<vmem>>, vector<8x128xf32>
    tpu.vector_store %arg5[%c0_108, %c0_109], %313 {strides = array<i32>} : memref<8x128xf32, #tpu.memory_space<vmem>>, vector<8x128xf32>,
    return
  }
  func.func @transform_0(%arg0: i32) -> (i32, i32) {
    %c0_i32 = arith.constant 0 : i32
    %c0_i32_0 = arith.constant 0 : i32
    return %arg0, %c0_i32 : i32, i32
  }
  func.func @transform_1(%arg0: i32) -> (i32, i32) {
    %c0_i32 = arith.constant 0 : i32
    %c0_i32_0 = arith.constant 0 : i32
    %c0_i32_1 = arith.constant 0 : i32
    return %c0_i32, %c0_i32_0 : i32, i32
  }
  func.func @transform_2(%arg0: i32) -> (i32, i32, i32) {
    %c0_i32 = arith.constant 0 : i32
    %c0_i32_0 = arith.constant 0 : i32
    %c0_i32_1 = arith.constant 0 : i32
    %c0_i32_2 = arith.constant 0 : i32
    return %c0_i32, %c0_i32_0, %c0_i32_1 : i32, i32, i32
  }
  func.func @transform_3(%arg0: i32) -> (i32, i32) {
    %c0_i32 = arith.constant 0 : i32
    %c0_i32_0 = arith.constant 0 : i32
    %c0_i32_1 = arith.constant 0 : i32
    return %c0_i32, %c0_i32_0 : i32, i32
  }
  func.func @transform_4(%arg0: i32) -> (i32, i32) {
    %c0_i32 = arith.constant 0 : i32
    %c0_i32_0 = arith.constant 0 : i32
    return %arg0, %c0_i32 : i32, i32
  }
}

</mosaic_0001>

<bundles_post_ra>
// kernel: beit_classify.1
= control target key start
LH: loop header
LB: loop body
LE: loop exit
PB: predicated region body
PF: predicated region fallthrough
CT: control target
= control target key end

     0   :  { %s8271_s15 = smov 0   ;;  %s11403_s0 = inlined_call_operand.vmem [shape: f32[256,128], index: 0, kind: input, shape index: {}]   ;;  %s11404_s1 = inlined_call_operand.vmem [shape: bf16[1280,128], index: 1, kind: input, shape index: {}]   ;;  %s11405_s2 = inlined_call_operand.vmem [shape: bf16[2,128,768], index: 2, kind: input, shape index: {}]   ;;  %s11406_s3 = inlined_call_operand.vmem [shape: f32[296,128], index: 3, kind: input, shape index: {}]   ;;  %s11407_s4 = inlined_call_operand.vmem [shape: f32[16,128], index: 4, kind: output, shape index: {}]  }
   0x1 LB: > { %s8277_s16 = sadd.s32 4294967295, %s8241_s15   ;;  %p6387_p0 = scmp.ge.s32.totalorder %s8241_s15, 1  ;;  %s8241_s15 = sphi %s8271_s15, %s14_s15  }
   0x2   : > { %p163_p1 = scmp.lt.s32.totalorder %s8241_s15, 3 }
   0x4   : > { %p164_p2 = pnand %p6387_p0, %p163_p1 }
   0x6   : > { %167 = sbr.rel (%p164_p2) target bundleno = 6081 (0x17c1), region = 36 }
   0xb   : > { %v7545_v0 = vld [vmem:[%s11404_s1 + $0x38] sm:$0xff]   ;;  %s6388_s19 = sshll.u32 %s8277_s16, 4  ;;  %v7546_v1 = vld [vmem:[%s11404_s1 + $0x30] sm:$0xff]   ;;  %v7547_v2 = vld [vmem:[%s11404_s1 + $0x28] sm:$0xff]   ;;  %vm8245_vm0 = vmmov 0   ;;  %p194_p4 = scmp.lt.s32.totalorder %s8277_s16, 1 }
   0xc   : > { %p189_p3 = scmp.lt.s32.totalorder %s6388_s19, 31  ;;  %6935 = vmatprep.subr.bf16.mxu1 %v7545_v0  ;;  %v7548_v3 = vld [vmem:[%s11404_s1 + $0x20] sm:$0xff]   ;;  %v7549_v7 = vld [vmem:[%s11404_s1 + $0x18] sm:$0xff]   ;;  %v7550_v8 = vld [vmem:[%s11404_s1 + $0x10] sm:$0xff]  }
   0xd   : > { %6936 = vmatpush3.bf16.msra.mxu1 %v7545_v0  ;;  %v7551_v9 = vld [vmem:[%s11404_s1 + $0x8] sm:$0xff]   ;;  %v7552_v10 = vld [vmem:[%s11404_s1] sm:$0xff]   ;;  %v7556_v46 = vld [vmem:[%s11405_s2 + $0x15c] ss:$24 sps:$4 sm:$0xff]   ;;  %s11616_s16 = smov (!%p194_p4, %s8277_s16), 1 }
   0xe   : > { %s11614_s19 = smov (!%p189_p3, %s6388_s19), 31  ;;  %6937 = vmatprep.subr.bf16.mxu1 %v7546_v1  ;;  %v8330_v33 = vld [vmem:[%s11406_s3 + $0x88] ss:$0 sm:$0xff]  ;;  %v7555_v45 = vld [vmem:[%s11405_s2 + $0x154] ss:$24 sps:$4 sm:$0xff]   ;;  %1039 = vmatprep.subr.bf16.mxu0 %v7556_v46  ;;  %s6390_s22 = sshll.u32 %s11616_s16, 3 }
   0xf   : > { %s6389_s24 = sshll.u32 %s11614_s19, 3  ;;  %v7553_v48 = vld [vmem:[%s11405_s2 + $0x150] ss:$24 sps:$4 sm:$0xff]   ;;  %v7561_v52 = vld [vmem:[%s11405_s2 + $0x124] ss:$24 sps:$4 sm:$0xff]  }
  0x10   : > { %s8294_s27 = scalar_lea.vmem %s11403_s0, %s6389_s24  ;;  %v7558_v49 = vld [vmem:[%s11405_s2 + $0x158] ss:$24 sps:$4 sm:$0xff]   ;;  %v7562_v53 = vld [vmem:[%s11405_s2 + $0x12c] ss:$24 sps:$4 sm:$0xff]   ;;  %v7564_v56 = vld [vmem:[%s11405_s2 + $0x128] ss:$24 sps:$4 sm:$0xff]  }
  0x11   : > { %6938 = vmatpush3.bf16.msra.mxu1 %v7546_v1  ;;  %v216_v4 = vld [vmem:[%s8294_s27] sm:$0xff]  ;;  %v217_v5 = vld [vmem:[%s8294_s27 + $0x8] sm:$0xff]  ;;  %v218_v11 = vld [vmem:[%s8294_s27 + $0x10] sm:$0xff]  ;;  %1040 = vmatpush1.bf16.msra.mxu0 %v7558_v49 }
  0x12   : > { %6939 = vmatprep.subr.bf16.mxu1 %v7547_v2  ;;  %v232_v6 = vpack.c.bf16 %v217_v5, %v216_v4  ;;  %v219_v12 = vld [vmem:[%s8294_s27 + $0x18] sm:$0xff]  ;;  %v220_v13 = vld [vmem:[%s8294_s27 + $0x20] sm:$0xff]  ;;  %v221_v14 = vld [vmem:[%s8294_s27 + $0x28] sm:$0xff]  ;;  %1041 = vmatprep.subr.bf16.mxu0 %v7562_v53 }
  0x13   : > { %v233_v15 = vpack.c.bf16 %v219_v12, %v218_v11  ;;  %v234_v16 = vpack.c.bf16 %v221_v14, %v220_v13  ;;  %v222_v17 = vld [vmem:[%s8294_s27 + $0x30] sm:$0xff]  ;;  %v223_v18 = vld [vmem:[%s8294_s27 + $0x38] sm:$0xff]  ;;  %v224_v19 = vld [vmem:[%s8294_s27 + $0x40] sm:$0xff] }
  0x14   : > { %6951 = vmatprep.mubr.bf16.mxu1 %v232_v6  ;;  %v225_v20 = vld [vmem:[%s8294_s27 + $0x48] sm:$0xff]  ;;  %v235_v21 = vpack.c.bf16 %v223_v18, %v222_v17  ;;  %v226_v23 = vld [vmem:[%s8294_s27 + $0x50] sm:$0xff]  ;;  %v227_v24 = vld [vmem:[%s8294_s27 + $0x58] sm:$0xff] }
  0x15   : > { %6940 = vmatpush3.bf16.msra.mxu1 %v7547_v2  ;;  %v236_v22 = vpack.c.bf16 %v225_v20, %v224_v19  ;;  %v228_v25 = vld [vmem:[%s8294_s27 + $0x60] sm:$0xff]  ;;  %v229_v26 = vld [vmem:[%s8294_s27 + $0x68] sm:$0xff]  ;;  %v237_v27 = vpack.c.bf16 %v227_v24, %v226_v23  ;;  %v230_v29 = vld [vmem:[%s8294_s27 + $0x70] sm:$0xff]  ;;  %1042 = vmatpush1.bf16.msra.mxu0 %v7564_v56 }
  0x16   : > { %6941 = vmatprep.subr.bf16.mxu1 %v7548_v3  ;;  %v238_v28 = vpack.c.bf16 %v229_v26, %v228_v25  ;;  %v231_v30 = vld [vmem:[%s8294_s27 + $0x78] sm:$0xff]  ;;  %v7567_v59 = vld [vmem:[%s11405_s2 + $0xf4] ss:$24 sps:$4 sm:$0xff]   ;;  %v7565_v62 = vld [vmem:[%s11405_s2 + $0xf0] ss:$24 sps:$4 sm:$0xff]   ;;  %s197_s27 = scalar_lea.vmem %s11407_s4, %s6390_s22 }
  0x17   : > { %v239_v31 = vpack.c.bf16 %v231_v30, %v230_v29  ;;  %v7559_v55 = vld [vmem:[%s11405_s2 + $0x120] ss:$24 sps:$4 sm:$0xff]   ;;  %v7568_v60 = vld [vmem:[%s11405_s2 + $0xfc] ss:$24 sps:$4 sm:$0xff]   ;;  %v7574_v4 = vld [vmem:[%s11405_s2 + $0xcc] ss:$24 sps:$4 sm:$0xff]  }
  0x18   : > { %v7570_v63 = vld [vmem:[%s11405_s2 + $0xf8] ss:$24 sps:$4 sm:$0xff]   ;;  %1043 = vmatprep.subr.bf16.mxu0 %v7568_v60  ;;  %v7580_v11 = vld [vmem:[%s11405_s2 + $0x9c] ss:$24 sps:$4 sm:$0xff]   ;;  %v7586_v18 = vld [vmem:[%s11405_s2 + $0x6c] ss:$24 sps:$4 sm:$0xff]  }
  0x19   : > { %6942 = vmatpush3.bf16.msra.mxu1 %v7548_v3  ;;  %1044 = vmatpush1.bf16.msra.mxu0 %v7570_v63  ;;  %v7573_v3 = vld [vmem:[%s11405_s2 + $0xc4] ss:$24 sps:$4 sm:$0xff]   ;;  %v7571_v6 = vld [vmem:[%s11405_s2 + $0xc0] ss:$24 sps:$4 sm:$0xff]   ;;  %v7577_v13 = vld [vmem:[%s11405_s2 + $0x90] ss:$24 sps:$4 sm:$0xff]  }
  0x1a   : > { %6943 = vmatprep.subr.bf16.mxu1 %v7549_v7  ;;  %1045 = vmatprep.subr.bf16.mxu0 %v7574_v4  ;;  %v7582_v14 = vld [vmem:[%s11405_s2 + $0x98] ss:$24 sps:$4 sm:$0xff]   ;;  %v7585_v17 = vld [vmem:[%s11405_s2 + $0x64] ss:$24 sps:$4 sm:$0xff]   ;;  %v7591_v24 = vld [vmem:[%s11405_s2 + $0x34] ss:$24 sps:$4 sm:$0xff]  }
  0x1b   : > { %v7583_v20 = vld [vmem:[%s11405_s2 + $0x60] ss:$24 sps:$4 sm:$0xff]   ;;  %v7592_v25 = vld [vmem:[%s11405_s2 + $0x3c] ss:$24 sps:$4 sm:$0xff]  }
  0x1d   : > { %6944 = vmatpush3.bf16.msra.mxu1 %v7549_v7  ;;  %v7576_v7 = vld [vmem:[%s11405_s2 + $0xc8] ss:$24 sps:$4 sm:$0xff]  }
  0x1e   : > { %6945 = vmatprep.subr.bf16.mxu1 %v7550_v8  ;;  %1046 = vmatpush1.bf16.msra.mxu0 %v7576_v7 }
  0x1f   : > { %1047 = vmatprep.subr.bf16.mxu0 %v7580_v11 }
  0x21   : > { %6946 = vmatpush3.bf16.msra.mxu1 %v7550_v8 }
  0x22   : > { %6947 = vmatprep.subr.bf16.mxu1 %v7551_v9  ;;  %1048 = vmatpush1.bf16.msra.mxu0 %v7582_v14 }
  0x23   : > { %1049 = vmatprep.subr.bf16.mxu0 %v7586_v18 }
  0x25   : > { %6948 = vmatpush3.bf16.msra.mxu1 %v7551_v9 }
  0x26   : > { %6949 = vmatprep.subr.bf16.mxu1 %v7552_v10 }
  0x29   : > { %6950 = vmatpush3.bf16.msra.mxu1 %v7552_v10  ;;  %v7579_v10 = vld [vmem:[%s11405_s2 + $0x94] ss:$24 sps:$4 sm:$0xff]  }
  0x2a   : > { %926 = vmatprep.subr.bf16.mxu1 %v7555_v45 }
  0x2c   : > { %6952 = vmatmul.mubr.bf16.vlgmr.msra.gmra.mxu1 %v233_v15 }
  0x2d   : > { %6955 = vmatprep.mubr.bf16.mxu1 %v234_v16  ;;  %927 = vmatpush1.bf16.msra.mxu1 %v7553_v48 }
  0x2e   : > { %928 = vmatprep.subr.bf16.mxu1 %v7561_v52 }
  0x31   : > { %929 = vmatpush1.bf16.msra.mxu1 %v7559_v55  ;;  %v7603_v55 = vld [vmem:[%s11405_s2 + $0x164] ss:$24 sps:$4 sm:$0xff]  }
  0x32   : > { %930 = vmatprep.subr.bf16.mxu1 %v7567_v59 }
  0x34   : > { %6956 = vmatmul.mubr.bf16.gmra.mxu1 %v235_v21  ;;  %v7588_v21 = vld [vmem:[%s11405_s2 + $0x68] ss:$24 sps:$4 sm:$0xff]  }
  0x35   : > { %6959 = vmatprep.mubr.bf16.mxu1 %v236_v22  ;;  %931 = vmatpush1.bf16.msra.mxu1 %v7565_v62 }
  0x36   : > { %932 = vmatprep.subr.bf16.mxu1 %v7573_v3  ;;  %1050 = vmatpush1.bf16.msra.mxu0 %v7588_v21 }
  0x37   : > { %1051 = vmatprep.subr.bf16.mxu0 %v7592_v25 }
  0x39   : > { %933 = vmatpush1.bf16.msra.mxu1 %v7571_v6 }
  0x3a   : > { %934 = vmatprep.subr.bf16.mxu1 %v7579_v10 }
  0x3c   : > { %6960 = vmatmul.mubr.bf16.gmra.mxu1 %v237_v27  ;;  %v7589_v27 = vld [vmem:[%s11405_s2 + $0x30] ss:$24 sps:$4 sm:$0xff]  }
  0x3d   : > { %6963 = vmatprep.mubr.bf16.mxu1 %v238_v28  ;;  %935 = vmatpush1.bf16.msra.mxu1 %v7577_v13  ;;  %v7594_v28 = vld [vmem:[%s11405_s2 + $0x38] ss:$24 sps:$4 sm:$0xff]  }
  0x3e   : > { %936 = vmatprep.subr.bf16.mxu1 %v7585_v17  ;;  %1052 = vmatpush1.bf16.msra.mxu0 %v7594_v28 }
  0x41   : > { %937 = vmatpush1.bf16.msra.mxu1 %v7583_v20 }
  0x42   : > { %938 = vmatprep.subr.bf16.mxu1 %v7591_v24 }
  0x44   : > { %6964 = vmatmul.mubr.bf16.gmra.mxu1 %v239_v31  ;;  %v7597_v31 = vld [vmem:[%s11405_s2 + $0x4] ss:$24 sps:$4 sm:$0xff]  }
  0x45   : > { %939 = vmatpush1.bf16.msra.mxu1 %v7589_v27 }
  0x46   : > { %940 = vmatprep.subr.bf16.mxu1 %v7597_v31 }
  0xec   : > { %v6953_v32 = vpop.f32.mrf.mxu1 }
  0xed   : > { %v8345_v43 = vadd.f32 %v6953_v32, %v8330_v33  ;;  %v7598_v32 = vld [vmem:[%s11405_s2 + $0xc] ss:$24 sps:$4 sm:$0xff]  }
  0xee   : > { %v343_v34 = vpop.f32.mrf.mxu1  ;;  %1053 = vmatprep.subr.bf16.mxu0 %v7598_v32 }
  0xef   : > { %v8333_v35 = vadd.f32 %v8330_v33, %v343_v34  ;;  %11471 = vst [vmem:[#allocation4_spill] sm:$0xff] %v8345_v43  ;;  %v456_v50 = vmul.f32 %v8345_v43, %v8345_v43 }
  0xf0   : > { %v6954_v36 = vpop.f32.mrf.mxu1 }
  0xf1   : > { %11469 = vst [vmem:[#allocation2_spill] sm:$0xff] %v8333_v35  ;;  %406 = vadd.xlane.f32.xlu0 %v8333_v35  ;;  %v454_v37 = vmul.f32 %v8333_v35, %v8333_v35  ;;  %v8348_v44 = vadd.f32 %v6954_v36, %v8330_v33  ;;  %v7595_v36 = vld [vmem:[%s11405_s2] ss:$24 sps:$4 sm:$0xff]  }
  0xf2   : > { %v346_v38 = vpop.f32.mrf.mxu1  ;;  %941 = vmatpush1.bf16.msra.mxu1 %v7595_v36 }
  0xf3   : > { %v8339_v39 = vadd.f32 %v8330_v33, %v346_v38  ;;  %470 = vadd.xlane.f32.xlu1 %v454_v37  ;;  %11472 = vst [vmem:[#allocation5_spill] sm:$0xff] %v8348_v44  ;;  %v457_v51 = vmul.f32 %v8348_v44, %v8348_v44  ;;  %v7600_v37 = vld [vmem:[%s11405_s2 + $0x8] ss:$24 sps:$4 sm:$0xff]   ;;  %1152 = vmatprep.subr.bf16.mxu1 %v7603_v55 }
  0xf4   : > { %v6957_v40 = vpop.f32.mrf.mxu1  ;;  %1054 = vmatpush1.bf16.msra.mxu0 %v7600_v37 }
  0xf5   : > { %11470 = vst [vmem:[#allocation3_spill] sm:$0xff] %v8339_v39  ;;  %408 = vadd.xlane.f32.xlu0 %v8339_v39  ;;  %v455_v41 = vmul.f32 %v8339_v39, %v8339_v39  ;;  %v8413_v5 = vadd.f32 %v6957_v40, %v8330_v33 }
  0xf6   : > { %v359_v42 = vpop.f32.mrf.mxu1 }
  0xf7   : > { %472 = vadd.xlane.f32.xlu1 %v455_v41  ;;  %v8381_v57 = vadd.f32 %v8330_v33, %v359_v42  ;;  %11475 = vst [vmem:[#allocation8_spill] sm:$0xff] %v8413_v5  ;;  %v460_v12 = vmul.f32 %v8413_v5, %v8413_v5  ;;  %v11408_v42 = vmov 0  }
  0xf8   : > { %v6958_v47 = vpop.f32.mrf.mxu1  ;;  %958 = vmatprep.mubr.bf16.mxu1 %v11408_v42  ;;  %1071 = vmatprep.mubr.bf16.mxu0 %v11408_v42 }
  0xf9   : > { %410 = vadd.xlane.f32.xlu0 %v8345_v43  ;;  %11473 = vst [vmem:[#allocation6_spill] sm:$0xff] %v8381_v57  ;;  %v458_v0 = vmul.f32 %v8381_v57, %v8381_v57  ;;  %v8422_v8 = vadd.f32 %v6958_v47, %v8330_v33 }
  0xfa   : > { %v362_v54 = vpop.f32.mrf.mxu1 }
  0xfb   : > { %412 = vadd.xlane.f32.xlu1 %v8348_v44  ;;  %v8384_v58 = vadd.f32 %v8330_v33, %v362_v54  ;;  %11476 = vst [vmem:[#allocation9_spill] sm:$0xff] %v8422_v8  ;;  %v461_v15 = vmul.f32 %v8422_v8, %v8422_v8 }
  0xfc   : > { %v8393_v61 = vpop.f32.mrf.mxu1 }
  0xfd   : > { %474 = vadd.xlane.f32.xlu0 %v456_v50  ;;  %11474 = vst [vmem:[#allocation7_spill] sm:$0xff] %v8384_v58  ;;  %v459_v1 = vmul.f32 %v8384_v58, %v8384_v58  ;;  %v8486_v34 = vadd.f32 %v8393_v61, %v8330_v33 }
  0xfe   : > { %v375_v2 = vpop.f32.mrf.mxu1 }
  0xff   : > { %476 = vadd.xlane.f32.xlu1 %v457_v51  ;;  %v8449_v19 = vadd.f32 %v8330_v33, %v375_v2  ;;  %11479 = vst [vmem:[#allocation12_spill] sm:$0xff] %v8486_v34  ;;  %v464_v41 = vmul.f32 %v8486_v34, %v8486_v34 }
 0x100   : > { %v6962_v9 = vpop.f32.mrf.mxu1 }
 0x101   : > { %414 = vadd.xlane.f32.xlu0 %v8381_v57  ;;  %11477 = vst [vmem:[#allocation10_spill] sm:$0xff] %v8449_v19  ;;  %v462_v26 = vmul.f32 %v8449_v19, %v8449_v19  ;;  %v8495_v38 = vadd.f32 %v6962_v9, %v8330_v33 }
 0x102   : > { %v378_v16 = vpop.f32.mrf.mxu1 }
 0x103   : > { %416 = vadd.xlane.f32.xlu1 %v8384_v58  ;;  %v8458_v22 = vadd.f32 %v8330_v33, %v378_v16  ;;  %11480 = vst [vmem:[#allocation13_spill] sm:$0xff] %v8495_v38  ;;  %v465_v45 = vmul.f32 %v8495_v38, %v8495_v38 }
 0x104   : > { %v6965_v23 = vpop.f32.mrf.mxu1 }
 0x105   : > { %478 = vadd.xlane.f32.xlu0 %v458_v0  ;;  %11478 = vst [vmem:[#allocation11_spill] sm:$0xff] %v8458_v22  ;;  %v463_v29 = vmul.f32 %v8458_v22, %v8458_v22  ;;  %v8518_v51 = vadd.f32 %v6965_v23, %v8330_v33 }
 0x106   : > { %v391_v30 = vpop.f32.mrf.mxu1 }
 0x107   : > { %480 = vadd.xlane.f32.xlu1 %v459_v1  ;;  %v8506_v47 = vadd.f32 %v8330_v33, %v391_v30  ;;  %11483 = vst [vmem:[#allocation16_spill] sm:$0xff] %v8518_v51  ;;  %v468_v53 = vmul.f32 %v8518_v51, %v8518_v51 }
 0x108   : > { %v6966_v40 = vpop.f32.mrf.mxu1 }
 0x109   : > { %418 = vadd.xlane.f32.xlu0 %v8413_v5  ;;  %11481 = vst [vmem:[#allocation14_spill] sm:$0xff] %v8506_v47  ;;  %v466_v49 = vmul.f32 %v8506_v47, %v8506_v47  ;;  %v8521_v52 = vadd.f32 %v6966_v40, %v8330_v33 }
 0x10a   : > { %v394_v46 = vpop.f32.mrf.mxu1 }
 0x10b   : > { %420 = vadd.xlane.f32.xlu1 %v8422_v8  ;;  %v8509_v48 = vadd.f32 %v8330_v33, %v394_v46  ;;  %11484 = vst [vmem:[#allocation17_spill] sm:$0xff] %v8521_v52  ;;  %v469_v54 = vmul.f32 %v8521_v52, %v8521_v52 }
 0x10d   : > { %482 = vadd.xlane.f32.xlu0 %v460_v12  ;;  %11482 = vst [vmem:[#allocation15_spill] sm:$0xff] %v8509_v48  ;;  %v467_v50 = vmul.f32 %v8509_v48, %v8509_v48 }
 0x10f   : > { %484 = vadd.xlane.f32.xlu1 %v461_v15 }
 0x111   : > { %422 = vadd.xlane.f32.xlu0 %v8449_v19 }
 0x113   : > { %424 = vadd.xlane.f32.xlu1 %v8458_v22 }
 0x115   : > { %486 = vadd.xlane.f32.xlu0 %v462_v26 }
 0x117   : > { %488 = vadd.xlane.f32.xlu1 %v463_v29 }
 0x119   : > { %426 = vadd.xlane.f32.xlu0 %v8486_v34 }
 0x11b   : > { %428 = vadd.xlane.f32.xlu1 %v8495_v38 }
 0x11d   : > { %490 = vadd.xlane.f32.xlu0 %v464_v41 }
 0x11f   : > { %492 = vadd.xlane.f32.xlu1 %v465_v45 }
 0x121   : > { %430 = vadd.xlane.f32.xlu0 %v8506_v47 }
 0x123   : > { %432 = vadd.xlane.f32.xlu1 %v8509_v48 }
 0x125   : > { %494 = vadd.xlane.f32.xlu0 %v466_v49 }
 0x127   : > { %496 = vadd.xlane.f32.xlu1 %v467_v50 }
 0x129   : > { %434 = vadd.xlane.f32.xlu0 %v8518_v51 }
 0x12b   : > { %436 = vadd.xlane.f32.xlu1 %v8521_v52 }
 0x12d   : > { %498 = vadd.xlane.f32.xlu0 %v468_v53 }
 0x12f   : > { %500 = vadd.xlane.f32.xlu1 %v469_v54 }
 0x17a   : > { %v407_v56 = vpop.xlane.xlu0 %406 }
 0x17b   : > { %v438_v33 = vmul.f32 0.03125, %v407_v56 }
 0x17c   : > { %v471_v59 = vpop.xlane.xlu1 %470 }
 0x17d   : > { %v518_v60 = vmul.f32 %v438_v33, %v438_v33  ;;  %v502_v61 = vmul.f32 0.03125, %v471_v59  ;;  %v566_v59 = vsub.f32 %v8333_v35, %v438_v33 }
 0x17e   : > { %v409_v62 = vpop.xlane.xlu0 %408 }
 0x17f   : > { %v534_v63 = vsub.f32 %v502_v61, %v518_v60  ;;  %v439_v0 = vmul.f32 0.03125, %v409_v62 }
 0x180   : > { %v473_v1 = vpop.xlane.xlu1 %472 }
 0x181   : > { %v550_v2 = vmax.f32 %v534_v63, 0.0  ;;  %v519_v3 = vmul.f32 %v439_v0, %v439_v0  ;;  %v503_v4 = vmul.f32 0.03125, %v473_v1  ;;  %v567_v61 = vsub.f32 %v8339_v39, %v439_v0 }
 0x182   : > { %v411_v6 = vpop.xlane.xlu0 %410 }
 0x183   : > { %v582_v7 = vadd.f32 1e-12, %v550_v2  ;;  %v535_v9 = vsub.f32 %v503_v4, %v519_v3  ;;  %v8532_v10 = vmul.f32 0.03125, %v411_v6 }
 0x184   : > { %v413_v11 = vpop.xlane.xlu1 %412 }
 0x185   : > { %v551_v12 = vmax.f32 %v535_v9, 0.0  ;;  %7769 = vrsqrt.f32 %v582_v7  ;;  %v8534_v13 = vmul.f32 0.03125, %v413_v11  ;;  %v520_v16 = vmul.f32 %v8532_v10, %v8532_v10 }
 0x186   : > { %v475_v14 = vpop.xlane.xlu0 %474 }
 0x187   : > { %v583_v15 = vadd.f32 1e-12, %v551_v12  ;;  %v504_v17 = vmul.f32 0.03125, %v475_v14  ;;  %v521_v20 = vmul.f32 %v8534_v13, %v8534_v13 }
 0x188   : > { %v477_v18 = vpop.xlane.xlu1 %476 }
 0x189   : > { %7771 = vrsqrt.f32 %v583_v15  ;;  %v536_v21 = vsub.f32 %v504_v17, %v520_v16  ;;  %v505_v23 = vmul.f32 0.03125, %v477_v18  ;;  %v7601_v16 = vld [vmem:[%s11405_s2 + $0x160] ss:$24 sps:$4 sm:$0xff]   ;;  %v7606_v18 = vld [vmem:[%s11405_s2 + $0x134] ss:$24 sps:$4 sm:$0xff]  }
 0x18a   : > { %v415_v24 = vpop.xlane.xlu0 %414 }
 0x18b   : > { %v552_v25 = vmax.f32 %v536_v21, 0.0  ;;  %v537_v26 = vsub.f32 %v505_v23, %v521_v20  ;;  %v8540_v27 = vmul.f32 0.03125, %v415_v24 }
 0x18c   : > { %v417_v28 = vpop.xlane.xlu1 %416 }
 0x18d   : > { %v584_v29 = vadd.f32 1e-12, %v552_v25  ;;  %v553_v30 = vmax.f32 %v537_v26, 0.0  ;;  %v8542_v31 = vmul.f32 0.03125, %v417_v28  ;;  %v522_v37 = vmul.f32 %v8540_v27, %v8540_v27 }
 0x18e   : > { %v479_v32 = vpop.xlane.xlu0 %478  ;;  %v568_v25 = vsub.f32 %v8345_v43, %v8532_v10  ;;  %v569_v28 = vsub.f32 %v8348_v44, %v8534_v13  ;;  %v7609_v13 = vld [vmem:[%s11405_s2 + $0x104] ss:$24 sps:$4 sm:$0xff]  }
 0x18f   : > { %7773 = vrsqrt.f32 %v584_v29  ;;  %v585_v36 = vadd.f32 1e-12, %v553_v30  ;;  %v506_v40 = vmul.f32 0.03125, %v479_v32  ;;  %v523_v45 = vmul.f32 %v8542_v31, %v8542_v31  ;;  %v7604_v32 = vld [vmem:[%s11405_s2 + $0x130] ss:$24 sps:$4 sm:$0xff]  }
 0x190   : > { %v481_v41 = vpop.xlane.xlu1 %480 }
 0x191   : > { %7775 = vrsqrt.f32 %v585_v36  ;;  %v538_v46 = vsub.f32 %v506_v40, %v522_v37  ;;  %v507_v49 = vmul.f32 0.03125, %v481_v41 }
 0x192   : > { %v419_v50 = vpop.xlane.xlu0 %418  ;;  %v7770_v53 = vpop.eup %7769 }
 0x193   : > { %v554_v54 = vmax.f32 %v538_v46, 0.0  ;;  %v539_v55 = vsub.f32 %v507_v49, %v523_v45  ;;  %v8548_v56 = vmul.f32 0.03125, %v419_v50  ;;  %v614_v6 = vmul.f32 %v7770_v53, %v566_v59 }
 0x194   : > { %v421_v60 = vpop.xlane.xlu1 %420 }
 0x195   : > { %v586_v62 = vadd.f32 1e-12, %v554_v54  ;;  %v555_v63 = vmax.f32 %v539_v55, 0.0  ;;  %v524_v2 = vmul.f32 %v8548_v56, %v8548_v56  ;;  %v8554_v3 = vmul.f32 0.03125, %v421_v60  ;;  %v7607_v60 = vld [vmem:[%s11405_s2 + $0x100] ss:$24 sps:$4 sm:$0xff]  }
 0x196   : > { %v7772_v1 = vpop.eup %7771  ;;  %v483_v4 = vpop.xlane.xlu0 %482 }
 0x197   : > { %7777 = vrsqrt.f32 %v586_v62  ;;  %v587_v7 = vadd.f32 1e-12, %v555_v63  ;;  %v508_v9 = vmul.f32 0.03125, %v483_v4  ;;  %v615_v11 = vmul.f32 %v7772_v1, %v567_v61  ;;  %v7612_v62 = vld [vmem:[%s11405_s2 + $0xd4] ss:$24 sps:$4 sm:$0xff]  }
 0x198   : > { %v525_v33 = vmul.f32 %v8554_v3, %v8554_v3  ;;  %v485_v12 = vpop.xlane.xlu1 %484 }
 0x199   : > { %7779 = vrsqrt.f32 %v587_v7  ;;  %v540_v0 = vsub.f32 %v508_v9, %v524_v2  ;;  %v509_v14 = vmul.f32 0.03125, %v485_v12  ;;  %v8558_v15 = vpack.c.bf16 %v615_v11, %v614_v6  ;;  %v7610_v12 = vld [vmem:[%s11405_s2 + $0xd0] ss:$24 sps:$4 sm:$0xff]  }
 0x19a   : > { %v423_v17 = vpop.xlane.xlu0 %422  ;;  %v570_v6 = vsub.f32 %v8381_v57, %v8540_v27  ;;  %v571_v9 = vsub.f32 %v8384_v58, %v8542_v31  ;;  %v7615_v31 = vld [vmem:[%s11405_s2 + $0xa4] ss:$24 sps:$4 sm:$0xff]  }
 0x19b   : > { %v556_v20 = vmax.f32 %v540_v0, 0.0  ;;  %v541_v21 = vsub.f32 %v509_v14, %v525_v33  ;;  %v8566_v23 = vmul.f32 0.03125, %v423_v17  ;;  %959 = vmatmul.mubr.bf16.vlgmr.msra.gmra.mxu1 %v8558_v15  ;;  %1072 = vmatmul.mubr.bf16.vlgmr.msra.gmra.mxu0 %v8558_v15 }
 0x19c   : > { %v7774_v24 = vpop.eup %7773  ;;  %v425_v26 = vpop.xlane.xlu1 %424  ;;  %968 = vmatprep.mubr.bf16.mxu1 %v11408_v42  ;;  %1081 = vmatprep.mubr.bf16.mxu0 %v11408_v42 }
 0x19d   : > { %v588_v29 = vadd.f32 1e-12, %v556_v20  ;;  %v557_v30 = vmax.f32 %v541_v21, 0.0  ;;  %1153 = vmatpush1.bf16.msra.mxu1 %v7601_v16  ;;  %v526_v37 = vmul.f32 %v8566_v23, %v8566_v23  ;;  %v8581_v10 = vmul.f32 0.03125, %v425_v26 }
 0x19e   : > { %v7776_v36 = vpop.eup %7775  ;;  %v487_v40 = vpop.xlane.xlu0 %486  ;;  %v616_v41 = vmul.f32 %v7774_v24, %v568_v25  ;;  %1154 = vmatprep.subr.bf16.mxu1 %v7606_v18 }
 0x19f   : > { %7781 = vrsqrt.f32 %v588_v29  ;;  %v589_v45 = vadd.f32 1e-12, %v557_v30  ;;  %v510_v46 = vmul.f32 0.03125, %v487_v40  ;;  %v617_v49 = vmul.f32 %v7776_v36, %v569_v28  ;;  %v7613_v30 = vld [vmem:[%s11405_s2 + $0xa0] ss:$24 sps:$4 sm:$0xff]  }
 0x1a0   : > { %v527_v50 = vmul.f32 %v8581_v10, %v8581_v10  ;;  %v489_v53 = vpop.xlane.xlu1 %488  ;;  %v7618_v36 = vld [vmem:[%s11405_s2 + $0x74] ss:$24 sps:$4 sm:$0xff]  }
 0x1a1   : > { %7783 = vrsqrt.f32 %v589_v45  ;;  %v542_v54 = vsub.f32 %v510_v46, %v526_v37  ;;  %v511_v55 = vmul.f32 0.03125, %v489_v53  ;;  %v8588_v59 = vpack.c.bf16 %v617_v49, %v616_v41  ;;  %1155 = vmatpush1.bf16.msra.mxu1 %v7604_v32 }
 0x1a2   : > { %v427_v61 = vpop.xlane.xlu0 %426  ;;  %1156 = vmatprep.subr.bf16.mxu1 %v7609_v13  ;;  %v572_v45 = vsub.f32 %v8413_v5, %v8548_v56  ;;  %v573_v49 = vsub.f32 %v8422_v8, %v8554_v3  ;;  %v7621_v3 = vld [vmem:[%s11405_s2 + $0x44] ss:$24 sps:$4 sm:$0xff]  }
 0x1a3   : > { %v558_v63 = vmax.f32 %v542_v54, 0.0  ;;  %v543_v1 = vsub.f32 %v511_v55, %v527_v50  ;;  %v8596_v2 = vmul.f32 0.03125, %v427_v61  ;;  %969 = vmatmul.mubr.bf16.gmra.mxu1 %v8588_v59  ;;  %1082 = vmatmul.mubr.bf16.gmra.mxu0 %v8588_v59  ;;  %v7616_v54 = vld [vmem:[%s11405_s2 + $0x70] ss:$24 sps:$4 sm:$0xff]  }
 0x1a4   : > { %v7778_v4 = vpop.eup %7777  ;;  %v429_v7 = vpop.xlane.xlu1 %428  ;;  %978 = vmatprep.mubr.bf16.mxu1 %v11408_v42  ;;  %1091 = vmatprep.mubr.bf16.mxu0 %v11408_v42 }
 0x1a5   : > { %v590_v11 = vadd.f32 1e-12, %v558_v63  ;;  %v559_v33 = vmax.f32 %v543_v1, 0.0  ;;  %1157 = vmatpush1.bf16.msra.mxu1 %v7607_v60  ;;  %v528_v14 = vmul.f32 %v8596_v2, %v8596_v2  ;;  %v8611_v27 = vmul.f32 0.03125, %v429_v7 }
 0x1a6   : > { %v7780_v0 = vpop.eup %7779  ;;  %v491_v16 = vpop.xlane.xlu0 %490  ;;  %v618_v17 = vmul.f32 %v7778_v4, %v570_v6  ;;  %1158 = vmatprep.subr.bf16.mxu1 %v7612_v62 }
 0x1a7   : > { %7785 = vrsqrt.f32 %v590_v11  ;;  %v591_v18 = vadd.f32 1e-12, %v559_v33  ;;  %v512_v20 = vmul.f32 0.03125, %v491_v16  ;;  %v619_v21 = vmul.f32 %v7780_v0, %v571_v9 }
 0x1a8   : > { %v529_v24 = vmul.f32 %v8611_v27, %v8611_v27  ;;  %v493_v25 = vpop.xlane.xlu1 %492 }
 0x1a9   : > { %7787 = vrsqrt.f32 %v591_v18  ;;  %v544_v26 = vsub.f32 %v512_v20, %v528_v14  ;;  %v513_v28 = vmul.f32 0.03125, %v493_v25  ;;  %v8618_v29 = vpack.c.bf16 %v619_v21, %v618_v17  ;;  %1159 = vmatpush1.bf16.msra.mxu1 %v7610_v12  ;;  %v7619_v12 = vld [vmem:[%s11405_s2 + $0x40] ss:$24 sps:$4 sm:$0xff]   ;;  %v7624_v14 = vld [vmem:[%s11405_s2 + $0x14] ss:$24 sps:$4 sm:$0xff]  }
 0x1aa   : > { %v431_v32 = vpop.xlane.xlu0 %430  ;;  %1160 = vmatprep.subr.bf16.mxu1 %v7615_v31  ;;  %v574_v20 = vsub.f32 %v8449_v19, %v8566_v23 }
 0x1ab   : > { %v560_v37 = vmax.f32 %v544_v26, 0.0  ;;  %v545_v40 = vsub.f32 %v513_v28, %v529_v24  ;;  %v8626_v41 = vmul.f32 0.03125, %v431_v32  ;;  %979 = vmatmul.mubr.bf16.gmra.mxu1 %v8618_v29  ;;  %1092 = vmatmul.mubr.bf16.gmra.mxu0 %v8618_v29  ;;  %v575_v24 = vsub.f32 %v8458_v22, %v8581_v10  ;;  %v7622_v28 = vld [vmem:[%s11405_s2 + $0x10] ss:$24 sps:$4 sm:$0xff]  }
 0x1ac   : > { %v7782_v13 = vpop.eup %7781  ;;  %v433_v46 = vpop.xlane.xlu1 %432  ;;  %988 = vmatprep.mubr.bf16.mxu1 %v11408_v42  ;;  %1101 = vmatprep.mubr.bf16.mxu0 %v11408_v42 }
 0x1ad   : > { %v592_v50 = vadd.f32 1e-12, %v560_v37  ;;  %v561_v53 = vmax.f32 %v545_v40, 0.0  ;;  %1161 = vmatpush1.bf16.msra.mxu1 %v7613_v30  ;;  %v530_v60 = vmul.f32 %v8626_v41, %v8626_v41  ;;  %v8641_v56 = vmul.f32 0.03125, %v433_v46 }
 0x1ae   : > { %v7784_v55 = vpop.eup %7783  ;;  %v495_v61 = vpop.xlane.xlu0 %494  ;;  %v620_v62 = vmul.f32 %v7782_v13, %v572_v45  ;;  %1162 = vmatprep.subr.bf16.mxu1 %v7618_v36 }
 0x1af   : > { %7789 = vrsqrt.f32 %v592_v50  ;;  %v593_v63 = vadd.f32 1e-12, %v561_v53  ;;  %v514_v1 = vmul.f32 0.03125, %v495_v61  ;;  %v621_v4 = vmul.f32 %v7784_v55, %v573_v49 }
 0x1b0   : > { %v531_v6 = vmul.f32 %v8641_v56, %v8641_v56  ;;  %v497_v7 = vpop.xlane.xlu1 %496  ;;  %v576_v61 = vsub.f32 %v8486_v34, %v8596_v2  ;;  %v578_v2 = vsub.f32 %v8506_v47, %v8626_v41 }
 0x1b1   : > { %7791 = vrsqrt.f32 %v593_v63  ;;  %v546_v9 = vsub.f32 %v514_v1, %v530_v60  ;;  %v515_v11 = vmul.f32 0.03125, %v497_v7  ;;  %v8648_v33 = vpack.c.bf16 %v621_v4, %v620_v62  ;;  %1163 = vmatpush1.bf16.msra.mxu1 %v7616_v54 }
 0x1b2   : > { %v435_v0 = vpop.xlane.xlu0 %434  ;;  %1164 = vmatprep.subr.bf16.mxu1 %v7621_v3  ;;  %v577_v62 = vsub.f32 %v8495_v38, %v8611_v27  ;;  %v579_v27 = vsub.f32 %v8509_v48, %v8641_v56 }
 0x1b3   : > { %v562_v16 = vmax.f32 %v546_v9, 0.0  ;;  %v547_v17 = vsub.f32 %v515_v11, %v531_v6  ;;  %v8656_v31 = vmul.f32 0.03125, %v435_v0  ;;  %989 = vmatmul.mubr.bf16.gmra.mxu1 %v8648_v33  ;;  %1102 = vmatmul.mubr.bf16.gmra.mxu0 %v8648_v33 }
 0x1b4   : > { %v7786_v18 = vpop.eup %7785  ;;  %v437_v21 = vpop.xlane.xlu1 %436  ;;  %998 = vmatprep.mubr.bf16.mxu1 %v11408_v42  ;;  %1111 = vmatprep.mubr.bf16.mxu0 %v11408_v42 }
 0x1b5   : > { %v594_v25 = vadd.f32 1e-12, %v562_v16  ;;  %v563_v26 = vmax.f32 %v547_v17, 0.0  ;;  %1165 = vmatpush1.bf16.msra.mxu1 %v7619_v12  ;;  %v532_v32 = vmul.f32 %v8656_v31, %v8656_v31  ;;  %v453_v23 = vmul.f32 0.03125, %v437_v21 }
 0x1b6   : > { %v7788_v30 = vpop.eup %7787  ;;  %v499_v36 = vpop.xlane.xlu0 %498  ;;  %v622_v37 = vmul.f32 %v7786_v18, %v574_v20  ;;  %1166 = vmatprep.subr.bf16.mxu1 %v7624_v14  ;;  %v580_v18 = vsub.f32 %v8518_v51, %v8656_v31  ;;  %v7629_v31 = vld [vmem:[%s11404_s1 + $0x58] sm:$0xff]  }
 0x1b7   : > { %7793 = vrsqrt.f32 %v594_v25  ;;  %v595_v40 = vadd.f32 1e-12, %v563_v26  ;;  %v516_v13 = vmul.f32 0.03125, %v499_v36  ;;  %v623_v45 = vmul.f32 %v7788_v30, %v575_v24  ;;  %v7630_v25 = vld [vmem:[%s11404_s1 + $0x50] sm:$0xff]   ;;  %v7631_v26 = vld [vmem:[%s11404_s1 + $0x48] sm:$0xff]  }
 0x1b8   : > { %v533_v10 = vmul.f32 %v453_v23, %v453_v23  ;;  %v501_v46 = vpop.xlane.xlu1 %500  ;;  %v581_v20 = vsub.f32 %v8521_v52, %v453_v23  ;;  %v7632_v23 = vld [vmem:[%s11404_s1 + $0x40] sm:$0xff]   ;;  %v8732_v36 = vld [vmem:[%s11406_s3 + $0x90] ss:$0 sm:$0xff] }
 0x1b9   : > { %7795 = vrsqrt.f32 %v595_v40  ;;  %v548_v49 = vsub.f32 %v516_v13, %v532_v32  ;;  %v517_v50 = vmul.f32 0.03125, %v501_v46  ;;  %v634_v53 = vpack.c.bf16 %v623_v45, %v622_v37  ;;  %1167 = vmatpush1.bf16.msra.mxu1 %v7622_v28  ;;  %v8724_v32 = vld [vmem:[%s11406_s3 + $0xa8] ss:$0 sm:$0xff]  ;;  %v8737_v37 = vld [vmem:[%s11406_s3 + $0xa0] ss:$0 sm:$0xff] }
 0x1bb   : > { %v564_v54 = vmax.f32 %v548_v49, 0.0  ;;  %v549_v55 = vsub.f32 %v517_v50, %v533_v10  ;;  %999 = vmatmul.mubr.bf16.gmra.mxu1 %v634_v53  ;;  %1112 = vmatmul.mubr.bf16.gmra.mxu0 %v634_v53 }
 0x1bc   : > { %v7790_v60 = vpop.eup %7789  ;;  %1008 = vmatprep.mubr.bf16.mxu1 %v11408_v42  ;;  %1121 = vmatprep.mubr.bf16.mxu0 %v11408_v42 }
 0x1bd   : > { %v596_v3 = vadd.f32 1e-12, %v564_v54  ;;  %v565_v63 = vmax.f32 %v549_v55, 0.0  ;;  %v624_v6 = vmul.f32 %v7790_v60, %v576_v61 }
 0x1be   : > { %v7792_v1 = vpop.eup %7791 }
 0x1bf   : > { %7797 = vrsqrt.f32 %v596_v3  ;;  %v597_v4 = vadd.f32 1e-12, %v565_v63  ;;  %v625_v7 = vmul.f32 %v7792_v1, %v577_v62 }
 0x1c1   : > { %7799 = vrsqrt.f32 %v597_v4  ;;  %v635_v9 = vpack.c.bf16 %v625_v7, %v624_v6 }
 0x1c3   : > { %1009 = vmatmul.mubr.bf16.gmra.mxu1 %v635_v9  ;;  %1122 = vmatmul.mubr.bf16.gmra.mxu0 %v635_v9 }
 0x1c4   : > { %v7794_v11 = vpop.eup %7793  ;;  %1018 = vmatprep.mubr.bf16.mxu1 %v11408_v42  ;;  %1131 = vmatprep.mubr.bf16.mxu0 %v11408_v42 }
 0x1c5   : > { %v626_v0 = vmul.f32 %v7794_v11, %v578_v2 }
 0x1c6   : > { %v7796_v12 = vpop.eup %7795 }
 0x1c7   : > { %v627_v14 = vmul.f32 %v7796_v12, %v579_v27 }
 0x1c9   : > { %v636_v16 = vpack.c.bf16 %v627_v14, %v626_v0 }
 0x1cb   : > { %1019 = vmatmul.mubr.bf16.gmra.mxu1 %v636_v16  ;;  %1132 = vmatmul.mubr.bf16.gmra.mxu0 %v636_v16 }
 0x1cc   : > { %v7798_v17 = vpop.eup %7797  ;;  %1028 = vmatprep.mubr.bf16.mxu1 %v11408_v42  ;;  %1141 = vmatprep.mubr.bf16.mxu0 %v11408_v42 }
 0x1cd   : > { %v628_v21 = vmul.f32 %v7798_v17, %v580_v18 }
 0x1ce   : > { %v7800_v41 = vpop.eup %7799 }
 0x1cf   : > { %v629_v24 = vmul.f32 %v7800_v41, %v581_v20 }
 0x1d1   : > { %v637_v56 = vpack.c.bf16 %v629_v24, %v628_v21 }
 0x1d3   : > { %1029 = vmatmul.mubr.bf16.gmra.mxu1 %v637_v56  ;;  %1142 = vmatmul.mubr.bf16.gmra.mxu0 %v637_v56 }
 0x1d4   : > { %1184 = vmatprep.mubr.bf16.mxu1 %v11408_v42 }
 0x1db   : > { %1185 = vmatmul.mubr.bf16.vlgmr.msra.gmra.mxu1 %v8558_v15  ;;  %v7625_v15 = vld [vmem:[%s11404_s1 + $0x78] sm:$0xff]  }
 0x1dc   : > { %1194 = vmatprep.mubr.bf16.mxu1 %v11408_v42  ;;  %7031 = vmatprep.subr.bf16.mxu1 %v7625_v15 }
 0x1dd   : > { %7032 = vmatpush3.bf16.msra.mxu1 %v7625_v15 }
 0x1e3   : > { %1195 = vmatmul.mubr.bf16.gmra.mxu1 %v8588_v59  ;;  %v7626_v59 = vld [vmem:[%s11404_s1 + $0x70] sm:$0xff]  }
 0x1e4   : > { %1204 = vmatprep.mubr.bf16.mxu1 %v11408_v42  ;;  %7033 = vmatprep.subr.bf16.mxu1 %v7626_v59 }
 0x1e5   : > { %7034 = vmatpush3.bf16.msra.mxu1 %v7626_v59 }
 0x1eb   : > { %1205 = vmatmul.mubr.bf16.gmra.mxu1 %v8618_v29  ;;  %v7627_v29 = vld [vmem:[%s11404_s1 + $0x68] sm:$0xff]  }
 0x1ec   : > { %1214 = vmatprep.mubr.bf16.mxu1 %v11408_v42  ;;  %7035 = vmatprep.subr.bf16.mxu1 %v7627_v29 }
 0x1ed   : > { %7036 = vmatpush3.bf16.msra.mxu1 %v7627_v29 }
 0x1f3   : > { %1215 = vmatmul.mubr.bf16.gmra.mxu1 %v8648_v33  ;;  %v7628_v33 = vld [vmem:[%s11404_s1 + $0x60] sm:$0xff]  }
 0x1f4   : > { %1224 = vmatprep.mubr.bf16.mxu1 %v11408_v42  ;;  %7037 = vmatprep.subr.bf16.mxu1 %v7628_v33 }
 0x1f5   : > { %7038 = vmatpush3.bf16.msra.mxu1 %v7628_v33 }
 0x1f6   : > { %7039 = vmatprep.subr.bf16.mxu1 %v7629_v31 }
 0x1f9   : > { %7040 = vmatpush3.bf16.msra.mxu1 %v7629_v31 }
 0x1fa   : > { %7041 = vmatprep.subr.bf16.mxu1 %v7630_v25 }
 0x1fb   : > { %1225 = vmatmul.mubr.bf16.gmra.mxu1 %v634_v53 }
 0x1fc   : > { %1234 = vmatprep.mubr.bf16.mxu1 %v11408_v42 }
 0x1fd   : > { %7042 = vmatpush3.bf16.msra.mxu1 %v7630_v25 }
 0x1fe   : > { %7043 = vmatprep.subr.bf16.mxu1 %v7631_v26 }
 0x201   : > { %7044 = vmatpush3.bf16.msra.mxu1 %v7631_v26 }
 0x202   : > { %7045 = vmatprep.subr.bf16.mxu1 %v7632_v23 }
 0x203   : > { %1235 = vmatmul.mubr.bf16.gmra.mxu1 %v635_v9 }
 0x204   : > { %1244 = vmatprep.mubr.bf16.mxu1 %v11408_v42 }
 0x205   : > { %7046 = vmatpush3.bf16.msra.mxu1 %v7632_v23 }
 0x20b   : > { %1245 = vmatmul.mubr.bf16.gmra.mxu1 %v636_v16 }
 0x20c   : > { %1254 = vmatprep.mubr.bf16.mxu1 %v11408_v42 }
 0x213   : > { %1255 = vmatmul.mubr.bf16.gmra.mxu1 %v637_v56 }
 0x25b   : > { %v960_v28 = vpop.f32.mrf.mxu1  ;;  %v1073_v30 = vpop.f32.mrf.mxu0 }
 0x25c   : > { %v1270_v49 = vadd.f32 %v8732_v36, %v960_v28  ;;  %v1291_v50 = vadd.f32 %v8737_v37, %v1073_v30 }
 0x25d   : > { %v8739_v40 = vpop.f32.mrf.mxu1  ;;  %v1075_v13 = vpop.f32.mrf.mxu0 }
 0x25e   : > { %v1909_v45 = vadd.f32 %v8724_v32, %v1075_v13 }
 0x25f   : > { %v964_v10 = vpop.f32.mrf.mxu1  ;;  %v1077_v46 = vpop.f32.mrf.mxu0 }
 0x260   : > { %v1271_v53 = vadd.f32 %v8732_v36, %v964_v10  ;;  %v1292_v54 = vadd.f32 %v8737_v37, %v1077_v46 }
 0x261   : > { %v8746_v55 = vpop.f32.mrf.mxu1  ;;  %v1079_v60 = vpop.f32.mrf.mxu0 }
 0x262   : > { %v1328_v61 = vpack.c.bf16 %v1271_v53, %v1270_v49  ;;  %v8748_v62 = vpack.c.bf16 %v1292_v54, %v1291_v50  ;;  %v1910_v3 = vadd.f32 %v8724_v32, %v1079_v60 }
 0x263   : > { %v970_v63 = vpop.f32.mrf.mxu1  ;;  %v1083_v1 = vpop.f32.mrf.mxu0 }
 0x264   : > { %v8751_v4 = vpack.c.bf16 %v1910_v3, %v1909_v45  ;;  %v8754_v6 = vadd.f32 %v8732_v36, %v970_v63  ;;  %6983 = vmatprep.mubr.bf16.mxu0 %v1328_v61  ;;  %v1293_v12 = vadd.f32 %v8737_v37, %v1083_v1 }
 0x265   : > { %v8756_v7 = vpop.f32.mrf.mxu1  ;;  %v1085_v9 = vpop.f32.mrf.mxu0 }
 0x266   : > { %v1911_v11 = vadd.f32 %v8724_v32, %v1085_v9 }
 0x267   : > { %v974_v2 = vpop.f32.mrf.mxu1  ;;  %v1087_v27 = vpop.f32.mrf.mxu0 }
 0x268   : > { %v8761_v0 = vadd.f32 %v8732_v36, %v974_v2  ;;  %v1294_v14 = vadd.f32 %v8737_v37, %v1087_v27 }
 0x269   : > { %v8764_v16 = vpop.f32.mrf.mxu1  ;;  %v1089_v17 = vpop.f32.mrf.mxu0 }
 0x26a   : > { %v8768_v20 = vpack.c.bf16 %v1294_v14, %v1293_v12  ;;  %v1912_v41 = vadd.f32 %v8724_v32, %v1089_v17 }
 0x26b   : > { %v980_v21 = vpop.f32.mrf.mxu1  ;;  %v1093_v24 = vpop.f32.mrf.mxu0 }
 0x26c   : > { %v8771_v56 = vpack.c.bf16 %v1912_v41, %v1911_v11  ;;  %v8774_v15 = vadd.f32 %v8732_v36, %v980_v21  ;;  %v1295_v26 = vadd.f32 %v8737_v37, %v1093_v24 }
 0x26d   : > { %v8776_v59 = vpop.f32.mrf.mxu1  ;;  %v1095_v29 = vpop.f32.mrf.mxu0 }
 0x26e   : > { %v1913_v33 = vadd.f32 %v8724_v32, %v1095_v29 }
 0x26f   : > { %v984_v31 = vpop.f32.mrf.mxu1  ;;  %v1097_v25 = vpop.f32.mrf.mxu0 }
 0x270   : > { %v8781_v28 = vadd.f32 %v8732_v36, %v984_v31  ;;  %v1296_v30 = vadd.f32 %v8737_v37, %v1097_v25 }
 0x271   : > { %v8784_v23 = vpop.f32.mrf.mxu1  ;;  %v1099_v13 = vpop.f32.mrf.mxu0 }
 0x272   : > { %v8788_v10 = vpack.c.bf16 %v1296_v30, %v1295_v26  ;;  %v1914_v46 = vadd.f32 %v8724_v32, %v1099_v13 }
 0x273   : > { %v990_v49 = vpop.f32.mrf.mxu1  ;;  %v8791_v50 = vpop.f32.mrf.mxu0 }
 0x274   : > { %v8793_v53 = vpack.c.bf16 %v1914_v46, %v1913_v33  ;;  %v8796_v54 = vadd.f32 %v8732_v36, %v990_v49 }
 0x275   : > { %v8798_v60 = vpop.f32.mrf.mxu1  ;;  %v1105_v61 = vpop.f32.mrf.mxu0 }
 0x276   : > { %v1915_v3 = vadd.f32 %v8724_v32, %v1105_v61 }
 0x277   : > { %v994_v63 = vpop.f32.mrf.mxu1  ;;  %v8801_v1 = vpop.f32.mrf.mxu0 }
 0x278   : > { %v8804_v9 = vadd.f32 %v8732_v36, %v994_v63 }
 0x279   : > { %v8806_v11 = vpop.f32.mrf.mxu1  ;;  %v1109_v2 = vpop.f32.mrf.mxu0 }
 0x27a   : > { %v1916_v12 = vadd.f32 %v8724_v32, %v1109_v2 }
 0x27b   : > { %v1000_v14 = vpop.f32.mrf.mxu1  ;;  %v8811_v17 = vpop.f32.mrf.mxu0 }
 0x27c   : > { %v8813_v41 = vpack.c.bf16 %v1916_v12, %v1915_v3  ;;  %v8816_v21 = vadd.f32 %v8732_v36, %v1000_v14 }
 0x27d   : > { %v8818_v24 = vpop.f32.mrf.mxu1  ;;  %v1115_v29 = vpop.f32.mrf.mxu0 }
 0x27e   : > { %v1917_v33 = vadd.f32 %v8724_v32, %v1115_v29 }
 0x27f   : > { %v1004_v31 = vpop.f32.mrf.mxu1  ;;  %v8821_v25 = vpop.f32.mrf.mxu0 }
 0x280   : > { %v8824_v26 = vadd.f32 %v8732_v36, %v1004_v31 }
 0x281   : > { %v8826_v30 = vpop.f32.mrf.mxu1  ;;  %v1119_v13 = vpop.f32.mrf.mxu0 }
 0x282   : > { %v1918_v49 = vadd.f32 %v8724_v32, %v1119_v13 }
 0x283   : > { %v1010_v61 = vpop.f32.mrf.mxu1  ;;  %v1123_v3 = vpop.f32.mrf.mxu0 }
 0x284   : > { %v8831_v63 = vpack.c.bf16 %v1918_v49, %v1917_v33  ;;  %v8834_v2 = vadd.f32 %v8732_v36, %v1010_v61 }
 0x285   : > { %v8836_v12 = vpop.f32.mrf.mxu1  ;;  %v1125_v14 = vpop.f32.mrf.mxu0 }
 0x286   : > { %11485 = vst [vmem:[#allocation18_spill] sm:$0xff] %v8836_v12  ;;  %v1919_v29 = vadd.f32 %v8724_v32, %v1125_v14 }
 0x287   : > { %v1014_v31 = vpop.f32.mrf.mxu1  ;;  %v1127_v42 = vpop.f32.mrf.mxu0 }
 0x288   : > { %v8840_v27 = vadd.f32 %v8732_v36, %v1014_v31 }
 0x289   : > { %v8842_v46 = vpop.f32.mrf.mxu1  ;;  %v1129_v13 = vpop.f32.mrf.mxu0 }
 0x28a   : > { %v1920_v49 = vadd.f32 %v8724_v32, %v1129_v13 }
 0x28b   : > { %v1020_v61 = vpop.f32.mrf.mxu1  ;;  %v1133_v45 = vpop.f32.mrf.mxu0 }
 0x28c   : > { %v8847_v18 = vpack.c.bf16 %v1920_v49, %v1919_v29  ;;  %v8850_v48 = vadd.f32 %v8732_v36, %v1020_v61 }
 0x28d   : > { %v8852_v14 = vpop.f32.mrf.mxu1  ;;  %v1135_v52 = vpop.f32.mrf.mxu0 }
 0x28e   : > { %11486 = vst [vmem:[#allocation19_spill] sm:$0xff] %v8852_v14  ;;  %v1921_v31 = vadd.f32 %v8724_v32, %v1135_v52 }
 0x28f   : > { %v1024_v47 = vpop.f32.mrf.mxu1  ;;  %v1137_v51 = vpop.f32.mrf.mxu0 }
 0x290   : > { %v8856_v22 = vadd.f32 %v8732_v36, %v1024_v47  ;;  %v1304_v57 = vadd.f32 %v8737_v37, %v1137_v51  ;;  %v8886_v51 = vld [vmem:[%s11406_s3 + $0xb8] ss:$0 sm:$0xff] }
 0x291   : > { %v8858_v33 = vpop.f32.mrf.mxu1  ;;  %v1139_v13 = vpop.f32.mrf.mxu0 }
 0x292   : > { %v1922_v49 = vadd.f32 %v8724_v32, %v1139_v13 }
 0x293   : > { %v1030_v61 = vpop.f32.mrf.mxu1  ;;  %v1143_v38 = vpop.f32.mrf.mxu0 }
 0x294   : > { %v8863_v19 = vpack.c.bf16 %v1922_v49, %v1921_v31  ;;  %v8866_v34 = vadd.f32 %v8732_v36, %v1030_v61  ;;  %v1305_v5 = vadd.f32 %v8737_v37, %v1143_v38  ;;  %v1303_v49 = vadd.f32 %v8737_v37, %v1133_v45 }
 0x295   : > { %v8868_v52 = vpop.f32.mrf.mxu1  ;;  %v8870_v58 = vpop.f32.mrf.mxu0 }
 0x296   : > { %11487 = vst [vmem:[#allocation20_spill] sm:$0xff] %v8868_v52  ;;  %v1342_v38 = vpack.c.bf16 %v1304_v57, %v1303_v49  ;;  %v1301_v57 = vadd.f32 %v8737_v37, %v1123_v3 }
 0x297   : > { %v1034_v47 = vpop.f32.mrf.mxu1  ;;  %v1147_v8 = vpop.f32.mrf.mxu0 }
 0x298   : > { %v8875_v29 = vadd.f32 %v8732_v36, %v1034_v47  ;;  %v1306_v13 = vadd.f32 %v8737_v37, %v1147_v8  ;;  %v8891_v8 = vld [vmem:[%s11406_s3 + $0xb0] ss:$0 sm:$0xff] }
 0x299   : > { %v8878_v31 = vpop.f32.mrf.mxu1 }
 0x29a   : > { %11488 = vst [vmem:[#allocation21_spill] sm:$0xff] %v8878_v31  ;;  %v1343_v39 = vpack.c.bf16 %v1306_v13, %v1305_v5  ;;  %v1302_v5 = vadd.f32 %v8737_v37, %v1127_v42 }
 0x29b   : > { %v1186_v44 = vpop.f32.mrf.mxu1 }
 0x29c   : > { %6967 = vmatprep.subr.bf16.mxu0 %v1343_v39  ;;  %v1312_v13 = vadd.f32 %v8891_v8, %v1186_v44  ;;  %v1341_v31 = vpack.c.bf16 %v1302_v5, %v1301_v57  ;;  %v1300_v44 = vadd.f32 %v8737_v37, %v8821_v25 }
 0x29d   : > { %v1188_v36 = vpop.f32.mrf.mxu1  ;;  %6968 = vmatpush3.bf16.xpose.msra.mxu0 %v1343_v39 }
 0x29e   : > { %v1930_v45 = vadd.f32 %v8886_v51, %v1188_v36  ;;  %6969 = vmatprep.subr.bf16.mxu0 %v1342_v38 }
 0x29f   : > { %v1190_v47 = vpop.f32.mrf.mxu1 }
 0x2a0   : > { %v1313_v61 = vadd.f32 %v8891_v8, %v1190_v47 }
 0x2a1   : > { %v1192_v35 = vpop.f32.mrf.mxu1 }
 0x2a2   : > { %v8898_v49 = vpack.c.bf16 %v1313_v61, %v1312_v13  ;;  %v1931_v43 = vadd.f32 %v8886_v51, %v1192_v35  ;;  %v1299_v35 = vadd.f32 %v8737_v37, %v8811_v17 }
 0x2a3   : > { %v1196_v52 = vpop.f32.mrf.mxu1 }
 0x2a4   : > { %v8901_v39 = vpack.c.bf16 %v1931_v43, %v1930_v45  ;;  %v1314_v47 = vadd.f32 %v8891_v8, %v1196_v52  ;;  %v1340_v45 = vpack.c.bf16 %v1300_v44, %v1299_v35 }
 0x2a5   : > { %v1198_v36 = vpop.f32.mrf.mxu1  ;;  %6970 = vmatpush3.bf16.xpose.msra.mxu0 %v1342_v38 }
 0x2a6   : > { %11489 = vst [vmem:[#allocation22_spill] sm:$0xff] %v8901_v39  ;;  %v1932_v14 = vadd.f32 %v8886_v51, %v1198_v36  ;;  %6971 = vmatprep.subr.bf16.mxu0 %v1341_v31  ;;  %v1298_v36 = vadd.f32 %v8737_v37, %v8801_v1 }
 0x2a7   : > { %v1200_v42 = vpop.f32.mrf.mxu1 }
 0x2a8   : > { %v1315_v3 = vadd.f32 %v8891_v8, %v1200_v42  ;;  %v1297_v42 = vadd.f32 %v8737_v37, %v8791_v50 }
 0x2a9   : > { %v1202_v61 = vpop.f32.mrf.mxu1 }
 0x2aa   : > { %v8910_v5 = vpack.c.bf16 %v1315_v3, %v1314_v47  ;;  %v1933_v43 = vadd.f32 %v8886_v51, %v1202_v61 }
 0x2ab   : > { %v8913_v38 = vpop.f32.mrf.mxu1 }
 0x2ac   : > { %v8915_v13 = vpack.c.bf16 %v1933_v43, %v1932_v14  ;;  %v1339_v14 = vpack.c.bf16 %v1298_v36, %v1297_v42 }
 0x2ad   : > { %v1208_v57 = vpop.f32.mrf.mxu1  ;;  %6972 = vmatpush3.bf16.xpose.msra.mxu0 %v1341_v31 }
 0x2ae   : > { %11490 = vst [vmem:[#allocation23_spill] sm:$0xff] %v8915_v13  ;;  %v1934_v25 = vadd.f32 %v8886_v51, %v1208_v57  ;;  %6973 = vmatprep.subr.bf16.mxu0 %v1340_v45 }
 0x2af   : > { %v8918_v52 = vpop.f32.mrf.mxu1 }
 0x2b1   : > { %v1212_v17 = vpop.f32.mrf.mxu1 }
 0x2b2   : > { %v1935_v47 = vadd.f32 %v8886_v51, %v1212_v17 }
 0x2b3   : > { %v8925_v3 = vpop.f32.mrf.mxu1 }
 0x2b4   : > { %v8927_v44 = vpack.c.bf16 %v1935_v47, %v1934_v25 }
 0x2b5   : > { %v1218_v31 = vpop.f32.mrf.mxu1  ;;  %6974 = vmatpush3.bf16.xpose.msra.mxu0 %v1340_v45 }
 0x2b6   : > { %11491 = vst [vmem:[#allocation24_spill] sm:$0xff] %v8927_v44  ;;  %v1936_v61 = vadd.f32 %v8886_v51, %v1218_v31  ;;  %6975 = vmatprep.subr.bf16.mxu0 %v1339_v14 }
 0x2b7   : > { %v1220_v35 = vpop.f32.mrf.mxu1 }
 0x2b9   : > { %v1222_v43 = vpop.f32.mrf.mxu1 }
 0x2ba   : > { %v1937_v1 = vadd.f32 %v8886_v51, %v1222_v43 }
 0x2bb   : > { %v1226_v57 = vpop.f32.mrf.mxu1 }
 0x2bc   : > { %v8931_v39 = vpack.c.bf16 %v1937_v1, %v1936_v61 }
 0x2bd   : > { %v1228_v37 = vpop.f32.mrf.mxu1  ;;  %6976 = vmatpush3.bf16.xpose.msra.mxu0 %v1339_v14 }
 0x2be   : > { %11492 = vst [vmem:[#allocation25_spill] sm:$0xff] %v8931_v39  ;;  %v1938_v50 = vadd.f32 %v8886_v51, %v1228_v37  ;;  %6977 = vmatprep.subr.bf16.mxu0 %v8788_v10 }
 0x2bf   : > { %v1230_v25 = vpop.f32.mrf.mxu1 }
 0x2c1   : > { %v1232_v36 = vpop.f32.mrf.mxu1 }
 0x2c2   : > { %v1939_v45 = vadd.f32 %v8886_v51, %v1232_v36 }
 0x2c3   : > { %v1236_v17 = vpop.f32.mrf.mxu1 }
 0x2c4   : > { %v8936_v42 = vpack.c.bf16 %v1939_v45, %v1938_v50 }
 0x2c5   : > { %v1238_v47 = vpop.f32.mrf.mxu1  ;;  %6978 = vmatpush3.bf16.xpose.msra.mxu0 %v8788_v10 }
 0x2c6   : > { %11493 = vst [vmem:[#allocation26_spill] sm:$0xff] %v8936_v42  ;;  %v1940_v31 = vadd.f32 %v8886_v51, %v1238_v47  ;;  %6979 = vmatprep.subr.bf16.mxu0 %v8768_v20 }
 0x2c7   : > { %v1240_v61 = vpop.f32.mrf.mxu1 }
 0x2c9   : > { %v1242_v14 = vpop.f32.mrf.mxu1 }
 0x2ca   : > { %v1941_v43 = vadd.f32 %v8886_v51, %v1242_v14 }
 0x2cb   : > { %v1246_v1 = vpop.f32.mrf.mxu1 }
 0x2cc   : > { %v8942_v37 = vpack.c.bf16 %v1941_v43, %v1940_v31  ;;  %v1324_v42 = vadd.f32 %v8891_v8, %v1246_v1 }
 0x2cd   : > { %v1248_v13 = vpop.f32.mrf.mxu1  ;;  %6980 = vmatpush3.bf16.xpose.msra.mxu0 %v8768_v20 }
 0x2ce   : > { %11494 = vst [vmem:[#allocation27_spill] sm:$0xff] %v8942_v37  ;;  %v1942_v50 = vadd.f32 %v8886_v51, %v1248_v13  ;;  %6981 = vmatprep.subr.bf16.mxu0 %v8748_v62 }
 0x2cf   : > { %v1250_v36 = vpop.f32.mrf.mxu1 }
 0x2d0   : > { %v1325_v31 = vadd.f32 %v8891_v8, %v1250_v36  ;;  %v11497_v36 = vpack.c.bf16 %v8781_v28, %v8774_v15  ;;  %v11498_v15 = vpack.c.bf16 %v8804_v9, %v8796_v54  ;;  %v11499_v28 = vpack.c.bf16 %v8824_v26, %v8816_v21  ;;  %v1149_v26 = vpop.f32.mrf.mxu0 }
 0x2d1   : > { %v1252_v10 = vpop.f32.mrf.mxu1  ;;  %v11500_v9 = vpack.c.bf16 %v8840_v27, %v8834_v2  ;;  %v11501_v21 = vpack.c.bf16 %v8856_v22, %v8850_v48  ;;  %v1923_v27 = vadd.f32 %v8724_v32, %v8870_v58  ;;  %v9005_v2 = vld [vmem:[%s11406_s3] sm:$0xff]  ;;  %v9013_v58 = vld [vmem:[%s11406_s3 + $0x10] sm:$0xff] }
 0x2d2   : > { %v1943_v45 = vadd.f32 %v8886_v51, %v1252_v10 }
 0x2d3   : > { %v1256_v47 = vpop.f32.mrf.mxu1 }
 0x2d4   : > { %v8948_v44 = vpack.c.bf16 %v1943_v45, %v1942_v50  ;;  %v1326_v43 = vadd.f32 %v8891_v8, %v1256_v47  ;;  %v1323_v50 = vadd.f32 %v8891_v8, %v1240_v61  ;;  %v1599_v45 = vpack.c.bf16 %v1325_v31, %v1324_v42 }
 0x2d5   : > { %v1258_v39 = vpop.f32.mrf.mxu1  ;;  %6982 = vmatpush3.bf16.xpose.msra.mxu0 %v8748_v62  ;;  %v11496_v62 = vpack.c.bf16 %v8761_v0, %v8754_v6  ;;  %v1320_v61 = vadd.f32 %v8891_v8, %v1226_v57  ;;  %v1319_v6 = vadd.f32 %v8891_v8, %v1220_v35  ;;  %v1317_v57 = vadd.f32 %v8891_v8, %v8918_v52 }
 0x2d6   : > { %11495 = vst [vmem:[#allocation28_spill] sm:$0xff] %v8948_v44  ;;  %v1944_v37 = vadd.f32 %v8886_v51, %v1258_v39  ;;  %v1322_v39 = vadd.f32 %v8891_v8, %v1236_v17  ;;  %v1316_v35 = vadd.f32 %v8891_v8, %v8913_v38  ;;  %v1924_v52 = vadd.f32 %v8724_v32, %v1149_v26  ;;  %v9028_v17 = vld [vmem:[%s11406_s3 + $0x18] sm:$0xff] }
 0x2d7   : > { %v1260_v14 = vpop.f32.mrf.mxu1 }
 0x2d8   : > { %v1327_v20 = vadd.f32 %v8891_v8, %v1260_v14  ;;  %v1598_v42 = vpack.c.bf16 %v1323_v50, %v1322_v39  ;;  %v1595_v54 = vpack.c.bf16 %v1317_v57, %v1316_v35  ;;  %v8998_v22 = vpack.c.bf16 %v1924_v52, %v1923_v27  ;;  %v9066_v39 = vld [vmem:[%s11406_s3 + $0x40] sm:$0xff]  ;;  %v9114_v52 = vld [vmem:[%s11406_s3 + $0x70] sm:$0xff]  ;;  %v9119_v27 = vld [vmem:[%s11406_s3 + $0x68] sm:$0xff] }
 0x2d9   : > { %v1262_v13 = vpop.f32.mrf.mxu1  ;;  %11504 = vst [vmem:[#allocation30_spill] sm:$0xff] %v9114_v52  ;;  %11505 = vst [vmem:[#allocation31_spill] sm:$0xff] %v9119_v27 }
 0x2da   : > { %v1600_v12 = vpack.c.bf16 %v1327_v20, %v1326_v43  ;;  %v1945_v10 = vadd.f32 %v8886_v51, %v1262_v13  ;;  %v1321_v51 = vadd.f32 %v8891_v8, %v1230_v25  ;;  %v9045_v43 = vld [vmem:[%s11406_s3 + $0x30] sm:$0xff]  ;;  %v9050_v13 = vld [vmem:[%s11406_s3 + $0x28] sm:$0xff] }
 0x2dc   : > { %v8958_v44 = vpack.c.bf16 %v1945_v10, %v1944_v37  ;;  %6984 = vmatmul.mubr.bf16.vlgmr.msra.gmra.mxu0 %v11496_v62  ;;  %6999 = vmatprep.subr.bf16.mxu0 %v1600_v12  ;;  %v1597_v0 = vpack.c.bf16 %v1321_v51, %v1320_v61  ;;  %v9033_v37 = vld [vmem:[%s11406_s3 + $0x20] sm:$0xff]  ;;  %v9061_v62 = vld [vmem:[%s11406_s3 + $0x38] sm:$0xff] }
 0x2dd   : > { %6987 = vmatprep.mubr.bf16.mxu0 %v11497_v36  ;;  %7000 = vmatpush3.bf16.msra.mxu0 %v1600_v12  ;;  %v1318_v12 = vadd.f32 %v8891_v8, %v8925_v3  ;;  %v11502_v8 = vpack.c.bf16 %v8875_v29, %v8866_v34 }
 0x2de   : > { %7001 = vmatprep.subr.bf16.mxu0 %v1599_v45  ;;  %7095 = vmatprep.subr.bf16.mxu1 %v8958_v44 }
 0x2df   : > { %v1596_v25 = vpack.c.bf16 %v1319_v6, %v1318_v12  ;;  %v9078_v6 = vld [vmem:[%s11406_s3 + $0x50] sm:$0xff] }
 0x2e1   : > { %7002 = vmatpush3.bf16.msra.mxu0 %v1599_v45 }
 0x2e2   : > { %7003 = vmatprep.subr.bf16.mxu0 %v1598_v42 }
 0x2e4   : > { %6988 = vmatmul.mubr.bf16.gmra.mxu0 %v11498_v15  ;;  %v9083_v15 = vld [vmem:[%s11406_s3 + $0x48] sm:$0xff] }
 0x2e5   : > { %6991 = vmatprep.mubr.bf16.mxu0 %v11499_v28  ;;  %7004 = vmatpush3.bf16.msra.mxu0 %v1598_v42 }
 0x2e6   : > { %7005 = vmatprep.subr.bf16.mxu0 %v1597_v0 }
 0x2e9   : > { %7006 = vmatpush3.bf16.msra.mxu0 %v1597_v0 }
 0x2ea   : > { %7007 = vmatprep.subr.bf16.mxu0 %v1596_v25 }
 0x2ec   : > { %6992 = vmatmul.mubr.bf16.gmra.mxu0 %v11500_v9 }
 0x2ed   : > { %6995 = vmatprep.mubr.bf16.mxu0 %v11501_v21  ;;  %7008 = vmatpush3.bf16.msra.mxu0 %v1596_v25  ;;  %v9096_v25 = vld [vmem:[%s11406_s3 + $0x58] sm:$0xff] }
 0x2ee   : > { %7009 = vmatprep.subr.bf16.mxu0 %v1595_v54 }
 0x2f1   : > { %7010 = vmatpush3.bf16.msra.mxu0 %v1595_v54  ;;  %v9101_v54 = vld [vmem:[%s11406_s3 + $0x60] sm:$0xff] }
 0x2f2   : > { %7011 = vmatprep.subr.bf16.mxu0 %v8910_v5  ;;  %11503 = vst [vmem:[#allocation29_spill] sm:$0xff] %v9101_v54 }
 0x2f4   : > { %6996 = vmatmul.mubr.bf16.gmra.mxu0 %v11502_v8 }
 0x2f5   : > { %7012 = vmatpush3.bf16.msra.mxu0 %v8910_v5 }
 0x2f6   : > { %7013 = vmatprep.subr.bf16.mxu0 %v8898_v49 }
 0x2f9   : > { %7014 = vmatpush3.bf16.msra.mxu0 %v8898_v49  ;;  %v9018_v49 = vld [vmem:[%s11406_s3 + $0x8] sm:$0xff] }
 0x2fa   : > { %7063 = vmatprep.subr.bf16.mxu0 %v8998_v22 }
 0x39c   : > { %v6985_v48 = vpop.f32.mrf.mxu0 }
 0x39d   : > { %v9022_v38 = vadd.f32 %v6985_v48, %v9013_v58 }
 0x39e   : > { %v1378_v34 = vpop.f32.mrf.mxu0 }
 0x39f   : > { %v9008_v29 = vadd.f32 %v1378_v34, %v9005_v2 }
 0x3a0   : > { %v6986_v32 = vpop.f32.mrf.mxu0 }
 0x3a1   : > { %1441 = vmax.xlane.f32.xlu0 %v9008_v29  ;;  %v9037_v14 = vadd.f32 %v6986_v32, %v9028_v17 }
 0x3a2   : > { %v1381_v5 = vpop.f32.mrf.mxu0 }
 0x3a3   : > { %v1382_v3 = vadd.f32 %v1381_v5, %v9018_v49  ;;  %v9132_v5 = vld [vmem:[%s11406_s3 + $0x78] sm:$0xff] }
 0x3a4   : > { %v6989_v1 = vpop.f32.mrf.mxu0  ;;  %11506 = vst [vmem:[#allocation32_spill] sm:$0xff] %v9132_v5 }
 0x3a5   : > { %1443 = vmax.xlane.f32.xlu1 %v1382_v3  ;;  %1445 = vmax.xlane.f32.xlu0 %v9022_v38  ;;  %v9055_v50 = vadd.f32 %v6989_v1, %v9045_v43 }
 0x3a6   : > { %v1394_v47 = vpop.f32.mrf.mxu0 }
 0x3a7   : > { %v9040_v31 = vadd.f32 %v1394_v47, %v9033_v37 }
 0x3a8   : > { %v6990_v20 = vpop.f32.mrf.mxu0 }
 0x3a9   : > { %1447 = vmax.xlane.f32.xlu1 %v9037_v14  ;;  %1449 = vmax.xlane.f32.xlu0 %v9040_v31  ;;  %v9070_v42 = vadd.f32 %v6990_v20, %v9061_v62 }
 0x3aa   : > { %v1397_v10 = vpop.f32.mrf.mxu0 }
 0x3ab   : > { %v1398_v45 = vadd.f32 %v1397_v10, %v9050_v13 }
 0x3ac   : > { %v6993_v36 = vpop.f32.mrf.mxu0 }
 0x3ad   : > { %1451 = vmax.xlane.f32.xlu1 %v1398_v45  ;;  %1453 = vmax.xlane.f32.xlu0 %v9055_v50  ;;  %v9088_v12 = vadd.f32 %v6993_v36, %v9078_v6 }
 0x3ae   : > { %v1410_v51 = vpop.f32.mrf.mxu0 }
 0x3af   : > { %v9073_v61 = vadd.f32 %v1410_v51, %v9066_v39 }
 0x3b0   : > { %v6994_v0 = vpop.f32.mrf.mxu0 }
 0x3b1   : > { %1455 = vmax.xlane.f32.xlu1 %v9070_v42  ;;  %1457 = vmax.xlane.f32.xlu0 %v9073_v61  ;;  %v9106_v21 = vadd.f32 %v6994_v0, %v9096_v25 }
 0x3b2   : > { %v1413_v28 = vpop.f32.mrf.mxu0 }
 0x3b3   : > { %v9091_v57 = vadd.f32 %v1413_v28, %v9083_v15 }
 0x3b4   : > { %v6997_v35 = vpop.f32.mrf.mxu0 }
 0x3b5   : > { %1459 = vmax.xlane.f32.xlu1 %v9091_v57  ;;  %1461 = vmax.xlane.f32.xlu0 %v9088_v12  ;;  %v9124_v34 = vadd.f32 %v6997_v35, %v9114_v52 }
 0x3b6   : > { %v1426_v9 = vpop.f32.mrf.mxu0 }
 0x3b7   : > { %v9109_v26 = vadd.f32 %v1426_v9, %v9101_v54 }
 0x3b8   : > { %v6998_v8 = vpop.f32.mrf.mxu0 }
 0x3b9   : > { %1463 = vmax.xlane.f32.xlu1 %v9106_v21  ;;  %1465 = vmax.xlane.f32.xlu0 %v9109_v26  ;;  %v9137_v1 = vadd.f32 %v6998_v8, %v9132_v5 }
 0x3ba   : > { %v1429_v48 = vpop.f32.mrf.mxu0 }
 0x3bb   : > { %v9127_v32 = vadd.f32 %v1429_v48, %v9119_v27 }
 0x3bd   : > { %1467 = vmax.xlane.f32.xlu1 %v9127_v32  ;;  %1469 = vmax.xlane.f32.xlu0 %v9124_v34 }
 0x3c1   : > { %1471 = vmax.xlane.f32.xlu1 %v9137_v1 }
 0x42a   : > { %v1442_v47 = vpop.xlane.xlu0 %1441 }
 0x42b   : > { %v1473_v20 = vsub.f32 %v9008_v29, %v1442_v47 }
 0x42d   : > { %v1489_v10 = vmul.f32 1.442695, %v1473_v20 }
 0x42e   : > { %v1444_v36 = vpop.xlane.xlu1 %1443  ;;  %v1446_v51 = vpop.xlane.xlu0 %1445 }
 0x42f   : > { %7801 = vpow2.f32 %v1489_v10  ;;  %v1474_v0 = vsub.f32 %v1382_v3, %v1444_v36  ;;  %v1475_v28 = vsub.f32 %v9022_v38, %v1446_v51 }
 0x431   : > { %v1491_v35 = vmul.f32 1.442695, %v1474_v0  ;;  %v1493_v9 = vmul.f32 1.442695, %v1475_v28 }
 0x432   : > { %v1448_v48 = vpop.xlane.xlu1 %1447  ;;  %v1450_v27 = vpop.xlane.xlu0 %1449 }
 0x433   : > { %7803 = vpow2.f32 %v1491_v35  ;;  %v1476_v8 = vsub.f32 %v9037_v14, %v1448_v48  ;;  %v1477_v5 = vsub.f32 %v9040_v31, %v1450_v27 }
 0x434   : > { %7805 = vpow2.f32 %v1493_v9 }
 0x435   : > { %v1495_v52 = vmul.f32 1.442695, %v1476_v8  ;;  %v1497_v54 = vmul.f32 1.442695, %v1477_v5 }
 0x436   : > { %v1452_v29 = vpop.xlane.xlu1 %1451  ;;  %v1454_v47 = vpop.xlane.xlu0 %1453 }
 0x437   : > { %7807 = vpow2.f32 %v1495_v52  ;;  %v1478_v20 = vsub.f32 %v1398_v45, %v1452_v29  ;;  %v1479_v3 = vsub.f32 %v9055_v50, %v1454_v47 }
 0x438   : > { %7809 = vpow2.f32 %v1497_v54 }
 0x439   : > { %v1499_v38 = vmul.f32 1.442695, %v1478_v20  ;;  %v1501_v10 = vmul.f32 1.442695, %v1479_v3 }
 0x43a   : > { %v1456_v36 = vpop.xlane.xlu1 %1455  ;;  %v1458_v51 = vpop.xlane.xlu0 %1457 }
 0x43b   : > { %7811 = vpow2.f32 %v1499_v38  ;;  %v1480_v0 = vsub.f32 %v9070_v42, %v1456_v36  ;;  %v1481_v14 = vsub.f32 %v9073_v61, %v1458_v51 }
 0x43c   : > { %v9147_v31 = vpop.eup %7801  ;;  %7813 = vpow2.f32 %v1501_v10 }
 0x43d   : > { %v1503_v27 = vmul.f32 1.442695, %v1480_v0  ;;  %v1505_v5 = vmul.f32 1.442695, %v1481_v14  ;;  %1521 = vadd.xlane.f32.xlu0 %v9147_v31 }
 0x43e   : > { %v1460_v45 = vpop.xlane.xlu1 %1459  ;;  %v1462_v52 = vpop.xlane.xlu0 %1461 }
 0x43f   : > { %7815 = vpow2.f32 %v1503_v27  ;;  %v1482_v50 = vsub.f32 %v9091_v57, %v1460_v45  ;;  %v1483_v54 = vsub.f32 %v9088_v12, %v1462_v52 }
 0x440   : > { %v9152_v28 = vpop.eup %7803  ;;  %7817 = vpow2.f32 %v1505_v5 }
 0x441   : > { %v9154_v42 = vpop.eup %7805  ;;  %v1507_v61 = vmul.f32 1.442695, %v1482_v50  ;;  %v1509_v35 = vmul.f32 1.442695, %v1483_v54  ;;  %1523 = vadd.xlane.f32.xlu1 %v9152_v28 }
 0x442   : > { %1525 = vadd.xlane.f32.xlu0 %v9154_v42  ;;  %v1464_v9 = vpop.xlane.xlu1 %1463  ;;  %v1466_v48 = vpop.xlane.xlu0 %1465 }
 0x443   : > { %7819 = vpow2.f32 %v1507_v61  ;;  %v1484_v8 = vsub.f32 %v9106_v21, %v1464_v9  ;;  %v1485_v57 = vsub.f32 %v9109_v26, %v1466_v48 }
 0x444   : > { %v9160_v29 = vpop.eup %7807  ;;  %7821 = vpow2.f32 %v1509_v35 }
 0x445   : > { %v9162_v12 = vpop.eup %7809  ;;  %v1511_v47 = vmul.f32 1.442695, %v1484_v8  ;;  %v1513_v20 = vmul.f32 1.442695, %v1485_v57  ;;  %1527 = vadd.xlane.f32.xlu1 %v9160_v29 }
 0x446   : > { %1529 = vadd.xlane.f32.xlu0 %v9162_v12  ;;  %v1468_v3 = vpop.xlane.xlu1 %1467  ;;  %v1470_v38 = vpop.xlane.xlu0 %1469 }
 0x447   : > { %7823 = vpow2.f32 %v1511_v47  ;;  %v1486_v10 = vsub.f32 %v9127_v32, %v1468_v3  ;;  %v1487_v21 = vsub.f32 %v9124_v34, %v1470_v38 }
 0x448   : > { %v9168_v36 = vpop.eup %7811  ;;  %7825 = vpow2.f32 %v1513_v20 }
 0x449   : > { %v9170_v26 = vpop.eup %7813  ;;  %v1515_v51 = vmul.f32 1.442695, %v1486_v10  ;;  %v1517_v0 = vmul.f32 1.442695, %v1487_v21  ;;  %1531 = vadd.xlane.f32.xlu1 %v9168_v36 }
 0x44a   : > { %1533 = vadd.xlane.f32.xlu0 %v9170_v26  ;;  %v1472_v14 = vpop.xlane.xlu1 %1471 }
 0x44b   : > { %7827 = vpow2.f32 %v1515_v51  ;;  %v1488_v27 = vsub.f32 %v9137_v1, %v1472_v14 }
 0x44c   : > { %v9175_v5 = vpop.eup %7815  ;;  %7829 = vpow2.f32 %v1517_v0 }
 0x44d   : > { %v9177_v32 = vpop.eup %7817  ;;  %v1519_v34 = vmul.f32 1.442695, %v1488_v27  ;;  %1535 = vadd.xlane.f32.xlu1 %v9175_v5 }
 0x44e   : > { %1537 = vadd.xlane.f32.xlu0 %v9177_v32 }
 0x44f   : > { %7831 = vpow2.f32 %v1519_v34 }
 0x450   : > { %v9181_v45 = vpop.eup %7819 }
 0x451   : > { %v9183_v52 = vpop.eup %7821  ;;  %1539 = vadd.xlane.f32.xlu1 %v9181_v45 }
 0x452   : > { %1541 = vadd.xlane.f32.xlu0 %v9183_v52 }
 0x454   : > { %v9187_v1 = vpop.eup %7823 }
 0x455   : > { %v9189_v50 = vpop.eup %7825  ;;  %1543 = vadd.xlane.f32.xlu1 %v9187_v1 }
 0x456   : > { %1545 = vadd.xlane.f32.xlu0 %v9189_v50 }
 0x458   : > { %v9193_v54 = vpop.eup %7827 }
 0x459   : > { %v9195_v61 = vpop.eup %7829  ;;  %1547 = vadd.xlane.f32.xlu1 %v9193_v54 }
 0x45a   : > { %1549 = vadd.xlane.f32.xlu0 %v9195_v61 }
 0x45c   : > { %v9199_v35 = vpop.eup %7831 }
 0x45d   : > { %1551 = vadd.xlane.f32.xlu1 %v9199_v35 }
 0x4c6   : > { %v1522_v9 = vpop.xlane.xlu0 %1521 }
 0x4c7   : > { %7833 = vrcp.f32 %v1522_v9 }
 0x4ca   : > { %v1524_v48 = vpop.xlane.xlu1 %1523 }
 0x4cb   : > { %7835 = vrcp.f32 %v1524_v48  ;;  %v1526_v8 = vpop.xlane.xlu0 %1525 }
 0x4cc   : > { %7837 = vrcp.f32 %v1526_v8 }
 0x4ce   : > { %v1528_v57 = vpop.xlane.xlu1 %1527 }
 0x4cf   : > { %7839 = vrcp.f32 %v1528_v57  ;;  %v1530_v47 = vpop.xlane.xlu0 %1529 }
 0x4d0   : > { %7841 = vrcp.f32 %v1530_v47 }
 0x4d2   : > { %v1532_v20 = vpop.xlane.xlu1 %1531 }
 0x4d3   : > { %7843 = vrcp.f32 %v1532_v20  ;;  %v1534_v3 = vpop.xlane.xlu0 %1533 }
 0x4d4   : > { %7845 = vrcp.f32 %v1534_v3  ;;  %v7834_v38 = vpop.eup %7833 }
 0x4d5   : > { %v1569_v0 = vmul.f32 %v7834_v38, %v9147_v31 }
 0x4d6   : > { %v1536_v10 = vpop.xlane.xlu1 %1535 }
 0x4d7   : > { %7847 = vrcp.f32 %v1536_v10  ;;  %v1538_v21 = vpop.xlane.xlu0 %1537 }
 0x4d8   : > { %v7836_v51 = vpop.eup %7835  ;;  %7849 = vrcp.f32 %v1538_v21 }
 0x4d9   : > { %v1570_v14 = vmul.f32 %v7836_v51, %v9152_v28  ;;  %v7838_v27 = vpop.eup %7837 }
 0x4da   : > { %v1540_v34 = vpop.xlane.xlu1 %1539  ;;  %v1571_v57 = vmul.f32 %v7838_v27, %v9154_v42 }
 0x4db   : > { %7851 = vrcp.f32 %v1540_v34  ;;  %v1542_v9 = vpop.xlane.xlu0 %1541  ;;  %v1585_v48 = vpack.c.bf16 %v1570_v14, %v1569_v0 }
 0x4dc   : > { %v7840_v8 = vpop.eup %7839  ;;  %7853 = vrcp.f32 %v1542_v9 }
 0x4dd   : > { %7015 = vmatprep.mubr.bf16.mxu0 %v1585_v48  ;;  %v1572_v47 = vmul.f32 %v7840_v8, %v9160_v29  ;;  %v7842_v20 = vpop.eup %7841 }
 0x4de   : > { %v1544_v3 = vpop.xlane.xlu1 %1543  ;;  %v1573_v28 = vmul.f32 %v7842_v20, %v9162_v12 }
 0x4df   : > { %7855 = vrcp.f32 %v1544_v3  ;;  %v1546_v10 = vpop.xlane.xlu0 %1545  ;;  %v1586_v21 = vpack.c.bf16 %v1572_v47, %v1571_v57 }
 0x4e0   : > { %v7844_v31 = vpop.eup %7843  ;;  %7857 = vrcp.f32 %v1546_v10 }
 0x4e1   : > { %7016 = vmatmul.mubr.bf16.vlgmr.msra.gmra.mxu0 %v1586_v21  ;;  %v1574_v38 = vmul.f32 %v7844_v31, %v9168_v36  ;;  %v7846_v51 = vpop.eup %7845 }
 0x4e2   : > { %7064 = vmatpush3.bf16.xpose.msra.mxu0 %v8998_v22  ;;  %v1548_v0 = vpop.xlane.xlu1 %1547  ;;  %v1575_v27 = vmul.f32 %v7846_v51, %v9170_v26 }
 0x4e3   : > { %7859 = vrcp.f32 %v1548_v0  ;;  %v1550_v42 = vpop.xlane.xlu0 %1549  ;;  %7065 = vmatprep.subr.bf16.mxu0 %v8863_v19  ;;  %v1587_v29 = vpack.c.bf16 %v1574_v38, %v1573_v28 }
 0x4e4   : > { %v7848_v14 = vpop.eup %7847  ;;  %7861 = vrcp.f32 %v1550_v42 }
 0x4e5   : > { %7019 = vmatprep.mubr.bf16.mxu0 %v1587_v29  ;;  %v1576_v34 = vmul.f32 %v7848_v14, %v9175_v5  ;;  %v7850_v9 = vpop.eup %7849  ;;  %v11508_v14 = vld [vmem:[#allocation19_spill] sm:$0xff] }
 0x4e6   : > { %v1552_v12 = vpop.xlane.xlu1 %1551  ;;  %v1577_v22 = vmul.f32 %v7850_v9, %v9177_v32  ;;  %v11510_v9 = vld [vmem:[#allocation20_spill] sm:$0xff] }
 0x4e7   : > { %7863 = vrcp.f32 %v1552_v12  ;;  %v1588_v36 = vpack.c.bf16 %v1576_v34, %v1575_v27 }
 0x4e8   : > { %v7852_v48 = vpop.eup %7851 }
 0x4e9   : > { %7020 = vmatmul.mubr.bf16.gmra.mxu0 %v1588_v36  ;;  %v1578_v8 = vmul.f32 %v7852_v48, %v9181_v45  ;;  %v7854_v57 = vpop.eup %7853 }
 0x4ea   : > { %7066 = vmatpush3.bf16.xpose.msra.mxu0 %v8863_v19  ;;  %v1579_v26 = vmul.f32 %v7854_v57, %v9183_v52  ;;  %v6459_v19 = vld [vmem:[%s11406_s3 + $0x98] ss:$0 sm:$0xff] }
 0x4eb   : > { %7067 = vmatprep.subr.bf16.mxu0 %v8847_v18  ;;  %v1589_v47 = vpack.c.bf16 %v1578_v8, %v1577_v22  ;;  %v1900_v27 = vadd.f32 %v6459_v19, %v11508_v14 }
 0x4ec   : > { %v7856_v20 = vpop.eup %7855 }
 0x4ed   : > { %7023 = vmatprep.mubr.bf16.mxu0 %v1589_v47  ;;  %v1580_v5 = vmul.f32 %v7856_v20, %v9187_v1  ;;  %v7858_v3 = vpop.eup %7857  ;;  %v1889_v1 = vadd.f32 %v6459_v19, %v8746_v55  ;;  %v1893_v55 = vadd.f32 %v6459_v19, %v8784_v23  ;;  %v11507_v23 = vld [vmem:[#allocation18_spill] sm:$0xff]  ;;  %v11511_v20 = vld [vmem:[#allocation28_spill] sm:$0xff] }
 0x4ee   : > { %v1581_v32 = vmul.f32 %v7858_v3, %v9189_v50  ;;  %v1898_v29 = vadd.f32 %v6459_v19, %v11507_v23 }
 0x4ef   : > { %v1590_v10 = vpack.c.bf16 %v1580_v5, %v1579_v26 }
 0x4f0   : > { %v7860_v21 = vpop.eup %7859 }
 0x4f1   : > { %7024 = vmatmul.mubr.bf16.gmra.mxu0 %v1590_v10  ;;  %v1582_v45 = vmul.f32 %v7860_v21, %v9193_v54  ;;  %v7862_v31 = vpop.eup %7861  ;;  %v1888_v54 = vadd.f32 %v6459_v19, %v8739_v40  ;;  %v1891_v40 = vadd.f32 %v6459_v19, %v8764_v16  ;;  %v11512_v21 = vld [vmem:[#allocation27_spill] sm:$0xff] }
 0x4f2   : > { %7068 = vmatpush3.bf16.xpose.msra.mxu0 %v8847_v18  ;;  %v1583_v38 = vmul.f32 %v7862_v31, %v9195_v61  ;;  %v1890_v18 = vadd.f32 %v6459_v19, %v8756_v7  ;;  %v1899_v7 = vadd.f32 %v6459_v19, %v8842_v46  ;;  %v11513_v31 = vld [vmem:[#allocation26_spill] sm:$0xff] }
 0x4f3   : > { %7069 = vmatprep.subr.bf16.mxu0 %v8831_v63  ;;  %v1591_v52 = vpack.c.bf16 %v1582_v45, %v1581_v32  ;;  %v1946_v0 = vpack.c.bf16 %v1889_v1, %v1888_v54  ;;  %v11514_v1 = vld [vmem:[#allocation25_spill] sm:$0xff]  ;;  %v11515_v54 = vld [vmem:[#allocation24_spill] sm:$0xff] }
 0x4f4   : > { %v7864_v28 = vpop.eup %7863  ;;  %v1951_v34 = vpack.c.bf16 %v1899_v7, %v1898_v29 }
 0x4f5   : > { %7027 = vmatprep.mubr.bf16.mxu0 %v1591_v52  ;;  %v1584_v50 = vmul.f32 %v7864_v28, %v9199_v35  ;;  %v1894_v35 = vadd.f32 %v6459_v19, %v8798_v60 }
 0x4f7   : > { %v1592_v51 = vpack.c.bf16 %v1584_v50, %v1583_v38 }
 0x4f9   : > { %7028 = vmatmul.mubr.bf16.gmra.mxu0 %v1592_v51 }
 0x4fa   : > { %7070 = vmatpush3.bf16.xpose.msra.mxu0 %v8831_v63  ;;  %7079 = vmatprep.mubr.bf16.mxu0 %v1946_v0  ;;  %v1947_v63 = vpack.c.bf16 %v1891_v40, %v1890_v18  ;;  %v11516_v18 = vld [vmem:[#allocation23_spill] sm:$0xff] }
 0x4fb   : > { %7071 = vmatprep.subr.bf16.mxu0 %v8813_v41 }
 0x502   : > { %7072 = vmatpush3.bf16.xpose.msra.mxu0 %v8813_v41  ;;  %v1892_v41 = vadd.f32 %v6459_v19, %v8776_v59  ;;  %v1901_v59 = vadd.f32 %v6459_v19, %v8858_v33 }
 0x503   : > { %7073 = vmatprep.subr.bf16.mxu0 %v8793_v53 }
 0x504   : > { %v1948_v61 = vpack.c.bf16 %v1893_v55, %v1892_v41  ;;  %v11517_v41 = vld [vmem:[#allocation22_spill] sm:$0xff] }
 0x50a   : > { %7074 = vmatpush3.bf16.xpose.msra.mxu0 %v8793_v53  ;;  %v1895_v53 = vadd.f32 %v6459_v19, %v8806_v11  ;;  %v1952_v11 = vpack.c.bf16 %v1901_v59, %v1900_v27 }
 0x50b   : > { %7075 = vmatprep.subr.bf16.mxu0 %v8771_v56 }
 0x50c   : > { %v1949_v42 = vpack.c.bf16 %v1895_v53, %v1894_v35 }
 0x512   : > { %7076 = vmatpush3.bf16.xpose.msra.mxu0 %v8771_v56  ;;  %v1897_v56 = vadd.f32 %v6459_v19, %v8826_v30  ;;  %v11509_v30 = vld [vmem:[#allocation21_spill] sm:$0xff] }
 0x513   : > { %7077 = vmatprep.subr.bf16.mxu0 %v8751_v4  ;;  %v1903_v60 = vadd.f32 %v6459_v19, %v11509_v30 }
 0x51a   : > { %7078 = vmatpush3.bf16.xpose.msra.mxu0 %v8751_v4  ;;  %v1896_v4 = vadd.f32 %v6459_v19, %v8818_v24  ;;  %v1902_v24 = vadd.f32 %v6459_v19, %v11510_v9 }
 0x51c   : > { %v1950_v16 = vpack.c.bf16 %v1897_v56, %v1896_v4  ;;  %v1953_v12 = vpack.c.bf16 %v1903_v60, %v1902_v24 }
 0x521   : > { %7080 = vmatmul.mubr.bf16.vlgmr.msra.gmra.mxu0 %v1947_v63 }
 0x522   : > { %7083 = vmatprep.mubr.bf16.mxu0 %v1948_v61 }
 0x529   : > { %7084 = vmatmul.mubr.bf16.gmra.mxu0 %v1949_v42 }
 0x52a   : > { %7087 = vmatprep.mubr.bf16.mxu0 %v1950_v16 }
 0x531   : > { %7088 = vmatmul.mubr.bf16.gmra.mxu0 %v1951_v34 }
 0x532   : > { %7091 = vmatprep.mubr.bf16.mxu0 %v1952_v11 }
 0x539   : > { %7092 = vmatmul.mubr.bf16.gmra.mxu0 %v1953_v12  ;;  %v11519_v12 = vld [vmem:[#allocation30_spill] sm:$0xff] }
 0x5a1   : > { %v7017_v36 = vpop.f32.mrf.mxu0 }
 0x5a3   : > { %v1635_v48 = vpop.f32.mrf.mxu0 }
 0x5a5   : > { %v7018_v22 = vpop.f32.mrf.mxu0 }
 0x5a6   : > { %v1699_v33 = vpack.c.bf16 %v7018_v22, %v7017_v36 }
 0x5a7   : > { %v1638_v46 = vpop.f32.mrf.mxu0 }
 0x5a8   : > { %v1698_v8 = vpack.c.bf16 %v1638_v46, %v1635_v48 }
 0x5a9   : > { %v7021_v57 = vpop.f32.mrf.mxu0 }
 0x5aa   : > { %7047 = vmatprep.mubr.bf16.mxu1 %v1698_v8 }
 0x5ab   : > { %v1651_v47 = vpop.f32.mrf.mxu0  ;;  %7048 = vmatmul.mubr.bf16.vlgmr.msra.gmra.mxu1 %v1699_v33 }
 0x5ac   : > { %7096 = vmatpush3.bf16.msra.mxu1 %v8958_v44 }
 0x5ad   : > { %7097 = vmatprep.subr.bf16.mxu1 %v11511_v20  ;;  %v7022_v26 = vpop.f32.mrf.mxu0 }
 0x5ae   : > { %v1701_v10 = vpack.c.bf16 %v7022_v26, %v7021_v57 }
 0x5af   : > { %v1654_v5 = vpop.f32.mrf.mxu0 }
 0x5b0   : > { %v1700_v3 = vpack.c.bf16 %v1654_v5, %v1651_v47  ;;  %7098 = vmatpush3.bf16.msra.mxu1 %v11511_v20 }
 0x5b1   : > { %7099 = vmatprep.subr.bf16.mxu1 %v11512_v21  ;;  %v7025_v32 = vpop.f32.mrf.mxu0 }
 0x5b2   : > { %7051 = vmatprep.mubr.bf16.mxu1 %v1700_v3 }
 0x5b3   : > { %v1667_v45 = vpop.f32.mrf.mxu0  ;;  %7052 = vmatmul.mubr.bf16.gmra.mxu1 %v1701_v10 }
 0x5b4   : > { %7100 = vmatpush3.bf16.msra.mxu1 %v11512_v21 }
 0x5b5   : > { %7101 = vmatprep.subr.bf16.mxu1 %v11513_v31  ;;  %v7026_v19 = vpop.f32.mrf.mxu0 }
 0x5b6   : > { %v1703_v28 = vpack.c.bf16 %v7026_v19, %v7025_v32 }
 0x5b7   : > { %v1670_v44 = vpop.f32.mrf.mxu0 }
 0x5b8   : > { %v1702_v52 = vpack.c.bf16 %v1670_v44, %v1667_v45  ;;  %7102 = vmatpush3.bf16.msra.mxu1 %v11513_v31 }
 0x5b9   : > { %7103 = vmatprep.subr.bf16.mxu1 %v11514_v1  ;;  %v7029_v38 = vpop.f32.mrf.mxu0 }
 0x5ba   : > { %7055 = vmatprep.mubr.bf16.mxu1 %v1702_v52 }
 0x5bb   : > { %v1683_v50 = vpop.f32.mrf.mxu0  ;;  %7056 = vmatmul.mubr.bf16.gmra.mxu1 %v1703_v28 }
 0x5bc   : > { %7104 = vmatpush3.bf16.msra.mxu1 %v11514_v1 }
 0x5bd   : > { %7105 = vmatprep.subr.bf16.mxu1 %v11515_v54  ;;  %v7030_v51 = vpop.f32.mrf.mxu0 }
 0x5be   : > { %v1705_v55 = vpack.c.bf16 %v7030_v51, %v7029_v38 }
 0x5bf   : > { %v1686_v0 = vpop.f32.mrf.mxu0 }
 0x5c0   : > { %v1704_v40 = vpack.c.bf16 %v1686_v0, %v1683_v50  ;;  %7106 = vmatpush3.bf16.msra.mxu1 %v11515_v54 }
 0x5c1   : > { %7107 = vmatprep.subr.bf16.mxu1 %v11516_v18 }
 0x5c2   : > { %7059 = vmatprep.mubr.bf16.mxu1 %v1704_v40 }
 0x5c3   : > { %7060 = vmatmul.mubr.bf16.gmra.mxu1 %v1705_v55 }
 0x5c4   : > { %7108 = vmatpush3.bf16.msra.mxu1 %v11516_v18 }
 0x5c5   : > { %7109 = vmatprep.subr.bf16.mxu1 %v11517_v41 }
 0x5c8   : > { %7110 = vmatpush3.bf16.msra.mxu1 %v11517_v41 }
 0x5e1   : > { %v7081_v63 = vpop.f32.mrf.mxu0 }
 0x5e2   : > { %v2005_v4 = vadd.f32 %v7081_v63, %v9013_v58 }
 0x5e3   : > { %v1996_v61 = vpop.f32.mrf.mxu0 }
 0x5e4   : > { %v1997_v53 = vadd.f32 %v1996_v61, %v9005_v2 }
 0x5e5   : > { %v7082_v56 = vpop.f32.mrf.mxu0 }
 0x5e6   : > { %2059 = vmax.xlane.f32.xlu0 %v1997_v53  ;;  %v2008_v59 = vadd.f32 %v7082_v56, %v9028_v17 }
 0x5e7   : > { %v1999_v35 = vpop.f32.mrf.mxu0 }
 0x5e8   : > { %v2000_v42 = vadd.f32 %v1999_v35, %v9018_v49 }
 0x5e9   : > { %v7085_v16 = vpop.f32.mrf.mxu0 }
 0x5ea   : > { %2061 = vmax.xlane.f32.xlu1 %v2000_v42  ;;  %2063 = vmax.xlane.f32.xlu0 %v2005_v4  ;;  %v2021_v2 = vadd.f32 %v7085_v16, %v9045_v43 }
 0x5eb   : > { %v2012_v7 = vpop.f32.mrf.mxu0 }
 0x5ec   : > { %v2013_v23 = vadd.f32 %v2012_v7, %v9033_v37 }
 0x5ed   : > { %v7086_v29 = vpop.f32.mrf.mxu0 }
 0x5ee   : > { %2065 = vmax.xlane.f32.xlu1 %v2008_v59  ;;  %2067 = vmax.xlane.f32.xlu0 %v2013_v23  ;;  %v2024_v49 = vadd.f32 %v7086_v29, %v9061_v62  ;;  %v11518_v62 = vld [vmem:[#allocation29_spill] sm:$0xff] }
 0x5ef   : > { %v2015_v14 = vpop.f32.mrf.mxu0 }
 0x5f0   : > { %v2016_v27 = vadd.f32 %v2015_v14, %v9050_v13 }
 0x5f1   : > { %v7089_v34 = vpop.f32.mrf.mxu0 }
 0x5f2   : > { %2069 = vmax.xlane.f32.xlu1 %v2016_v27  ;;  %2071 = vmax.xlane.f32.xlu0 %v2021_v2  ;;  %v9277_v37 = vadd.f32 %v7089_v34, %v9078_v6 }
 0x5f3   : > { %v2028_v58 = vpop.f32.mrf.mxu0 }
 0x5f4   : > { %v2029_v11 = vadd.f32 %v2028_v58, %v9066_v39 }
 0x5f5   : > { %v7090_v30 = vpop.f32.mrf.mxu0 }
 0x5f6   : > { %2073 = vmax.xlane.f32.xlu1 %v2024_v49  ;;  %2075 = vmax.xlane.f32.xlu0 %v2029_v11  ;;  %v9282_v9 = vadd.f32 %v7090_v30, %v9096_v25  ;;  %v11521_v25 = vld [vmem:[#allocation32_spill] sm:$0xff] }
 0x5f7   : > { %v2031_v17 = vpop.f32.mrf.mxu0 }
 0x5f8   : > { %v2032_v60 = vadd.f32 %v2031_v17, %v9083_v15  ;;  %v11520_v15 = vld [vmem:[#allocation31_spill] sm:$0xff] }
 0x5f9   : > { %v7093_v43 = vpop.f32.mrf.mxu0 }
 0x5fa   : > { %2077 = vmax.xlane.f32.xlu1 %v2032_v60  ;;  %2079 = vmax.xlane.f32.xlu0 %v9277_v37  ;;  %v9290_v36 = vadd.f32 %v7093_v43, %v11519_v12 }
 0x5fb   : > { %v2044_v13 = vpop.f32.mrf.mxu0 }
 0x5fc   : > { %v9285_v24 = vadd.f32 %v2044_v13, %v11518_v62 }
 0x5fd   : > { %v7094_v39 = vpop.f32.mrf.mxu0 }
 0x5fe   : > { %2081 = vmax.xlane.f32.xlu1 %v9282_v9  ;;  %2083 = vmax.xlane.f32.xlu0 %v9285_v24  ;;  %v9298_v22 = vadd.f32 %v7094_v39, %v11521_v25 }
 0x5ff   : > { %v2047_v6 = vpop.f32.mrf.mxu0 }
 0x600   : > { %v9293_v48 = vadd.f32 %v2047_v6, %v11520_v15 }
 0x602   : > { %2085 = vmax.xlane.f32.xlu1 %v9293_v48  ;;  %2087 = vmax.xlane.f32.xlu0 %v9290_v36 }
 0x606   : > { %2089 = vmax.xlane.f32.xlu1 %v9298_v22 }
 0x66f   : > { %v2060_v46 = vpop.xlane.xlu0 %2059 }
 0x670   : > { %v2091_v8 = vsub.f32 %v1997_v53, %v2060_v46  ;;  %v7633_v46 = vld [vmem:[%s11404_s1 + $0xb8] sm:$0xff]  }
 0x671   : > { %7127 = vmatprep.subr.bf16.mxu1 %v7633_v46 }
 0x672   : > { %v2107_v33 = vmul.f32 1.442695, %v2091_v8 }
 0x673   : > { %v2062_v57 = vpop.xlane.xlu1 %2061  ;;  %v2064_v47 = vpop.xlane.xlu0 %2063 }
 0x674   : > { %7865 = vpow2.f32 %v2107_v33  ;;  %v2092_v20 = vsub.f32 %v2000_v42, %v2062_v57  ;;  %v2093_v26 = vsub.f32 %v2005_v4, %v2064_v47 }
 0x676   : > { %v2109_v5 = vmul.f32 1.442695, %v2092_v20  ;;  %v2111_v3 = vmul.f32 1.442695, %v2093_v26 }
 0x677   : > { %v2066_v10 = vpop.xlane.xlu1 %2065  ;;  %v2068_v21 = vpop.xlane.xlu0 %2067 }
 0x678   : > { %7867 = vpow2.f32 %v2109_v5  ;;  %v2094_v32 = vsub.f32 %v2008_v59, %v2066_v10  ;;  %v2095_v45 = vsub.f32 %v2013_v23, %v2068_v21 }
 0x679   : > { %7869 = vpow2.f32 %v2111_v3 }
 0x67a   : > { %v2113_v31 = vmul.f32 1.442695, %v2094_v32  ;;  %v2115_v19 = vmul.f32 1.442695, %v2095_v45 }
 0x67b   : > { %v2070_v44 = vpop.xlane.xlu1 %2069  ;;  %v2072_v52 = vpop.xlane.xlu0 %2071 }
 0x67c   : > { %7871 = vpow2.f32 %v2113_v31  ;;  %v2096_v28 = vsub.f32 %v2016_v27, %v2070_v44  ;;  %v2097_v1 = vsub.f32 %v2021_v2, %v2072_v52 }
 0x67d   : > { %7873 = vpow2.f32 %v2115_v19 }
 0x67e   : > { %v2117_v38 = vmul.f32 1.442695, %v2096_v28  ;;  %v2119_v50 = vmul.f32 1.442695, %v2097_v1 }
 0x67f   : > { %v2074_v54 = vpop.xlane.xlu1 %2073  ;;  %v2076_v51 = vpop.xlane.xlu0 %2075 }
 0x680   : > { %7875 = vpow2.f32 %v2117_v38  ;;  %v2098_v0 = vsub.f32 %v2024_v49, %v2074_v54  ;;  %v2099_v40 = vsub.f32 %v2029_v11, %v2076_v51 }
 0x681   : > { %v9301_v55 = vpop.eup %7865  ;;  %7877 = vpow2.f32 %v2119_v50 }
 0x682   : > { %v2121_v18 = vmul.f32 1.442695, %v2098_v0  ;;  %v2123_v41 = vmul.f32 1.442695, %v2099_v40  ;;  %2139 = vadd.xlane.f32.xlu0 %v9301_v55 }
 0x683   : > { %v2078_v63 = vpop.xlane.xlu1 %2077  ;;  %v2080_v61 = vpop.xlane.xlu0 %2079 }
 0x684   : > { %7879 = vpow2.f32 %v2121_v18  ;;  %v2100_v53 = vsub.f32 %v2032_v60, %v2078_v63  ;;  %v2101_v56 = vsub.f32 %v9277_v37, %v2080_v61 }
 0x685   : > { %v9305_v35 = vpop.eup %7867  ;;  %7881 = vpow2.f32 %v2123_v41 }
 0x686   : > { %v9307_v4 = vpop.eup %7869  ;;  %v2125_v42 = vmul.f32 1.442695, %v2100_v53  ;;  %v2127_v16 = vmul.f32 1.442695, %v2101_v56  ;;  %2141 = vadd.xlane.f32.xlu1 %v9305_v35 }
 0x687   : > { %2143 = vadd.xlane.f32.xlu0 %v9307_v4  ;;  %v2082_v7 = vpop.xlane.xlu1 %2081  ;;  %v2084_v59 = vpop.xlane.xlu0 %2083 }
 0x688   : > { %7883 = vpow2.f32 %v2125_v42  ;;  %v2102_v23 = vsub.f32 %v9282_v9, %v2082_v7  ;;  %v2103_v29 = vsub.f32 %v9285_v24, %v2084_v59 }
 0x689   : > { %v9313_v14 = vpop.eup %7871  ;;  %7885 = vpow2.f32 %v2127_v16 }
 0x68a   : > { %v9315_v2 = vpop.eup %7873  ;;  %v2129_v27 = vmul.f32 1.442695, %v2102_v23  ;;  %v2131_v34 = vmul.f32 1.442695, %v2103_v29  ;;  %2145 = vadd.xlane.f32.xlu1 %v9313_v14 }
 0x68b   : > { %2147 = vadd.xlane.f32.xlu0 %v9315_v2  ;;  %v2086_v58 = vpop.xlane.xlu1 %2085  ;;  %v2088_v49 = vpop.xlane.xlu0 %2087 }
 0x68c   : > { %7887 = vpow2.f32 %v2129_v27  ;;  %v2104_v11 = vsub.f32 %v9293_v48, %v2086_v58  ;;  %v2105_v30 = vsub.f32 %v9290_v36, %v2088_v49 }
 0x68d   : > { %v9321_v17 = vpop.eup %7875  ;;  %7889 = vpow2.f32 %v2131_v34 }
 0x68e   : > { %v9323_v37 = vpop.eup %7877  ;;  %v2133_v60 = vmul.f32 1.442695, %v2104_v11  ;;  %v2135_v43 = vmul.f32 1.442695, %v2105_v30  ;;  %2149 = vadd.xlane.f32.xlu1 %v9321_v17  ;;  %v7637_v11 = vld [vmem:[%s11404_s1 + $0x98] sm:$0xff]  }
 0x68f   : > { %2151 = vadd.xlane.f32.xlu0 %v9323_v37  ;;  %v2090_v13 = vpop.xlane.xlu1 %2089 }
 0x690   : > { %7891 = vpow2.f32 %v2133_v60  ;;  %v2106_v9 = vsub.f32 %v9298_v22, %v2090_v13  ;;  %v7638_v13 = vld [vmem:[%s11404_s1 + $0x90] sm:$0xff]  }
 0x691   : > { %v9328_v62 = vpop.eup %7879  ;;  %7893 = vpow2.f32 %v2135_v43 }
 0x692   : > { %v9330_v24 = vpop.eup %7881  ;;  %v2137_v39 = vmul.f32 1.442695, %v2106_v9  ;;  %2153 = vadd.xlane.f32.xlu1 %v9328_v62 }
 0x693   : > { %2155 = vadd.xlane.f32.xlu0 %v9330_v24 }
 0x694   : > { %7895 = vpow2.f32 %v2137_v39 }
 0x695   : > { %v9334_v6 = vpop.eup %7883 }
 0x696   : > { %v9336_v12 = vpop.eup %7885  ;;  %2157 = vadd.xlane.f32.xlu1 %v9334_v6 }
 0x697   : > { %2159 = vadd.xlane.f32.xlu0 %v9336_v12 }
 0x699   : > { %v9340_v36 = vpop.eup %7887 }
 0x69a   : > { %v9342_v15 = vpop.eup %7889  ;;  %2161 = vadd.xlane.f32.xlu1 %v9340_v36 }
 0x69b   : > { %2163 = vadd.xlane.f32.xlu0 %v9342_v15 }
 0x69d   : > { %v9346_v48 = vpop.eup %7891 }
 0x69e   : > { %v9348_v25 = vpop.eup %7893  ;;  %2165 = vadd.xlane.f32.xlu1 %v9346_v48 }
 0x69f   : > { %2167 = vadd.xlane.f32.xlu0 %v9348_v25 }
 0x6a1   : > { %v9352_v22 = vpop.eup %7895 }
 0x6a2   : > { %2169 = vadd.xlane.f32.xlu1 %v9352_v22 }
 0x70b   : > { %v2140_v8 = vpop.xlane.xlu0 %2139 }
 0x70c   : > { %7897 = vrcp.f32 %v2140_v8 }
 0x70f   : > { %v2142_v33 = vpop.xlane.xlu1 %2141 }
 0x710   : > { %7899 = vrcp.f32 %v2142_v33  ;;  %v2144_v57 = vpop.xlane.xlu0 %2143  ;;  %v7639_v33 = vld [vmem:[%s11404_s1 + $0x88] sm:$0xff]  }
 0x711   : > { %7901 = vrcp.f32 %v2144_v57 }
 0x713   : > { %v2146_v47 = vpop.xlane.xlu1 %2145 }
 0x714   : > { %7903 = vrcp.f32 %v2146_v47  ;;  %v2148_v20 = vpop.xlane.xlu0 %2147 }
 0x715   : > { %7905 = vrcp.f32 %v2148_v20 }
 0x717   : > { %v2150_v26 = vpop.xlane.xlu1 %2149 }
 0x718   : > { %7907 = vrcp.f32 %v2150_v26  ;;  %v2152_v5 = vpop.xlane.xlu0 %2151 }
 0x719   : > { %7909 = vrcp.f32 %v2152_v5  ;;  %v7898_v3 = vpop.eup %7897 }
 0x71a   : > { %v2187_v45 = vmul.f32 %v7898_v3, %v9301_v55  ;;  %v7634_v55 = vld [vmem:[%s11404_s1 + $0xb0] sm:$0xff]  }
 0x71b   : > { %v2154_v10 = vpop.xlane.xlu1 %2153 }
 0x71c   : > { %7911 = vrcp.f32 %v2154_v10  ;;  %v2156_v21 = vpop.xlane.xlu0 %2155 }
 0x71d   : > { %v7900_v32 = vpop.eup %7899  ;;  %7913 = vrcp.f32 %v2156_v21 }
 0x71e   : > { %v2188_v31 = vmul.f32 %v7900_v32, %v9305_v35  ;;  %v7902_v19 = vpop.eup %7901 }
 0x71f   : > { %v2158_v44 = vpop.xlane.xlu1 %2157  ;;  %v2189_v38 = vmul.f32 %v7902_v19, %v9307_v4  ;;  %v7635_v4 = vld [vmem:[%s11404_s1 + $0xa8] sm:$0xff]  }
 0x720   : > { %7915 = vrcp.f32 %v2158_v44  ;;  %v2160_v52 = vpop.xlane.xlu0 %2159  ;;  %v2203_v28 = vpack.c.bf16 %v2188_v31, %v2187_v45 }
 0x721   : > { %v7904_v1 = vpop.eup %7903  ;;  %7917 = vrcp.f32 %v2160_v52 }
 0x722   : > { %7111 = vmatprep.mubr.bf16.mxu1 %v2203_v28  ;;  %v2190_v50 = vmul.f32 %v7904_v1, %v9313_v14  ;;  %v7906_v54 = vpop.eup %7905  ;;  %v7636_v14 = vld [vmem:[%s11404_s1 + $0xa0] sm:$0xff]  }
 0x723   : > { %v2162_v51 = vpop.xlane.xlu1 %2161  ;;  %v2191_v41 = vmul.f32 %v7906_v54, %v9315_v2 }
 0x724   : > { %7919 = vrcp.f32 %v2162_v51  ;;  %v2164_v0 = vpop.xlane.xlu0 %2163  ;;  %v2204_v40 = vpack.c.bf16 %v2190_v50, %v2189_v38 }
 0x725   : > { %v7908_v18 = vpop.eup %7907  ;;  %7921 = vrcp.f32 %v2164_v0 }
 0x726   : > { %7112 = vmatmul.mubr.bf16.vlgmr.msra.gmra.mxu1 %v2204_v40  ;;  %v2192_v63 = vmul.f32 %v7908_v18, %v9321_v17  ;;  %v7910_v61 = vpop.eup %7909 }
 0x727   : > { %v2166_v53 = vpop.xlane.xlu1 %2165  ;;  %7128 = vmatpush3.bf16.msra.mxu1 %v7633_v46  ;;  %v2193_v16 = vmul.f32 %v7910_v61, %v9323_v37 }
 0x728   : > { %7923 = vrcp.f32 %v2166_v53  ;;  %v2168_v56 = vpop.xlane.xlu0 %2167  ;;  %v2205_v35 = vpack.c.bf16 %v2192_v63, %v2191_v41  ;;  %7129 = vmatprep.subr.bf16.mxu1 %v7634_v55 }
 0x729   : > { %v7912_v42 = vpop.eup %7911  ;;  %7925 = vrcp.f32 %v2168_v56 }
 0x72a   : > { %7115 = vmatprep.mubr.bf16.mxu1 %v2205_v35  ;;  %v2194_v7 = vmul.f32 %v7912_v42, %v9328_v62  ;;  %v7914_v59 = vpop.eup %7913 }
 0x72b   : > { %v2170_v23 = vpop.xlane.xlu1 %2169  ;;  %7130 = vmatpush3.bf16.msra.mxu1 %v7634_v55  ;;  %v2195_v27 = vmul.f32 %v7914_v59, %v9330_v24 }
 0x72c   : > { %7927 = vrcp.f32 %v2170_v23  ;;  %v2206_v29 = vpack.c.bf16 %v2194_v7, %v2193_v16  ;;  %7131 = vmatprep.subr.bf16.mxu1 %v7635_v4 }
 0x72d   : > { %v7916_v2 = vpop.eup %7915 }
 0x72e   : > { %7116 = vmatmul.mubr.bf16.gmra.mxu1 %v2206_v29  ;;  %v2196_v34 = vmul.f32 %v7916_v2, %v9334_v6  ;;  %v7918_v58 = vpop.eup %7917 }
 0x72f   : > { %7132 = vmatpush3.bf16.msra.mxu1 %v7635_v4  ;;  %v2197_v17 = vmul.f32 %v7918_v58, %v9336_v12  ;;  %v11523_v58 = vld [vmem:[#allocation2_spill] sm:$0xff] }
 0x730   : > { %v2207_v49 = vpack.c.bf16 %v2196_v34, %v2195_v27  ;;  %7133 = vmatprep.subr.bf16.mxu1 %v7636_v14  ;;  %v9423_v34 = vld [vmem:[%s11406_s3 + $0xc0] ss:$0 sm:$0xff] }
 0x731   : > { %v7920_v30 = vpop.eup %7919 }
 0x732   : > { %7119 = vmatprep.mubr.bf16.mxu1 %v2207_v49  ;;  %v2198_v37 = vmul.f32 %v7920_v30, %v9340_v36  ;;  %v7922_v60 = vpop.eup %7921 }
 0x733   : > { %7134 = vmatpush3.bf16.msra.mxu1 %v7636_v14  ;;  %v2199_v62 = vmul.f32 %v7922_v60, %v9342_v15  ;;  %v7640_v15 = vld [vmem:[%s11404_s1 + $0x80] sm:$0xff]   ;;  %v11522_v14 = vld [vmem:[#allocation4_spill] sm:$0xff] }
 0x734   : > { %v2208_v43 = vpack.c.bf16 %v2198_v37, %v2197_v17  ;;  %7135 = vmatprep.subr.bf16.mxu1 %v7637_v11  ;;  %v11524_v17 = vld [vmem:[#allocation5_spill] sm:$0xff] }
 0x735   : > { %v7924_v9 = vpop.eup %7923 }
 0x736   : > { %7120 = vmatmul.mubr.bf16.gmra.mxu1 %v2208_v43  ;;  %v2200_v24 = vmul.f32 %v7924_v9, %v9346_v48  ;;  %v7926_v39 = vpop.eup %7925  ;;  %v7049_v48 = vpop.f32.mrf.mxu1  ;;  %v11525_v9 = vld [vmem:[#allocation3_spill] sm:$0xff] }
 0x737   : > { %7136 = vmatpush3.bf16.msra.mxu1 %v7637_v11  ;;  %v2201_v36 = vmul.f32 %v7926_v39, %v9348_v25  ;;  %v1869_v2 = vadd.f32 %v7049_v48, %v11522_v14  ;;  %v11526_v48 = vld [vmem:[#allocation8_spill] sm:$0xff]  ;;  %v7643_v14 = vld [vmem:[%s11404_s1 + $0xe8] sm:$0xff]  }
 0x738   : > { %v2209_v6 = vpack.c.bf16 %v2200_v24, %v2199_v62  ;;  %7137 = vmatprep.subr.bf16.mxu1 %v7638_v13  ;;  %v1804_v57 = vpop.f32.mrf.mxu1 }
 0x739   : > { %v7928_v12 = vpop.eup %7927  ;;  %v1867_v49 = vadd.f32 %v1804_v57, %v11523_v58 }
 0x73a   : > { %7123 = vmatprep.mubr.bf16.mxu1 %v2209_v6  ;;  %v2202_v46 = vmul.f32 %v7928_v12, %v9352_v22  ;;  %v7050_v25 = vpop.f32.mrf.mxu1 }
 0x73b   : > { %7138 = vmatpush3.bf16.msra.mxu1 %v7638_v13  ;;  %v1870_v37 = vadd.f32 %v7050_v25, %v11524_v17 }
 0x73c   : > { %v2210_v8 = vpack.c.bf16 %v2202_v46, %v2201_v36  ;;  %7139 = vmatprep.subr.bf16.mxu1 %v7639_v33  ;;  %v1807_v47 = vpop.f32.mrf.mxu1 }
 0x73d   : > { %v1868_v62 = vadd.f32 %v1807_v47, %v11525_v9 }
 0x73e   : > { %7124 = vmatmul.mubr.bf16.gmra.mxu1 %v2210_v8  ;;  %v9395_v22 = vpop.f32.mrf.mxu1 }
 0x73f   : > { %7140 = vmatpush3.bf16.msra.mxu1 %v7639_v33  ;;  %v1873_v57 = vadd.f32 %v9395_v22, %v11526_v48 }
 0x740   : > { %7141 = vmatprep.subr.bf16.mxu1 %v7640_v15  ;;  %v9397_v20 = vpop.f32.mrf.mxu1 }
 0x742   : > { %v9399_v26 = vpop.f32.mrf.mxu1 }
 0x743   : > { %7142 = vmatpush3.bf16.msra.mxu1 %v7640_v15 }
 0x744   : > { %v9401_v5 = vpop.f32.mrf.mxu1 }
 0x746   : > { %v9403_v3 = vpop.f32.mrf.mxu1 }
 0x748   : > { %v9405_v10 = vpop.f32.mrf.mxu1 }
 0x74a   : > { %v9407_v21 = vpop.f32.mrf.mxu1 }
 0x74c   : > { %v9409_v32 = vpop.f32.mrf.mxu1 }
 0x74e   : > { %v9411_v45 = vpop.f32.mrf.mxu1 }
 0x750   : > { %v9413_v31 = vpop.f32.mrf.mxu1 }
 0x752   : > { %v9415_v19 = vpop.f32.mrf.mxu1 }
 0x754   : > { %v9417_v44 = vpop.f32.mrf.mxu1 }
 0x7e6   : > { %v7113_v52 = vpop.f32.mrf.mxu1 }
 0x7e8   : > { %v2253_v28 = vpop.f32.mrf.mxu1 }
 0x7ea   : > { %v7114_v1 = vpop.f32.mrf.mxu1 }
 0x7eb   : > { %v2317_v54 = vpack.c.bf16 %v7114_v1, %v7113_v52  ;;  %v11527_v1 = vld [vmem:[#allocation6_spill] sm:$0xff] }
 0x7ec   : > { %v2256_v38 = vpop.f32.mrf.mxu1 }
 0x7ed   : > { %v2316_v50 = vpack.c.bf16 %v2256_v38, %v2253_v28  ;;  %v1871_v38 = vadd.f32 %v9397_v20, %v11527_v1  ;;  %v11535_v1 = vld [vmem:[#allocation14_spill] sm:$0xff] }
 0x7ee   : > { %v7117_v51 = vpop.f32.mrf.mxu1 }
 0x7ef   : > { %7143 = vmatprep.mubr.bf16.mxu1 %v2316_v50  ;;  %v11528_v50 = vld [vmem:[#allocation9_spill] sm:$0xff] }
 0x7f0   : > { %v2269_v0 = vpop.f32.mrf.mxu1  ;;  %7144 = vmatmul.mubr.bf16.vlgmr.msra.gmra.mxu1 %v2317_v54  ;;  %v1874_v54 = vadd.f32 %v9399_v26, %v11528_v50 }
 0x7f2   : > { %v7118_v40 = vpop.f32.mrf.mxu1 }
 0x7f3   : > { %v2319_v41 = vpack.c.bf16 %v7118_v40, %v7117_v51 }
 0x7f4   : > { %v2272_v55 = vpop.f32.mrf.mxu1 }
 0x7f5   : > { %v2318_v18 = vpack.c.bf16 %v2272_v55, %v2269_v0 }
 0x7f6   : > { %v7121_v63 = vpop.f32.mrf.mxu1 }
 0x7f7   : > { %7147 = vmatprep.mubr.bf16.mxu1 %v2318_v18  ;;  %v11529_v18 = vld [vmem:[#allocation7_spill] sm:$0xff] }
 0x7f8   : > { %v2285_v61 = vpop.f32.mrf.mxu1  ;;  %7148 = vmatmul.mubr.bf16.gmra.mxu1 %v2319_v41  ;;  %v1872_v41 = vadd.f32 %v9401_v5, %v11529_v18  ;;  %v11537_v18 = vld [vmem:[#allocation15_spill] sm:$0xff] }
 0x7fa   : > { %v7122_v53 = vpop.f32.mrf.mxu1 }
 0x7fb   : > { %v2321_v4 = vpack.c.bf16 %v7122_v53, %v7121_v63  ;;  %v7641_v53 = vld [vmem:[%s11404_s1 + $0xf8] sm:$0xff]  }
 0x7fc   : > { %v2288_v56 = vpop.f32.mrf.mxu1  ;;  %7159 = vmatprep.subr.bf16.mxu0 %v7641_v53 }
 0x7fd   : > { %v2320_v35 = vpack.c.bf16 %v2288_v56, %v2285_v61  ;;  %7160 = vmatpush3.bf16.msra.mxu0 %v7641_v53 }
 0x7fe   : > { %v7125_v42 = vpop.f32.mrf.mxu1 }
 0x7ff   : > { %7151 = vmatprep.mubr.bf16.mxu1 %v2320_v35 }
 0x800   : > { %v2301_v16 = vpop.f32.mrf.mxu1  ;;  %7152 = vmatmul.mubr.bf16.gmra.mxu1 %v2321_v4  ;;  %v7642_v4 = vld [vmem:[%s11404_s1 + $0xf0] sm:$0xff]  }
 0x801   : > { %7161 = vmatprep.subr.bf16.mxu0 %v7642_v4 }
 0x802   : > { %v7126_v7 = vpop.f32.mrf.mxu1  ;;  %7162 = vmatpush3.bf16.msra.mxu0 %v7642_v4 }
 0x803   : > { %v2323_v29 = vpack.c.bf16 %v7126_v7, %v7125_v42  ;;  %v11530_v42 = vld [vmem:[#allocation12_spill] sm:$0xff]  ;;  %7163 = vmatprep.subr.bf16.mxu0 %v7643_v14 }
 0x804   : > { %v2304_v59 = vpop.f32.mrf.mxu1 }
 0x805   : > { %v2322_v23 = vpack.c.bf16 %v2304_v59, %v2301_v16  ;;  %v1877_v16 = vadd.f32 %v9403_v3, %v11530_v42 }
 0x806   : > { %7164 = vmatpush3.bf16.msra.mxu0 %v7643_v14 }
 0x807   : > { %7155 = vmatprep.mubr.bf16.mxu1 %v2322_v23 }
 0x808   : > { %7156 = vmatmul.mubr.bf16.gmra.mxu1 %v2323_v29 }
 0x8b0   : > { %v7145_v27 = vpop.f32.mrf.mxu1 }
 0x8b1   : > { %v2487_v11 = vadd.f32 %v7145_v27, %v1869_v2  ;;  %v11531_v2 = vld [vmem:[#allocation10_spill] sm:$0xff]  ;;  %v11532_v27 = vld [vmem:[#allocation13_spill] sm:$0xff] }
 0x8b2   : > { %v2422_v30 = vpop.f32.mrf.mxu1  ;;  %v1875_v3 = vadd.f32 %v9405_v10, %v11531_v2  ;;  %v1878_v58 = vadd.f32 %v9407_v21, %v11532_v27  ;;  %v7644_v10 = vld [vmem:[%s11404_s1 + $0xe0] sm:$0xff]  }
 0x8b3   : > { %v9428_v60 = vadd.f32 %v9423_v34, %v2487_v11  ;;  %v2485_v43 = vadd.f32 %v2422_v30, %v1867_v49  ;;  %7165 = vmatprep.subr.bf16.mxu0 %v7644_v10 }
 0x8b4   : > { %v7146_v13 = vpop.f32.mrf.mxu1  ;;  %7166 = vmatpush3.bf16.msra.mxu0 %v7644_v10 }
 0x8b5   : > { %v2488_v24 = vadd.f32 %v7146_v13, %v1870_v37  ;;  %2526 = vadd.xlane.f32.xlu0 %v9428_v60  ;;  %v9433_v6 = vadd.f32 %v9423_v34, %v2485_v43  ;;  %v2572_v47 = vmul.f32 %v9428_v60, %v9428_v60  ;;  %v11533_v43 = vld [vmem:[#allocation11_spill] sm:$0xff] }
 0x8b6   : > { %v2425_v39 = vpop.f32.mrf.mxu1  ;;  %v1876_v21 = vadd.f32 %v9409_v32, %v11533_v43 }
 0x8b7   : > { %v9436_v12 = vadd.f32 %v9423_v34, %v2488_v24  ;;  %v2486_v36 = vadd.f32 %v2425_v39, %v1868_v62  ;;  %v2570_v33 = vmul.f32 %v9433_v6, %v9433_v6  ;;  %v7645_v39 = vld [vmem:[%s11404_s1 + $0xd8] sm:$0xff]  }
 0x8b8   : > { %v7149_v46 = vpop.f32.mrf.mxu1  ;;  %7167 = vmatprep.subr.bf16.mxu0 %v7645_v39 }
 0x8b9   : > { %2522 = vadd.xlane.f32.xlu0 %v9433_v6  ;;  %2528 = vadd.xlane.f32.xlu1 %v9436_v12  ;;  %v9441_v8 = vadd.f32 %v9423_v34, %v2486_v36  ;;  %v2491_v25 = vadd.f32 %v7149_v46, %v1873_v57  ;;  %v2573_v40 = vmul.f32 %v9436_v12, %v9436_v12 }
 0x8ba   : > { %v2438_v15 = vpop.f32.mrf.mxu1  ;;  %7168 = vmatpush3.bf16.msra.mxu0 %v7645_v39 }
 0x8bb   : > { %v2571_v52 = vmul.f32 %v9441_v8, %v9441_v8  ;;  %v9457_v22 = vadd.f32 %v9423_v34, %v2491_v25  ;;  %v2489_v51 = vadd.f32 %v2438_v15, %v1871_v38  ;;  %v11534_v15 = vld [vmem:[#allocation16_spill] sm:$0xff]  ;;  %v11536_v38 = vld [vmem:[#allocation17_spill] sm:$0xff] }
 0x8bc   : > { %v7150_v28 = vpop.f32.mrf.mxu1  ;;  %v1881_v48 = vadd.f32 %v9411_v45, %v11534_v15  ;;  %v1879_v45 = vadd.f32 %v9413_v31, %v11535_v1  ;;  %v1882_v50 = vadd.f32 %v9415_v19, %v11536_v38  ;;  %v7648_v31 = vld [vmem:[%s11404_s1 + $0xc0] sm:$0xff]   ;;  %v1880_v19 = vadd.f32 %v9417_v44, %v11537_v18 }
 0x8bd   : > { %2586 = vadd.xlane.f32.xlu0 %v2570_v33  ;;  %2524 = vadd.xlane.f32.xlu1 %v9441_v8  ;;  %v2492_v0 = vadd.f32 %v7150_v28, %v1874_v54  ;;  %v9465_v20 = vadd.f32 %v9423_v34, %v2489_v51  ;;  %v2576_v59 = vmul.f32 %v9457_v22, %v9457_v22  ;;  %v7646_v33 = vld [vmem:[%s11404_s1 + $0xd0] sm:$0xff]   ;;  %v7647_v28 = vld [vmem:[%s11404_s1 + $0xc8] sm:$0xff]  }
 0x8be   : > { %v2441_v55 = vpop.f32.mrf.mxu1  ;;  %7169 = vmatprep.subr.bf16.mxu0 %v7646_v33 }
 0x8bf   : > { %v9468_v26 = vadd.f32 %v9423_v34, %v2492_v0  ;;  %v2490_v63 = vadd.f32 %v2441_v55, %v1872_v41  ;;  %v2574_v56 = vmul.f32 %v9465_v20, %v9465_v20  ;;  %7170 = vmatpush3.bf16.msra.mxu0 %v7646_v33 }
 0x8c0   : > { %v7153_v61 = vpop.f32.mrf.mxu1  ;;  %7171 = vmatprep.subr.bf16.mxu0 %v7647_v28 }
 0x8c1   : > { %2590 = vadd.xlane.f32.xlu0 %v2572_v47  ;;  %2588 = vadd.xlane.f32.xlu1 %v2571_v52  ;;  %v9476_v5 = vadd.f32 %v9423_v34, %v2490_v63  ;;  %v2495_v7 = vadd.f32 %v7153_v61, %v1877_v16  ;;  %v2577_v17 = vmul.f32 %v9468_v26, %v9468_v26 }
 0x8c2   : > { %v2454_v35 = vpop.f32.mrf.mxu1 }
 0x8c3   : > { %v2575_v23 = vmul.f32 %v9476_v5, %v9476_v5  ;;  %v9498_v49 = vadd.f32 %v9423_v34, %v2495_v7  ;;  %v2493_v11 = vadd.f32 %v2454_v35, %v1875_v3  ;;  %7172 = vmatpush3.bf16.msra.mxu0 %v7647_v28 }
 0x8c4   : > { %v7154_v29 = vpop.f32.mrf.mxu1  ;;  %7173 = vmatprep.subr.bf16.mxu0 %v7648_v31 }
 0x8c5   : > { %2592 = vadd.xlane.f32.xlu1 %v2573_v40  ;;  %2534 = vadd.xlane.f32.xlu0 %v9457_v22  ;;  %v2496_v30 = vadd.f32 %v7154_v29, %v1878_v58  ;;  %v9509_v13 = vadd.f32 %v9423_v34, %v2493_v11  ;;  %v2580_v25 = vmul.f32 %v9498_v49, %v9498_v49 }
 0x8c6   : > { %v2457_v37 = vpop.f32.mrf.mxu1 }
 0x8c7   : > { %v9512_v9 = vadd.f32 %v9423_v34, %v2496_v30  ;;  %v2494_v62 = vadd.f32 %v2457_v37, %v1876_v21  ;;  %v2578_v36 = vmul.f32 %v9509_v13, %v9509_v13  ;;  %7174 = vmatpush3.bf16.msra.mxu0 %v7648_v31 }
 0x8c8   : > { %v7157_v24 = vpop.f32.mrf.mxu1 }
 0x8c9   : > { %2530 = vadd.xlane.f32.xlu0 %v9465_v20  ;;  %2536 = vadd.xlane.f32.xlu1 %v9468_v26  ;;  %v9520_v32 = vadd.f32 %v9423_v34, %v2494_v62  ;;  %v2499_v57 = vadd.f32 %v7157_v24, %v1881_v48  ;;  %v2581_v40 = vmul.f32 %v9512_v9, %v9512_v9 }
 0x8ca   : > { %v2470_v46 = vpop.f32.mrf.mxu1 }
 0x8cb   : > { %v2579_v47 = vmul.f32 %v9520_v32, %v9520_v32  ;;  %v9542_v54 = vadd.f32 %v9423_v34, %v2499_v57  ;;  %v2497_v51 = vadd.f32 %v2470_v46, %v1879_v45 }
 0x8cc   : > { %v7158_v52 = vpop.f32.mrf.mxu1 }
 0x8cd   : > { %2594 = vadd.xlane.f32.xlu0 %v2574_v56  ;;  %2532 = vadd.xlane.f32.xlu1 %v9476_v5  ;;  %v2500_v0 = vadd.f32 %v7158_v52, %v1882_v50  ;;  %v9553_v41 = vadd.f32 %v9423_v34, %v2497_v51  ;;  %v2584_v56 = vmul.f32 %v9542_v54, %v9542_v54 }
 0x8ce   : > { %v2473_v55 = vpop.f32.mrf.mxu1 }
 0x8cf   : > { %v9556_v63 = vadd.f32 %v9423_v34, %v2500_v0  ;;  %v2498_v61 = vadd.f32 %v2473_v55, %v1880_v19  ;;  %v2582_v44 = vmul.f32 %v9553_v41, %v9553_v41 }
 0x8d1   : > { %2598 = vadd.xlane.f32.xlu0 %v2576_v59  ;;  %2596 = vadd.xlane.f32.xlu1 %v2575_v23  ;;  %v9561_v53 = vadd.f32 %v9423_v34, %v2498_v61  ;;  %v2585_v4 = vmul.f32 %v9556_v63, %v9556_v63 }
 0x8d3   : > { %v2583_v35 = vmul.f32 %v9561_v53, %v9561_v53 }
 0x8d5   : > { %2600 = vadd.xlane.f32.xlu1 %v2577_v17  ;;  %2542 = vadd.xlane.f32.xlu0 %v9498_v49 }
 0x8d9   : > { %2538 = vadd.xlane.f32.xlu0 %v9509_v13  ;;  %2544 = vadd.xlane.f32.xlu1 %v9512_v9 }
 0x8dd   : > { %2602 = vadd.xlane.f32.xlu0 %v2578_v36  ;;  %2540 = vadd.xlane.f32.xlu1 %v9520_v32 }
 0x8e1   : > { %2606 = vadd.xlane.f32.xlu0 %v2580_v25  ;;  %2604 = vadd.xlane.f32.xlu1 %v2579_v47 }
 0x8e5   : > { %2608 = vadd.xlane.f32.xlu1 %v2581_v40  ;;  %2550 = vadd.xlane.f32.xlu0 %v9542_v54 }
 0x8e9   : > { %2546 = vadd.xlane.f32.xlu0 %v9553_v41  ;;  %2552 = vadd.xlane.f32.xlu1 %v9556_v63 }
 0x8ed   : > { %2610 = vadd.xlane.f32.xlu0 %v2582_v44  ;;  %2548 = vadd.xlane.f32.xlu1 %v9561_v53 }
 0x8f1   : > { %2614 = vadd.xlane.f32.xlu0 %v2584_v56  ;;  %2612 = vadd.xlane.f32.xlu1 %v2583_v35 }
 0x8f5   : > { %2616 = vadd.xlane.f32.xlu1 %v2585_v4 }
 0x93e   : > { %v2527_v34 = vpop.xlane.xlu0 %2526 }
 0x93f   : > { %v9574_v59 = vmul.f32 0.03125, %v2527_v34 }
 0x941   : > { %v2636_v58 = vmul.f32 %v9574_v59, %v9574_v59 }
 0x942   : > { %v2523_v42 = vpop.xlane.xlu0 %2522  ;;  %v2529_v16 = vpop.xlane.xlu1 %2528 }
 0x943   : > { %v9572_v7 = vmul.f32 0.03125, %v2523_v42  ;;  %v9582_v11 = vmul.f32 0.03125, %v2529_v16 }
 0x945   : > { %v2634_v14 = vmul.f32 %v9572_v7, %v9572_v7  ;;  %v2637_v33 = vmul.f32 %v9582_v11, %v9582_v11 }
 0x946   : > { %v2587_v23 = vpop.xlane.xlu0 %2586  ;;  %v2525_v29 = vpop.xlane.xlu1 %2524 }
 0x947   : > { %v2618_v2 = vmul.f32 0.03125, %v2587_v23  ;;  %v9578_v3 = vmul.f32 0.03125, %v2525_v29 }
 0x949   : > { %v2650_v27 = vsub.f32 %v2618_v2, %v2634_v14  ;;  %v2635_v10 = vmul.f32 %v9578_v3, %v9578_v3 }
 0x94a   : > { %v2591_v30 = vpop.xlane.xlu0 %2590  ;;  %v2589_v17 = vpop.xlane.xlu1 %2588 }
 0x94b   : > { %v2666_v37 = vmax.f32 %v2650_v27, 0.0  ;;  %v2620_v43 = vmul.f32 0.03125, %v2591_v30  ;;  %v2619_v21 = vmul.f32 0.03125, %v2589_v17 }
 0x94d   : > { %v2652_v62 = vsub.f32 %v2620_v43, %v2636_v58  ;;  %v2651_v24 = vsub.f32 %v2619_v21, %v2635_v10  ;;  %v2698_v39 = vadd.f32 1e-12, %v2666_v37  ;;  %v2682_v43 = vsub.f32 %v9433_v6, %v9572_v7 }
 0x94e   : > { %v2593_v36 = vpop.xlane.xlu1 %2592  ;;  %v2535_v46 = vpop.xlane.xlu0 %2534  ;;  %v2683_v21 = vsub.f32 %v9441_v8, %v9578_v3  ;;  %v2684_v7 = vsub.f32 %v9428_v60, %v9574_v59  ;;  %v2685_v3 = vsub.f32 %v9436_v12, %v9582_v11 }
 0x94f   : > { %v2668_v15 = vmax.f32 %v2652_v62, 0.0  ;;  %v2667_v48 = vmax.f32 %v2651_v24, 0.0  ;;  %v2621_v57 = vmul.f32 0.03125, %v2593_v36  ;;  %7929 = vrsqrt.f32 %v2698_v39 }
 0x950   : > { %v9590_v51 = vmul.f32 0.03125, %v2535_v46 }
 0x951   : > { %v2699_v25 = vadd.f32 1e-12, %v2667_v48  ;;  %v2653_v47 = vsub.f32 %v2621_v57, %v2637_v33  ;;  %v2700_v52 = vadd.f32 1e-12, %v2668_v15 }
 0x952   : > { %v2531_v28 = vpop.xlane.xlu0 %2530  ;;  %v2537_v1 = vpop.xlane.xlu1 %2536  ;;  %v2640_v61 = vmul.f32 %v9590_v51, %v9590_v51 }
 0x953   : > { %v2669_v45 = vmax.f32 %v2653_v47, 0.0  ;;  %v9588_v38 = vmul.f32 0.03125, %v2531_v28  ;;  %7931 = vrsqrt.f32 %v2699_v25  ;;  %v9598_v44 = vmul.f32 0.03125, %v2537_v1 }
 0x954   : > { %7933 = vrsqrt.f32 %v2700_v52 }
 0x955   : > { %v2701_v50 = vadd.f32 1e-12, %v2669_v45  ;;  %v2638_v55 = vmul.f32 %v9588_v38, %v9588_v38  ;;  %v2641_v30 = vmul.f32 %v9598_v44, %v9598_v44 }
 0x956   : > { %v2595_v0 = vpop.xlane.xlu0 %2594  ;;  %v2533_v40 = vpop.xlane.xlu1 %2532 }
 0x957   : > { %7935 = vrsqrt.f32 %v2701_v50  ;;  %v2622_v31 = vmul.f32 0.03125, %v2595_v0  ;;  %v9594_v18 = vmul.f32 0.03125, %v2533_v40 }
 0x959   : > { %v2654_v19 = vsub.f32 %v2622_v31, %v2638_v55  ;;  %v2639_v34 = vmul.f32 %v9594_v18, %v9594_v18 }
 0x95a   : > { %v2599_v56 = vpop.xlane.xlu0 %2598  ;;  %v2597_v35 = vpop.xlane.xlu1 %2596 }
 0x95b   : > { %v2670_v4 = vmax.f32 %v2654_v19, 0.0  ;;  %v2624_v42 = vmul.f32 0.03125, %v2599_v56  ;;  %v2623_v16 = vmul.f32 0.03125, %v2597_v35 }
 0x95c   : > { %v7930_v58 = vpop.eup %7929 }
 0x95d   : > { %v2656_v23 = vsub.f32 %v2624_v42, %v2640_v61  ;;  %v2655_v29 = vsub.f32 %v2623_v16, %v2639_v34  ;;  %v2702_v14 = vadd.f32 1e-12, %v2670_v4  ;;  %v2730_v15 = vmul.f32 %v7930_v58, %v2682_v43 }
 0x95e   : > { %v2601_v2 = vpop.xlane.xlu1 %2600  ;;  %v2543_v27 = vpop.xlane.xlu0 %2542 }
 0x95f   : > { %v2672_v17 = vmax.f32 %v2656_v23, 0.0  ;;  %v2671_v37 = vmax.f32 %v2655_v29, 0.0  ;;  %v2625_v10 = vmul.f32 0.03125, %v2601_v2  ;;  %7937 = vrsqrt.f32 %v2702_v14 }
 0x960   : > { %v7932_v62 = vpop.eup %7931  ;;  %v9614_v45 = vmul.f32 0.03125, %v2543_v27 }
 0x961   : > { %v2703_v24 = vadd.f32 1e-12, %v2671_v37  ;;  %v2657_v39 = vsub.f32 %v2625_v10, %v2641_v30  ;;  %v2704_v36 = vadd.f32 1e-12, %v2672_v17  ;;  %v2731_v48 = vmul.f32 %v7932_v62, %v2683_v21  ;;  %v7934_v57 = vpop.eup %7933 }
 0x962   : > { %v2539_v46 = vpop.xlane.xlu0 %2538  ;;  %v2545_v33 = vpop.xlane.xlu1 %2544  ;;  %v2732_v40 = vmul.f32 %v7934_v57, %v2684_v7  ;;  %v2644_v56 = vmul.f32 %v9614_v45, %v9614_v45  ;;  %v2686_v62 = vsub.f32 %v9465_v20, %v9588_v38  ;;  %v2688_v38 = vsub.f32 %v9457_v22, %v9590_v51 }
 0x963   : > { %v2673_v25 = vmax.f32 %v2657_v39, 0.0  ;;  %v9608_v47 = vmul.f32 0.03125, %v2539_v46  ;;  %7939 = vrsqrt.f32 %v2703_v24  ;;  %v2746_v28 = vpack.c.bf16 %v2731_v48, %v2730_v15 }
 0x964   : > { %v7936_v52 = vpop.eup %7935  ;;  %7941 = vrsqrt.f32 %v2704_v36  ;;  %v9622_v35 = vmul.f32 0.03125, %v2545_v33  ;;  %v2687_v24 = vsub.f32 %v9476_v5, %v9594_v18  ;;  %v2689_v18 = vsub.f32 %v9468_v26, %v9598_v44 }
 0x965   : > { %v2705_v1 = vadd.f32 1e-12, %v2673_v25  ;;  %7175 = vmatprep.mubr.bf16.mxu0 %v2746_v28  ;;  %v2733_v55 = vmul.f32 %v7936_v52, %v2685_v3  ;;  %v2642_v31 = vmul.f32 %v9608_v47, %v9608_v47 }
 0x966   : > { %v2603_v50 = vpop.xlane.xlu0 %2602  ;;  %v2541_v0 = vpop.xlane.xlu1 %2540  ;;  %v2645_v37 = vmul.f32 %v9622_v35, %v9622_v35 }
 0x967   : > { %7943 = vrsqrt.f32 %v2705_v1  ;;  %v2626_v19 = vmul.f32 0.03125, %v2603_v50  ;;  %v9618_v59 = vmul.f32 0.03125, %v2541_v0  ;;  %v2747_v61 = vpack.c.bf16 %v2733_v55, %v2732_v40 }
 0x969   : > { %v2658_v11 = vsub.f32 %v2626_v19, %v2642_v31  ;;  %7176 = vmatmul.mubr.bf16.vlgmr.msra.gmra.mxu0 %v2747_v61  ;;  %v2643_v16 = vmul.f32 %v9618_v59, %v9618_v59 }
 0x96a   : > { %v2607_v4 = vpop.xlane.xlu0 %2606  ;;  %v2605_v34 = vpop.xlane.xlu1 %2604 }
 0x96b   : > { %v2674_v42 = vmax.f32 %v2658_v11, 0.0  ;;  %v2628_v23 = vmul.f32 0.03125, %v2607_v4  ;;  %v2627_v29 = vmul.f32 0.03125, %v2605_v34 }
 0x96c   : > { %v7938_v17 = vpop.eup %7937 }
 0x96d   : > { %v2660_v14 = vsub.f32 %v2628_v23, %v2644_v56  ;;  %v2659_v2 = vsub.f32 %v2627_v29, %v2643_v16  ;;  %v2706_v27 = vadd.f32 1e-12, %v2674_v42  ;;  %v2734_v57 = vmul.f32 %v7938_v17, %v2686_v62 }
 0x96e   : > { %v2609_v58 = vpop.xlane.xlu1 %2608  ;;  %v2551_v30 = vpop.xlane.xlu0 %2550 }
 0x96f   : > { %v2676_v10 = vmax.f32 %v2660_v14, 0.0  ;;  %v2675_v43 = vmax.f32 %v2659_v2, 0.0  ;;  %v2629_v21 = vmul.f32 0.03125, %v2609_v58  ;;  %7945 = vrsqrt.f32 %v2706_v27 }
 0x970   : > { %v7940_v39 = vpop.eup %7939  ;;  %v9638_v0 = vmul.f32 0.03125, %v2551_v30 }
 0x971   : > { %v2708_v36 = vadd.f32 1e-12, %v2676_v10  ;;  %v2707_v46 = vadd.f32 1e-12, %v2675_v43  ;;  %v2661_v33 = vsub.f32 %v2629_v21, %v2645_v37  ;;  %v2735_v25 = vmul.f32 %v7940_v39, %v2687_v24  ;;  %v7942_v52 = vpop.eup %7941 }
 0x972   : > { %v2547_v15 = vpop.xlane.xlu0 %2546  ;;  %v2553_v48 = vpop.xlane.xlu1 %2552  ;;  %v2736_v31 = vmul.f32 %v7942_v52, %v2688_v38  ;;  %v2648_v44 = vmul.f32 %v9638_v0, %v9638_v0  ;;  %v2690_v24 = vsub.f32 %v9509_v13, %v9608_v47  ;;  %v2691_v39 = vsub.f32 %v9520_v32, %v9618_v59 }
 0x973   : > { %v2677_v7 = vmax.f32 %v2661_v33, 0.0  ;;  %v9632_v3 = vmul.f32 0.03125, %v2547_v15  ;;  %7947 = vrsqrt.f32 %v2707_v46  ;;  %v2748_v1 = vpack.c.bf16 %v2735_v25, %v2734_v57 }
 0x974   : > { %v7944_v28 = vpop.eup %7943  ;;  %7949 = vrsqrt.f32 %v2708_v36  ;;  %v2569_v34 = vmul.f32 0.03125, %v2553_v48  ;;  %v2692_v52 = vsub.f32 %v9498_v49, %v9614_v45 }
 0x975   : > { %v2709_v50 = vadd.f32 1e-12, %v2677_v7  ;;  %7179 = vmatprep.mubr.bf16.mxu0 %v2748_v1  ;;  %v2737_v19 = vmul.f32 %v7944_v28, %v2689_v18  ;;  %v2646_v61 = vmul.f32 %v9632_v3, %v9632_v3  ;;  %v2693_v7 = vsub.f32 %v9512_v9, %v9622_v35 }
 0x976   : > { %v2611_v40 = vpop.xlane.xlu0 %2610  ;;  %v2549_v55 = vpop.xlane.xlu1 %2548  ;;  %v2649_v10 = vmul.f32 %v2569_v34, %v2569_v34 }
 0x977   : > { %7951 = vrsqrt.f32 %v2709_v50  ;;  %v2630_v11 = vmul.f32 0.03125, %v2611_v40  ;;  %v2567_v51 = vmul.f32 0.03125, %v2549_v55  ;;  %v2749_v56 = vpack.c.bf16 %v2737_v19, %v2736_v31 }
 0x978   : > { %v2694_v55 = vsub.f32 %v9553_v41, %v9632_v3  ;;  %v7649_v3 = vld [vmem:[%s11404_s1 + $0x138] sm:$0xff]  }
 0x979   : > { %v2662_v4 = vsub.f32 %v2630_v11, %v2646_v61  ;;  %7180 = vmatmul.mubr.bf16.gmra.mxu0 %v2749_v56  ;;  %v2647_v29 = vmul.f32 %v2567_v51, %v2567_v51  ;;  %v2695_v45 = vsub.f32 %v9561_v53, %v2567_v51  ;;  %v2696_v11 = vsub.f32 %v9542_v54, %v9638_v0  ;;  %v7650_v0 = vld [vmem:[%s11404_s1 + $0x130] sm:$0xff]   ;;  %v7651_v51 = vld [vmem:[%s11404_s1 + $0x128] sm:$0xff]  }
 0x97a   : > { %v2615_v42 = vpop.xlane.xlu0 %2614  ;;  %v2613_v16 = vpop.xlane.xlu1 %2612  ;;  %v2697_v56 = vsub.f32 %v9556_v63, %v2569_v34  ;;  %7191 = vmatprep.subr.bf16.mxu1 %v7649_v3  ;;  %v7652_v34 = vld [vmem:[%s11404_s1 + $0x120] sm:$0xff]  }
 0x97b   : > { %v2678_v23 = vmax.f32 %v2662_v4, 0.0  ;;  %v2632_v14 = vmul.f32 0.03125, %v2615_v42  ;;  %v2631_v2 = vmul.f32 0.03125, %v2613_v16  ;;  %7192 = vmatpush3.bf16.msra.mxu1 %v7649_v3 }
 0x97c   : > { %v7946_v37 = vpop.eup %7945  ;;  %7193 = vmatprep.subr.bf16.mxu1 %v7650_v0 }
 0x97d   : > { %v2664_v27 = vsub.f32 %v2632_v14, %v2648_v44  ;;  %v2663_v58 = vsub.f32 %v2631_v2, %v2647_v29  ;;  %v2710_v30 = vadd.f32 1e-12, %v2678_v23  ;;  %v2738_v57 = vmul.f32 %v7946_v37, %v2690_v24  ;;  %v7653_v14 = vld [vmem:[%s11404_s1 + $0x118] sm:$0xff]   ;;  %v7654_v2 = vld [vmem:[%s11404_s1 + $0x110] sm:$0xff]  }
 0x97e   : > { %v2617_v17 = vpop.xlane.xlu1 %2616  ;;  %v11538_v29 = vmov 0  }
 0x97f   : > { %v2680_v43 = vmax.f32 %v2664_v27, 0.0  ;;  %v2679_v21 = vmax.f32 %v2663_v58, 0.0  ;;  %v2633_v62 = vmul.f32 0.03125, %v2617_v17  ;;  %7953 = vrsqrt.f32 %v2710_v30  ;;  %7194 = vmatpush3.bf16.msra.mxu1 %v7650_v0  ;;  %v7655_v27 = vld [vmem:[%s11404_s1 + $0x108] sm:$0xff]   ;;  %v7656_v58 = vld [vmem:[%s11404_s1 + $0x100] sm:$0xff]  }
 0x980   : > { %v7948_v36 = vpop.eup %7947  ;;  %7195 = vmatprep.subr.bf16.mxu1 %v7651_v51  ;;  %v9686_v30 = vld [vmem:[%s11406_s3 + $0xc8] ss:$0 sm:$0xff] }
 0x981   : > { %v2712_v46 = vadd.f32 1e-12, %v2680_v43  ;;  %v2711_v33 = vadd.f32 1e-12, %v2679_v21  ;;  %v2665_v15 = vsub.f32 %v2633_v62, %v2649_v10  ;;  %v7950_v48 = vpop.eup %7949  ;;  %v2739_v25 = vmul.f32 %v7948_v36, %v2691_v39 }
 0x982   : > { %v2740_v18 = vmul.f32 %v7950_v48, %v2692_v52 }
 0x983   : > { %v2681_v28 = vmax.f32 %v2665_v15, 0.0  ;;  %7955 = vrsqrt.f32 %v2711_v33  ;;  %v2750_v47 = vpack.c.bf16 %v2739_v25, %v2738_v57  ;;  %7196 = vmatpush3.bf16.msra.mxu1 %v7651_v51 }
 0x984   : > { %v7952_v38 = vpop.eup %7951  ;;  %7957 = vrsqrt.f32 %v2712_v46  ;;  %7197 = vmatprep.subr.bf16.mxu1 %v7652_v34 }
 0x985   : > { %v2713_v59 = vadd.f32 1e-12, %v2681_v28  ;;  %v2741_v1 = vmul.f32 %v7952_v38, %v2693_v7  ;;  %7183 = vmatprep.mubr.bf16.mxu0 %v2750_v47 }
 0x987   : > { %7959 = vrsqrt.f32 %v2713_v59  ;;  %v2751_v50 = vpack.c.bf16 %v2741_v1, %v2740_v18  ;;  %7198 = vmatpush3.bf16.msra.mxu1 %v7652_v34 }
 0x988   : > { %7199 = vmatprep.subr.bf16.mxu1 %v7653_v14 }
 0x989   : > { %7184 = vmatmul.mubr.bf16.gmra.mxu0 %v2751_v50 }
 0x98b   : > { %7200 = vmatpush3.bf16.msra.mxu1 %v7653_v14 }
 0x98c   : > { %v7954_v40 = vpop.eup %7953  ;;  %7201 = vmatprep.subr.bf16.mxu1 %v7654_v2 }
 0x98d   : > { %v2742_v19 = vmul.f32 %v7954_v40, %v2694_v55 }
 0x98f   : > { %7202 = vmatpush3.bf16.msra.mxu1 %v7654_v2 }
 0x990   : > { %v7956_v31 = vpop.eup %7955  ;;  %7203 = vmatprep.subr.bf16.mxu1 %v7655_v27 }
 0x991   : > { %v7958_v35 = vpop.eup %7957  ;;  %v2743_v61 = vmul.f32 %v7956_v31, %v2695_v45 }
 0x992   : > { %v2744_v42 = vmul.f32 %v7958_v35, %v2696_v11 }
 0x993   : > { %v2752_v44 = vpack.c.bf16 %v2743_v61, %v2742_v19  ;;  %7204 = vmatpush3.bf16.msra.mxu1 %v7655_v27 }
 0x994   : > { %v7960_v4 = vpop.eup %7959  ;;  %7205 = vmatprep.subr.bf16.mxu1 %v7656_v58 }
 0x995   : > { %v2745_v16 = vmul.f32 %v7960_v4, %v2697_v56  ;;  %7187 = vmatprep.mubr.bf16.mxu0 %v2752_v44 }
 0x997   : > { %v2753_v23 = vpack.c.bf16 %v2745_v16, %v2744_v42  ;;  %7206 = vmatpush3.bf16.msra.mxu1 %v7656_v58 }
 0x999   : > { %7188 = vmatmul.mubr.bf16.gmra.mxu0 %v2753_v23 }
 0x99a   : > { %3823 = vmatprep.mubr.bf16.mxu0 %v11538_v29 }
 0xa29   : > { %v7177_v17 = vpop.f32.mrf.mxu0 }
 0xa2a   : > { %v9689_v37 = vadd.f32 %v7177_v17, %v9686_v30 }
 0xa2b   : > { %v2857_v10 = vpop.f32.mrf.mxu0 }
 0xa2c   : > { %v2938_v43 = vmul.f32 0.044715, %v9689_v37  ;;  %v9693_v21 = vadd.f32 %v9686_v30, %v2857_v10 }
 0xa2d   : > { %v7178_v62 = vpop.f32.mrf.mxu0 }
 0xa2e   : > { %v2954_v24 = vmul.f32 %v2938_v43, %v9689_v37  ;;  %v2936_v39 = vmul.f32 0.044715, %v9693_v21  ;;  %v2869_v36 = vadd.f32 %v7178_v62, %v9686_v30 }
 0xa2f   : > { %v2860_v46 = vpop.f32.mrf.mxu0 }
 0xa30   : > { %v2970_v33 = vmul.f32 %v2954_v24, %v9689_v37  ;;  %v2952_v15 = vmul.f32 %v2936_v39, %v9693_v21  ;;  %v2939_v48 = vmul.f32 0.044715, %v2869_v36  ;;  %v9701_v57 = vadd.f32 %v9686_v30, %v2860_v46 }
 0xa32   : > { %v2986_v25 = vadd.f32 %v2970_v33, %v9689_v37  ;;  %v2968_v52 = vmul.f32 %v2952_v15, %v9693_v21  ;;  %v2955_v7 = vmul.f32 %v2939_v48, %v2869_v36  ;;  %v2937_v28 = vmul.f32 0.044715, %v9701_v57 }
 0xa34   : > { %v3002_v38 = vmul.f32 0.7978846, %v2986_v25  ;;  %v2971_v47 = vmul.f32 %v2955_v7, %v2869_v36  ;;  %v2984_v59 = vadd.f32 %v2968_v52, %v9693_v21  ;;  %v2953_v18 = vmul.f32 %v2937_v28, %v9701_v57 }
 0xa36   : > { %v2987_v1 = vadd.f32 %v2971_v47, %v2869_v36  ;;  %v3000_v50 = vmul.f32 0.7978846, %v2984_v59  ;;  %v2969_v40 = vmul.f32 %v2953_v18, %v9701_v57  ;;  %7961 = vtanh.f32 %v3002_v38 }
 0xa37   : > { %v2923_v38 = vmul.f32 0.5, %v2869_v36  ;;  %v2922_v36 = vmul.f32 0.5, %v9689_v37 }
 0xa38   : > { %v3003_v55 = vmul.f32 0.7978846, %v2987_v1  ;;  %v2985_v31 = vadd.f32 %v2969_v40, %v9701_v57  ;;  %7963 = vtanh.f32 %v3000_v50 }
 0xa39   : > { %v7181_v45 = vpop.f32.mrf.mxu0 }
 0xa3a   : > { %7965 = vtanh.f32 %v3003_v55  ;;  %v9711_v35 = vadd.f32 %v7181_v45, %v9686_v30  ;;  %v3001_v61 = vmul.f32 0.7978846, %v2985_v31  ;;  %v2921_v31 = vmul.f32 0.5, %v9701_v57 }
 0xa3b   : > { %v2873_v19 = vpop.f32.mrf.mxu0 }
 0xa3c   : > { %v2942_v11 = vmul.f32 0.044715, %v9711_v35  ;;  %v9715_v56 = vadd.f32 %v9686_v30, %v2873_v19  ;;  %7967 = vtanh.f32 %v3001_v61 }
 0xa3d   : > { %v7182_v4 = vpop.f32.mrf.mxu0 }
 0xa3e   : > { %v2958_v44 = vmul.f32 %v2942_v11, %v9711_v35  ;;  %v2940_v42 = vmul.f32 0.044715, %v9715_v56  ;;  %v9720_v16 = vadd.f32 %v7182_v4, %v9686_v30  ;;  %v2920_v4 = vmul.f32 0.5, %v9693_v21 }
 0xa3f   : > { %v2876_v23 = vpop.f32.mrf.mxu0 }
 0xa40   : > { %v2974_v3 = vmul.f32 %v2958_v44, %v9711_v35  ;;  %v2956_v0 = vmul.f32 %v2940_v42, %v9715_v56  ;;  %v2943_v51 = vmul.f32 0.044715, %v9720_v16  ;;  %v9726_v34 = vadd.f32 %v9686_v30, %v2876_v23 }
 0xa42   : > { %v2990_v14 = vadd.f32 %v2974_v3, %v9711_v35  ;;  %v2972_v2 = vmul.f32 %v2956_v0, %v9715_v56  ;;  %v2959_v27 = vmul.f32 %v2943_v51, %v9720_v16  ;;  %v2941_v58 = vmul.f32 0.044715, %v9726_v34 }
 0xa43   : > { %v7962_v62 = vpop.eup %7961 }
 0xa44   : > { %v3006_v17 = vmul.f32 0.7978846, %v2990_v14  ;;  %v2975_v10 = vmul.f32 %v2959_v27, %v9720_v16  ;;  %v2957_v43 = vmul.f32 %v2941_v58, %v9726_v34  ;;  %v2988_v24 = vadd.f32 %v2972_v2, %v9715_v56 }
 0xa45   : > { %v7964_v39 = vpop.eup %7963  ;;  %v3034_v18 = vadd.f32 1.0, %v7962_v62 }
 0xa46   : > { %v2991_v46 = vadd.f32 %v2975_v10, %v9720_v16  ;;  %v2973_v33 = vmul.f32 %v2957_v43, %v9726_v34  ;;  %v3004_v48 = vmul.f32 0.7978846, %v2988_v24  ;;  %7969 = vtanh.f32 %v3006_v17 }
 0xa47   : > { %v7966_v15 = vpop.eup %7965  ;;  %v3032_v50 = vadd.f32 1.0, %v7964_v39  ;;  %v3050_v0 = vmul.f32 %v3034_v18, %v2922_v36  ;;  %v2926_v36 = vmul.f32 0.5, %v9711_v35 }
 0xa48   : > { %v3035_v25 = vadd.f32 1.0, %v7966_v15  ;;  %v3007_v52 = vmul.f32 0.7978846, %v2991_v46  ;;  %v2989_v28 = vadd.f32 %v2973_v33, %v9726_v34  ;;  %7971 = vtanh.f32 %v3004_v48 }
 0xa49   : > { %v7185_v7 = vpop.f32.mrf.mxu0  ;;  %v7968_v59 = vpop.eup %7967  ;;  %v3048_v14 = vmul.f32 %v3032_v50, %v2920_v4  ;;  %v2924_v4 = vmul.f32 0.5, %v9715_v56 }
 0xa4a   : > { %v9739_v47 = vadd.f32 %v7185_v7, %v9686_v30  ;;  %7973 = vtanh.f32 %v3007_v52  ;;  %v3005_v40 = vmul.f32 0.7978846, %v2989_v28  ;;  %v3033_v19 = vadd.f32 1.0, %v7968_v59 }
 0xa4b   : > { %v2889_v1 = vpop.f32.mrf.mxu0  ;;  %v3051_v61 = vmul.f32 %v3035_v25, %v2923_v38  ;;  %v2927_v59 = vmul.f32 0.5, %v9720_v16  ;;  %v2925_v16 = vmul.f32 0.5, %v9726_v34 }
 0xa4c   : > { %v2946_v55 = vmul.f32 0.044715, %v9739_v47  ;;  %v9743_v45 = vadd.f32 %v9686_v30, %v2889_v1  ;;  %7975 = vtanh.f32 %v3005_v40  ;;  %v3049_v3 = vmul.f32 %v3033_v19, %v2921_v31 }
 0xa4d   : > { %v7186_v11 = vpop.f32.mrf.mxu0  ;;  %v3065_v27 = vpack.c.bf16 %v3051_v61, %v3050_v0 }
 0xa4e   : > { %v2962_v44 = vmul.f32 %v2946_v55, %v9739_v47  ;;  %v2944_v42 = vmul.f32 0.044715, %v9743_v45  ;;  %v9751_v23 = vadd.f32 %v7186_v11, %v9686_v30  ;;  %v3064_v58 = vpack.c.bf16 %v3049_v3, %v3048_v14 }
 0xa4f   : > { %v2892_v51 = vpop.f32.mrf.mxu0 }
 0xa50   : > { %v2978_v57 = vmul.f32 %v2962_v44, %v9739_v47  ;;  %v2960_v37 = vmul.f32 %v2944_v42, %v9743_v45  ;;  %v2947_v2 = vmul.f32 0.044715, %v9751_v23  ;;  %v9757_v21 = vadd.f32 %v9686_v30, %v2892_v51  ;;  %7207 = vmatprep.mubr.bf16.mxu1 %v3064_v58 }
 0xa51   : > { %7208 = vmatmul.mubr.bf16.vlgmr.msra.gmra.mxu1 %v3065_v27 }
 0xa52   : > { %v2994_v17 = vadd.f32 %v2978_v57, %v9739_v47  ;;  %v2976_v10 = vmul.f32 %v2960_v37, %v9743_v45  ;;  %v2963_v43 = vmul.f32 %v2947_v2, %v9751_v23  ;;  %v2945_v62 = vmul.f32 0.044715, %v9757_v21 }
 0xa53   : > { %v7970_v15 = vpop.eup %7969 }
 0xa54   : > { %v2979_v24 = vmul.f32 %v2963_v43, %v9751_v23  ;;  %v2961_v39 = vmul.f32 %v2945_v62, %v9757_v21  ;;  %v2992_v46 = vadd.f32 %v2976_v10, %v9743_v45  ;;  %v3010_v33 = vmul.f32 0.7978846, %v2994_v17 }
 0xa55   : > { %v7972_v7 = vpop.eup %7971  ;;  %v3038_v40 = vadd.f32 1.0, %v7970_v15 }
 0xa56   : > { %v2995_v48 = vadd.f32 %v2979_v24, %v9751_v23  ;;  %v2977_v25 = vmul.f32 %v2961_v39, %v9757_v21  ;;  %v3008_v52 = vmul.f32 0.7978846, %v2992_v46  ;;  %v3036_v50 = vadd.f32 1.0, %v7972_v7 }
 0xa57   : > { %v7974_v28 = vpop.eup %7973  ;;  %v3054_v37 = vmul.f32 %v3038_v40, %v2926_v36  ;;  %v2928_v36 = vmul.f32 0.5, %v9743_v45 }
 0xa58   : > { %v3011_v38 = vmul.f32 0.7978846, %v2995_v48  ;;  %v2993_v18 = vadd.f32 %v2977_v25, %v9757_v21  ;;  %7977 = vtanh.f32 %v3008_v52  ;;  %v3039_v55 = vadd.f32 1.0, %v7974_v28 }
 0xa59   : > { %7979 = vtanh.f32 %v3010_v33  ;;  %v7189_v1 = vpop.f32.mrf.mxu0  ;;  %v7976_v31 = vpop.eup %7975  ;;  %v3052_v14 = vmul.f32 %v3036_v50, %v2924_v4  ;;  %v2929_v4 = vmul.f32 0.5, %v9757_v21 }
 0xa5a   : > { %7981 = vtanh.f32 %v3011_v38  ;;  %v9771_v19 = vadd.f32 %v7189_v1, %v9686_v30  ;;  %v3009_v61 = vmul.f32 0.7978846, %v2993_v18  ;;  %v3037_v44 = vadd.f32 1.0, %v7976_v31 }
 0xa5b   : > { %v2905_v11 = vpop.f32.mrf.mxu0  ;;  %v3055_v42 = vmul.f32 %v3039_v55, %v2927_v59 }
 0xa5c   : > { %v2950_v3 = vmul.f32 0.044715, %v9771_v19  ;;  %v9778_v0 = vadd.f32 %v9686_v30, %v2905_v11  ;;  %7983 = vtanh.f32 %v3009_v61  ;;  %v3053_v57 = vmul.f32 %v3037_v44, %v2925_v16 }
 0xa5d   : > { %v7190_v51 = vpop.f32.mrf.mxu0  ;;  %v3067_v58 = vpack.c.bf16 %v3055_v42, %v3054_v37  ;;  %v2931_v61 = vmul.f32 0.5, %v9751_v23  ;;  %v2930_v42 = vmul.f32 0.5, %v9739_v47 }
 0xa5e   : > { %v2966_v35 = vmul.f32 %v2950_v3, %v9771_v19  ;;  %v2948_v2 = vmul.f32 0.044715, %v9778_v0  ;;  %v2917_v56 = vadd.f32 %v7190_v51, %v9686_v30  ;;  %v3066_v34 = vpack.c.bf16 %v3053_v57, %v3052_v14 }
 0xa5f   : > { %v2908_v27 = vpop.f32.mrf.mxu0 }
 0xa60   : > { %v2982_v17 = vmul.f32 %v2966_v35, %v9771_v19  ;;  %v2964_v10 = vmul.f32 %v2948_v2, %v9778_v0  ;;  %v2951_v43 = vmul.f32 0.044715, %v2917_v56  ;;  %v2909_v62 = vadd.f32 %v9686_v30, %v2908_v27  ;;  %7211 = vmatprep.mubr.bf16.mxu1 %v3066_v34 }
 0xa61   : > { %7212 = vmatmul.mubr.bf16.gmra.mxu1 %v3067_v58  ;;  %v2935_v21 = vmul.f32 0.5, %v2917_v56 }
 0xa62   : > { %v2998_v24 = vadd.f32 %v2982_v17, %v9771_v19  ;;  %v2980_v39 = vmul.f32 %v2964_v10, %v9778_v0  ;;  %v2967_v46 = vmul.f32 %v2951_v43, %v2917_v56  ;;  %v2949_v33 = vmul.f32 0.044715, %v2909_v62 }
 0xa63   : > { %v2932_v10 = vmul.f32 0.5, %v9778_v0  ;;  %v2933_v47 = vmul.f32 0.5, %v2909_v62 }
 0xa64   : > { %v3014_v15 = vmul.f32 0.7978846, %v2998_v24  ;;  %v2983_v48 = vmul.f32 %v2967_v46, %v2917_v56  ;;  %v2965_v25 = vmul.f32 %v2949_v33, %v2909_v62  ;;  %v2996_v7 = vadd.f32 %v2980_v39, %v9778_v0  ;;  %v9800_v0 = vld [vmem:[%s11406_s3 + $0xd0] ss:$0 sm:$0xff] }
 0xa65   : > { %v7978_v52 = vpop.eup %7977  ;;  %v2934_v24 = vmul.f32 0.5, %v9771_v19 }
 0xa66   : > { %v7980_v28 = vpop.eup %7979  ;;  %v2999_v38 = vadd.f32 %v2983_v48, %v2917_v56  ;;  %v2981_v59 = vmul.f32 %v2965_v25, %v2909_v62  ;;  %7985 = vtanh.f32 %v3014_v15  ;;  %v3012_v30 = vmul.f32 0.7978846, %v2996_v7 }
 0xa67   : > { %v7982_v18 = vpop.eup %7981  ;;  %v3040_v50 = vadd.f32 1.0, %v7978_v52  ;;  %v3042_v11 = vadd.f32 1.0, %v7980_v28 }
 0xa68   : > { %v3015_v1 = vmul.f32 0.7978846, %v2999_v38  ;;  %v3043_v40 = vadd.f32 1.0, %v7982_v18  ;;  %v2997_v55 = vadd.f32 %v2981_v59, %v2909_v62  ;;  %7987 = vtanh.f32 %v3012_v30 }
 0xa69   : > { %v7984_v31 = vpop.eup %7983  ;;  %v3056_v51 = vmul.f32 %v3040_v50, %v2928_v36  ;;  %v3058_v57 = vmul.f32 %v3042_v11, %v2930_v42  ;;  %v7662_v36 = vld [vmem:[%s11405_s2 + $0x2dc] ss:$24 sps:$4 sm:$0xff]   ;;  %v7657_v11 = vld [vmem:[%s11405_s2 + $0x2d0] ss:$24 sps:$4 sm:$0xff]  }
 0xa6a   : > { %7989 = vtanh.f32 %v3015_v1  ;;  %v3041_v16 = vadd.f32 1.0, %v7984_v31  ;;  %v3013_v44 = vmul.f32 0.7978846, %v2997_v55  ;;  %v3059_v3 = vmul.f32 %v3043_v40, %v2931_v61  ;;  %3904 = vmatprep.subr.bf16.mxu1 %v7662_v36 }
 0xa6c   : > { %v3057_v14 = vmul.f32 %v3041_v16, %v2929_v4  ;;  %7991 = vtanh.f32 %v3013_v44  ;;  %v3069_v35 = vpack.c.bf16 %v3059_v3, %v3058_v57  ;;  %v7665_v3 = vld [vmem:[%s11405_s2 + $0x2a4] ss:$24 sps:$4 sm:$0xff]  }
 0xa6e   : > { %v3068_v37 = vpack.c.bf16 %v3057_v14, %v3056_v51  ;;  %v7668_v51 = vld [vmem:[%s11405_s2 + $0x2ac] ss:$24 sps:$4 sm:$0xff]   ;;  %v7663_v14 = vld [vmem:[%s11405_s2 + $0x2a0] ss:$24 sps:$4 sm:$0xff]  }
 0xa70   : > { %7215 = vmatprep.mubr.bf16.mxu1 %v3068_v37 }
 0xa71   : > { %7216 = vmatmul.mubr.bf16.gmra.mxu1 %v3069_v35 }
 0xa73   : > { %v7986_v45 = vpop.eup %7985 }
 0xa74   : > { %v3046_v17 = vadd.f32 1.0, %v7986_v45  ;;  %v7671_v45 = vld [vmem:[%s11405_s2 + $0x274] ss:$24 sps:$4 sm:$0xff]  }
 0xa75   : > { %v7988_v23 = vpop.eup %7987 }
 0xa76   : > { %v3044_v27 = vadd.f32 1.0, %v7988_v23  ;;  %v3062_v15 = vmul.f32 %v3046_v17, %v2934_v24  ;;  %v7674_v23 = vld [vmem:[%s11405_s2 + $0x27c] ss:$24 sps:$4 sm:$0xff]  }
 0xa77   : > { %v7990_v2 = vpop.eup %7989  ;;  %v7677_v17 = vld [vmem:[%s11405_s2 + $0x244] ss:$24 sps:$4 sm:$0xff]  }
 0xa78   : > { %v3047_v34 = vadd.f32 1.0, %v7990_v2  ;;  %v3060_v46 = vmul.f32 %v3044_v27, %v2932_v10  ;;  %v7669_v2 = vld [vmem:[%s11405_s2 + $0x270] ss:$24 sps:$4 sm:$0xff]   ;;  %v7680_v10 = vld [vmem:[%s11405_s2 + $0x24c] ss:$24 sps:$4 sm:$0xff]  }
 0xa79   : > { %v7992_v58 = vpop.eup %7991 }
 0xa7a   : > { %v3045_v43 = vadd.f32 1.0, %v7992_v58  ;;  %v3063_v39 = vmul.f32 %v3047_v34, %v2935_v21 }
 0xa7c   : > { %v3061_v33 = vmul.f32 %v3045_v43, %v2933_v47  ;;  %v3071_v25 = vpack.c.bf16 %v3063_v39, %v3062_v15  ;;  %v7675_v47 = vld [vmem:[%s11405_s2 + $0x240] ss:$24 sps:$4 sm:$0xff]   ;;  %v7683_v15 = vld [vmem:[%s11405_s2 + $0x214] ss:$24 sps:$4 sm:$0xff]  }
 0xa7e   : > { %v3070_v48 = vpack.c.bf16 %v3061_v33, %v3060_v46 }
 0xa80   : > { %7219 = vmatprep.mubr.bf16.mxu1 %v3070_v48  ;;  %v7686_v48 = vld [vmem:[%s11405_s2 + $0x21c] ss:$24 sps:$4 sm:$0xff]  }
 0xa81   : > { %7220 = vmatmul.mubr.bf16.gmra.mxu1 %v3071_v25  ;;  %v7684_v25 = vld [vmem:[%s11405_s2 + $0x218] ss:$24 sps:$4 sm:$0xff]  }
 0xa82   : > { %3936 = vmatprep.mubr.bf16.mxu1 %v11538_v29 }
 0xb11   : > { %v7209_v52 = vpop.f32.mrf.mxu1 }
 0xb12   : > { %v3235_v59 = vadd.f32 %v7209_v52, %v9428_v60 }
 0xb13   : > { %v3170_v7 = vpop.f32.mrf.mxu1 }
 0xb14   : > { %v3233_v56 = vadd.f32 %v3170_v7, %v9433_v6  ;;  %v9815_v30 = vadd.f32 %v9800_v0, %v3235_v59  ;;  %v7687_v59 = vld [vmem:[%s11405_s2 + $0x1e0] ss:$24 sps:$4 sm:$0xff]  }
 0xb15   : > { %v7210_v19 = vpop.f32.mrf.mxu1 }
 0xb16   : > { %v9803_v62 = vadd.f32 %v9800_v0, %v3233_v56  ;;  %11541 = vst [vmem:[#allocation21_spill] sm:$0xff] %v9815_v30  ;;  %v3236_v1 = vadd.f32 %v7210_v19, %v9436_v12  ;;  %v3320_v31 = vmul.f32 %v9815_v30, %v9815_v30  ;;  %v7659_v12 = vld [vmem:[%s11405_s2 + $0x2d4] ss:$24 sps:$4 sm:$0xff]  }
 0xb17   : > { %v3173_v28 = vpop.f32.mrf.mxu1  ;;  %3791 = vmatprep.subr.bf16.mxu0 %v7659_v12 }
 0xb18   : > { %11539 = vst [vmem:[#allocation18_spill] sm:$0xff] %v9803_v62  ;;  %v3234_v38 = vadd.f32 %v3173_v28, %v9441_v8  ;;  %3270 = vadd.xlane.f32.xlu0 %v9803_v62  ;;  %v3318_v6 = vmul.f32 %v9803_v62, %v9803_v62  ;;  %v9822_v40 = vadd.f32 %v9800_v0, %v3236_v1  ;;  %v7689_v28 = vld [vmem:[%s11405_s2 + $0x1e4] ss:$24 sps:$4 sm:$0xff]  }
 0xb19   : > { %3792 = vmatpush1.bf16.msra.mxu0 %v7657_v11  ;;  %v7701_v11 = vld [vmem:[%s11405_s2 + $0x184] ss:$24 sps:$4 sm:$0xff]  }
 0xb1a   : > { %v9809_v18 = vadd.f32 %v9800_v0, %v3234_v38  ;;  %11542 = vst [vmem:[#allocation20_spill] sm:$0xff] %v9822_v40  ;;  %v3321_v42 = vmul.f32 %v9822_v40, %v9822_v40  ;;  %3793 = vmatprep.subr.bf16.mxu0 %v7665_v3  ;;  %v7692_v38 = vld [vmem:[%s11405_s2 + $0x1ec] ss:$24 sps:$4 sm:$0xff]  }
 0xb1c   : > { %11540 = vst [vmem:[#allocation19_spill] sm:$0xff] %v9809_v18  ;;  %3334 = vadd.xlane.f32.xlu0 %v3318_v6  ;;  %3272 = vadd.xlane.f32.xlu1 %v9809_v18  ;;  %v3319_v8 = vmul.f32 %v9809_v18, %v9809_v18 }
 0xb1d   : > { %3794 = vmatpush1.bf16.msra.mxu0 %v7663_v14 }
 0xb1e   : > { %3795 = vmatprep.subr.bf16.mxu0 %v7671_v45 }
 0xb20   : > { %3274 = vadd.xlane.f32.xlu0 %v9815_v30  ;;  %3336 = vadd.xlane.f32.xlu1 %v3319_v8 }
 0xb21   : > { %v7213_v50 = vpop.f32.mrf.mxu1  ;;  %3796 = vmatpush1.bf16.msra.mxu0 %v7669_v2 }
 0xb22   : > { %v3239_v37 = vadd.f32 %v7213_v50, %v9457_v22  ;;  %v7672_v22 = vld [vmem:[%s11405_s2 + $0x278] ss:$24 sps:$4 sm:$0xff]   ;;  %3797 = vmatprep.subr.bf16.mxu0 %v7677_v17  ;;  %v7695_v50 = vld [vmem:[%s11405_s2 + $0x1b4] ss:$24 sps:$4 sm:$0xff]  }
 0xb23   : > { %v3186_v60 = vpop.f32.mrf.mxu1 }
 0xb24   : > { %v3237_v55 = vadd.f32 %v3186_v60, %v9465_v20  ;;  %v7660_v20 = vld [vmem:[%s11405_s2 + $0x2d8] ss:$24 sps:$4 sm:$0xff]   ;;  %3338 = vadd.xlane.f32.xlu0 %v3320_v31  ;;  %3276 = vadd.xlane.f32.xlu1 %v9822_v40  ;;  %v9879_v27 = vadd.f32 %v9800_v0, %v3239_v37  ;;  %v7698_v60 = vld [vmem:[%s11405_s2 + $0x1bc] ss:$24 sps:$4 sm:$0xff]  }
 0xb25   : > { %v7214_v61 = vpop.f32.mrf.mxu1  ;;  %3905 = vmatpush1.bf16.msra.mxu1 %v7660_v20  ;;  %3798 = vmatpush1.bf16.msra.mxu0 %v7675_v47  ;;  %v7704_v20 = vld [vmem:[%s11405_s2 + $0x18c] ss:$24 sps:$4 sm:$0xff]  }
 0xb26   : > { %v9840_v4 = vadd.f32 %v9800_v0, %v3237_v55  ;;  %3906 = vmatprep.subr.bf16.mxu1 %v7668_v51  ;;  %11545 = vst [vmem:[#allocation26_spill] sm:$0xff] %v9879_v27  ;;  %v3240_v34 = vadd.f32 %v7214_v61, %v9468_v26  ;;  %v7678_v26 = vld [vmem:[%s11405_s2 + $0x248] ss:$24 sps:$4 sm:$0xff]   ;;  %v3324_v46 = vmul.f32 %v9879_v27, %v9879_v27 }
 0xb27   : > { %v3189_v16 = vpop.f32.mrf.mxu1  ;;  %3799 = vmatprep.subr.bf16.mxu0 %v7683_v15  ;;  %v7693_v55 = vld [vmem:[%s11405_s2 + $0x1b0] ss:$24 sps:$4 sm:$0xff]  }
 0xb28   : > { %11543 = vst [vmem:[#allocation28_spill] sm:$0xff] %v9840_v4  ;;  %v3238_v44 = vadd.f32 %v3189_v16, %v9476_v5  ;;  %v7666_v5 = vld [vmem:[%s11405_s2 + $0x2a8] ss:$24 sps:$4 sm:$0xff]   ;;  %3278 = vadd.xlane.f32.xlu0 %v9840_v4  ;;  %3340 = vadd.xlane.f32.xlu1 %v3321_v42  ;;  %v3322_v35 = vmul.f32 %v9840_v4, %v9840_v4 }
 0xb29   : > { %3907 = vmatpush1.bf16.msra.mxu1 %v7666_v5  ;;  %v9899_v39 = vadd.f32 %v9800_v0, %v3240_v34  ;;  %v7699_v16 = vld [vmem:[%s11405_s2 + $0x180] ss:$24 sps:$4 sm:$0xff]  }
 0xb2a   : > { %v9859_v57 = vadd.f32 %v9800_v0, %v3238_v44  ;;  %3908 = vmatprep.subr.bf16.mxu1 %v7674_v23 }
 0xb2b   : > { %11546 = vst [vmem:[#allocation25_spill] sm:$0xff] %v9899_v39  ;;  %v3325_v19 = vmul.f32 %v9899_v39, %v9899_v39 }
 0xb2c   : > { %11544 = vst [vmem:[#allocation27_spill] sm:$0xff] %v9859_v57  ;;  %3342 = vadd.xlane.f32.xlu0 %v3322_v35  ;;  %3280 = vadd.xlane.f32.xlu1 %v9859_v57  ;;  %v3323_v58 = vmul.f32 %v9859_v57, %v9859_v57 }
 0xb2d   : > { %3909 = vmatpush1.bf16.msra.mxu1 %v7672_v22 }
 0xb2e   : > { %3910 = vmatprep.subr.bf16.mxu1 %v7680_v10 }
 0xb30   : > { %3282 = vadd.xlane.f32.xlu0 %v9879_v27  ;;  %3344 = vadd.xlane.f32.xlu1 %v3323_v58 }
 0xb31   : > { %v7217_v21 = vpop.f32.mrf.mxu1  ;;  %3911 = vmatpush1.bf16.msra.mxu1 %v7678_v26 }
 0xb32   : > { %3912 = vmatprep.subr.bf16.mxu1 %v7686_v48  ;;  %v3243_v1 = vadd.f32 %v7217_v21, %v9498_v49  ;;  %v7696_v49 = vld [vmem:[%s11405_s2 + $0x1b8] ss:$24 sps:$4 sm:$0xff]  }
 0xb33   : > { %v3202_v43 = vpop.f32.mrf.mxu1 }
 0xb34   : > { %v3241_v24 = vadd.f32 %v3202_v43, %v9509_v13  ;;  %v7681_v13 = vld [vmem:[%s11405_s2 + $0x210] ss:$24 sps:$4 sm:$0xff]   ;;  %3346 = vadd.xlane.f32.xlu0 %v3324_v46  ;;  %3284 = vadd.xlane.f32.xlu1 %v9899_v39  ;;  %v9955_v31 = vadd.f32 %v9800_v0, %v3243_v1 }
 0xb35   : > { %v7218_v33 = vpop.f32.mrf.mxu1  ;;  %3800 = vmatpush1.bf16.msra.mxu0 %v7681_v13  ;;  %3913 = vmatpush1.bf16.msra.mxu1 %v7684_v25 }
 0xb36   : > { %v9916_v52 = vadd.f32 %v9800_v0, %v3241_v24  ;;  %3801 = vmatprep.subr.bf16.mxu0 %v7689_v28  ;;  %3914 = vmatprep.subr.bf16.mxu1 %v7692_v38  ;;  %11549 = vst [vmem:[#allocation22_spill] sm:$0xff] %v9955_v31  ;;  %v3244_v12 = vadd.f32 %v7218_v33, %v9512_v9  ;;  %v7702_v9 = vld [vmem:[%s11405_s2 + $0x188] ss:$24 sps:$4 sm:$0xff]  }
 0xb37   : > { %v3205_v7 = vpop.f32.mrf.mxu1  ;;  %v3328_v51 = vmul.f32 %v9955_v31, %v9955_v31 }
 0xb38   : > { %11547 = vst [vmem:[#allocation24_spill] sm:$0xff] %v9916_v52  ;;  %v3242_v56 = vadd.f32 %v3205_v7, %v9520_v32  ;;  %v7690_v32 = vld [vmem:[%s11405_s2 + $0x1e8] ss:$24 sps:$4 sm:$0xff]   ;;  %3286 = vadd.xlane.f32.xlu0 %v9916_v52  ;;  %3348 = vadd.xlane.f32.xlu1 %v3325_v19  ;;  %v3326_v8 = vmul.f32 %v9916_v52, %v9916_v52 }
 0xb39   : > { %3802 = vmatpush1.bf16.msra.mxu0 %v7687_v59  ;;  %3915 = vmatpush1.bf16.msra.mxu1 %v7690_v32  ;;  %v9975_v3 = vadd.f32 %v9800_v0, %v3244_v12 }
 0xb3a   : > { %v9935_v6 = vadd.f32 %v9800_v0, %v3242_v56  ;;  %3803 = vmatprep.subr.bf16.mxu0 %v7695_v50  ;;  %3916 = vmatprep.subr.bf16.mxu1 %v7698_v60 }
 0xb3b   : > { %11550 = vst [vmem:[#allocation29_spill] sm:$0xff] %v9975_v3  ;;  %v3329_v35 = vmul.f32 %v9975_v3, %v9975_v3 }
 0xb3c   : > { %11548 = vst [vmem:[#allocation23_spill] sm:$0xff] %v9935_v6  ;;  %3350 = vadd.xlane.f32.xlu0 %v3326_v8  ;;  %3288 = vadd.xlane.f32.xlu1 %v9935_v6  ;;  %v3327_v36 = vmul.f32 %v9935_v6, %v9935_v6 }
 0xb3d   : > { %3804 = vmatpush1.bf16.msra.mxu0 %v7693_v55  ;;  %3917 = vmatpush1.bf16.msra.mxu1 %v7696_v49 }
 0xb3e   : > { %3805 = vmatprep.subr.bf16.mxu0 %v7701_v11  ;;  %3918 = vmatprep.subr.bf16.mxu1 %v7704_v20 }
 0xb40   : > { %3290 = vadd.xlane.f32.xlu0 %v9955_v31  ;;  %3352 = vadd.xlane.f32.xlu1 %v3327_v36 }
 0xb41   : > { %v7221_v61 = vpop.f32.mrf.mxu1  ;;  %3806 = vmatpush1.bf16.msra.mxu0 %v7699_v16  ;;  %3919 = vmatpush1.bf16.msra.mxu1 %v7702_v9 }
 0xb42   : > { %v3247_v23 = vadd.f32 %v7221_v61, %v9542_v54 }
 0xb43   : > { %v3218_v44 = vpop.f32.mrf.mxu1 }
 0xb44   : > { %v3245_v42 = vadd.f32 %v3218_v44, %v9553_v41  ;;  %3354 = vadd.xlane.f32.xlu0 %v3328_v51  ;;  %3292 = vadd.xlane.f32.xlu1 %v9975_v3  ;;  %v9995_v22 = vadd.f32 %v9800_v0, %v3247_v23 }
 0xb45   : > { %v7222_v14 = vpop.f32.mrf.mxu1 }
 0xb46   : > { %v9980_v5 = vadd.f32 %v9800_v0, %v3245_v42  ;;  %11553 = vst [vmem:[#allocation32_spill] sm:$0xff] %v9995_v22  ;;  %v3332_v54 = vmul.f32 %v9995_v22, %v9995_v22 }
 0xb47   : > { %v3221_v37 = vpop.f32.mrf.mxu1 }
 0xb48   : > { %11551 = vst [vmem:[#allocation30_spill] sm:$0xff] %v9980_v5  ;;  %v3246_v41 = vadd.f32 %v3221_v37, %v9561_v53  ;;  %3356 = vadd.xlane.f32.xlu1 %v3329_v35  ;;  %3294 = vadd.xlane.f32.xlu0 %v9980_v5  ;;  %v3330_v2 = vmul.f32 %v9980_v5, %v9980_v5 }
 0xb49   : > { %v3248_v53 = vadd.f32 %v7222_v14, %v9556_v63  ;;  %v7707_v63 = vld [vmem:[%s11405_s2 + $0x2e4] ss:$24 sps:$4 sm:$0xff]  }
 0xb4a   : > { %v9987_v45 = vadd.f32 %v9800_v0, %v3246_v41  ;;  %4017 = vmatprep.subr.bf16.mxu0 %v7707_v63 }
 0xb4b   : > { %v10002_v58 = vadd.f32 %v9800_v0, %v3248_v53 }
 0xb4c   : > { %11552 = vst [vmem:[#allocation31_spill] sm:$0xff] %v9987_v45  ;;  %3358 = vadd.xlane.f32.xlu0 %v3330_v2  ;;  %3296 = vadd.xlane.f32.xlu1 %v9987_v45  ;;  %v3331_v34 = vmul.f32 %v9987_v45, %v9987_v45 }
 0xb4d   : > { %11554 = vst [vmem:[#allocation4_spill] sm:$0xff] %v10002_v58  ;;  %v3333_v21 = vmul.f32 %v10002_v58, %v10002_v58 }
 0xb50   : > { %3298 = vadd.xlane.f32.xlu0 %v9995_v22  ;;  %3360 = vadd.xlane.f32.xlu1 %v3331_v34 }
 0xb54   : > { %3362 = vadd.xlane.f32.xlu0 %v3332_v54  ;;  %3300 = vadd.xlane.f32.xlu1 %v10002_v58 }
 0xb58   : > { %3364 = vadd.xlane.f32.xlu1 %v3333_v21 }
 0xba1   : > { %v3271_v17 = vpop.xlane.xlu0 %3270 }
 0xba2   : > { %v10012_v10 = vmul.f32 0.03125, %v3271_v17 }
 0xba4   : > { %v3382_v26 = vmul.f32 %v10012_v10, %v10012_v10 }
 0xba5   : > { %v3335_v0 = vpop.xlane.xlu0 %3334  ;;  %v3273_v47 = vpop.xlane.xlu1 %3272 }
 0xba6   : > { %v3366_v43 = vmul.f32 0.03125, %v3335_v0  ;;  %v10016_v24 = vmul.f32 0.03125, %v3273_v47 }
 0xba8   : > { %v3398_v46 = vsub.f32 %v3366_v43, %v3382_v26  ;;  %v3383_v13 = vmul.f32 %v10016_v24, %v10016_v24 }
 0xba9   : > { %v3275_v33 = vpop.xlane.xlu0 %3274  ;;  %v3337_v15 = vpop.xlane.xlu1 %3336 }
 0xbaa   : > { %v3414_v48 = vmax.f32 %v3398_v46, 0.0  ;;  %v10020_v25 = vmul.f32 0.03125, %v3275_v33  ;;  %v3367_v7 = vmul.f32 0.03125, %v3337_v15 }
 0xbac   : > { %v3399_v56 = vsub.f32 %v3367_v7, %v3383_v13  ;;  %v3446_v19 = vadd.f32 1e-12, %v3414_v48  ;;  %v3384_v59 = vmul.f32 %v10020_v25, %v10020_v25  ;;  %v3430_v13 = vsub.f32 %v9803_v62, %v10012_v10  ;;  %v7705_v10 = vld [vmem:[%s11405_s2 + $0x2e0] ss:$24 sps:$4 sm:$0xff]  }
 0xbad   : > { %v3339_v28 = vpop.xlane.xlu0 %3338  ;;  %v3277_v38 = vpop.xlane.xlu1 %3276  ;;  %v3431_v7 = vsub.f32 %v9809_v18, %v10016_v24 }
 0xbae   : > { %v3415_v32 = vmax.f32 %v3399_v56, 0.0  ;;  %v3368_v1 = vmul.f32 0.03125, %v3339_v28  ;;  %v10024_v8 = vmul.f32 0.03125, %v3277_v38  ;;  %7993 = vrsqrt.f32 %v3446_v19 }
 0xbb0   : > { %v3447_v50 = vadd.f32 1e-12, %v3415_v32  ;;  %v3400_v60 = vsub.f32 %v3368_v1, %v3384_v59  ;;  %v3385_v55 = vmul.f32 %v10024_v8, %v10024_v8 }
 0xbb1   : > { %v3279_v49 = vpop.xlane.xlu0 %3278  ;;  %v3341_v12 = vpop.xlane.xlu1 %3340 }
 0xbb2   : > { %7995 = vrsqrt.f32 %v3447_v50  ;;  %v3416_v36 = vmax.f32 %v3400_v60, 0.0  ;;  %v10028_v61 = vmul.f32 0.03125, %v3279_v49  ;;  %v3369_v11 = vmul.f32 0.03125, %v3341_v12  ;;  %v7710_v12 = vld [vmem:[%s11405_s2 + $0x2b4] ss:$24 sps:$4 sm:$0xff]  }
 0xbb4   : > { %v3401_v20 = vsub.f32 %v3369_v11, %v3385_v55  ;;  %v3448_v16 = vadd.f32 1e-12, %v3416_v36  ;;  %v3386_v42 = vmul.f32 %v10028_v61, %v10028_v61 }
 0xbb5   : > { %v3343_v9 = vpop.xlane.xlu0 %3342  ;;  %v3281_v44 = vpop.xlane.xlu1 %3280 }
 0xbb6   : > { %v3417_v51 = vmax.f32 %v3401_v20, 0.0  ;;  %v3370_v14 = vmul.f32 0.03125, %v3343_v9  ;;  %v10032_v37 = vmul.f32 0.03125, %v3281_v44  ;;  %7997 = vrsqrt.f32 %v3448_v16 }
 0xbb8   : > { %v3449_v41 = vadd.f32 1e-12, %v3417_v51  ;;  %v3402_v35 = vsub.f32 %v3370_v14, %v3386_v42  ;;  %v3387_v23 = vmul.f32 %v10032_v37, %v10032_v37 }
 0xbb9   : > { %v3283_v2 = vpop.xlane.xlu0 %3282  ;;  %v3345_v53 = vpop.xlane.xlu1 %3344 }
 0xbba   : > { %7999 = vrsqrt.f32 %v3449_v41  ;;  %v3418_v34 = vmax.f32 %v3402_v35, 0.0  ;;  %v10036_v54 = vmul.f32 0.03125, %v3283_v2  ;;  %v3371_v21 = vmul.f32 0.03125, %v3345_v53 }
 0xbbb   : > { %v7994_v26 = vpop.eup %7993  ;;  %v3432_v41 = vsub.f32 %v9815_v30, %v10020_v25  ;;  %v3433_v35 = vsub.f32 %v9822_v40, %v10024_v8 }
 0xbbc   : > { %v3403_v63 = vsub.f32 %v3371_v21, %v3387_v23  ;;  %v3450_v17 = vadd.f32 1e-12, %v3418_v34  ;;  %v3388_v43 = vmul.f32 %v10036_v54, %v10036_v54  ;;  %v3478_v32 = vmul.f32 %v7994_v26, %v3430_v13  ;;  %v7708_v23 = vld [vmem:[%s11405_s2 + $0x2b0] ss:$24 sps:$4 sm:$0xff]   ;;  %v7713_v34 = vld [vmem:[%s11405_s2 + $0x284] ss:$24 sps:$4 sm:$0xff]  }
 0xbbd   : > { %v3347_v0 = vpop.xlane.xlu0 %3346  ;;  %v3285_v47 = vpop.xlane.xlu1 %3284 }
 0xbbe   : > { %v3419_v46 = vmax.f32 %v3403_v63, 0.0  ;;  %v3372_v33 = vmul.f32 0.03125, %v3347_v0  ;;  %v10040_v15 = vmul.f32 0.03125, %v3285_v47  ;;  %8001 = vrsqrt.f32 %v3450_v17 }
 0xbbf   : > { %v7996_v48 = vpop.eup %7995 }
 0xbc0   : > { %v3451_v56 = vadd.f32 1e-12, %v3419_v46  ;;  %v3404_v19 = vsub.f32 %v3372_v33, %v3388_v43  ;;  %v3389_v28 = vmul.f32 %v10040_v15, %v10040_v15  ;;  %v3479_v1 = vmul.f32 %v7996_v48, %v3431_v7  ;;  %v7711_v46 = vld [vmem:[%s11405_s2 + $0x280] ss:$24 sps:$4 sm:$0xff]   ;;  %v7716_v48 = vld [vmem:[%s11405_s2 + $0x254] ss:$24 sps:$4 sm:$0xff]  }
 0xbc1   : > { %v3287_v38 = vpop.xlane.xlu0 %3286  ;;  %v3349_v59 = vpop.xlane.xlu1 %3348 }
 0xbc2   : > { %8003 = vrsqrt.f32 %v3451_v56  ;;  %v3420_v50 = vmax.f32 %v3404_v19, 0.0  ;;  %v10048_v60 = vmul.f32 0.03125, %v3287_v38  ;;  %v3373_v55 = vmul.f32 0.03125, %v3349_v59 }
 0xbc3   : > { %v10050_v49 = vpack.c.bf16 %v3479_v1, %v3478_v32  ;;  %v7998_v16 = vpop.eup %7997 }
 0xbc4   : > { %v3405_v24 = vsub.f32 %v3373_v55, %v3389_v28  ;;  %v3452_v36 = vadd.f32 1e-12, %v3420_v50  ;;  %v3390_v9 = vmul.f32 %v10048_v60, %v10048_v60  ;;  %v3480_v17 = vmul.f32 %v7998_v16, %v3432_v41  ;;  %v7717_v41 = vld [vmem:[%s11405_s2 + $0x220] ss:$24 sps:$4 sm:$0xff]  }
 0xbc5   : > { %3824 = vmatmul.mubr.bf16.vlgmr.msra.gmra.mxu0 %v10050_v49  ;;  %3937 = vmatmul.mubr.bf16.vlgmr.msra.gmra.mxu1 %v10050_v49  ;;  %v3351_v11 = vpop.xlane.xlu0 %3350  ;;  %v3289_v20 = vpop.xlane.xlu1 %3288  ;;  %v3434_v50 = vsub.f32 %v9840_v4, %v10028_v61  ;;  %v3435_v55 = vsub.f32 %v9859_v57, %v10032_v37 }
 0xbc6   : > { %v3421_v44 = vmax.f32 %v3405_v24, 0.0  ;;  %v3374_v42 = vmul.f32 0.03125, %v3351_v11  ;;  %v10062_v51 = vmul.f32 0.03125, %v3289_v20  ;;  %3833 = vmatprep.mubr.bf16.mxu0 %v11538_v29  ;;  %3946 = vmatprep.mubr.bf16.mxu1 %v11538_v29  ;;  %8005 = vrsqrt.f32 %v3452_v36  ;;  %v7719_v36 = vld [vmem:[%s11405_s2 + $0x224] ss:$24 sps:$4 sm:$0xff]  }
 0xbc7   : > { %v8000_v14 = vpop.eup %7999  ;;  %4018 = vmatpush1.bf16.msra.mxu0 %v7705_v10  ;;  %v7714_v10 = vld [vmem:[%s11405_s2 + $0x250] ss:$24 sps:$4 sm:$0xff]  }
 0xbc8   : > { %v3453_v2 = vadd.f32 1e-12, %v3421_v44  ;;  %v3406_v53 = vsub.f32 %v3374_v42, %v3390_v9  ;;  %4019 = vmatprep.subr.bf16.mxu0 %v7710_v12  ;;  %v3391_v21 = vmul.f32 %v10062_v51, %v10062_v51  ;;  %v3481_v8 = vmul.f32 %v8000_v14, %v3433_v35 }
 0xbc9   : > { %v3291_v25 = vpop.xlane.xlu0 %3290  ;;  %v3353_v63 = vpop.xlane.xlu1 %3352 }
 0xbca   : > { %8007 = vrsqrt.f32 %v3453_v2  ;;  %v3422_v0 = vmax.f32 %v3406_v53, 0.0  ;;  %v10078_v47 = vmul.f32 0.03125, %v3291_v25  ;;  %v3375_v26 = vmul.f32 0.03125, %v3353_v63  ;;  %v7722_v2 = vld [vmem:[%s11405_s2 + $0x1f4] ss:$24 sps:$4 sm:$0xff]  }
 0xbcb   : > { %v10080_v43 = vpack.c.bf16 %v3481_v8, %v3480_v17  ;;  %4020 = vmatpush1.bf16.msra.mxu0 %v7708_v23  ;;  %v8002_v19 = vpop.eup %8001 }
 0xbcc   : > { %v3407_v33 = vsub.f32 %v3375_v26, %v3391_v21  ;;  %4021 = vmatprep.subr.bf16.mxu0 %v7713_v34  ;;  %v3454_v13 = vadd.f32 1e-12, %v3422_v0  ;;  %v3392_v28 = vmul.f32 %v10078_v47, %v10078_v47  ;;  %v3482_v16 = vmul.f32 %v8002_v19, %v3434_v50 }
 0xbcd   : > { %3834 = vmatmul.mubr.bf16.gmra.mxu0 %v10080_v43  ;;  %3947 = vmatmul.mubr.bf16.gmra.mxu1 %v10080_v43  ;;  %v3355_v7 = vpop.xlane.xlu0 %3354  ;;  %v3293_v56 = vpop.xlane.xlu1 %3292  ;;  %v3436_v26 = vsub.f32 %v9879_v27, %v10036_v54 }
 0xbce   : > { %v3423_v38 = vmax.f32 %v3407_v33, 0.0  ;;  %v3376_v59 = vmul.f32 0.03125, %v3355_v7  ;;  %v10092_v32 = vmul.f32 0.03125, %v3293_v56  ;;  %3843 = vmatprep.mubr.bf16.mxu0 %v11538_v29  ;;  %3956 = vmatprep.mubr.bf16.mxu1 %v11538_v29  ;;  %8009 = vrsqrt.f32 %v3454_v13  ;;  %v7720_v33 = vld [vmem:[%s11405_s2 + $0x1f0] ss:$24 sps:$4 sm:$0xff]  }
 0xbcf   : > { %v8004_v1 = vpop.eup %8003  ;;  %4022 = vmatpush1.bf16.msra.mxu0 %v7711_v46  ;;  %v3437_v46 = vsub.f32 %v9899_v39, %v10040_v15  ;;  %v7725_v7 = vld [vmem:[%s11405_s2 + $0x1c4] ss:$24 sps:$4 sm:$0xff]  }
 0xbd0   : > { %v3455_v24 = vadd.f32 1e-12, %v3423_v38  ;;  %v3408_v12 = vsub.f32 %v3376_v59, %v3392_v28  ;;  %4023 = vmatprep.subr.bf16.mxu0 %v7716_v48  ;;  %v3393_v11 = vmul.f32 %v10092_v32, %v10092_v32  ;;  %v3483_v37 = vmul.f32 %v8004_v1, %v3435_v55  ;;  %v7723_v55 = vld [vmem:[%s11405_s2 + $0x1c0] ss:$24 sps:$4 sm:$0xff]  }
 0xbd1   : > { %v3295_v61 = vpop.xlane.xlu0 %3294  ;;  %v3357_v20 = vpop.xlane.xlu1 %3356 }
 0xbd2   : > { %8011 = vrsqrt.f32 %v3455_v24  ;;  %v3424_v9 = vmax.f32 %v3408_v12, 0.0  ;;  %v10108_v44 = vmul.f32 0.03125, %v3295_v61  ;;  %v3377_v42 = vmul.f32 0.03125, %v3357_v20  ;;  %v7728_v12 = vld [vmem:[%s11405_s2 + $0x194] ss:$24 sps:$4 sm:$0xff]  }
 0xbd3   : > { %v10110_v14 = vpack.c.bf16 %v3483_v37, %v3482_v16  ;;  %4024 = vmatpush1.bf16.msra.mxu0 %v7714_v10  ;;  %v8006_v21 = vpop.eup %8005 }
 0xbd4   : > { %v3456_v35 = vadd.f32 1e-12, %v3424_v9  ;;  %v3409_v23 = vsub.f32 %v3377_v42, %v3393_v11  ;;  %4025 = vmatprep.subr.bf16.mxu0 %v7719_v36  ;;  %v3394_v25 = vmul.f32 %v10108_v44, %v10108_v44  ;;  %v3484_v28 = vmul.f32 %v8006_v21, %v3436_v26 }
 0xbd5   : > { %3844 = vmatmul.mubr.bf16.gmra.mxu0 %v10110_v14  ;;  %3957 = vmatmul.mubr.bf16.gmra.mxu1 %v10110_v14  ;;  %v3359_v53 = vpop.xlane.xlu0 %3358  ;;  %v3297_v34 = vpop.xlane.xlu1 %3296 }
 0xbd6   : > { %v3425_v63 = vmax.f32 %v3409_v23, 0.0  ;;  %v3378_v17 = vmul.f32 0.03125, %v3359_v53  ;;  %v10122_v8 = vmul.f32 0.03125, %v3297_v34  ;;  %3853 = vmatprep.mubr.bf16.mxu0 %v11538_v29  ;;  %3966 = vmatprep.mubr.bf16.mxu1 %v11538_v29  ;;  %8013 = vrsqrt.f32 %v3456_v35  ;;  %v7726_v23 = vld [vmem:[%s11405_s2 + $0x190] ss:$24 sps:$4 sm:$0xff]  }
 0xbd7   : > { %v8008_v0 = vpop.eup %8007  ;;  %4026 = vmatpush1.bf16.msra.mxu0 %v7717_v41  ;;  %v3438_v41 = vsub.f32 %v9916_v52, %v10048_v60  ;;  %v3439_v35 = vsub.f32 %v9935_v6, %v10062_v51 }
 0xbd8   : > { %v3457_v48 = vadd.f32 1e-12, %v3425_v63  ;;  %v3410_v13 = vsub.f32 %v3378_v17, %v3394_v25  ;;  %4027 = vmatprep.subr.bf16.mxu0 %v7722_v2  ;;  %v3395_v56 = vmul.f32 %v10122_v8, %v10122_v8  ;;  %v3485_v15 = vmul.f32 %v8008_v0, %v3437_v46 }
 0xbd9   : > { %v3299_v54 = vpop.xlane.xlu0 %3298  ;;  %v3361_v19 = vpop.xlane.xlu1 %3360 }
 0xbda   : > { %8015 = vrsqrt.f32 %v3457_v48  ;;  %v3426_v38 = vmax.f32 %v3410_v13, 0.0  ;;  %v10138_v59 = vmul.f32 0.03125, %v3299_v54  ;;  %v3379_v1 = vmul.f32 0.03125, %v3361_v19 }
 0xbdb   : > { %v10140_v50 = vpack.c.bf16 %v3485_v15, %v3484_v28  ;;  %4028 = vmatpush1.bf16.msra.mxu0 %v7720_v33  ;;  %v8010_v61 = vpop.eup %8009  ;;  %v3440_v33 = vsub.f32 %v9955_v31, %v10078_v47  ;;  %v3441_v48 = vsub.f32 %v9975_v3, %v10092_v32  ;;  %v3442_v47 = vsub.f32 %v9980_v5, %v10108_v44 }
 0xbdc   : > { %v3458_v10 = vadd.f32 1e-12, %v3426_v38  ;;  %v3411_v24 = vsub.f32 %v3379_v1, %v3395_v56  ;;  %4029 = vmatprep.subr.bf16.mxu0 %v7725_v7  ;;  %v3396_v20 = vmul.f32 %v10138_v59, %v10138_v59  ;;  %v3486_v21 = vmul.f32 %v8010_v61, %v3438_v41  ;;  %v10222_v41 = vld [vmem:[%s11406_s3 + $0xd8] ss:$0 sm:$0xff] }
 0xbdd   : > { %3854 = vmatmul.mubr.bf16.gmra.mxu0 %v10140_v50  ;;  %3967 = vmatmul.mubr.bf16.gmra.mxu1 %v10140_v50  ;;  %v3363_v36 = vpop.xlane.xlu0 %3362  ;;  %v3301_v11 = vpop.xlane.xlu1 %3300  ;;  %v3443_v32 = vsub.f32 %v9987_v45, %v10122_v8 }
 0xbde   : > { %v3427_v16 = vmax.f32 %v3411_v24, 0.0  ;;  %v3380_v37 = vmul.f32 0.03125, %v3363_v36  ;;  %v3317_v9 = vmul.f32 0.03125, %v3301_v11  ;;  %3863 = vmatprep.mubr.bf16.mxu0 %v11538_v29  ;;  %3976 = vmatprep.mubr.bf16.mxu1 %v11538_v29  ;;  %8017 = vrsqrt.f32 %v3458_v10 }
 0xbdf   : > { %v8012_v42 = vpop.eup %8011  ;;  %4030 = vmatpush1.bf16.msra.mxu0 %v7723_v55 }
 0xbe0   : > { %v3459_v2 = vadd.f32 1e-12, %v3427_v16  ;;  %v3412_v53 = vsub.f32 %v3380_v37, %v3396_v20  ;;  %4031 = vmatprep.subr.bf16.mxu0 %v7728_v12  ;;  %v3487_v25 = vmul.f32 %v8012_v42, %v3439_v35  ;;  %v3397_v17 = vmul.f32 %v3317_v9, %v3317_v9  ;;  %v7735_v20 = vld [vmem:[%s11404_s1 + $0x148] sm:$0xff]   ;;  %v7736_v16 = vld [vmem:[%s11404_s1 + $0x140] sm:$0xff]   ;;  %v10217_v42 = vld [vmem:[%s11406_s3 + $0xf0] ss:$0 sm:$0xff] }
 0xbe1   : > { %v3365_v34 = vpop.xlane.xlu1 %3364  ;;  %v3444_v12 = vsub.f32 %v9995_v22, %v10138_v59  ;;  %v3445_v36 = vsub.f32 %v10002_v58, %v3317_v9  ;;  %v7733_v59 = vld [vmem:[%s11404_s1 + $0x158] sm:$0xff]   ;;  %v10227_v35 = vld [vmem:[%s11406_s3 + $0xe8] ss:$0 sm:$0xff] }
 0xbe2   : > { %8019 = vrsqrt.f32 %v3459_v2  ;;  %v3428_v63 = vmax.f32 %v3412_v53, 0.0  ;;  %v3381_v0 = vmul.f32 0.03125, %v3365_v34  ;;  %v3498_v60 = vpack.c.bf16 %v3487_v25, %v3486_v21 }
 0xbe3   : > { %4032 = vmatpush1.bf16.msra.mxu0 %v7726_v23  ;;  %v8014_v46 = vpop.eup %8013 }
 0xbe4   : > { %v3460_v26 = vadd.f32 1e-12, %v3428_v63  ;;  %v3413_v51 = vsub.f32 %v3381_v0, %v3397_v17  ;;  %v3488_v54 = vmul.f32 %v8014_v46, %v3440_v33 }
 0xbe5   : > { %3864 = vmatmul.mubr.bf16.gmra.mxu0 %v3498_v60  ;;  %3977 = vmatmul.mubr.bf16.gmra.mxu1 %v3498_v60 }
 0xbe6   : > { %v3429_v13 = vmax.f32 %v3413_v51, 0.0  ;;  %3873 = vmatprep.mubr.bf16.mxu0 %v11538_v29  ;;  %3986 = vmatprep.mubr.bf16.mxu1 %v11538_v29  ;;  %8021 = vrsqrt.f32 %v3460_v26 }
 0xbe7   : > { %v8016_v7 = vpop.eup %8015 }
 0xbe8   : > { %v3461_v56 = vadd.f32 1e-12, %v3429_v13  ;;  %v3489_v19 = vmul.f32 %v8016_v7, %v3441_v48 }
 0xbea   : > { %8023 = vrsqrt.f32 %v3461_v56  ;;  %v3499_v28 = vpack.c.bf16 %v3489_v19, %v3488_v54 }
 0xbeb   : > { %v8018_v15 = vpop.eup %8017 }
 0xbec   : > { %v3490_v1 = vmul.f32 %v8018_v15, %v3442_v47 }
 0xbed   : > { %3874 = vmatmul.mubr.bf16.gmra.mxu0 %v3499_v28  ;;  %3987 = vmatmul.mubr.bf16.gmra.mxu1 %v3499_v28 }
 0xbee   : > { %3883 = vmatprep.mubr.bf16.mxu0 %v11538_v29  ;;  %3996 = vmatprep.mubr.bf16.mxu1 %v11538_v29 }
 0xbef   : > { %v8020_v38 = vpop.eup %8019 }
 0xbf0   : > { %v3491_v55 = vmul.f32 %v8020_v38, %v3443_v32 }
 0xbf2   : > { %v3500_v10 = vpack.c.bf16 %v3491_v55, %v3490_v1 }
 0xbf3   : > { %v8022_v24 = vpop.eup %8021 }
 0xbf4   : > { %v3492_v8 = vmul.f32 %v8022_v24, %v3444_v12 }
 0xbf5   : > { %3884 = vmatmul.mubr.bf16.gmra.mxu0 %v3500_v10  ;;  %3997 = vmatmul.mubr.bf16.gmra.mxu1 %v3500_v10 }
 0xbf6   : > { %3893 = vmatprep.mubr.bf16.mxu0 %v11538_v29  ;;  %4006 = vmatprep.mubr.bf16.mxu1 %v11538_v29 }
 0xbf7   : > { %v8024_v44 = vpop.eup %8023 }
 0xbf8   : > { %v3493_v11 = vmul.f32 %v8024_v44, %v3445_v36 }
 0xbfa   : > { %v3501_v61 = vpack.c.bf16 %v3493_v11, %v3492_v8 }
 0xbfd   : > { %3894 = vmatmul.mubr.bf16.gmra.mxu0 %v3501_v61  ;;  %4007 = vmatmul.mubr.bf16.gmra.mxu1 %v3501_v61 }
 0xbfe   : > { %4049 = vmatprep.mubr.bf16.mxu0 %v11538_v29 }
 0xc05   : > { %4050 = vmatmul.mubr.bf16.vlgmr.msra.gmra.mxu0 %v10050_v49  ;;  %v7729_v49 = vld [vmem:[%s11404_s1 + $0x178] sm:$0xff]  }
 0xc06   : > { %4059 = vmatprep.mubr.bf16.mxu0 %v11538_v29  ;;  %7287 = vmatprep.subr.bf16.mxu0 %v7729_v49 }
 0xc07   : > { %7288 = vmatpush3.bf16.msra.mxu0 %v7729_v49 }
 0xc0d   : > { %4060 = vmatmul.mubr.bf16.gmra.mxu0 %v10080_v43  ;;  %v7730_v43 = vld [vmem:[%s11404_s1 + $0x170] sm:$0xff]  }
 0xc0e   : > { %4069 = vmatprep.mubr.bf16.mxu0 %v11538_v29  ;;  %7289 = vmatprep.subr.bf16.mxu0 %v7730_v43 }
 0xc0f   : > { %7290 = vmatpush3.bf16.msra.mxu0 %v7730_v43 }
 0xc15   : > { %4070 = vmatmul.mubr.bf16.gmra.mxu0 %v10110_v14  ;;  %v7731_v14 = vld [vmem:[%s11404_s1 + $0x168] sm:$0xff]  }
 0xc16   : > { %4079 = vmatprep.mubr.bf16.mxu0 %v11538_v29  ;;  %7291 = vmatprep.subr.bf16.mxu0 %v7731_v14 }
 0xc17   : > { %7292 = vmatpush3.bf16.msra.mxu0 %v7731_v14 }
 0xc1d   : > { %4080 = vmatmul.mubr.bf16.gmra.mxu0 %v10140_v50  ;;  %v7734_v50 = vld [vmem:[%s11404_s1 + $0x150] sm:$0xff]  }
 0xc1e   : > { %4089 = vmatprep.mubr.bf16.mxu0 %v11538_v29 }
 0xc25   : > { %4090 = vmatmul.mubr.bf16.gmra.mxu0 %v3498_v60 }
 0xc26   : > { %4099 = vmatprep.mubr.bf16.mxu0 %v11538_v29 }
 0xc2d   : > { %4100 = vmatmul.mubr.bf16.gmra.mxu0 %v3499_v28 }
 0xc2e   : > { %4109 = vmatprep.mubr.bf16.mxu0 %v11538_v29 }
 0xc35   : > { %4110 = vmatmul.mubr.bf16.gmra.mxu0 %v3500_v10 }
 0xc36   : > { %4119 = vmatprep.mubr.bf16.mxu0 %v11538_v29  ;;  %v7732_v29 = vld [vmem:[%s11404_s1 + $0x160] sm:$0xff]  }
 0xc37   : > { %7293 = vmatprep.subr.bf16.mxu0 %v7732_v29 }
 0xc38   : > { %7294 = vmatpush3.bf16.msra.mxu0 %v7732_v29 }
 0xc39   : > { %7295 = vmatprep.subr.bf16.mxu0 %v7733_v59 }
 0xc3c   : > { %7296 = vmatpush3.bf16.msra.mxu0 %v7733_v59 }
 0xc3d   : > { %4120 = vmatmul.mubr.bf16.gmra.mxu0 %v3501_v61  ;;  %7297 = vmatprep.subr.bf16.mxu0 %v7734_v50 }
 0xc40   : > { %7298 = vmatpush3.bf16.msra.mxu0 %v7734_v50 }
 0xc41   : > { %7299 = vmatprep.subr.bf16.mxu0 %v7735_v20 }
 0xc44   : > { %7300 = vmatpush3.bf16.msra.mxu0 %v7735_v20 }
 0xc45   : > { %7301 = vmatprep.subr.bf16.mxu0 %v7736_v16 }
 0xc48   : > { %7302 = vmatpush3.bf16.msra.mxu0 %v7736_v16 }
 0xc85   : > { %v3825_v37 = vpop.f32.mrf.mxu0  ;;  %v3938_v9 = vpop.f32.mrf.mxu1 }
 0xc86   : > { %v4135_v25 = vadd.f32 %v10222_v41, %v3825_v37  ;;  %v4156_v63 = vadd.f32 %v10227_v35, %v3938_v9 }
 0xc87   : > { %v10229_v23 = vpop.f32.mrf.mxu0  ;;  %v3940_v2 = vpop.f32.mrf.mxu1 }
 0xc88   : > { %v4774_v53 = vadd.f32 %v10217_v42, %v3940_v2 }
 0xc89   : > { %v3829_v34 = vpop.f32.mrf.mxu0  ;;  %v3942_v21 = vpop.f32.mrf.mxu1 }
 0xc8a   : > { %v4136_v17 = vadd.f32 %v10222_v41, %v3829_v34  ;;  %v4157_v0 = vadd.f32 %v10227_v35, %v3942_v21 }
 0xc8b   : > { %v10236_v60 = vpop.f32.mrf.mxu0  ;;  %v3944_v26 = vpop.f32.mrf.mxu1 }
 0xc8c   : > { %v4193_v51 = vpack.c.bf16 %v4136_v17, %v4135_v25  ;;  %v10238_v46 = vpack.c.bf16 %v4157_v0, %v4156_v63  ;;  %v4775_v33 = vadd.f32 %v10217_v42, %v3944_v26 }
 0xc8d   : > { %v3835_v48 = vpop.f32.mrf.mxu0  ;;  %v3948_v13 = vpop.f32.mrf.mxu1 }
 0xc8e   : > { %v10241_v7 = vpack.c.bf16 %v4775_v33, %v4774_v53  ;;  %v10244_v56 = vadd.f32 %v10222_v41, %v3835_v48  ;;  %7239 = vmatprep.mubr.bf16.mxu1 %v4193_v51  ;;  %v4158_v32 = vadd.f32 %v10227_v35, %v3948_v13 }
 0xc8f   : > { %v10246_v54 = vpop.f32.mrf.mxu0  ;;  %v3950_v19 = vpop.f32.mrf.mxu1 }
 0xc90   : > { %v4776_v28 = vadd.f32 %v10217_v42, %v3950_v19 }
 0xc91   : > { %v3839_v15 = vpop.f32.mrf.mxu0  ;;  %v3952_v47 = vpop.f32.mrf.mxu1 }
 0xc92   : > { %v10251_v38 = vadd.f32 %v10222_v41, %v3839_v15  ;;  %v4159_v1 = vadd.f32 %v10227_v35, %v3952_v47 }
 0xc93   : > { %v10254_v55 = vpop.f32.mrf.mxu0  ;;  %v3954_v10 = vpop.f32.mrf.mxu1 }
 0xc94   : > { %v10258_v12 = vpack.c.bf16 %v4159_v1, %v4158_v32  ;;  %v4777_v36 = vadd.f32 %v10217_v42, %v3954_v10 }
 0xc95   : > { %v3845_v44 = vpop.f32.mrf.mxu0  ;;  %v3958_v8 = vpop.f32.mrf.mxu1 }
 0xc96   : > { %v10261_v11 = vpack.c.bf16 %v4777_v36, %v4776_v28  ;;  %v10264_v61 = vadd.f32 %v10222_v41, %v3845_v44  ;;  %v4160_v50 = vadd.f32 %v10227_v35, %v3958_v8 }
 0xc97   : > { %v10266_v49 = vpop.f32.mrf.mxu0  ;;  %v3960_v43 = vpop.f32.mrf.mxu1 }
 0xc98   : > { %v4778_v14 = vadd.f32 %v10217_v42, %v3960_v43 }
 0xc99   : > { %v3849_v29 = vpop.f32.mrf.mxu0  ;;  %v3962_v59 = vpop.f32.mrf.mxu1 }
 0xc9a   : > { %v10271_v20 = vadd.f32 %v10222_v41, %v3849_v29  ;;  %v4161_v16 = vadd.f32 %v10227_v35, %v3962_v59 }
 0xc9b   : > { %v10274_v37 = vpop.f32.mrf.mxu0  ;;  %v3964_v9 = vpop.f32.mrf.mxu1 }
 0xc9c   : > { %v10278_v53 = vpack.c.bf16 %v4161_v16, %v4160_v50  ;;  %v4779_v34 = vadd.f32 %v10217_v42, %v3964_v9 }
 0xc9d   : > { %v3855_v21 = vpop.f32.mrf.mxu0  ;;  %v10281_v25 = vpop.f32.mrf.mxu1 }
 0xc9e   : > { %v10283_v63 = vpack.c.bf16 %v4779_v34, %v4778_v14  ;;  %v10286_v17 = vadd.f32 %v10222_v41, %v3855_v21 }
 0xc9f   : > { %v10288_v0 = vpop.f32.mrf.mxu0  ;;  %v3970_v26 = vpop.f32.mrf.mxu1 }
 0xca0   : > { %v4780_v51 = vadd.f32 %v10217_v42, %v3970_v26 }
 0xca1   : > { %v3859_v33 = vpop.f32.mrf.mxu0  ;;  %v10291_v48 = vpop.f32.mrf.mxu1 }
 0xca2   : > { %v10294_v13 = vadd.f32 %v10222_v41, %v3859_v33 }
 0xca3   : > { %v10296_v19 = vpop.f32.mrf.mxu0  ;;  %v3974_v28 = vpop.f32.mrf.mxu1 }
 0xca4   : > { %v4781_v47 = vadd.f32 %v10217_v42, %v3974_v28 }
 0xca5   : > { %v3865_v32 = vpop.f32.mrf.mxu0  ;;  %v10301_v1 = vpop.f32.mrf.mxu1 }
 0xca6   : > { %v10303_v10 = vpack.c.bf16 %v4781_v47, %v4780_v51  ;;  %v10306_v36 = vadd.f32 %v10222_v41, %v3865_v32 }
 0xca7   : > { %v10308_v44 = vpop.f32.mrf.mxu0  ;;  %v3980_v8 = vpop.f32.mrf.mxu1 }
 0xca8   : > { %v4782_v43 = vadd.f32 %v10217_v42, %v3980_v8 }
 0xca9   : > { %v3869_v14 = vpop.f32.mrf.mxu0  ;;  %v10311_v29 = vpop.f32.mrf.mxu1 }
 0xcaa   : > { %v10314_v59 = vadd.f32 %v10222_v41, %v3869_v14 }
 0xcab   : > { %v10316_v50 = vpop.f32.mrf.mxu0  ;;  %v3984_v16 = vpop.f32.mrf.mxu1 }
 0xcac   : > { %v4783_v34 = vadd.f32 %v10217_v42, %v3984_v16  ;;  %v10335_v16 = vld [vmem:[%s11406_s3 + $0xe0] ss:$0 sm:$0xff] }
 0xcad   : > { %v3875_v21 = vpop.f32.mrf.mxu0  ;;  %v10321_v26 = vpop.f32.mrf.mxu1 }
 0xcae   : > { %v10323_v51 = vpack.c.bf16 %v4783_v34, %v4782_v43  ;;  %v10326_v33 = vadd.f32 %v10222_v41, %v3875_v21 }
 0xcaf   : > { %v3877_v28 = vpop.f32.mrf.mxu0  ;;  %v3990_v47 = vpop.f32.mrf.mxu1 }
 0xcb0   : > { %v4784_v32 = vadd.f32 %v10217_v42, %v3990_v47  ;;  %v10338_v34 = vadd.f32 %v10335_v16, %v3877_v28 }
 0xcb1   : > { %v3879_v8 = vpop.f32.mrf.mxu0  ;;  %v3992_v14 = vpop.f32.mrf.mxu1 }
 0xcb2   : > { %v10330_v15 = vadd.f32 %v10222_v41, %v3879_v8  ;;  %11555 = vst [vmem:[#allocation2_spill] sm:$0xff] %v10338_v34 }
 0xcb3   : > { %v3881_v9 = vpop.f32.mrf.mxu0  ;;  %v3994_v43 = vpop.f32.mrf.mxu1 }
 0xcb4   : > { %v10343_v47 = vadd.f32 %v10335_v16, %v3881_v9  ;;  %v4785_v2 = vadd.f32 %v10217_v42, %v3994_v43 }
 0xcb5   : > { %v3885_v8 = vpop.f32.mrf.mxu0  ;;  %v3998_v24 = vpop.f32.mrf.mxu1 }
 0xcb6   : > { %v10348_v58 = vpack.c.bf16 %v4785_v2, %v4784_v32  ;;  %v10351_v5 = vadd.f32 %v10222_v41, %v3885_v8 }
 0xcb7   : > { %v3887_v28 = vpop.f32.mrf.mxu0  ;;  %v4000_v22 = vpop.f32.mrf.mxu1 }
 0xcb8   : > { %v4786_v6 = vadd.f32 %v10217_v42, %v4000_v22  ;;  %v10358_v31 = vadd.f32 %v10335_v16, %v3887_v28 }
 0xcb9   : > { %v3889_v21 = vpop.f32.mrf.mxu0  ;;  %v4002_v3 = vpop.f32.mrf.mxu1 }
 0xcba   : > { %v10355_v9 = vadd.f32 %v10222_v41, %v3889_v21  ;;  %11556 = vst [vmem:[#allocation5_spill] sm:$0xff] %v10358_v31 }
 0xcbb   : > { %v3891_v43 = vpop.f32.mrf.mxu0  ;;  %v4004_v52 = vpop.f32.mrf.mxu1 }
 0xcbc   : > { %v10363_v32 = vadd.f32 %v10335_v16, %v3891_v43  ;;  %v4787_v8 = vadd.f32 %v10217_v42, %v4004_v52  ;;  %v4169_v43 = vadd.f32 %v10227_v35, %v4002_v3 }
 0xcbd   : > { %v3895_v45 = vpop.f32.mrf.mxu0  ;;  %v4008_v22 = vpop.f32.mrf.mxu1 }
 0xcbe   : > { %11557 = vst [vmem:[#allocation3_spill] sm:$0xff] %v10363_v32  ;;  %v10368_v21 = vpack.c.bf16 %v4787_v8, %v4786_v6  ;;  %v10371_v39 = vadd.f32 %v10222_v41, %v3895_v45  ;;  %v4170_v18 = vadd.f32 %v10227_v35, %v4008_v22  ;;  %v4168_v6 = vadd.f32 %v10227_v35, %v3998_v24 }
 0xcbf   : > { %v3897_v28 = vpop.f32.mrf.mxu0  ;;  %v10373_v4 = vpop.f32.mrf.mxu1  ;;  %v4166_v24 = vadd.f32 %v10227_v35, %v10321_v26 }
 0xcc0   : > { %v10383_v45 = vadd.f32 %v10335_v16, %v3897_v28  ;;  %v4167_v28 = vadd.f32 %v10227_v35, %v3992_v14 }
 0xcc1   : > { %v3899_v27 = vpop.f32.mrf.mxu0  ;;  %v4012_v2 = vpop.f32.mrf.mxu1 }
 0xcc2   : > { %v10378_v52 = vadd.f32 %v10222_v41, %v3899_v27  ;;  %v4171_v40 = vadd.f32 %v10227_v35, %v4012_v2  ;;  %11558 = vst [vmem:[#allocation8_spill] sm:$0xff] %v10383_v45  ;;  %v10393_v27 = vld [vmem:[%s11406_s3 + $0x100] ss:$0 sm:$0xff]  ;;  %v4207_v41 = vpack.c.bf16 %v4169_v43, %v4168_v6  ;;  %v10400_v2 = vld [vmem:[%s11406_s3 + $0xf8] ss:$0 sm:$0xff] }
 0xcc3   : > { %v3901_v8 = vpop.f32.mrf.mxu0 }
 0xcc4   : > { %v4208_v62 = vpack.c.bf16 %v4171_v40, %v4170_v18  ;;  %v10388_v30 = vadd.f32 %v10335_v16, %v3901_v8 }
 0xcc5   : > { %v4051_v3 = vpop.f32.mrf.mxu0 }
 0xcc6   : > { %11559 = vst [vmem:[#allocation6_spill] sm:$0xff] %v10388_v30  ;;  %7223 = vmatprep.subr.bf16.mxu1 %v4208_v62  ;;  %v4177_v8 = vadd.f32 %v10400_v2, %v4051_v3 }
 0xcc7   : > { %v4053_v18 = vpop.f32.mrf.mxu0  ;;  %7224 = vmatpush3.bf16.xpose.msra.mxu1 %v4208_v62  ;;  %v4206_v62 = vpack.c.bf16 %v4167_v28, %v4166_v24 }
 0xcc8   : > { %v4795_v40 = vadd.f32 %v10393_v27, %v4053_v18  ;;  %7225 = vmatprep.subr.bf16.mxu1 %v4207_v41 }
 0xcc9   : > { %v4055_v22 = vpop.f32.mrf.mxu0 }
 0xcca   : > { %v4178_v43 = vadd.f32 %v10400_v2, %v4055_v22  ;;  %v4165_v22 = vadd.f32 %v10227_v35, %v10311_v29 }
 0xccb   : > { %v4057_v6 = vpop.f32.mrf.mxu0 }
 0xccc   : > { %v10408_v57 = vpack.c.bf16 %v4178_v43, %v4177_v8  ;;  %v4796_v45 = vadd.f32 %v10393_v27, %v4057_v6  ;;  %v4164_v43 = vadd.f32 %v10227_v35, %v10301_v1 }
 0xccd   : > { %v4061_v30 = vpop.f32.mrf.mxu0 }
 0xcce   : > { %v10411_v31 = vpack.c.bf16 %v4796_v45, %v4795_v40  ;;  %v4179_v32 = vadd.f32 %v10400_v2, %v4061_v30  ;;  %v4205_v40 = vpack.c.bf16 %v4165_v22, %v4164_v43 }
 0xccf   : > { %v4063_v18 = vpop.f32.mrf.mxu0  ;;  %7226 = vmatpush3.bf16.xpose.msra.mxu1 %v4207_v41 }
 0xcd0   : > { %11560 = vst [vmem:[#allocation9_spill] sm:$0xff] %v10411_v31  ;;  %v4797_v14 = vadd.f32 %v10393_v27, %v4063_v18  ;;  %7227 = vmatprep.subr.bf16.mxu1 %v4206_v62  ;;  %v4163_v18 = vadd.f32 %v10227_v35, %v10291_v48 }
 0xcd1   : > { %v4065_v3 = vpop.f32.mrf.mxu0 }
 0xcd2   : > { %v4180_v26 = vadd.f32 %v10400_v2, %v4065_v3 }
 0xcd3   : > { %v4067_v8 = vpop.f32.mrf.mxu0 }
 0xcd4   : > { %v10420_v24 = vpack.c.bf16 %v4180_v26, %v4179_v32  ;;  %v4798_v45 = vadd.f32 %v10393_v27, %v4067_v8  ;;  %v4162_v32 = vadd.f32 %v10227_v35, %v10281_v25 }
 0xcd5   : > { %v10423_v41 = vpop.f32.mrf.mxu0 }
 0xcd6   : > { %v10425_v28 = vpack.c.bf16 %v4798_v45, %v4797_v14  ;;  %v4204_v14 = vpack.c.bf16 %v4163_v18, %v4162_v32 }
 0xcd7   : > { %v4073_v6 = vpop.f32.mrf.mxu0  ;;  %7228 = vmatpush3.bf16.xpose.msra.mxu1 %v4206_v62 }
 0xcd8   : > { %11561 = vst [vmem:[#allocation7_spill] sm:$0xff] %v10425_v28  ;;  %v4799_v29 = vadd.f32 %v10393_v27, %v4073_v6  ;;  %7229 = vmatprep.subr.bf16.mxu1 %v4205_v40 }
 0xcd9   : > { %v10428_v30 = vpop.f32.mrf.mxu0 }
 0xcdb   : > { %v4077_v1 = vpop.f32.mrf.mxu0 }
 0xcdc   : > { %v4800_v3 = vadd.f32 %v10393_v27, %v4077_v1 }
 0xcdd   : > { %v10435_v26 = vpop.f32.mrf.mxu0 }
 0xcde   : > { %v10437_v22 = vpack.c.bf16 %v4800_v3, %v4799_v29 }
 0xcdf   : > { %v4083_v62 = vpop.f32.mrf.mxu0  ;;  %7230 = vmatpush3.bf16.xpose.msra.mxu1 %v4205_v40 }
 0xce0   : > { %11562 = vst [vmem:[#allocation12_spill] sm:$0xff] %v10437_v22  ;;  %v4801_v8 = vadd.f32 %v10393_v27, %v4083_v62  ;;  %7231 = vmatprep.subr.bf16.mxu1 %v4204_v14 }
 0xce1   : > { %v4085_v43 = vpop.f32.mrf.mxu0 }
 0xce3   : > { %v4087_v45 = vpop.f32.mrf.mxu0 }
 0xce4   : > { %v4802_v48 = vadd.f32 %v10393_v27, %v4087_v45 }
 0xce5   : > { %v4091_v6 = vpop.f32.mrf.mxu0 }
 0xce6   : > { %v10441_v31 = vpack.c.bf16 %v4802_v48, %v4801_v8 }
 0xce7   : > { %v4093_v35 = vpop.f32.mrf.mxu0  ;;  %7232 = vmatpush3.bf16.xpose.msra.mxu1 %v4204_v14 }
 0xce8   : > { %11563 = vst [vmem:[#allocation10_spill] sm:$0xff] %v10441_v31  ;;  %v4803_v25 = vadd.f32 %v10393_v27, %v4093_v35  ;;  %7233 = vmatprep.subr.bf16.mxu1 %v10278_v53 }
 0xce9   : > { %v4095_v29 = vpop.f32.mrf.mxu0 }
 0xceb   : > { %v4097_v18 = vpop.f32.mrf.mxu0 }
 0xcec   : > { %v4804_v40 = vadd.f32 %v10393_v27, %v4097_v18 }
 0xced   : > { %v4101_v1 = vpop.f32.mrf.mxu0 }
 0xcee   : > { %v10446_v32 = vpack.c.bf16 %v4804_v40, %v4803_v25 }
 0xcef   : > { %v4103_v3 = vpop.f32.mrf.mxu0  ;;  %7234 = vmatpush3.bf16.xpose.msra.mxu1 %v10278_v53 }
 0xcf0   : > { %11564 = vst [vmem:[#allocation13_spill] sm:$0xff] %v10446_v32  ;;  %v4805_v62 = vadd.f32 %v10393_v27, %v4103_v3  ;;  %7235 = vmatprep.subr.bf16.mxu1 %v10258_v12 }
 0xcf1   : > { %v4105_v8 = vpop.f32.mrf.mxu0 }
 0xcf3   : > { %v4107_v14 = vpop.f32.mrf.mxu0 }
 0xcf4   : > { %v4806_v45 = vadd.f32 %v10393_v27, %v4107_v14 }
 0xcf5   : > { %v4111_v48 = vpop.f32.mrf.mxu0 }
 0xcf6   : > { %v10452_v35 = vpack.c.bf16 %v4806_v45, %v4805_v62  ;;  %v4189_v32 = vadd.f32 %v10400_v2, %v4111_v48 }
 0xcf7   : > { %v4113_v28 = vpop.f32.mrf.mxu0  ;;  %7236 = vmatpush3.bf16.xpose.msra.mxu1 %v10258_v12 }
 0xcf8   : > { %11565 = vst [vmem:[#allocation11_spill] sm:$0xff] %v10452_v35  ;;  %v4807_v25 = vadd.f32 %v10393_v27, %v4113_v28  ;;  %7237 = vmatprep.subr.bf16.mxu1 %v10238_v46 }
 0xcf9   : > { %v4115_v18 = vpop.f32.mrf.mxu0 }
 0xcfa   : > { %v4190_v62 = vadd.f32 %v10400_v2, %v4115_v18  ;;  %v11568_v18 = vpack.c.bf16 %v10271_v20, %v10264_v61  ;;  %v11569_v61 = vpack.c.bf16 %v10294_v13, %v10286_v17  ;;  %v11570_v20 = vpack.c.bf16 %v10314_v59, %v10306_v36  ;;  %v4014_v59 = vpop.f32.mrf.mxu1 }
 0xcfb   : > { %v4117_v53 = vpop.f32.mrf.mxu0  ;;  %v11571_v13 = vpack.c.bf16 %v10330_v15, %v10326_v33  ;;  %v11572_v36 = vpack.c.bf16 %v10355_v9, %v10351_v5  ;;  %v4788_v15 = vadd.f32 %v10217_v42, %v10373_v4 }
 0xcfc   : > { %v4808_v40 = vadd.f32 %v10393_v27, %v4117_v53 }
 0xcfd   : > { %v4121_v3 = vpop.f32.mrf.mxu0 }
 0xcfe   : > { %v10458_v22 = vpack.c.bf16 %v4808_v40, %v4807_v25  ;;  %v4191_v45 = vadd.f32 %v10400_v2, %v4121_v3  ;;  %v4188_v25 = vadd.f32 %v10400_v2, %v4105_v8  ;;  %v4464_v40 = vpack.c.bf16 %v4190_v62, %v4189_v32 }
 0xcff   : > { %v4123_v31 = vpop.f32.mrf.mxu0  ;;  %7238 = vmatpush3.bf16.xpose.msra.mxu1 %v10238_v46  ;;  %v11567_v46 = vpack.c.bf16 %v10251_v38, %v10244_v56  ;;  %v4185_v8 = vadd.f32 %v10400_v2, %v4091_v6  ;;  %v4184_v56 = vadd.f32 %v10400_v2, %v4085_v43  ;;  %v4182_v6 = vadd.f32 %v10400_v2, %v10428_v30 }
 0xd00   : > { %11566 = vst [vmem:[#allocation16_spill] sm:$0xff] %v10458_v22  ;;  %v4809_v35 = vadd.f32 %v10393_v27, %v4123_v31  ;;  %v4187_v31 = vadd.f32 %v10400_v2, %v4101_v1  ;;  %v4181_v43 = vadd.f32 %v10400_v2, %v10423_v41  ;;  %v4789_v30 = vadd.f32 %v10217_v42, %v4014_v59  ;;  %v10532_v41 = vld [vmem:[%s11406_s3 + $0x8] sm:$0xff] }
 0xd01   : > { %v4125_v14 = vpop.f32.mrf.mxu0 }
 0xd02   : > { %v4192_v12 = vadd.f32 %v10400_v2, %v4125_v14  ;;  %v4463_v32 = vpack.c.bf16 %v4188_v25, %v4187_v31  ;;  %v4460_v17 = vpack.c.bf16 %v4182_v6, %v4181_v43  ;;  %v10508_v5 = vpack.c.bf16 %v4789_v30, %v4788_v15  ;;  %v10547_v14 = vld [vmem:[%s11406_s3 + $0x20] sm:$0xff]  ;;  %v10565_v25 = vld [vmem:[%s11406_s3 + $0x28] sm:$0xff]  ;;  %v10572_v31 = vld [vmem:[%s11406_s3 + $0x38] sm:$0xff] }
 0xd03   : > { %v4127_v28 = vpop.f32.mrf.mxu0  ;;  %v10626_v15 = vld [vmem:[%s11406_s3 + $0x70] sm:$0xff] }
 0xd04   : > { %v4465_v34 = vpack.c.bf16 %v4192_v12, %v4191_v45  ;;  %v4810_v53 = vadd.f32 %v10393_v27, %v4127_v28  ;;  %v4186_v27 = vadd.f32 %v10400_v2, %v4095_v29  ;;  %v10557_v28 = vld [vmem:[%s11406_s3 + $0x30] sm:$0xff]  ;;  %11575 = vst [vmem:[#allocation17_spill] sm:$0xff] %v10626_v15 }
 0xd06   : > { %v10468_v22 = vpack.c.bf16 %v4810_v53, %v4809_v35  ;;  %7240 = vmatmul.mubr.bf16.vlgmr.msra.gmra.mxu1 %v11567_v46  ;;  %7255 = vmatprep.subr.bf16.mxu1 %v4465_v34  ;;  %v4462_v38 = vpack.c.bf16 %v4186_v27, %v4185_v8  ;;  %v10539_v35 = vld [vmem:[%s11406_s3 + $0x18] sm:$0xff] }
 0xd07   : > { %7243 = vmatprep.mubr.bf16.mxu1 %v11568_v18  ;;  %7256 = vmatpush3.bf16.msra.mxu1 %v4465_v34  ;;  %v4183_v34 = vadd.f32 %v10400_v2, %v10435_v26  ;;  %v11573_v2 = vpack.c.bf16 %v10378_v52, %v10371_v39  ;;  %v10515_v39 = vld [vmem:[%s11406_s3] sm:$0xff] }
 0xd08   : > { %7257 = vmatprep.subr.bf16.mxu1 %v4464_v40  ;;  %7351 = vmatprep.subr.bf16.mxu0 %v10468_v22 }
 0xd09   : > { %v4461_v29 = vpack.c.bf16 %v4184_v56, %v4183_v34  ;;  %v10598_v34 = vld [vmem:[%s11406_s3 + $0x48] sm:$0xff] }
 0xd0b   : > { %7258 = vmatpush3.bf16.msra.mxu1 %v4464_v40 }
 0xd0c   : > { %7259 = vmatprep.subr.bf16.mxu1 %v4463_v32 }
 0xd0e   : > { %7244 = vmatmul.mubr.bf16.gmra.mxu1 %v11569_v61  ;;  %v10590_v61 = vld [vmem:[%s11406_s3 + $0x50] sm:$0xff] }
 0xd0f   : > { %7247 = vmatprep.mubr.bf16.mxu1 %v11570_v20  ;;  %7260 = vmatpush3.bf16.msra.mxu1 %v4463_v32  ;;  %v10580_v32 = vld [vmem:[%s11406_s3 + $0x40] sm:$0xff] }
 0xd10   : > { %7261 = vmatprep.subr.bf16.mxu1 %v4462_v38 }
 0xd13   : > { %7262 = vmatpush3.bf16.msra.mxu1 %v4462_v38 }
 0xd14   : > { %7263 = vmatprep.subr.bf16.mxu1 %v4461_v29 }
 0xd16   : > { %7248 = vmatmul.mubr.bf16.gmra.mxu1 %v11571_v13 }
 0xd17   : > { %7251 = vmatprep.mubr.bf16.mxu1 %v11572_v36  ;;  %7264 = vmatpush3.bf16.msra.mxu1 %v4461_v29  ;;  %v10616_v36 = vld [vmem:[%s11406_s3 + $0x60] sm:$0xff] }
 0xd18   : > { %7265 = vmatprep.subr.bf16.mxu1 %v4460_v17  ;;  %11574 = vst [vmem:[#allocation14_spill] sm:$0xff] %v10616_v36 }
 0xd1b   : > { %7266 = vmatpush3.bf16.msra.mxu1 %v4460_v17  ;;  %v10608_v17 = vld [vmem:[%s11406_s3 + $0x58] sm:$0xff] }
 0xd1c   : > { %7267 = vmatprep.subr.bf16.mxu1 %v10420_v24 }
 0xd1e   : > { %7252 = vmatmul.mubr.bf16.gmra.mxu1 %v11573_v2 }
 0xd1f   : > { %7268 = vmatpush3.bf16.msra.mxu1 %v10420_v24 }
 0xd20   : > { %7269 = vmatprep.subr.bf16.mxu1 %v10408_v57 }
 0xd23   : > { %7270 = vmatpush3.bf16.msra.mxu1 %v10408_v57  ;;  %v10524_v57 = vld [vmem:[%s11406_s3 + $0x10] sm:$0xff] }
 0xd24   : > { %7319 = vmatprep.subr.bf16.mxu1 %v10508_v5 }
 0xdc6   : > { %v7241_v33 = vpop.f32.mrf.mxu1 }
 0xdc7   : > { %v10527_v42 = vadd.f32 %v10524_v57, %v7241_v33 }
 0xdc8   : > { %v4243_v9 = vpop.f32.mrf.mxu1 }
 0xdc9   : > { %v10518_v52 = vadd.f32 %v10515_v39, %v4243_v9  ;;  %v10634_v9 = vld [vmem:[%s11406_s3 + $0x68] sm:$0xff] }
 0xdca   : > { %v7242_v24 = vpop.f32.mrf.mxu1  ;;  %11576 = vst [vmem:[#allocation15_spill] sm:$0xff] %v10634_v9 }
 0xdcb   : > { %4306 = vmax.xlane.f32.xlu0 %v10518_v52  ;;  %v10542_v3 = vadd.f32 %v10539_v35, %v7242_v24 }
 0xdcc   : > { %v4246_v4 = vpop.f32.mrf.mxu1 }
 0xdcd   : > { %v4247_v26 = vadd.f32 %v10532_v41, %v4246_v4  ;;  %v10644_v4 = vld [vmem:[%s11406_s3 + $0x78] sm:$0xff] }
 0xdce   : > { %v7245_v1 = vpop.f32.mrf.mxu1  ;;  %11577 = vst [vmem:[#allocation33_spill] sm:$0xff] %v10644_v4 }
 0xdcf   : > { %4308 = vmax.xlane.f32.xlu1 %v4247_v26  ;;  %4310 = vmax.xlane.f32.xlu0 %v10527_v42  ;;  %v10560_v53 = vadd.f32 %v10557_v28, %v7245_v1 }
 0xdd0   : > { %v4259_v48 = vpop.f32.mrf.mxu1 }
 0xdd1   : > { %v10550_v62 = vadd.f32 %v10547_v14, %v4259_v48 }
 0xdd2   : > { %v7246_v45 = vpop.f32.mrf.mxu1 }
 0xdd3   : > { %4312 = vmax.xlane.f32.xlu1 %v10542_v3  ;;  %4314 = vmax.xlane.f32.xlu0 %v10550_v62  ;;  %v10575_v27 = vadd.f32 %v10572_v31, %v7246_v45 }
 0xdd4   : > { %v4262_v12 = vpop.f32.mrf.mxu1 }
 0xdd5   : > { %v4263_v40 = vadd.f32 %v10565_v25, %v4262_v12 }
 0xdd6   : > { %v7249_v46 = vpop.f32.mrf.mxu1 }
 0xdd7   : > { %4316 = vmax.xlane.f32.xlu1 %v4263_v40  ;;  %4318 = vmax.xlane.f32.xlu0 %v10560_v53  ;;  %v10593_v20 = vadd.f32 %v10590_v61, %v7249_v46 }
 0xdd8   : > { %v4275_v18 = vpop.f32.mrf.mxu1 }
 0xdd9   : > { %v10583_v8 = vadd.f32 %v10580_v32, %v4275_v18 }
 0xdda   : > { %v7250_v56 = vpop.f32.mrf.mxu1 }
 0xddb   : > { %4320 = vmax.xlane.f32.xlu1 %v10575_v27  ;;  %4322 = vmax.xlane.f32.xlu0 %v10583_v8  ;;  %v10611_v13 = vadd.f32 %v10608_v17, %v7250_v56 }
 0xddc   : > { %v4278_v38 = vpop.f32.mrf.mxu1 }
 0xddd   : > { %v10601_v6 = vadd.f32 %v10598_v34, %v4278_v38 }
 0xdde   : > { %v7253_v29 = vpop.f32.mrf.mxu1 }
 0xddf   : > { %4324 = vmax.xlane.f32.xlu1 %v10601_v6  ;;  %4326 = vmax.xlane.f32.xlu0 %v10593_v20  ;;  %v10629_v33 = vadd.f32 %v10626_v15, %v7253_v29 }
 0xde0   : > { %v4291_v43 = vpop.f32.mrf.mxu1 }
 0xde1   : > { %v10619_v59 = vadd.f32 %v10616_v36, %v4291_v43 }
 0xde2   : > { %v7254_v30 = vpop.f32.mrf.mxu1 }
 0xde3   : > { %4328 = vmax.xlane.f32.xlu1 %v10611_v13  ;;  %4330 = vmax.xlane.f32.xlu0 %v10619_v59  ;;  %v10647_v1 = vadd.f32 %v10644_v4, %v7254_v30 }
 0xde4   : > { %v4294_v2 = vpop.f32.mrf.mxu1 }
 0xde5   : > { %v10637_v24 = vadd.f32 %v10634_v9, %v4294_v2 }
 0xde7   : > { %4332 = vmax.xlane.f32.xlu1 %v10637_v24  ;;  %4334 = vmax.xlane.f32.xlu0 %v10629_v33 }
 0xdeb   : > { %4336 = vmax.xlane.f32.xlu1 %v10647_v1 }
 0xe54   : > { %v4307_v48 = vpop.xlane.xlu0 %4306 }
 0xe55   : > { %v4338_v45 = vsub.f32 %v10518_v52, %v4307_v48 }
 0xe57   : > { %v4354_v12 = vmul.f32 1.442695, %v4338_v45 }
 0xe58   : > { %v4309_v46 = vpop.xlane.xlu1 %4308  ;;  %v4311_v18 = vpop.xlane.xlu0 %4310 }
 0xe59   : > { %8025 = vpow2.f32 %v4354_v12  ;;  %v4339_v56 = vsub.f32 %v4247_v26, %v4309_v46  ;;  %v4340_v38 = vsub.f32 %v10527_v42, %v4311_v18 }
 0xe5b   : > { %v4356_v29 = vmul.f32 1.442695, %v4339_v56  ;;  %v4358_v43 = vmul.f32 1.442695, %v4340_v38 }
 0xe5c   : > { %v4313_v2 = vpop.xlane.xlu1 %4312  ;;  %v4315_v9 = vpop.xlane.xlu0 %4314 }
 0xe5d   : > { %8027 = vpow2.f32 %v4356_v29  ;;  %v4341_v30 = vsub.f32 %v10542_v3, %v4313_v2  ;;  %v4342_v4 = vsub.f32 %v10550_v62, %v4315_v9 }
 0xe5e   : > { %8029 = vpow2.f32 %v4358_v43 }
 0xe5f   : > { %v4360_v15 = vmul.f32 1.442695, %v4341_v30  ;;  %v4362_v36 = vmul.f32 1.442695, %v4342_v4 }
 0xe60   : > { %v4317_v52 = vpop.xlane.xlu1 %4316  ;;  %v4319_v48 = vpop.xlane.xlu0 %4318 }
 0xe61   : > { %8031 = vpow2.f32 %v4360_v15  ;;  %v4343_v45 = vsub.f32 %v4263_v40, %v4317_v52  ;;  %v4344_v26 = vsub.f32 %v10560_v53, %v4319_v48 }
 0xe62   : > { %8033 = vpow2.f32 %v4362_v36 }
 0xe63   : > { %v4364_v42 = vmul.f32 1.442695, %v4343_v45  ;;  %v4366_v12 = vmul.f32 1.442695, %v4344_v26 }
 0xe64   : > { %v4321_v46 = vpop.xlane.xlu1 %4320  ;;  %v4323_v18 = vpop.xlane.xlu0 %4322 }
 0xe65   : > { %8035 = vpow2.f32 %v4364_v42  ;;  %v4345_v56 = vsub.f32 %v10575_v27, %v4321_v46  ;;  %v4346_v3 = vsub.f32 %v10583_v8, %v4323_v18 }
 0xe66   : > { %v10657_v62 = vpop.eup %8025  ;;  %8037 = vpow2.f32 %v4366_v12 }
 0xe67   : > { %v4368_v9 = vmul.f32 1.442695, %v4345_v56  ;;  %v4370_v4 = vmul.f32 1.442695, %v4346_v3  ;;  %4386 = vadd.xlane.f32.xlu0 %v10657_v62 }
 0xe68   : > { %v4325_v40 = vpop.xlane.xlu1 %4324  ;;  %v4327_v15 = vpop.xlane.xlu0 %4326 }
 0xe69   : > { %8039 = vpow2.f32 %v4368_v9  ;;  %v4347_v53 = vsub.f32 %v10601_v6, %v4325_v40  ;;  %v4348_v36 = vsub.f32 %v10593_v20, %v4327_v15 }
 0xe6a   : > { %v10662_v38 = vpop.eup %8027  ;;  %8041 = vpow2.f32 %v4370_v4 }
 0xe6b   : > { %v10664_v27 = vpop.eup %8029  ;;  %v4372_v8 = vmul.f32 1.442695, %v4347_v53  ;;  %v4374_v29 = vmul.f32 1.442695, %v4348_v36  ;;  %4388 = vadd.xlane.f32.xlu1 %v10662_v38 }
 0xe6c   : > { %4390 = vadd.xlane.f32.xlu0 %v10664_v27  ;;  %v4329_v43 = vpop.xlane.xlu1 %4328  ;;  %v4331_v2 = vpop.xlane.xlu0 %4330 }
 0xe6d   : > { %8043 = vpow2.f32 %v4372_v8  ;;  %v4349_v30 = vsub.f32 %v10611_v13, %v4329_v43  ;;  %v4350_v6 = vsub.f32 %v10619_v59, %v4331_v2 }
 0xe6e   : > { %v10670_v52 = vpop.eup %8031  ;;  %8045 = vpow2.f32 %v4374_v29 }
 0xe6f   : > { %v10672_v20 = vpop.eup %8033  ;;  %v4376_v48 = vmul.f32 1.442695, %v4349_v30  ;;  %v4378_v45 = vmul.f32 1.442695, %v4350_v6  ;;  %4392 = vadd.xlane.f32.xlu1 %v10670_v52 }
 0xe70   : > { %4394 = vadd.xlane.f32.xlu0 %v10672_v20  ;;  %v4333_v26 = vpop.xlane.xlu1 %4332  ;;  %v4335_v42 = vpop.xlane.xlu0 %4334 }
 0xe71   : > { %8047 = vpow2.f32 %v4376_v48  ;;  %v4351_v12 = vsub.f32 %v10637_v24, %v4333_v26  ;;  %v4352_v13 = vsub.f32 %v10629_v33, %v4335_v42 }
 0xe72   : > { %v10678_v46 = vpop.eup %8035  ;;  %8049 = vpow2.f32 %v4378_v45 }
 0xe73   : > { %v10680_v59 = vpop.eup %8037  ;;  %v4380_v18 = vmul.f32 1.442695, %v4351_v12  ;;  %v4382_v56 = vmul.f32 1.442695, %v4352_v13  ;;  %4396 = vadd.xlane.f32.xlu1 %v10678_v46 }
 0xe74   : > { %4398 = vadd.xlane.f32.xlu0 %v10680_v59  ;;  %v4337_v3 = vpop.xlane.xlu1 %4336 }
 0xe75   : > { %8051 = vpow2.f32 %v4380_v18  ;;  %v4353_v9 = vsub.f32 %v10647_v1, %v4337_v3 }
 0xe76   : > { %v10685_v4 = vpop.eup %8039  ;;  %8053 = vpow2.f32 %v4382_v56 }
 0xe77   : > { %v10687_v24 = vpop.eup %8041  ;;  %v4384_v33 = vmul.f32 1.442695, %v4353_v9  ;;  %4400 = vadd.xlane.f32.xlu1 %v10685_v4 }
 0xe78   : > { %4402 = vadd.xlane.f32.xlu0 %v10687_v24 }
 0xe79   : > { %8055 = vpow2.f32 %v4384_v33 }
 0xe7a   : > { %v10691_v40 = vpop.eup %8043 }
 0xe7b   : > { %v10693_v15 = vpop.eup %8045  ;;  %4404 = vadd.xlane.f32.xlu1 %v10691_v40 }
 0xe7c   : > { %4406 = vadd.xlane.f32.xlu0 %v10693_v15 }
 0xe7e   : > { %v10697_v1 = vpop.eup %8047 }
 0xe7f   : > { %v10699_v53 = vpop.eup %8049  ;;  %4408 = vadd.xlane.f32.xlu1 %v10697_v1 }
 0xe80   : > { %4410 = vadd.xlane.f32.xlu0 %v10699_v53 }
 0xe82   : > { %v10703_v36 = vpop.eup %8051 }
 0xe83   : > { %v10705_v8 = vpop.eup %8053  ;;  %4412 = vadd.xlane.f32.xlu1 %v10703_v36 }
 0xe84   : > { %4414 = vadd.xlane.f32.xlu0 %v10705_v8 }
 0xe86   : > { %v10709_v29 = vpop.eup %8055 }
 0xe87   : > { %4416 = vadd.xlane.f32.xlu1 %v10709_v29 }
 0xef0   : > { %v4387_v43 = vpop.xlane.xlu0 %4386 }
 0xef1   : > { %8057 = vrcp.f32 %v4387_v43 }
 0xef4   : > { %v4389_v2 = vpop.xlane.xlu1 %4388 }
 0xef5   : > { %8059 = vrcp.f32 %v4389_v2  ;;  %v4391_v30 = vpop.xlane.xlu0 %4390 }
 0xef6   : > { %8061 = vrcp.f32 %v4391_v30 }
 0xef8   : > { %v4393_v6 = vpop.xlane.xlu1 %4392 }
 0xef9   : > { %8063 = vrcp.f32 %v4393_v6  ;;  %v4395_v48 = vpop.xlane.xlu0 %4394 }
 0xefa   : > { %8065 = vrcp.f32 %v4395_v48 }
 0xefc   : > { %v4397_v45 = vpop.xlane.xlu1 %4396 }
 0xefd   : > { %8067 = vrcp.f32 %v4397_v45  ;;  %v4399_v26 = vpop.xlane.xlu0 %4398 }
 0xefe   : > { %8069 = vrcp.f32 %v4399_v26  ;;  %v8058_v42 = vpop.eup %8057 }
 0xeff   : > { %v4434_v56 = vmul.f32 %v8058_v42, %v10657_v62 }
 0xf00   : > { %v4401_v12 = vpop.xlane.xlu1 %4400 }
 0xf01   : > { %8071 = vrcp.f32 %v4401_v12  ;;  %v4403_v13 = vpop.xlane.xlu0 %4402 }
 0xf02   : > { %v8060_v18 = vpop.eup %8059  ;;  %8073 = vrcp.f32 %v4403_v13 }
 0xf03   : > { %v4435_v3 = vmul.f32 %v8060_v18, %v10662_v38  ;;  %v8062_v9 = vpop.eup %8061 }
 0xf04   : > { %v4405_v33 = vpop.xlane.xlu1 %4404  ;;  %v4436_v6 = vmul.f32 %v8062_v9, %v10664_v27 }
 0xf05   : > { %8075 = vrcp.f32 %v4405_v33  ;;  %v4407_v43 = vpop.xlane.xlu0 %4406  ;;  %v4450_v2 = vpack.c.bf16 %v4435_v3, %v4434_v56 }
 0xf06   : > { %v8064_v30 = vpop.eup %8063  ;;  %8077 = vrcp.f32 %v4407_v43 }
 0xf07   : > { %v4437_v48 = vmul.f32 %v8064_v30, %v10670_v52  ;;  %7271 = vmatprep.mubr.bf16.mxu1 %v4450_v2  ;;  %v8066_v45 = vpop.eup %8065 }
 0xf08   : > { %v4409_v26 = vpop.xlane.xlu1 %4408  ;;  %v4438_v38 = vmul.f32 %v8066_v45, %v10672_v20 }
 0xf09   : > { %v4451_v12 = vpack.c.bf16 %v4437_v48, %v4436_v6  ;;  %8079 = vrcp.f32 %v4409_v26  ;;  %v4411_v13 = vpop.xlane.xlu0 %4410 }
 0xf0a   : > { %v8068_v62 = vpop.eup %8067  ;;  %8081 = vrcp.f32 %v4411_v13 }
 0xf0b   : > { %7272 = vmatmul.mubr.bf16.vlgmr.msra.gmra.mxu1 %v4451_v12  ;;  %v4439_v42 = vmul.f32 %v8068_v62, %v10678_v46  ;;  %v8070_v18 = vpop.eup %8069 }
 0xf0c   : > { %7320 = vmatpush3.bf16.xpose.msra.mxu1 %v10508_v5  ;;  %v4413_v27 = vpop.xlane.xlu1 %4412  ;;  %v4440_v9 = vmul.f32 %v8070_v18, %v10680_v59 }
 0xf0d   : > { %8083 = vrcp.f32 %v4413_v27  ;;  %v4415_v52 = vpop.xlane.xlu0 %4414  ;;  %7321 = vmatprep.subr.bf16.mxu1 %v10368_v21  ;;  %v4452_v56 = vpack.c.bf16 %v4439_v42, %v4438_v38  ;;  %v11580_v27 = vld [vmem:[#allocation3_spill] sm:$0xff] }
 0xf0e   : > { %v8072_v3 = vpop.eup %8071  ;;  %8085 = vrcp.f32 %v4415_v52  ;;  %v11581_v52 = vld [vmem:[#allocation5_spill] sm:$0xff] }
 0xf0f   : > { %7275 = vmatprep.mubr.bf16.mxu1 %v4452_v56  ;;  %v4441_v33 = vmul.f32 %v8072_v3, %v10685_v4  ;;  %v8074_v43 = vpop.eup %8073  ;;  %v11583_v56 = vld [vmem:[#allocation6_spill] sm:$0xff] }
 0xf10   : > { %v4417_v20 = vpop.xlane.xlu1 %4416  ;;  %v4442_v5 = vmul.f32 %v8074_v43, %v10687_v24 }
 0xf11   : > { %8087 = vrcp.f32 %v4417_v20  ;;  %v4453_v46 = vpack.c.bf16 %v4441_v33, %v4440_v9 }
 0xf12   : > { %v8076_v2 = vpop.eup %8075 }
 0xf13   : > { %7276 = vmatmul.mubr.bf16.gmra.mxu1 %v4453_v46  ;;  %v4443_v30 = vmul.f32 %v8076_v2, %v10691_v40  ;;  %v8078_v6 = vpop.eup %8077 }
 0xf14   : > { %7322 = vmatpush3.bf16.xpose.msra.mxu1 %v10368_v21  ;;  %v4444_v59 = vmul.f32 %v8078_v6, %v10693_v15  ;;  %v4754_v15 = vadd.f32 %v10335_v16, %v10236_v60  ;;  %v4755_v60 = vadd.f32 %v10335_v16, %v10246_v54 }
 0xf15   : > { %7323 = vmatprep.subr.bf16.mxu1 %v10348_v58  ;;  %v4454_v48 = vpack.c.bf16 %v4443_v30, %v4442_v5 }
 0xf16   : > { %v8080_v45 = vpop.eup %8079 }
 0xf17   : > { %7279 = vmatprep.mubr.bf16.mxu1 %v4454_v48  ;;  %v4445_v4 = vmul.f32 %v8080_v45, %v10697_v1  ;;  %v8082_v26 = vpop.eup %8081  ;;  %v11587_v48 = vld [vmem:[#allocation11_spill] sm:$0xff] }
 0xf18   : > { %v4446_v24 = vmul.f32 %v8082_v26, %v10699_v53  ;;  %v4753_v53 = vadd.f32 %v10335_v16, %v10229_v23  ;;  %v4758_v23 = vadd.f32 %v10335_v16, %v10274_v37  ;;  %v4761_v37 = vadd.f32 %v10335_v16, %v10308_v44 }
 0xf19   : > { %v4455_v12 = vpack.c.bf16 %v4445_v4, %v4444_v59  ;;  %v11588_v4 = vld [vmem:[#allocation13_spill] sm:$0xff] }
 0xf1a   : > { %v8084_v13 = vpop.eup %8083 }
 0xf1b   : > { %7280 = vmatmul.mubr.bf16.gmra.mxu1 %v4455_v12  ;;  %v4447_v40 = vmul.f32 %v8084_v13, %v10703_v36  ;;  %v8086_v62 = vpop.eup %8085  ;;  %v4811_v36 = vpack.c.bf16 %v4754_v15, %v4753_v53  ;;  %v11591_v53 = vld [vmem:[#allocation7_spill] sm:$0xff] }
 0xf1c   : > { %7324 = vmatpush3.bf16.xpose.msra.mxu1 %v10348_v58  ;;  %v4448_v1 = vmul.f32 %v8086_v62, %v10705_v8  ;;  %v4756_v58 = vadd.f32 %v10335_v16, %v10254_v55  ;;  %v4759_v55 = vadd.f32 %v10335_v16, %v10288_v0 }
 0xf1d   : > { %7325 = vmatprep.subr.bf16.mxu1 %v10323_v51  ;;  %v4456_v21 = vpack.c.bf16 %v4447_v40, %v4446_v24  ;;  %v11589_v24 = vld [vmem:[#allocation10_spill] sm:$0xff] }
 0xf1e   : > { %v8088_v38 = vpop.eup %8087 }
 0xf1f   : > { %7283 = vmatprep.mubr.bf16.mxu1 %v4456_v21  ;;  %v4449_v42 = vmul.f32 %v8088_v38, %v10709_v29  ;;  %v11590_v21 = vld [vmem:[#allocation12_spill] sm:$0xff] }
 0xf21   : > { %v4457_v18 = vpack.c.bf16 %v4449_v42, %v4448_v1 }
 0xf23   : > { %7284 = vmatmul.mubr.bf16.gmra.mxu1 %v4457_v18  ;;  %v11592_v18 = vld [vmem:[#allocation9_spill] sm:$0xff] }
 0xf24   : > { %7326 = vmatpush3.bf16.xpose.msra.mxu1 %v10323_v51  ;;  %7335 = vmatprep.mubr.bf16.mxu1 %v4811_v36 }
 0xf25   : > { %7327 = vmatprep.subr.bf16.mxu1 %v10303_v10 }
 0xf2c   : > { %7328 = vmatpush3.bf16.xpose.msra.mxu1 %v10303_v10  ;;  %v4812_v10 = vpack.c.bf16 %v4756_v58, %v4755_v60 }
 0xf2d   : > { %7329 = vmatprep.subr.bf16.mxu1 %v10283_v63 }
 0xf34   : > { %7330 = vmatpush3.bf16.xpose.msra.mxu1 %v10283_v63  ;;  %v4757_v63 = vadd.f32 %v10335_v16, %v10266_v49  ;;  %v11578_v49 = vld [vmem:[#allocation2_spill] sm:$0xff] }
 0xf35   : > { %7331 = vmatprep.subr.bf16.mxu1 %v10261_v11  ;;  %v11579_v29 = vpack.c.bf16 %v10343_v47, %v11578_v49  ;;  %v11586_v47 = vld [vmem:[#allocation16_spill] sm:$0xff] }
 0xf36   : > { %v4813_v51 = vpack.c.bf16 %v4758_v23, %v4757_v63 }
 0xf3c   : > { %7332 = vmatpush3.bf16.xpose.msra.mxu1 %v10261_v11  ;;  %v4760_v11 = vadd.f32 %v10335_v16, %v10296_v19  ;;  %v11582_v19 = vpack.c.bf16 %v11580_v27, %v11581_v52 }
 0xf3d   : > { %7333 = vmatprep.subr.bf16.mxu1 %v10241_v7 }
 0xf3e   : > { %v4814_v54 = vpack.c.bf16 %v4760_v11, %v4759_v55 }
 0xf44   : > { %7334 = vmatpush3.bf16.xpose.msra.mxu1 %v10241_v7  ;;  %v4762_v7 = vadd.f32 %v10335_v16, %v10316_v50  ;;  %v11584_v50 = vld [vmem:[#allocation8_spill] sm:$0xff] }
 0xf45   : > { %v11585_v3 = vpack.c.bf16 %v11583_v56, %v11584_v50 }
 0xf46   : > { %v4815_v8 = vpack.c.bf16 %v4762_v7, %v4761_v37 }
 0xf4b   : > { %7336 = vmatmul.mubr.bf16.vlgmr.msra.gmra.mxu1 %v4812_v10 }
 0xf4c   : > { %7339 = vmatprep.mubr.bf16.mxu1 %v4813_v51 }
 0xf53   : > { %7340 = vmatmul.mubr.bf16.gmra.mxu1 %v4814_v54 }
 0xf54   : > { %7343 = vmatprep.mubr.bf16.mxu1 %v4815_v8 }
 0xf5b   : > { %7344 = vmatmul.mubr.bf16.gmra.mxu1 %v11579_v29 }
 0xf5c   : > { %7347 = vmatprep.mubr.bf16.mxu1 %v11582_v19 }
 0xf63   : > { %7348 = vmatmul.mubr.bf16.gmra.mxu1 %v11585_v3  ;;  %v11594_v3 = vld [vmem:[#allocation17_spill] sm:$0xff] }
 0xfcb   : > { %v7273_v0 = vpop.f32.mrf.mxu1 }
 0xfcd   : > { %v4500_v9 = vpop.f32.mrf.mxu1 }
 0xfcf   : > { %v7274_v33 = vpop.f32.mrf.mxu1 }
 0xfd0   : > { %v4564_v43 = vpack.c.bf16 %v7274_v33, %v7273_v0 }
 0xfd1   : > { %v4503_v44 = vpop.f32.mrf.mxu1 }
 0xfd2   : > { %v4563_v16 = vpack.c.bf16 %v4503_v44, %v4500_v9 }
 0xfd3   : > { %v7277_v20 = vpop.f32.mrf.mxu1 }
 0xfd4   : > { %7303 = vmatprep.mubr.bf16.mxu0 %v4563_v16 }
 0xfd5   : > { %v4516_v46 = vpop.f32.mrf.mxu1  ;;  %7304 = vmatmul.mubr.bf16.vlgmr.msra.gmra.mxu0 %v4564_v43 }
 0xfd6   : > { %7352 = vmatpush3.bf16.msra.mxu0 %v10468_v22 }
 0xfd7   : > { %7353 = vmatprep.subr.bf16.mxu0 %v11586_v47  ;;  %v7278_v2 = vpop.f32.mrf.mxu1 }
 0xfd8   : > { %v4566_v6 = vpack.c.bf16 %v7278_v2, %v7277_v20 }
 0xfd9   : > { %v4519_v5 = vpop.f32.mrf.mxu1 }
 0xfda   : > { %v4565_v30 = vpack.c.bf16 %v4519_v5, %v4516_v46  ;;  %7354 = vmatpush3.bf16.msra.mxu0 %v11586_v47 }
 0xfdb   : > { %7355 = vmatprep.subr.bf16.mxu0 %v11587_v48  ;;  %v7281_v45 = vpop.f32.mrf.mxu1 }
 0xfdc   : > { %7307 = vmatprep.mubr.bf16.mxu0 %v4565_v30 }
 0xfdd   : > { %v4532_v59 = vpop.f32.mrf.mxu1  ;;  %7308 = vmatmul.mubr.bf16.gmra.mxu0 %v4566_v6 }
 0xfde   : > { %7356 = vmatpush3.bf16.msra.mxu0 %v11587_v48 }
 0xfdf   : > { %7357 = vmatprep.subr.bf16.mxu0 %v11588_v4  ;;  %v7282_v26 = vpop.f32.mrf.mxu1 }
 0xfe0   : > { %v4568_v13 = vpack.c.bf16 %v7282_v26, %v7281_v45 }
 0xfe1   : > { %v4535_v22 = vpop.f32.mrf.mxu1 }
 0xfe2   : > { %v4567_v12 = vpack.c.bf16 %v4535_v22, %v4532_v59  ;;  %7358 = vmatpush3.bf16.msra.mxu0 %v11588_v4 }
 0xfe3   : > { %7359 = vmatprep.subr.bf16.mxu0 %v11589_v24  ;;  %v7285_v40 = vpop.f32.mrf.mxu1 }
 0xfe4   : > { %7311 = vmatprep.mubr.bf16.mxu0 %v4567_v12 }
 0xfe5   : > { %v4548_v62 = vpop.f32.mrf.mxu1  ;;  %7312 = vmatmul.mubr.bf16.gmra.mxu0 %v4568_v13 }
 0xfe6   : > { %7360 = vmatpush3.bf16.msra.mxu0 %v11589_v24 }
 0xfe7   : > { %7361 = vmatprep.subr.bf16.mxu0 %v11590_v21  ;;  %v7286_v38 = vpop.f32.mrf.mxu1 }
 0xfe8   : > { %v4570_v42 = vpack.c.bf16 %v7286_v38, %v7285_v40 }
 0xfe9   : > { %v4551_v15 = vpop.f32.mrf.mxu1 }
 0xfea   : > { %v4569_v1 = vpack.c.bf16 %v4551_v15, %v4548_v62  ;;  %7362 = vmatpush3.bf16.msra.mxu0 %v11590_v21 }
 0xfeb   : > { %7363 = vmatprep.subr.bf16.mxu0 %v11591_v53 }
 0xfec   : > { %7315 = vmatprep.mubr.bf16.mxu0 %v4569_v1 }
 0xfed   : > { %7316 = vmatmul.mubr.bf16.gmra.mxu0 %v4570_v42 }
 0xfee   : > { %7364 = vmatpush3.bf16.msra.mxu0 %v11591_v53 }
 0xfef   : > { %7365 = vmatprep.subr.bf16.mxu0 %v11592_v18 }
 0xff2   : > { %7366 = vmatpush3.bf16.msra.mxu0 %v11592_v18 }
0x100b   : > { %v7337_v36 = vpop.f32.mrf.mxu1 }
0x100c   : > { %v4870_v10 = vadd.f32 %v10524_v57, %v7337_v36 }
0x100d   : > { %v4861_v58 = vpop.f32.mrf.mxu1 }
0x100e   : > { %v4862_v23 = vadd.f32 %v10515_v39, %v4861_v58 }
0x100f   : > { %v7338_v60 = vpop.f32.mrf.mxu1 }
0x1010   : > { %4924 = vmax.xlane.f32.xlu0 %v4862_v23  ;;  %v4873_v55 = vadd.f32 %v10539_v35, %v7338_v60 }
0x1011   : > { %v4864_v63 = vpop.f32.mrf.mxu1 }
0x1012   : > { %v4865_v51 = vadd.f32 %v10532_v41, %v4864_v63 }
0x1013   : > { %v7341_v11 = vpop.f32.mrf.mxu1 }
0x1014   : > { %4926 = vmax.xlane.f32.xlu1 %v4865_v51  ;;  %4928 = vmax.xlane.f32.xlu0 %v4870_v10  ;;  %v4886_v39 = vadd.f32 %v10557_v28, %v7341_v11 }
0x1015   : > { %v4877_v7 = vpop.f32.mrf.mxu1 }
0x1016   : > { %v4878_v37 = vadd.f32 %v10547_v14, %v4877_v7 }
0x1017   : > { %v7342_v54 = vpop.f32.mrf.mxu1 }
0x1018   : > { %4930 = vmax.xlane.f32.xlu1 %v4873_v55  ;;  %4932 = vmax.xlane.f32.xlu0 %v4878_v37  ;;  %v4889_v41 = vadd.f32 %v10572_v31, %v7342_v54  ;;  %v11593_v31 = vld [vmem:[#allocation14_spill] sm:$0xff] }
0x1019   : > { %v4880_v8 = vpop.f32.mrf.mxu1 }
0x101a   : > { %v4881_v49 = vadd.f32 %v10565_v25, %v4880_v8 }
0x101b   : > { %v7345_v29 = vpop.f32.mrf.mxu1 }
0x101c   : > { %4934 = vmax.xlane.f32.xlu1 %v4881_v49  ;;  %4936 = vmax.xlane.f32.xlu0 %v4886_v39  ;;  %v10797_v14 = vadd.f32 %v10590_v61, %v7345_v29 }
0x101d   : > { %v4893_v57 = vpop.f32.mrf.mxu1 }
0x101e   : > { %v4894_v27 = vadd.f32 %v10580_v32, %v4893_v57 }
0x101f   : > { %v7346_v52 = vpop.f32.mrf.mxu1 }
0x1020   : > { %4938 = vmax.xlane.f32.xlu1 %v4889_v41  ;;  %4940 = vmax.xlane.f32.xlu0 %v4894_v27  ;;  %v10802_v56 = vadd.f32 %v10608_v17, %v7346_v52  ;;  %v11596_v17 = vld [vmem:[#allocation33_spill] sm:$0xff] }
0x1021   : > { %v4896_v35 = vpop.f32.mrf.mxu1 }
0x1022   : > { %v4897_v19 = vadd.f32 %v10598_v34, %v4896_v35  ;;  %v11595_v34 = vld [vmem:[#allocation15_spill] sm:$0xff] }
0x1023   : > { %v7349_v28 = vpop.f32.mrf.mxu1 }
0x1024   : > { %4942 = vmax.xlane.f32.xlu1 %v4897_v19  ;;  %4944 = vmax.xlane.f32.xlu0 %v10797_v14  ;;  %v10810_v0 = vadd.f32 %v11594_v3, %v7349_v28 }
0x1025   : > { %v4909_v25 = vpop.f32.mrf.mxu1 }
0x1026   : > { %v10805_v50 = vadd.f32 %v11593_v31, %v4909_v25 }
0x1027   : > { %v7350_v32 = vpop.f32.mrf.mxu1 }
0x1028   : > { %4946 = vmax.xlane.f32.xlu1 %v10802_v56  ;;  %4948 = vmax.xlane.f32.xlu0 %v10805_v50  ;;  %v10818_v33 = vadd.f32 %v11596_v17, %v7350_v32 }
0x1029   : > { %v4912_v61 = vpop.f32.mrf.mxu1 }
0x102a   : > { %v10813_v9 = vadd.f32 %v11595_v34, %v4912_v61 }
0x102c   : > { %4950 = vmax.xlane.f32.xlu1 %v10813_v9  ;;  %4952 = vmax.xlane.f32.xlu0 %v10810_v0 }
0x1030   : > { %4954 = vmax.xlane.f32.xlu1 %v10818_v33 }
0x1099   : > { %v4925_v44 = vpop.xlane.xlu0 %4924 }
0x109a   : > { %v4956_v16 = vsub.f32 %v4862_v23, %v4925_v44  ;;  %v7737_v44 = vld [vmem:[%s11404_s1 + $0x1b8] sm:$0xff]  }
0x109b   : > { %7383 = vmatprep.subr.bf16.mxu0 %v7737_v44 }
0x109c   : > { %v4972_v43 = vmul.f32 1.442695, %v4956_v16 }
0x109d   : > { %v4927_v20 = vpop.xlane.xlu1 %4926  ;;  %v4929_v46 = vpop.xlane.xlu0 %4928 }
0x109e   : > { %8089 = vpow2.f32 %v4972_v43  ;;  %v4957_v47 = vsub.f32 %v4865_v51, %v4927_v20  ;;  %v4958_v2 = vsub.f32 %v4870_v10, %v4929_v46 }
0x10a0   : > { %v4974_v5 = vmul.f32 1.442695, %v4957_v47  ;;  %v4976_v30 = vmul.f32 1.442695, %v4958_v2 }
0x10a1   : > { %v4931_v6 = vpop.xlane.xlu1 %4930  ;;  %v4933_v48 = vpop.xlane.xlu0 %4932 }
0x10a2   : > { %8091 = vpow2.f32 %v4974_v5  ;;  %v4959_v45 = vsub.f32 %v4873_v55, %v4931_v6  ;;  %v4960_v59 = vsub.f32 %v4878_v37, %v4933_v48 }
0x10a3   : > { %8093 = vpow2.f32 %v4976_v30 }
0x10a4   : > { %v4978_v4 = vmul.f32 1.442695, %v4959_v45  ;;  %v4980_v26 = vmul.f32 1.442695, %v4960_v59 }
0x10a5   : > { %v4935_v22 = vpop.xlane.xlu1 %4934  ;;  %v4937_v12 = vpop.xlane.xlu0 %4936 }
0x10a6   : > { %8095 = vpow2.f32 %v4978_v4  ;;  %v4961_v13 = vsub.f32 %v4881_v49, %v4935_v22  ;;  %v4962_v24 = vsub.f32 %v4886_v39, %v4937_v12 }
0x10a7   : > { %8097 = vpow2.f32 %v4980_v26 }
0x10a8   : > { %v4982_v40 = vmul.f32 1.442695, %v4961_v13  ;;  %v4984_v62 = vmul.f32 1.442695, %v4962_v24 }
0x10a9   : > { %v4939_v21 = vpop.xlane.xlu1 %4938  ;;  %v4941_v38 = vpop.xlane.xlu0 %4940 }
0x10aa   : > { %8099 = vpow2.f32 %v4982_v40  ;;  %v4963_v15 = vsub.f32 %v4889_v41, %v4939_v21  ;;  %v4964_v1 = vsub.f32 %v4894_v27, %v4941_v38 }
0x10ab   : > { %v10821_v42 = vpop.eup %8089  ;;  %8101 = vpow2.f32 %v4984_v62 }
0x10ac   : > { %v4986_v53 = vmul.f32 1.442695, %v4963_v15  ;;  %v4988_v18 = vmul.f32 1.442695, %v4964_v1  ;;  %5004 = vadd.xlane.f32.xlu0 %v10821_v42 }
0x10ad   : > { %v4943_v36 = vpop.xlane.xlu1 %4942  ;;  %v4945_v58 = vpop.xlane.xlu0 %4944 }
0x10ae   : > { %8103 = vpow2.f32 %v4986_v53  ;;  %v4965_v23 = vsub.f32 %v4897_v19, %v4943_v36  ;;  %v4966_v60 = vsub.f32 %v10797_v14, %v4945_v58 }
0x10af   : > { %v10825_v63 = vpop.eup %8091  ;;  %8105 = vpow2.f32 %v4988_v18 }
0x10b0   : > { %v10827_v10 = vpop.eup %8093  ;;  %v4990_v51 = vmul.f32 1.442695, %v4965_v23  ;;  %v4992_v11 = vmul.f32 1.442695, %v4966_v60  ;;  %5006 = vadd.xlane.f32.xlu1 %v10825_v63 }
0x10b1   : > { %5008 = vadd.xlane.f32.xlu0 %v10827_v10  ;;  %v4947_v7 = vpop.xlane.xlu1 %4946  ;;  %v4949_v55 = vpop.xlane.xlu0 %4948 }
0x10b2   : > { %8107 = vpow2.f32 %v4990_v51  ;;  %v4967_v37 = vsub.f32 %v10802_v56, %v4947_v7  ;;  %v4968_v54 = vsub.f32 %v10805_v50, %v4949_v55 }
0x10b3   : > { %v10833_v8 = vpop.eup %8095  ;;  %8109 = vpow2.f32 %v4992_v11 }
0x10b4   : > { %v10835_v39 = vpop.eup %8097  ;;  %v4994_v49 = vmul.f32 1.442695, %v4967_v37  ;;  %v4996_v29 = vmul.f32 1.442695, %v4968_v54  ;;  %5010 = vadd.xlane.f32.xlu1 %v10833_v8 }
0x10b5   : > { %5012 = vadd.xlane.f32.xlu0 %v10835_v39  ;;  %v4951_v57 = vpop.xlane.xlu1 %4950  ;;  %v4953_v41 = vpop.xlane.xlu0 %4952 }
0x10b6   : > { %8111 = vpow2.f32 %v4994_v49  ;;  %v4969_v27 = vsub.f32 %v10813_v9, %v4951_v57  ;;  %v4970_v52 = vsub.f32 %v10810_v0, %v4953_v41 }
0x10b7   : > { %v10841_v35 = vpop.eup %8099  ;;  %8113 = vpow2.f32 %v4996_v29 }
0x10b8   : > { %v10843_v14 = vpop.eup %8101  ;;  %v4998_v19 = vmul.f32 1.442695, %v4969_v27  ;;  %v5000_v28 = vmul.f32 1.442695, %v4970_v52  ;;  %5014 = vadd.xlane.f32.xlu1 %v10841_v35  ;;  %v7741_v27 = vld [vmem:[%s11404_s1 + $0x198] sm:$0xff]  }
0x10b9   : > { %5016 = vadd.xlane.f32.xlu0 %v10843_v14  ;;  %v4955_v25 = vpop.xlane.xlu1 %4954 }
0x10ba   : > { %8115 = vpow2.f32 %v4998_v19  ;;  %v4971_v56 = vsub.f32 %v10818_v33, %v4955_v25  ;;  %v7742_v25 = vld [vmem:[%s11404_s1 + $0x190] sm:$0xff]  }
0x10bb   : > { %v10848_v31 = vpop.eup %8103  ;;  %8117 = vpow2.f32 %v5000_v28 }
0x10bc   : > { %v10850_v50 = vpop.eup %8105  ;;  %v5002_v32 = vmul.f32 1.442695, %v4971_v56  ;;  %5018 = vadd.xlane.f32.xlu1 %v10848_v31 }
0x10bd   : > { %5020 = vadd.xlane.f32.xlu0 %v10850_v50 }
0x10be   : > { %8119 = vpow2.f32 %v5002_v32 }
0x10bf   : > { %v10854_v61 = vpop.eup %8107 }
0x10c0   : > { %v10856_v3 = vpop.eup %8109  ;;  %5022 = vadd.xlane.f32.xlu1 %v10854_v61 }
0x10c1   : > { %5024 = vadd.xlane.f32.xlu0 %v10856_v3 }
0x10c3   : > { %v10860_v0 = vpop.eup %8111 }
0x10c4   : > { %v10862_v34 = vpop.eup %8113  ;;  %5026 = vadd.xlane.f32.xlu1 %v10860_v0 }
0x10c5   : > { %5028 = vadd.xlane.f32.xlu0 %v10862_v34 }
0x10c7   : > { %v10866_v9 = vpop.eup %8115 }
0x10c8   : > { %v10868_v17 = vpop.eup %8117  ;;  %5030 = vadd.xlane.f32.xlu1 %v10866_v9 }
0x10c9   : > { %5032 = vadd.xlane.f32.xlu0 %v10868_v17 }
0x10cb   : > { %v10872_v33 = vpop.eup %8119 }
0x10cc   : > { %5034 = vadd.xlane.f32.xlu1 %v10872_v33 }
0x1135   : > { %v5005_v16 = vpop.xlane.xlu0 %5004 }
0x1136   : > { %8121 = vrcp.f32 %v5005_v16 }
0x1139   : > { %v5007_v43 = vpop.xlane.xlu1 %5006 }
0x113a   : > { %8123 = vrcp.f32 %v5007_v43  ;;  %v5009_v20 = vpop.xlane.xlu0 %5008  ;;  %v7743_v43 = vld [vmem:[%s11404_s1 + $0x188] sm:$0xff]  }
0x113b   : > { %8125 = vrcp.f32 %v5009_v20 }
0x113d   : > { %v5011_v46 = vpop.xlane.xlu1 %5010 }
0x113e   : > { %8127 = vrcp.f32 %v5011_v46  ;;  %v5013_v47 = vpop.xlane.xlu0 %5012 }
0x113f   : > { %8129 = vrcp.f32 %v5013_v47 }
0x1141   : > { %v5015_v2 = vpop.xlane.xlu1 %5014 }
0x1142   : > { %8131 = vrcp.f32 %v5015_v2  ;;  %v5017_v5 = vpop.xlane.xlu0 %5016 }
0x1143   : > { %8133 = vrcp.f32 %v5017_v5  ;;  %v8122_v30 = vpop.eup %8121 }
0x1144   : > { %v5052_v59 = vmul.f32 %v8122_v30, %v10821_v42  ;;  %v7738_v42 = vld [vmem:[%s11404_s1 + $0x1b0] sm:$0xff]  }
0x1145   : > { %v5019_v6 = vpop.xlane.xlu1 %5018 }
0x1146   : > { %8135 = vrcp.f32 %v5019_v6  ;;  %v5021_v48 = vpop.xlane.xlu0 %5020 }
0x1147   : > { %v8124_v45 = vpop.eup %8123  ;;  %8137 = vrcp.f32 %v5021_v48 }
0x1148   : > { %v5053_v4 = vmul.f32 %v8124_v45, %v10825_v63  ;;  %v8126_v26 = vpop.eup %8125 }
0x1149   : > { %v5023_v22 = vpop.xlane.xlu1 %5022  ;;  %v5054_v40 = vmul.f32 %v8126_v26, %v10827_v10  ;;  %v7739_v10 = vld [vmem:[%s11404_s1 + $0x1a8] sm:$0xff]  }
0x114a   : > { %8139 = vrcp.f32 %v5023_v22  ;;  %v5025_v12 = vpop.xlane.xlu0 %5024  ;;  %v5068_v13 = vpack.c.bf16 %v5053_v4, %v5052_v59 }
0x114b   : > { %v8128_v24 = vpop.eup %8127  ;;  %8141 = vrcp.f32 %v5025_v12 }
0x114c   : > { %v5055_v62 = vmul.f32 %v8128_v24, %v10833_v8  ;;  %7367 = vmatprep.mubr.bf16.mxu0 %v5068_v13  ;;  %v8130_v21 = vpop.eup %8129  ;;  %v7740_v8 = vld [vmem:[%s11404_s1 + $0x1a0] sm:$0xff]  }
0x114d   : > { %v5027_v38 = vpop.xlane.xlu1 %5026  ;;  %v5056_v18 = vmul.f32 %v8130_v21, %v10835_v39 }
0x114e   : > { %v5069_v15 = vpack.c.bf16 %v5055_v62, %v5054_v40  ;;  %8143 = vrcp.f32 %v5027_v38  ;;  %v5029_v1 = vpop.xlane.xlu0 %5028 }
0x114f   : > { %v8132_v53 = vpop.eup %8131  ;;  %8145 = vrcp.f32 %v5029_v1 }
0x1150   : > { %7368 = vmatmul.mubr.bf16.vlgmr.msra.gmra.mxu0 %v5069_v15  ;;  %v5057_v36 = vmul.f32 %v8132_v53, %v10841_v35  ;;  %v8134_v58 = vpop.eup %8133 }
0x1151   : > { %v5031_v23 = vpop.xlane.xlu1 %5030  ;;  %7384 = vmatpush3.bf16.msra.mxu0 %v7737_v44  ;;  %v5058_v11 = vmul.f32 %v8134_v58, %v10843_v14 }
0x1152   : > { %8147 = vrcp.f32 %v5031_v23  ;;  %v5033_v60 = vpop.xlane.xlu0 %5032  ;;  %v5070_v63 = vpack.c.bf16 %v5057_v36, %v5056_v18  ;;  %7385 = vmatprep.subr.bf16.mxu0 %v7738_v42 }
0x1153   : > { %v8136_v51 = vpop.eup %8135  ;;  %8149 = vrcp.f32 %v5033_v60 }
0x1154   : > { %7371 = vmatprep.mubr.bf16.mxu0 %v5070_v63  ;;  %v5059_v7 = vmul.f32 %v8136_v51, %v10848_v31  ;;  %v8138_v55 = vpop.eup %8137 }
0x1155   : > { %v5035_v37 = vpop.xlane.xlu1 %5034  ;;  %7386 = vmatpush3.bf16.msra.mxu0 %v7738_v42  ;;  %v5060_v49 = vmul.f32 %v8138_v55, %v10850_v50 }
0x1156   : > { %8151 = vrcp.f32 %v5035_v37  ;;  %v5071_v54 = vpack.c.bf16 %v5059_v7, %v5058_v11  ;;  %7387 = vmatprep.subr.bf16.mxu0 %v7739_v10 }
0x1157   : > { %v8140_v39 = vpop.eup %8139 }
0x1158   : > { %7372 = vmatmul.mubr.bf16.gmra.mxu0 %v5071_v54  ;;  %v5061_v29 = vmul.f32 %v8140_v39, %v10854_v61  ;;  %v8142_v57 = vpop.eup %8141 }
0x1159   : > { %7388 = vmatpush3.bf16.msra.mxu0 %v7739_v10  ;;  %v5062_v35 = vmul.f32 %v8142_v57, %v10856_v3  ;;  %v11598_v57 = vld [vmem:[#allocation18_spill] sm:$0xff] }
0x115a   : > { %v5072_v41 = vpack.c.bf16 %v5061_v29, %v5060_v49  ;;  %7389 = vmatprep.subr.bf16.mxu0 %v7740_v8  ;;  %v10943_v29 = vld [vmem:[%s11406_s3 + $0x108] ss:$0 sm:$0xff] }
0x115b   : > { %v8144_v52 = vpop.eup %8143 }
0x115c   : > { %7375 = vmatprep.mubr.bf16.mxu0 %v5072_v41  ;;  %v5063_v14 = vmul.f32 %v8144_v52, %v10860_v0  ;;  %v8146_v19 = vpop.eup %8145 }
0x115d   : > { %7390 = vmatpush3.bf16.msra.mxu0 %v7740_v8  ;;  %v5064_v31 = vmul.f32 %v8146_v19, %v10862_v34  ;;  %v7744_v34 = vld [vmem:[%s11404_s1 + $0x180] sm:$0xff]   ;;  %v11597_v8 = vld [vmem:[#allocation21_spill] sm:$0xff] }
0x115e   : > { %v5073_v28 = vpack.c.bf16 %v5063_v14, %v5062_v35  ;;  %7391 = vmatprep.subr.bf16.mxu0 %v7741_v27  ;;  %v11599_v35 = vld [vmem:[#allocation20_spill] sm:$0xff] }
0x115f   : > { %v8148_v56 = vpop.eup %8147 }
0x1160   : > { %7376 = vmatmul.mubr.bf16.gmra.mxu0 %v5073_v28  ;;  %v5065_v50 = vmul.f32 %v8148_v56, %v10866_v9  ;;  %v8150_v32 = vpop.eup %8149  ;;  %v7305_v9 = vpop.f32.mrf.mxu0  ;;  %v11600_v56 = vld [vmem:[#allocation19_spill] sm:$0xff] }
0x1161   : > { %7392 = vmatpush3.bf16.msra.mxu0 %v7741_v27  ;;  %v5066_v0 = vmul.f32 %v8150_v32, %v10868_v17  ;;  %v4734_v39 = vadd.f32 %v7305_v9, %v11597_v8  ;;  %v11601_v9 = vld [vmem:[#allocation26_spill] sm:$0xff]  ;;  %v11606_v8 = vld [vmem:[#allocation24_spill] sm:$0xff] }
0x1162   : > { %v5074_v61 = vpack.c.bf16 %v5065_v50, %v5064_v31  ;;  %7393 = vmatprep.subr.bf16.mxu0 %v7742_v25  ;;  %v4669_v20 = vpop.f32.mrf.mxu0 }
0x1163   : > { %v8152_v3 = vpop.eup %8151  ;;  %v4732_v41 = vadd.f32 %v4669_v20, %v11598_v57  ;;  %v7747_v57 = vld [vmem:[%s11404_s1 + $0x1e8] sm:$0xff]  }
0x1164   : > { %7379 = vmatprep.mubr.bf16.mxu0 %v5074_v61  ;;  %v5067_v44 = vmul.f32 %v8152_v3, %v10872_v33  ;;  %v7306_v17 = vpop.f32.mrf.mxu0 }
0x1165   : > { %7394 = vmatpush3.bf16.msra.mxu0 %v7742_v25  ;;  %v4735_v14 = vadd.f32 %v7306_v17, %v11599_v35 }
0x1166   : > { %v5075_v16 = vpack.c.bf16 %v5067_v44, %v5066_v0  ;;  %7395 = vmatprep.subr.bf16.mxu0 %v7743_v43  ;;  %v4672_v46 = vpop.f32.mrf.mxu0 }
0x1167   : > { %v4733_v31 = vadd.f32 %v4672_v46, %v11600_v56 }
0x1168   : > { %7380 = vmatmul.mubr.bf16.gmra.mxu0 %v5075_v16  ;;  %v10915_v33 = vpop.f32.mrf.mxu0 }
0x1169   : > { %7396 = vmatpush3.bf16.msra.mxu0 %v7743_v43  ;;  %v4738_v20 = vadd.f32 %v10915_v33, %v11601_v9  ;;  %v7750_v9 = vld [vmem:[%s11404_s1 + $0x1d0] sm:$0xff]  }
0x116a   : > { %7397 = vmatprep.subr.bf16.mxu0 %v7744_v34  ;;  %v10917_v47 = vpop.f32.mrf.mxu0 }
0x116c   : > { %v10919_v2 = vpop.f32.mrf.mxu0 }
0x116d   : > { %7398 = vmatpush3.bf16.msra.mxu0 %v7744_v34 }
0x116e   : > { %v10921_v5 = vpop.f32.mrf.mxu0 }
0x1170   : > { %v10923_v30 = vpop.f32.mrf.mxu0 }
0x1172   : > { %v10925_v6 = vpop.f32.mrf.mxu0 }
0x1174   : > { %v10927_v48 = vpop.f32.mrf.mxu0 }
0x1176   : > { %v10929_v45 = vpop.f32.mrf.mxu0 }
0x1178   : > { %v10931_v59 = vpop.f32.mrf.mxu0 }
0x117a   : > { %v10933_v4 = vpop.f32.mrf.mxu0 }
0x117c   : > { %v10935_v26 = vpop.f32.mrf.mxu0 }
0x117e   : > { %v10937_v22 = vpop.f32.mrf.mxu0 }
0x1210   : > { %v7369_v12 = vpop.f32.mrf.mxu0 }
0x1212   : > { %v5118_v13 = vpop.f32.mrf.mxu0 }
0x1214   : > { %v7370_v24 = vpop.f32.mrf.mxu0 }
0x1215   : > { %v5182_v21 = vpack.c.bf16 %v7370_v24, %v7369_v12  ;;  %v11602_v24 = vld [vmem:[#allocation28_spill] sm:$0xff] }
0x1216   : > { %v5121_v40 = vpop.f32.mrf.mxu0 }
0x1217   : > { %v5181_v62 = vpack.c.bf16 %v5121_v40, %v5118_v13  ;;  %v4736_v40 = vadd.f32 %v10917_v47, %v11602_v24  ;;  %v11611_v24 = vld [vmem:[#allocation4_spill] sm:$0xff] }
0x1218   : > { %v7373_v38 = vpop.f32.mrf.mxu0 }
0x1219   : > { %7399 = vmatprep.mubr.bf16.mxu0 %v5181_v62  ;;  %v11603_v62 = vld [vmem:[#allocation25_spill] sm:$0xff] }
0x121a   : > { %v5134_v15 = vpop.f32.mrf.mxu0  ;;  %7400 = vmatmul.mubr.bf16.vlgmr.msra.gmra.mxu0 %v5182_v21  ;;  %v4739_v21 = vadd.f32 %v10919_v2, %v11603_v62  ;;  %v7751_v62 = vld [vmem:[%s11404_s1 + $0x1c8] sm:$0xff]  }
0x121c   : > { %v7374_v1 = vpop.f32.mrf.mxu0 }
0x121d   : > { %v5184_v18 = vpack.c.bf16 %v7374_v1, %v7373_v38 }
0x121e   : > { %v5137_v42 = vpop.f32.mrf.mxu0 }
0x121f   : > { %v5183_v53 = vpack.c.bf16 %v5137_v42, %v5134_v15 }
0x1220   : > { %v7377_v36 = vpop.f32.mrf.mxu0 }
0x1221   : > { %7403 = vmatprep.mubr.bf16.mxu0 %v5183_v53  ;;  %v11604_v53 = vld [vmem:[#allocation27_spill] sm:$0xff] }
0x1222   : > { %v5150_v58 = vpop.f32.mrf.mxu0  ;;  %7404 = vmatmul.mubr.bf16.gmra.mxu0 %v5184_v18  ;;  %v4737_v18 = vadd.f32 %v10921_v5, %v11604_v53  ;;  %v7752_v53 = vld [vmem:[%s11404_s1 + $0x1c0] sm:$0xff]  }
0x1224   : > { %v7378_v23 = vpop.f32.mrf.mxu0 }
0x1225   : > { %v5186_v10 = vpack.c.bf16 %v7378_v23, %v7377_v36  ;;  %v7745_v23 = vld [vmem:[%s11404_s1 + $0x1f8] sm:$0xff]  }
0x1226   : > { %v5153_v60 = vpop.f32.mrf.mxu0  ;;  %7415 = vmatprep.subr.bf16.mxu1 %v7745_v23 }
0x1227   : > { %v5185_v63 = vpack.c.bf16 %v5153_v60, %v5150_v58  ;;  %7416 = vmatpush3.bf16.msra.mxu1 %v7745_v23 }
0x1228   : > { %v7381_v51 = vpop.f32.mrf.mxu0 }
0x1229   : > { %7407 = vmatprep.mubr.bf16.mxu0 %v5185_v63 }
0x122a   : > { %v5166_v11 = vpop.f32.mrf.mxu0  ;;  %7408 = vmatmul.mubr.bf16.gmra.mxu0 %v5186_v10  ;;  %v11605_v10 = vld [vmem:[#allocation22_spill] sm:$0xff] }
0x122c   : > { %v7382_v7 = vpop.f32.mrf.mxu0 }
0x122d   : > { %v5188_v54 = vpack.c.bf16 %v7382_v7, %v7381_v51  ;;  %v4742_v51 = vadd.f32 %v10923_v30, %v11605_v10  ;;  %v4740_v30 = vadd.f32 %v10925_v6, %v11606_v8  ;;  %v11608_v6 = vld [vmem:[#allocation23_spill] sm:$0xff] }
0x122e   : > { %v5169_v55 = vpop.f32.mrf.mxu0 }
0x122f   : > { %v5187_v37 = vpack.c.bf16 %v5169_v55, %v5166_v11  ;;  %v7746_v11 = vld [vmem:[%s11404_s1 + $0x1f0] sm:$0xff]  }
0x1230   : > { %7417 = vmatprep.subr.bf16.mxu1 %v7746_v11 }
0x1231   : > { %7411 = vmatprep.mubr.bf16.mxu0 %v5187_v37  ;;  %7418 = vmatpush3.bf16.msra.mxu1 %v7746_v11 }
0x1232   : > { %7412 = vmatmul.mubr.bf16.gmra.mxu0 %v5188_v54  ;;  %7419 = vmatprep.subr.bf16.mxu1 %v7747_v57 }
0x1235   : > { %7420 = vmatpush3.bf16.msra.mxu1 %v7747_v57 }
0x12da   : > { %v7401_v49 = vpop.f32.mrf.mxu0 }
0x12db   : > { %v5352_v27 = vadd.f32 %v7401_v49, %v4734_v39  ;;  %v11607_v39 = vld [vmem:[#allocation29_spill] sm:$0xff] }
0x12dc   : > { %v5287_v52 = vpop.f32.mrf.mxu0  ;;  %v4743_v49 = vadd.f32 %v10927_v48, %v11607_v39  ;;  %v4741_v48 = vadd.f32 %v10929_v45, %v11608_v6  ;;  %v7749_v45 = vld [vmem:[%s11404_s1 + $0x1d8] sm:$0xff]  }
0x12dd   : > { %v10948_v19 = vadd.f32 %v10943_v29, %v5352_v27  ;;  %v5350_v28 = vadd.f32 %v5287_v52, %v4732_v41 }
0x12de   : > { %v7402_v25 = vpop.f32.mrf.mxu0 }
0x12df   : > { %v5353_v50 = vadd.f32 %v7402_v25, %v4735_v14  ;;  %5391 = vadd.xlane.f32.xlu0 %v10948_v19  ;;  %v10953_v61 = vadd.f32 %v10943_v29, %v5350_v28  ;;  %v5437_v43 = vmul.f32 %v10948_v19, %v10948_v19  ;;  %v7748_v28 = vld [vmem:[%s11404_s1 + $0x1e0] sm:$0xff]  }
0x12e0   : > { %v5290_v32 = vpop.f32.mrf.mxu0  ;;  %7421 = vmatprep.subr.bf16.mxu1 %v7748_v28 }
0x12e1   : > { %v10956_v3 = vadd.f32 %v10943_v29, %v5353_v50  ;;  %v5351_v0 = vadd.f32 %v5290_v32, %v4733_v31  ;;  %v5435_v46 = vmul.f32 %v10953_v61, %v10953_v61  ;;  %7422 = vmatpush3.bf16.msra.mxu1 %v7748_v28 }
0x12e2   : > { %v7405_v44 = vpop.f32.mrf.mxu0  ;;  %7423 = vmatprep.subr.bf16.mxu1 %v7749_v45 }
0x12e3   : > { %5387 = vadd.xlane.f32.xlu0 %v10953_v61  ;;  %5393 = vadd.xlane.f32.xlu1 %v10956_v3  ;;  %v10961_v16 = vadd.f32 %v10943_v29, %v5351_v0  ;;  %v5356_v17 = vadd.f32 %v7405_v44, %v4738_v20  ;;  %v5438_v12 = vmul.f32 %v10956_v3, %v10956_v3 }
0x12e4   : > { %v5303_v34 = vpop.f32.mrf.mxu0 }
0x12e5   : > { %v10977_v33 = vadd.f32 %v10943_v29, %v5356_v17  ;;  %v5354_v38 = vadd.f32 %v5303_v34, %v4736_v40  ;;  %v5436_v1 = vmul.f32 %v10961_v16, %v10961_v16  ;;  %7424 = vmatpush3.bf16.msra.mxu1 %v7749_v45  ;;  %v4747_v40 = vadd.f32 %v10935_v26, %v11611_v24 }
0x12e6   : > { %v7406_v13 = vpop.f32.mrf.mxu0  ;;  %7425 = vmatprep.subr.bf16.mxu1 %v7750_v9 }
0x12e7   : > { %5455 = vadd.xlane.f32.xlu0 %v5437_v43  ;;  %5389 = vadd.xlane.f32.xlu1 %v10961_v16  ;;  %v5357_v15 = vadd.f32 %v7406_v13, %v4739_v21  ;;  %v10985_v47 = vadd.f32 %v10943_v29, %v5354_v38  ;;  %v5441_v60 = vmul.f32 %v10977_v33, %v10977_v33  ;;  %v11609_v43 = vld [vmem:[#allocation32_spill] sm:$0xff]  ;;  %v11610_v13 = vld [vmem:[#allocation30_spill] sm:$0xff] }
0x12e8   : > { %v5306_v42 = vpop.f32.mrf.mxu0  ;;  %v4746_v34 = vadd.f32 %v10931_v59, %v11609_v43  ;;  %v4744_v59 = vadd.f32 %v10933_v4, %v11610_v13  ;;  %v11612_v4 = vld [vmem:[#allocation31_spill] sm:$0xff] }
0x12e9   : > { %v10988_v2 = vadd.f32 %v10943_v29, %v5357_v15  ;;  %v5355_v36 = vadd.f32 %v5306_v42, %v4737_v18  ;;  %v5439_v55 = vmul.f32 %v10985_v47, %v10985_v47  ;;  %7426 = vmatpush3.bf16.msra.mxu1 %v7750_v9  ;;  %v4745_v26 = vadd.f32 %v10937_v22, %v11612_v4 }
0x12ea   : > { %v7409_v58 = vpop.f32.mrf.mxu0  ;;  %7427 = vmatprep.subr.bf16.mxu1 %v7751_v62 }
0x12eb   : > { %5451 = vadd.xlane.f32.xlu0 %v5435_v46  ;;  %5457 = vadd.xlane.f32.xlu1 %v5438_v12  ;;  %v10996_v5 = vadd.f32 %v10943_v29, %v5355_v36  ;;  %v5360_v7 = vadd.f32 %v7409_v58, %v4742_v51  ;;  %v5442_v37 = vmul.f32 %v10988_v2, %v10988_v2 }
0x12ec   : > { %v5319_v63 = vpop.f32.mrf.mxu0 }
0x12ed   : > { %v11018_v41 = vadd.f32 %v10943_v29, %v5360_v7  ;;  %v5358_v27 = vadd.f32 %v5319_v63, %v4740_v30  ;;  %v5440_v35 = vmul.f32 %v10996_v5, %v10996_v5  ;;  %7428 = vmatpush3.bf16.msra.mxu1 %v7751_v62 }
0x12ee   : > { %v7410_v54 = vpop.f32.mrf.mxu0  ;;  %7429 = vmatprep.subr.bf16.mxu1 %v7752_v53 }
0x12ef   : > { %5453 = vadd.xlane.f32.xlu1 %v5436_v1  ;;  %5399 = vadd.xlane.f32.xlu0 %v10977_v33  ;;  %v5361_v52 = vadd.f32 %v7410_v54, %v4743_v49  ;;  %v11029_v25 = vadd.f32 %v10943_v29, %v5358_v27  ;;  %v5445_v0 = vmul.f32 %v11018_v41, %v11018_v41 }
0x12f0   : > { %v5322_v14 = vpop.f32.mrf.mxu0 }
0x12f1   : > { %v11032_v56 = vadd.f32 %v10943_v29, %v5361_v52  ;;  %v5359_v31 = vadd.f32 %v5322_v14, %v4741_v48  ;;  %v5443_v17 = vmul.f32 %v11029_v25, %v11029_v25  ;;  %7430 = vmatpush3.bf16.msra.mxu1 %v7752_v53 }
0x12f2   : > { %v7413_v50 = vpop.f32.mrf.mxu0 }
0x12f3   : > { %5395 = vadd.xlane.f32.xlu0 %v10985_v47  ;;  %5401 = vadd.xlane.f32.xlu1 %v10988_v2  ;;  %v11040_v32 = vadd.f32 %v10943_v29, %v5359_v31  ;;  %v5364_v20 = vadd.f32 %v7413_v50, %v4746_v34  ;;  %v5446_v46 = vmul.f32 %v11032_v56, %v11032_v56 }
0x12f4   : > { %v5335_v44 = vpop.f32.mrf.mxu0 }
0x12f5   : > { %v11062_v21 = vadd.f32 %v10943_v29, %v5364_v20  ;;  %v5362_v38 = vadd.f32 %v5335_v44, %v4744_v59  ;;  %v5444_v1 = vmul.f32 %v11040_v32, %v11040_v32 }
0x12f6   : > { %v7414_v12 = vpop.f32.mrf.mxu0 }
0x12f7   : > { %5463 = vadd.xlane.f32.xlu0 %v5441_v60  ;;  %5397 = vadd.xlane.f32.xlu1 %v10996_v5  ;;  %v5365_v15 = vadd.f32 %v7414_v12, %v4747_v40  ;;  %v11073_v18 = vadd.f32 %v10943_v29, %v5362_v38  ;;  %v5449_v60 = vmul.f32 %v11062_v21, %v11062_v21 }
0x12f8   : > { %v5338_v42 = vpop.f32.mrf.mxu0 }
0x12f9   : > { %v11076_v36 = vadd.f32 %v10943_v29, %v5365_v15  ;;  %v5363_v58 = vadd.f32 %v5338_v42, %v4745_v26  ;;  %v5447_v23 = vmul.f32 %v11073_v18, %v11073_v18 }
0x12fb   : > { %5459 = vadd.xlane.f32.xlu0 %v5439_v55  ;;  %5465 = vadd.xlane.f32.xlu1 %v5442_v37  ;;  %v11081_v22 = vadd.f32 %v10943_v29, %v5363_v58  ;;  %v5450_v10 = vmul.f32 %v11076_v36, %v11076_v36 }
0x12fd   : > { %v5448_v63 = vmul.f32 %v11081_v22, %v11081_v22 }
0x12ff   : > { %5461 = vadd.xlane.f32.xlu1 %v5440_v35  ;;  %5407 = vadd.xlane.f32.xlu0 %v11018_v41 }
0x1303   : > { %5403 = vadd.xlane.f32.xlu0 %v11029_v25  ;;  %5409 = vadd.xlane.f32.xlu1 %v11032_v56 }
0x1307   : > { %5471 = vadd.xlane.f32.xlu0 %v5445_v0  ;;  %5405 = vadd.xlane.f32.xlu1 %v11040_v32 }
0x130b   : > { %5467 = vadd.xlane.f32.xlu0 %v5443_v17  ;;  %5473 = vadd.xlane.f32.xlu1 %v5446_v46 }
0x130f   : > { %5469 = vadd.xlane.f32.xlu1 %v5444_v1  ;;  %5415 = vadd.xlane.f32.xlu0 %v11062_v21 }
0x1313   : > { %5411 = vadd.xlane.f32.xlu0 %v11073_v18  ;;  %5417 = vadd.xlane.f32.xlu1 %v11076_v36 }
0x1317   : > { %5475 = vadd.xlane.f32.xlu0 %v5447_v23  ;;  %5413 = vadd.xlane.f32.xlu1 %v11081_v22 }
0x131b   : > { %5479 = vadd.xlane.f32.xlu0 %v5449_v60  ;;  %5477 = vadd.xlane.f32.xlu1 %v5448_v63 }
0x131f   : > { %5481 = vadd.xlane.f32.xlu1 %v5450_v10 }
0x1368   : > { %v5392_v29 = vpop.xlane.xlu0 %5391 }
0x1369   : > { %v11092_v7 = vmul.f32 0.03125, %v5392_v29 }
0x136b   : > { %v5501_v8 = vmul.f32 %v11092_v7, %v11092_v7 }
0x136c   : > { %v5388_v51 = vpop.xlane.xlu0 %5387  ;;  %v5394_v11 = vpop.xlane.xlu1 %5393 }
0x136d   : > { %v11094_v55 = vmul.f32 0.03125, %v5388_v51  ;;  %v11098_v30 = vmul.f32 0.03125, %v5394_v11 }
0x136f   : > { %v5499_v57 = vmul.f32 %v11094_v55, %v11094_v55  ;;  %v5502_v35 = vmul.f32 %v11098_v30, %v11098_v30 }
0x1370   : > { %v5456_v37 = vpop.xlane.xlu0 %5455  ;;  %v5390_v54 = vpop.xlane.xlu1 %5389 }
0x1371   : > { %v5485_v39 = vmul.f32 0.03125, %v5456_v37  ;;  %v11104_v14 = vmul.f32 0.03125, %v5390_v54 }
0x1373   : > { %v5517_v49 = vsub.f32 %v5485_v39, %v5501_v8  ;;  %v5500_v44 = vmul.f32 %v11104_v14, %v11104_v14 }
0x1374   : > { %v5452_v27 = vpop.xlane.xlu0 %5451  ;;  %v5458_v52 = vpop.xlane.xlu1 %5457 }
0x1375   : > { %v5483_v6 = vmul.f32 0.03125, %v5452_v27  ;;  %v5486_v48 = vmul.f32 0.03125, %v5458_v52  ;;  %v5533_v28 = vmax.f32 %v5517_v49, 0.0 }
0x1377   : > { %v5515_v31 = vsub.f32 %v5483_v6, %v5499_v57  ;;  %v5518_v50 = vsub.f32 %v5486_v48, %v5502_v35  ;;  %v5565_v20 = vadd.f32 1e-12, %v5533_v28 }
0x1378   : > { %v5454_v45 = vpop.xlane.xlu1 %5453  ;;  %v5400_v0 = vpop.xlane.xlu0 %5399 }
0x1379   : > { %v5531_v43 = vmax.f32 %v5515_v31, 0.0  ;;  %v5534_v34 = vmax.f32 %v5518_v50, 0.0  ;;  %v5484_v9 = vmul.f32 0.03125, %v5454_v45  ;;  %v11108_v40 = vmul.f32 0.03125, %v5400_v0 }
0x137a   : > { %8153 = vrsqrt.f32 %v5565_v20  ;;  %v5547_v20 = vsub.f32 %v10953_v61, %v11094_v55 }
0x137b   : > { %v5566_v17 = vadd.f32 1e-12, %v5534_v34  ;;  %v5516_v46 = vsub.f32 %v5484_v9, %v5500_v44  ;;  %v5563_v12 = vadd.f32 1e-12, %v5531_v43  ;;  %v5505_v42 = vmul.f32 %v11108_v40, %v11108_v40 }
0x137c   : > { %v5396_v13 = vpop.xlane.xlu0 %5395  ;;  %v5402_v59 = vpop.xlane.xlu1 %5401  ;;  %v5550_v43 = vsub.f32 %v10956_v3, %v11098_v30 }
0x137d   : > { %v5532_v24 = vmax.f32 %v5516_v46, 0.0  ;;  %8155 = vrsqrt.f32 %v5566_v17  ;;  %v11110_v38 = vmul.f32 0.03125, %v5396_v13  ;;  %v11114_v4 = vmul.f32 0.03125, %v5402_v59 }
0x137e   : > { %8157 = vrsqrt.f32 %v5563_v12  ;;  %v5548_v17 = vsub.f32 %v10961_v16, %v11104_v14  ;;  %v5549_v12 = vsub.f32 %v10948_v19, %v11092_v7 }
0x137f   : > { %v5564_v62 = vadd.f32 1e-12, %v5532_v24  ;;  %v5503_v58 = vmul.f32 %v11110_v38, %v11110_v38  ;;  %v5506_v63 = vmul.f32 %v11114_v4, %v11114_v4 }
0x1380   : > { %v5464_v15 = vpop.xlane.xlu0 %5463  ;;  %v5398_v1 = vpop.xlane.xlu1 %5397 }
0x1381   : > { %8159 = vrsqrt.f32 %v5564_v62  ;;  %v5489_v26 = vmul.f32 0.03125, %v5464_v15  ;;  %v11120_v10 = vmul.f32 0.03125, %v5398_v1 }
0x1383   : > { %v5521_v53 = vsub.f32 %v5489_v26, %v5505_v42  ;;  %v5504_v49 = vmul.f32 %v11120_v10, %v11120_v10 }
0x1384   : > { %v5460_v23 = vpop.xlane.xlu0 %5459  ;;  %v5466_v60 = vpop.xlane.xlu1 %5465 }
0x1385   : > { %v5487_v29 = vmul.f32 0.03125, %v5460_v23  ;;  %v5490_v51 = vmul.f32 0.03125, %v5466_v60  ;;  %v5537_v11 = vmax.f32 %v5521_v53, 0.0 }
0x1387   : > { %v5519_v37 = vsub.f32 %v5487_v29, %v5503_v58  ;;  %v5522_v54 = vsub.f32 %v5490_v51, %v5506_v63  ;;  %v5569_v35 = vadd.f32 1e-12, %v5537_v11  ;;  %v8154_v6 = vpop.eup %8153 }
0x1388   : > { %v5462_v8 = vpop.xlane.xlu1 %5461  ;;  %v5408_v39 = vpop.xlane.xlu0 %5407  ;;  %v5597_v55 = vmul.f32 %v8154_v6, %v5549_v12 }
0x1389   : > { %v5535_v57 = vmax.f32 %v5519_v37, 0.0  ;;  %v5538_v27 = vmax.f32 %v5522_v54, 0.0  ;;  %v5488_v52 = vmul.f32 0.03125, %v5462_v8  ;;  %8161 = vrsqrt.f32 %v5569_v35 }
0x138a   : > { %v8156_v31 = vpop.eup %8155  ;;  %v11130_v46 = vmul.f32 0.03125, %v5408_v39 }
0x138b   : > { %v5570_v48 = vadd.f32 1e-12, %v5538_v27  ;;  %v5520_v28 = vsub.f32 %v5488_v52, %v5504_v49  ;;  %v5567_v50 = vadd.f32 1e-12, %v5535_v57  ;;  %v8158_v44 = vpop.eup %8157  ;;  %v5598_v13 = vmul.f32 %v8156_v31, %v5550_v43 }
0x138c   : > { %v5404_v45 = vpop.xlane.xlu0 %5403  ;;  %v5410_v0 = vpop.xlane.xlu1 %5409  ;;  %v5595_v15 = vmul.f32 %v8158_v44, %v5547_v20  ;;  %v5509_v26 = vmul.f32 %v11130_v46, %v11130_v46  ;;  %v5554_v20 = vsub.f32 %v10988_v2, %v11114_v4 }
0x138d   : > { %v5536_v34 = vmax.f32 %v5520_v28, 0.0  ;;  %8163 = vrsqrt.f32 %v5570_v48  ;;  %v11134_v24 = vmul.f32 0.03125, %v5404_v45  ;;  %v11136_v42 = vmul.f32 0.03125, %v5410_v0 }
0x138e   : > { %v8160_v9 = vpop.eup %8159  ;;  %8165 = vrsqrt.f32 %v5567_v50  ;;  %v5612_v7 = vpack.c.bf16 %v5598_v13, %v5597_v55 }
0x138f   : > { %v5568_v59 = vadd.f32 1e-12, %v5536_v34  ;;  %v5596_v1 = vmul.f32 %v8160_v9, %v5548_v17  ;;  %v5507_v58 = vmul.f32 %v11134_v24, %v11134_v24  ;;  %v5510_v29 = vmul.f32 %v11136_v42, %v11136_v42 }
0x1390   : > { %v5472_v30 = vpop.xlane.xlu0 %5471  ;;  %v5406_v62 = vpop.xlane.xlu1 %5405  ;;  %v5553_v9 = vsub.f32 %v10977_v33, %v11108_v40 }
0x1391   : > { %8167 = vrsqrt.f32 %v5568_v59  ;;  %v5493_v14 = vmul.f32 0.03125, %v5472_v30  ;;  %v5611_v53 = vpack.c.bf16 %v5596_v1, %v5595_v15  ;;  %v11144_v51 = vmul.f32 0.03125, %v5406_v62 }
0x1392   : > { %v5551_v59 = vsub.f32 %v10985_v47, %v11110_v38  ;;  %v5552_v30 = vsub.f32 %v10996_v5, %v11120_v10 }
0x1393   : > { %v5525_v23 = vsub.f32 %v5493_v14, %v5509_v26  ;;  %7431 = vmatprep.mubr.bf16.mxu1 %v5611_v53  ;;  %v5508_v27 = vmul.f32 %v11144_v51, %v11144_v51 }
0x1394   : > { %v5468_v60 = vpop.xlane.xlu0 %5467  ;;  %v5474_v63 = vpop.xlane.xlu1 %5473  ;;  %7432 = vmatmul.mubr.bf16.vlgmr.msra.gmra.mxu1 %v5612_v7 }
0x1395   : > { %v5491_v11 = vmul.f32 0.03125, %v5468_v60  ;;  %v5494_v37 = vmul.f32 0.03125, %v5474_v63  ;;  %v5541_v39 = vmax.f32 %v5525_v23, 0.0 }
0x1396   : > { %v8162_v48 = vpop.eup %8161 }
0x1397   : > { %v5523_v54 = vsub.f32 %v5491_v11, %v5507_v58  ;;  %v5526_v8 = vsub.f32 %v5494_v37, %v5510_v29  ;;  %v5573_v0 = vadd.f32 1e-12, %v5541_v39  ;;  %v5601_v15 = vmul.f32 %v8162_v48, %v5553_v9 }
0x1398   : > { %v5470_v49 = vpop.xlane.xlu1 %5469  ;;  %v5416_v57 = vpop.xlane.xlu0 %5415  ;;  %v5555_v9 = vsub.f32 %v11029_v25, %v11134_v24 }
0x1399   : > { %v5539_v52 = vmax.f32 %v5523_v54, 0.0  ;;  %v5542_v35 = vmax.f32 %v5526_v8, 0.0  ;;  %v5492_v6 = vmul.f32 0.03125, %v5470_v49  ;;  %v11158_v40 = vmul.f32 0.03125, %v5416_v57 }
0x139a   : > { %v8164_v45 = vpop.eup %8163 }
0x139b   : > { %v5571_v28 = vadd.f32 1e-12, %v5539_v52  ;;  %v5574_v31 = vadd.f32 1e-12, %v5542_v35  ;;  %v5524_v50 = vsub.f32 %v5492_v6, %v5508_v27  ;;  %v8166_v34 = vpop.eup %8165  ;;  %v5602_v1 = vmul.f32 %v8164_v45, %v5554_v20 }
0x139c   : > { %v5412_v44 = vpop.xlane.xlu0 %5411  ;;  %v5418_v43 = vpop.xlane.xlu1 %5417  ;;  %v5599_v14 = vmul.f32 %v8166_v34, %v5551_v59  ;;  %v5513_v60 = vmul.f32 %v11158_v40, %v11158_v40  ;;  %v5556_v20 = vsub.f32 %v11040_v32, %v11144_v51  ;;  %v5557_v59 = vsub.f32 %v11018_v41, %v11130_v46 }
0x139d   : > { %v5540_v17 = vmax.f32 %v5524_v50, 0.0  ;;  %v11152_v12 = vmul.f32 0.03125, %v5412_v44  ;;  %8169 = vrsqrt.f32 %v5574_v31  ;;  %v5614_v23 = vpack.c.bf16 %v5602_v1, %v5601_v15 }
0x139e   : > { %v8168_v13 = vpop.eup %8167  ;;  %8171 = vrsqrt.f32 %v5571_v28  ;;  %v5434_v63 = vmul.f32 0.03125, %v5418_v43  ;;  %v5558_v43 = vsub.f32 %v11032_v56, %v11136_v42 }
0x139f   : > { %v5572_v62 = vadd.f32 1e-12, %v5540_v17  ;;  %8173 = vrsqrt.f32 %v5573_v0  ;;  %v5600_v26 = vmul.f32 %v8168_v13, %v5552_v30  ;;  %v5511_v53 = vmul.f32 %v11152_v12, %v11152_v12 }
0x13a0   : > { %v5476_v55 = vpop.xlane.xlu0 %5475  ;;  %v5414_v4 = vpop.xlane.xlu1 %5413  ;;  %v5514_v35 = vmul.f32 %v5434_v63, %v5434_v63  ;;  %v5559_v51 = vsub.f32 %v11073_v18, %v11152_v12  ;;  %v7753_v12 = vld [vmem:[%s11404_s1 + $0x238] sm:$0xff]  }
0x13a1   : > { %8175 = vrsqrt.f32 %v5572_v62  ;;  %v5495_v38 = vmul.f32 0.03125, %v5476_v55  ;;  %v5432_v7 = vmul.f32 0.03125, %v5414_v4  ;;  %v5613_v58 = vpack.c.bf16 %v5600_v26, %v5599_v14  ;;  %7447 = vmatprep.subr.bf16.mxu0 %v7753_v12 }
0x13a2   : > { %7448 = vmatpush3.bf16.msra.mxu0 %v7753_v12 }
0x13a3   : > { %v5527_v10 = vsub.f32 %v5495_v38, %v5511_v53  ;;  %7435 = vmatprep.mubr.bf16.mxu1 %v5613_v58  ;;  %v5512_v54 = vmul.f32 %v5432_v7, %v5432_v7  ;;  %v5560_v14 = vsub.f32 %v11081_v22, %v5432_v7  ;;  %v5561_v58 = vsub.f32 %v11062_v21, %v11158_v40  ;;  %v7754_v7 = vld [vmem:[%s11404_s1 + $0x230] sm:$0xff]   ;;  %v7755_v40 = vld [vmem:[%s11404_s1 + $0x228] sm:$0xff]  }
0x13a4   : > { %v5480_v29 = vpop.xlane.xlu0 %5479  ;;  %v5478_v11 = vpop.xlane.xlu1 %5477  ;;  %7436 = vmatmul.mubr.bf16.gmra.mxu1 %v5614_v23  ;;  %7449 = vmatprep.subr.bf16.mxu0 %v7754_v7 }
0x13a5   : > { %v5543_v37 = vmax.f32 %v5527_v10, 0.0  ;;  %v5497_v8 = vmul.f32 0.03125, %v5480_v29  ;;  %v5496_v39 = vmul.f32 0.03125, %v5478_v11  ;;  %v5562_v10 = vsub.f32 %v11076_v36, %v5434_v63  ;;  %v7756_v63 = vld [vmem:[%s11404_s1 + $0x220] sm:$0xff]  }
0x13a6   : > { %7450 = vmatpush3.bf16.msra.mxu0 %v7754_v7 }
0x13a7   : > { %v5529_v49 = vsub.f32 %v5497_v8, %v5513_v60  ;;  %v5528_v57 = vsub.f32 %v5496_v39, %v5512_v54  ;;  %v5575_v27 = vadd.f32 1e-12, %v5543_v37  ;;  %7451 = vmatprep.subr.bf16.mxu0 %v7755_v40  ;;  %v7757_v54 = vld [vmem:[%s11404_s1 + $0x218] sm:$0xff]   ;;  %v7758_v8 = vld [vmem:[%s11404_s1 + $0x210] sm:$0xff]   ;;  %v7759_v39 = vld [vmem:[%s11404_s1 + $0x208] sm:$0xff]  }
0x13a8   : > { %v5482_v52 = vpop.xlane.xlu1 %5481 }
0x13a9   : > { %v5545_v6 = vmax.f32 %v5529_v49, 0.0  ;;  %v5544_v48 = vmax.f32 %v5528_v57, 0.0  ;;  %v5498_v28 = vmul.f32 0.03125, %v5482_v52  ;;  %8177 = vrsqrt.f32 %v5575_v27  ;;  %v7760_v49 = vld [vmem:[%s11404_s1 + $0x200] sm:$0xff]   ;;  %v11205_v57 = vld [vmem:[%s11406_s3 + $0x110] ss:$0 sm:$0xff] }
0x13aa   : > { %v8170_v31 = vpop.eup %8169  ;;  %7452 = vmatpush3.bf16.msra.mxu0 %v7755_v40 }
0x13ab   : > { %v5577_v50 = vadd.f32 1e-12, %v5545_v6  ;;  %v5576_v45 = vadd.f32 1e-12, %v5544_v48  ;;  %v5530_v0 = vsub.f32 %v5498_v28, %v5514_v35  ;;  %v8172_v44 = vpop.eup %8171  ;;  %v5606_v30 = vmul.f32 %v8170_v31, %v5558_v43  ;;  %7453 = vmatprep.subr.bf16.mxu0 %v7756_v63 }
0x13ac   : > { %v8174_v34 = vpop.eup %8173  ;;  %v5603_v15 = vmul.f32 %v8172_v44, %v5555_v9 }
0x13ad   : > { %v5546_v17 = vmax.f32 %v5530_v0, 0.0  ;;  %8179 = vrsqrt.f32 %v5576_v45  ;;  %v5605_v42 = vmul.f32 %v8174_v34, %v5557_v59 }
0x13ae   : > { %v8176_v13 = vpop.eup %8175  ;;  %8181 = vrsqrt.f32 %v5577_v50  ;;  %7454 = vmatpush3.bf16.msra.mxu0 %v7756_v63 }
0x13af   : > { %v5578_v62 = vadd.f32 1e-12, %v5546_v17  ;;  %v5604_v1 = vmul.f32 %v8176_v13, %v5556_v20  ;;  %v5616_v4 = vpack.c.bf16 %v5606_v30, %v5605_v42  ;;  %7455 = vmatprep.subr.bf16.mxu0 %v7757_v54 }
0x13b1   : > { %8183 = vrsqrt.f32 %v5578_v62  ;;  %v5615_v55 = vpack.c.bf16 %v5604_v1, %v5603_v15 }
0x13b2   : > { %7456 = vmatpush3.bf16.msra.mxu0 %v7757_v54 }
0x13b3   : > { %7439 = vmatprep.mubr.bf16.mxu1 %v5615_v55  ;;  %7457 = vmatprep.subr.bf16.mxu0 %v7758_v8 }
0x13b4   : > { %7440 = vmatmul.mubr.bf16.gmra.mxu1 %v5616_v4 }
0x13b6   : > { %v8178_v24 = vpop.eup %8177  ;;  %7458 = vmatpush3.bf16.msra.mxu0 %v7758_v8 }
0x13b7   : > { %v5607_v53 = vmul.f32 %v8178_v24, %v5559_v51  ;;  %7459 = vmatprep.subr.bf16.mxu0 %v7759_v39 }
0x13ba   : > { %v8180_v26 = vpop.eup %8179  ;;  %7460 = vmatpush3.bf16.msra.mxu0 %v7759_v39 }
0x13bb   : > { %v8182_v46 = vpop.eup %8181  ;;  %v5608_v38 = vmul.f32 %v8180_v26, %v5560_v14  ;;  %7461 = vmatprep.subr.bf16.mxu0 %v7760_v49 }
0x13bc   : > { %v5609_v29 = vmul.f32 %v8182_v46, %v5561_v58 }
0x13bd   : > { %v5617_v60 = vpack.c.bf16 %v5608_v38, %v5607_v53 }
0x13be   : > { %v8184_v23 = vpop.eup %8183  ;;  %7462 = vmatpush3.bf16.msra.mxu0 %v7760_v49 }
0x13bf   : > { %v5610_v11 = vmul.f32 %v8184_v23, %v5562_v10  ;;  %7443 = vmatprep.mubr.bf16.mxu1 %v5617_v60 }
0x13c1   : > { %v5618_v37 = vpack.c.bf16 %v5610_v11, %v5609_v29 }
0x13c3   : > { %7444 = vmatmul.mubr.bf16.gmra.mxu1 %v5618_v37 }
0x1454   : > { %v7433_v27 = vpop.f32.mrf.mxu1 }
0x1455   : > { %v11208_v52 = vadd.f32 %v7433_v27, %v11205_v57 }
0x1456   : > { %v5722_v35 = vpop.f32.mrf.mxu1 }
0x1457   : > { %v5803_v6 = vmul.f32 0.044715, %v11208_v52  ;;  %v11212_v48 = vadd.f32 %v11205_v57, %v5722_v35 }
0x1458   : > { %v7434_v28 = vpop.f32.mrf.mxu1 }
0x1459   : > { %v5819_v31 = vmul.f32 %v5803_v6, %v11208_v52  ;;  %v5801_v50 = vmul.f32 0.044715, %v11212_v48  ;;  %v5734_v45 = vadd.f32 %v7434_v28, %v11205_v57 }
0x145a   : > { %v5725_v0 = vpop.f32.mrf.mxu1 }
0x145b   : > { %v5835_v44 = vmul.f32 %v5819_v31, %v11208_v52  ;;  %v5817_v43 = vmul.f32 %v5801_v50, %v11212_v48  ;;  %v5804_v34 = vmul.f32 0.044715, %v5734_v45  ;;  %v11220_v9 = vadd.f32 %v11205_v57, %v5725_v0 }
0x145d   : > { %v5851_v20 = vadd.f32 %v5835_v44, %v11208_v52  ;;  %v5833_v17 = vmul.f32 %v5817_v43, %v11212_v48  ;;  %v5820_v13 = vmul.f32 %v5804_v34, %v5734_v45  ;;  %v5802_v59 = vmul.f32 0.044715, %v11220_v9 }
0x145f   : > { %v5867_v30 = vmul.f32 0.7978846, %v5851_v20  ;;  %v5836_v62 = vmul.f32 %v5820_v13, %v5734_v45  ;;  %v5849_v15 = vadd.f32 %v5833_v17, %v11212_v48  ;;  %v5818_v1 = vmul.f32 %v5802_v59, %v11220_v9 }
0x1460   : > { %v5788_v59 = vmul.f32 0.5, %v5734_v45 }
0x1461   : > { %v5852_v42 = vadd.f32 %v5836_v62, %v5734_v45  ;;  %v5865_v55 = vmul.f32 0.7978846, %v5849_v15  ;;  %v5834_v4 = vmul.f32 %v5818_v1, %v11220_v9  ;;  %8185 = vtanh.f32 %v5867_v30 }
0x1462   : > { %v5787_v45 = vmul.f32 0.5, %v11208_v52 }
0x1463   : > { %v5868_v24 = vmul.f32 0.7978846, %v5852_v42  ;;  %v5850_v14 = vadd.f32 %v5834_v4, %v11220_v9  ;;  %8187 = vtanh.f32 %v5865_v55 }
0x1464   : > { %v7437_v51 = vpop.f32.mrf.mxu1 }
0x1465   : > { %8189 = vtanh.f32 %v5868_v24  ;;  %v11230_v26 = vadd.f32 %v7437_v51, %v11205_v57  ;;  %v5866_v53 = vmul.f32 0.7978846, %v5850_v14  ;;  %v5786_v51 = vmul.f32 0.5, %v11220_v9 }
0x1466   : > { %v5738_v46 = vpop.f32.mrf.mxu1 }
0x1467   : > { %v5807_v38 = vmul.f32 0.044715, %v11230_v26  ;;  %v11234_v58 = vadd.f32 %v11205_v57, %v5738_v46  ;;  %8191 = vtanh.f32 %v5866_v53 }
0x1468   : > { %v7438_v10 = vpop.f32.mrf.mxu1 }
0x1469   : > { %v5823_v23 = vmul.f32 %v5807_v38, %v11230_v26  ;;  %v5805_v60 = vmul.f32 0.044715, %v11234_v58  ;;  %v11239_v29 = vadd.f32 %v7438_v10, %v11205_v57  ;;  %v5785_v38 = vmul.f32 0.5, %v11212_v48 }
0x146a   : > { %v5741_v11 = vpop.f32.mrf.mxu1 }
0x146b   : > { %v5839_v37 = vmul.f32 %v5823_v23, %v11230_v26  ;;  %v5821_v12 = vmul.f32 %v5805_v60, %v11234_v58  ;;  %v5808_v7 = vmul.f32 0.044715, %v11239_v29  ;;  %v11245_v40 = vadd.f32 %v11205_v57, %v5741_v11 }
0x146d   : > { %v5855_v63 = vadd.f32 %v5839_v37, %v11230_v26  ;;  %v5837_v54 = vmul.f32 %v5821_v12, %v11234_v58  ;;  %v5824_v8 = vmul.f32 %v5808_v7, %v11239_v29  ;;  %v5806_v39 = vmul.f32 0.044715, %v11245_v40 }
0x146e   : > { %v8186_v6 = vpop.eup %8185 }
0x146f   : > { %v5871_v49 = vmul.f32 0.7978846, %v5855_v63  ;;  %v5840_v27 = vmul.f32 %v5824_v8, %v11239_v29  ;;  %v5822_v35 = vmul.f32 %v5806_v39, %v11245_v40  ;;  %v5853_v28 = vadd.f32 %v5837_v54, %v11234_v58 }
0x1470   : > { %v8188_v31 = vpop.eup %8187  ;;  %v5899_v15 = vadd.f32 1.0, %v8186_v6 }
0x1471   : > { %v5856_v50 = vadd.f32 %v5840_v27, %v11239_v29  ;;  %v5838_v0 = vmul.f32 %v5822_v35, %v11245_v40  ;;  %v5869_v43 = vmul.f32 0.7978846, %v5853_v28  ;;  %8193 = vtanh.f32 %v5871_v49 }
0x1472   : > { %v8190_v44 = vpop.eup %8189  ;;  %v5897_v42 = vadd.f32 1.0, %v8188_v31  ;;  %v5915_v37 = vmul.f32 %v5899_v15, %v5787_v45 }
0x1473   : > { %v5900_v34 = vadd.f32 1.0, %v8190_v44  ;;  %v5872_v20 = vmul.f32 0.7978846, %v5856_v50  ;;  %v5854_v13 = vadd.f32 %v5838_v0, %v11245_v40  ;;  %8195 = vtanh.f32 %v5869_v43 }
0x1474   : > { %v7441_v17 = vpop.f32.mrf.mxu1  ;;  %v8192_v62 = vpop.eup %8191  ;;  %v5913_v7 = vmul.f32 %v5897_v42, %v5785_v38  ;;  %v5790_v38 = vmul.f32 0.5, %v11245_v40 }
0x1475   : > { %v11258_v30 = vadd.f32 %v7441_v17, %v11205_v57  ;;  %8197 = vtanh.f32 %v5872_v20  ;;  %v5870_v55 = vmul.f32 0.7978846, %v5854_v13  ;;  %v5898_v14 = vadd.f32 1.0, %v8192_v62 }
0x1476   : > { %v5754_v1 = vpop.f32.mrf.mxu1  ;;  %v5916_v46 = vmul.f32 %v5900_v34, %v5788_v59 }
0x1477   : > { %v5811_v4 = vmul.f32 0.044715, %v11258_v30  ;;  %v11262_v24 = vadd.f32 %v11205_v57, %v5754_v1  ;;  %8199 = vtanh.f32 %v5870_v55  ;;  %v5914_v11 = vmul.f32 %v5898_v14, %v5786_v51 }
0x1478   : > { %v7442_v53 = vpop.f32.mrf.mxu1  ;;  %v5930_v54 = vpack.c.bf16 %v5916_v46, %v5915_v37  ;;  %v5792_v1 = vmul.f32 0.5, %v11239_v29  ;;  %v5791_v29 = vmul.f32 0.5, %v11230_v26 }
0x1479   : > { %v5827_v10 = vmul.f32 %v5811_v4, %v11258_v30  ;;  %v5809_v23 = vmul.f32 0.044715, %v11262_v24  ;;  %v11270_v60 = vadd.f32 %v7442_v53, %v11205_v57  ;;  %v5929_v8 = vpack.c.bf16 %v5914_v11, %v5913_v7 }
0x147a   : > { %v5757_v12 = vpop.f32.mrf.mxu1  ;;  %v5789_v11 = vmul.f32 0.5, %v11234_v58 }
0x147b   : > { %v5843_v9 = vmul.f32 %v5827_v10, %v11258_v30  ;;  %v5825_v52 = vmul.f32 %v5809_v23, %v11262_v24  ;;  %v5812_v63 = vmul.f32 0.044715, %v11270_v60  ;;  %v11276_v48 = vadd.f32 %v11205_v57, %v5757_v12  ;;  %7463 = vmatprep.mubr.bf16.mxu0 %v5929_v8 }
0x147c   : > { %7464 = vmatmul.mubr.bf16.vlgmr.msra.gmra.mxu0 %v5930_v54 }
0x147d   : > { %v5859_v39 = vadd.f32 %v5843_v9, %v11258_v30  ;;  %v5841_v49 = vmul.f32 %v5825_v52, %v11262_v24  ;;  %v5828_v27 = vmul.f32 %v5812_v63, %v11270_v60  ;;  %v5810_v35 = vmul.f32 0.044715, %v11276_v48 }
0x147e   : > { %v8194_v0 = vpop.eup %8193 }
0x147f   : > { %v5844_v6 = vmul.f32 %v5828_v27, %v11270_v60  ;;  %v5826_v28 = vmul.f32 %v5810_v35, %v11276_v48  ;;  %v5857_v31 = vadd.f32 %v5841_v49, %v11262_v24  ;;  %v5875_v50 = vmul.f32 0.7978846, %v5859_v39 }
0x1480   : > { %v8196_v20 = vpop.eup %8195  ;;  %v5903_v14 = vadd.f32 1.0, %v8194_v0 }
0x1481   : > { %v5860_v44 = vadd.f32 %v5844_v6, %v11270_v60  ;;  %v5842_v43 = vmul.f32 %v5826_v28, %v11276_v48  ;;  %v5873_v34 = vmul.f32 0.7978846, %v5857_v31  ;;  %v5901_v51 = vadd.f32 1.0, %v8196_v20 }
0x1482   : > { %v8198_v17 = vpop.eup %8197  ;;  %v5919_v8 = vmul.f32 %v5903_v14, %v5791_v29 }
0x1483   : > { %v5876_v13 = vmul.f32 0.7978846, %v5860_v44  ;;  %v7445_v59 = vpop.f32.mrf.mxu1  ;;  %v5858_v62 = vadd.f32 %v5842_v43, %v11276_v48  ;;  %8201 = vtanh.f32 %v5873_v34  ;;  %v5904_v42 = vadd.f32 1.0, %v8198_v17 }
0x1484   : > { %8203 = vtanh.f32 %v5875_v50  ;;  %v11289_v15 = vadd.f32 %v7445_v59, %v11205_v57  ;;  %v8200_v55 = vpop.eup %8199  ;;  %v5917_v54 = vmul.f32 %v5901_v51, %v5789_v11  ;;  %v5796_v51 = vmul.f32 0.5, %v11270_v60 }
0x1485   : > { %8205 = vtanh.f32 %v5876_v13  ;;  %v5770_v4 = vpop.f32.mrf.mxu1  ;;  %v5874_v45 = vmul.f32 0.7978846, %v5858_v62  ;;  %v5902_v10 = vadd.f32 1.0, %v8200_v55  ;;  %v5920_v37 = vmul.f32 %v5904_v42, %v5792_v1 }
0x1486   : > { %v5815_v46 = vmul.f32 0.044715, %v11289_v15  ;;  %v11294_v53 = vadd.f32 %v11205_v57, %v5770_v4 }
0x1487   : > { %v7446_v23 = vpop.f32.mrf.mxu1  ;;  %8207 = vtanh.f32 %v5874_v45  ;;  %v5918_v52 = vmul.f32 %v5902_v10, %v5790_v38  ;;  %v5932_v27 = vpack.c.bf16 %v5920_v37, %v5919_v8  ;;  %v5794_v38 = vmul.f32 0.5, %v11276_v48 }
0x1488   : > { %v5831_v12 = vmul.f32 %v5815_v46, %v11289_v15  ;;  %v5813_v7 = vmul.f32 0.044715, %v11294_v53  ;;  %v5782_v9 = vadd.f32 %v7446_v23, %v11205_v57  ;;  %v5793_v46 = vmul.f32 0.5, %v11262_v24 }
0x1489   : > { %v5773_v63 = vpop.f32.mrf.mxu1  ;;  %v5931_v26 = vpack.c.bf16 %v5918_v52, %v5917_v54  ;;  %v5795_v23 = vmul.f32 0.5, %v11258_v30 }
0x148a   : > { %v5847_v40 = vmul.f32 %v5831_v12, %v11289_v15  ;;  %v5829_v39 = vmul.f32 %v5813_v7, %v11294_v53  ;;  %v5816_v49 = vmul.f32 0.044715, %v5782_v9  ;;  %v5774_v58 = vadd.f32 %v11205_v57, %v5773_v63 }
0x148b   : > { %7467 = vmatprep.mubr.bf16.mxu0 %v5931_v26 }
0x148c   : > { %v5863_v35 = vadd.f32 %v5847_v40, %v11289_v15  ;;  %v5845_v6 = vmul.f32 %v5829_v39, %v11294_v53  ;;  %v5832_v28 = vmul.f32 %v5816_v49, %v5782_v9  ;;  %v5814_v31 = vmul.f32 0.044715, %v5774_v58  ;;  %7468 = vmatmul.mubr.bf16.gmra.mxu0 %v5932_v27 }
0x148d   : > { %v5800_v39 = vmul.f32 0.5, %v5782_v9  ;;  %v5797_v49 = vmul.f32 0.5, %v11294_v53  ;;  %v5798_v30 = vmul.f32 0.5, %v5774_v58  ;;  %v5799_v27 = vmul.f32 0.5, %v11289_v15 }
0x148e   : > { %v5848_v50 = vmul.f32 %v5832_v28, %v5782_v9  ;;  %v5830_v0 = vmul.f32 %v5814_v31, %v5774_v58  ;;  %v5861_v44 = vadd.f32 %v5845_v6, %v11294_v53  ;;  %v5879_v43 = vmul.f32 0.7978846, %v5863_v35 }
0x1490   : > { %v8202_v34 = vpop.eup %8201  ;;  %v5864_v20 = vadd.f32 %v5848_v50, %v5782_v9  ;;  %v5846_v17 = vmul.f32 %v5830_v0, %v5774_v58  ;;  %v5877_v13 = vmul.f32 0.7978846, %v5861_v44  ;;  %v8244_v44 = vmov 0.0  }
0x1491   : > { %v8204_v57 = vpop.eup %8203  ;;  %v5905_v42 = vadd.f32 1.0, %v8202_v34  ;;  %7479 = vmatprep.subr.mxu1 %v8244_v44  ;;  %7514 = vmatprep.subr.bf16.mxu0 %v8244_v44 }
0x1492   : > { %v8206_v59 = vpop.eup %8205  ;;  %v5880_v62 = vmul.f32 0.7978846, %v5864_v20  ;;  %v5862_v1 = vadd.f32 %v5846_v17, %v5774_v58  ;;  %8209 = vtanh.f32 %v5877_v13  ;;  %v5907_v14 = vadd.f32 1.0, %v8204_v57  ;;  %7511 = vmatprep.mubr.msk.f32.mxu1 %vm8245_vm0, %v8244_v44 }
0x1493   : > { %8211 = vtanh.f32 %v5879_v43  ;;  %v5908_v55 = vadd.f32 1.0, %v8206_v59  ;;  %v5921_v29 = vmul.f32 %v5905_v42, %v5793_v46 }
0x1494   : > { %v8208_v4 = vpop.eup %8207  ;;  %8213 = vtanh.f32 %v5880_v62  ;;  %v5878_v45 = vmul.f32 0.7978846, %v5862_v1  ;;  %v5923_v12 = vmul.f32 %v5907_v14, %v5795_v23  ;;  %v6625_v14 = vld [vmem:[%s11406_s3 + $0x118] ss:$0 sm:$0xff] }
0x1495   : > { %v5906_v10 = vadd.f32 1.0, %v8208_v4  ;;  %v5924_v11 = vmul.f32 %v5908_v55, %v5796_v51 }
0x1496   : > { %8215 = vtanh.f32 %v5878_v45 }
0x1497   : > { %v5922_v37 = vmul.f32 %v5906_v10, %v5794_v38  ;;  %v5934_v52 = vpack.c.bf16 %v5924_v11, %v5923_v12 }
0x1499   : > { %v5933_v7 = vpack.c.bf16 %v5922_v37, %v5921_v29 }
0x149b   : > { %7471 = vmatprep.mubr.bf16.mxu0 %v5933_v7 }
0x149c   : > { %7472 = vmatmul.mubr.bf16.gmra.mxu0 %v5934_v52 }
0x149f   : > { %v8210_v63 = vpop.eup %8209 }
0x14a0   : > { %v8212_v60 = vpop.eup %8211  ;;  %v5909_v8 = vadd.f32 1.0, %v8210_v63 }
0x14a1   : > { %v8214_v54 = vpop.eup %8213  ;;  %v5911_v48 = vadd.f32 1.0, %v8212_v60 }
0x14a2   : > { %v5912_v40 = vadd.f32 1.0, %v8214_v54  ;;  %v5925_v6 = vmul.f32 %v5909_v8, %v5797_v49 }
0x14a3   : > { %v8216_v24 = vpop.eup %8215  ;;  %v5927_v31 = vmul.f32 %v5911_v48, %v5799_v27  ;;  %v7764_v27 = vld [vmem:[%s11404_s1 + $0x260] sm:$0xff]  }
0x14a4   : > { %v5910_v26 = vadd.f32 1.0, %v8216_v24  ;;  %v5928_v35 = vmul.f32 %v5912_v40, %v5800_v39 }
0x14a6   : > { %v5926_v28 = vmul.f32 %v5910_v26, %v5798_v30  ;;  %v5936_v0 = vpack.c.bf16 %v5928_v35, %v5927_v31  ;;  %v7762_v30 = vld [vmem:[%s11404_s1 + $0x270] sm:$0xff]   ;;  %v7763_v26 = vld [vmem:[%s11404_s1 + $0x268] sm:$0xff]   ;;  %v7765_v35 = vld [vmem:[%s11404_s1 + $0x258] sm:$0xff]  }
0x14a7   : > { %v7768_v31 = vld [vmem:[%s11404_s1 + $0x240] sm:$0xff]  }
0x14a8   : > { %v5935_v50 = vpack.c.bf16 %v5926_v28, %v5925_v6  ;;  %v7766_v6 = vld [vmem:[%s11404_s1 + $0x250] sm:$0xff]   ;;  %v7767_v28 = vld [vmem:[%s11404_s1 + $0x248] sm:$0xff]  }
0x14aa   : > { %7475 = vmatprep.mubr.bf16.mxu0 %v5935_v50 }
0x14ab   : > { %7476 = vmatmul.mubr.bf16.gmra.mxu0 %v5936_v0 }
0x14ac   : > { %7530 = vmatprep.mubr.msk.bf16.mxu0 %vm8245_vm0, %v8244_v44 }
0x153c   : > { %v7465_v53 = vpop.f32.mrf.mxu0 }
0x153e   : > { %v11318_v15 = vpop.f32.mrf.mxu0 }
0x1540   : > { %v7466_v9 = vpop.f32.mrf.mxu0 }
0x1542   : > { %v11320_v58 = vpop.f32.mrf.mxu0 }
0x1543   : > { %v6099_v40 = vadd.f32 %v11320_v58, %v10961_v16  ;;  %v215_v16 = vld [vmem:[%s11406_s3 + $0x80] sm:$0xff] }
0x1545   : > { %v6120_v24 = vadd.f32 %v6625_v14, %v6099_v40 }
0x154c   : > { %v7469_v43 = vpop.f32.mrf.mxu0 }
0x154e   : > { %v6051_v34 = vpop.f32.mrf.mxu0 }
0x154f   : > { %v6102_v60 = vadd.f32 %v6051_v34, %v10985_v47 }
0x1550   : > { %v7470_v20 = vpop.f32.mrf.mxu0 }
0x1551   : > { %v6123_v8 = vadd.f32 %v6625_v14, %v6102_v60 }
0x1552   : > { %v6054_v17 = vpop.f32.mrf.mxu0 }
0x1553   : > { %v6103_v63 = vadd.f32 %v6054_v17, %v10996_v5 }
0x1555   : > { %v6124_v54 = vadd.f32 %v6625_v14, %v6103_v63 }
0x155c   : > { %v7473_v13 = vpop.f32.mrf.mxu0 }
0x155e   : > { %v6067_v57 = vpop.f32.mrf.mxu0 }
0x155f   : > { %v6106_v12 = vadd.f32 %v6067_v57, %v11029_v25 }
0x1560   : > { %v7474_v59 = vpop.f32.mrf.mxu0 }
0x1561   : > { %v6109_v11 = vadd.f32 %v7474_v59, %v11032_v56  ;;  %v6105_v56 = vadd.f32 %v7470_v20, %v10988_v2  ;;  %v6127_v52 = vadd.f32 %v6625_v14, %v6106_v12  ;;  %v6101_v2 = vadd.f32 %v7466_v9, %v10956_v3 }
0x1562   : > { %v6070_v62 = vpop.f32.mrf.mxu0  ;;  %v6098_v3 = vadd.f32 %v11318_v15, %v10953_v61  ;;  %v7761_v61 = vld [vmem:[%s11404_s1 + $0x278] sm:$0xff]  }
0x1563   : > { %v6130_v37 = vadd.f32 %v6625_v14, %v6109_v11  ;;  %v6122_v5 = vadd.f32 %v6625_v14, %v6101_v2  ;;  %7515 = vmatpush3.bf16.msra.mxu0 %v7761_v61 }
0x1564   : > { %7516 = vmatprep.subr.bf16.mxu0 %v8244_v44 }
0x1567   : > { %7517 = vmatpush3.bf16.msra.mxu0 %v7762_v30 }
0x1568   : > { %7518 = vmatprep.subr.bf16.mxu0 %v8244_v44 }
0x156b   : > { %v7477_v1 = vpop.f32.mrf.mxu0  ;;  %7519 = vmatpush3.bf16.msra.mxu0 %v7763_v26 }
0x156c   : > { %v6112_v4 = vadd.f32 %v7477_v1, %v11062_v21  ;;  %v6108_v21 = vadd.f32 %v7473_v13, %v11018_v41  ;;  %v6104_v41 = vadd.f32 %v7469_v43, %v10977_v33  ;;  %v6100_v33 = vadd.f32 %v7465_v53, %v10948_v19  ;;  %7520 = vmatprep.subr.bf16.mxu0 %v8244_v44 }
0x156d   : > { %v6083_v42 = vpop.f32.mrf.mxu0  ;;  %v6119_v19 = vadd.f32 %v6625_v14, %v6098_v3 }
0x156e   : > { %v6133_v10 = vadd.f32 %v6625_v14, %v6112_v4  ;;  %v6110_v23 = vadd.f32 %v6083_v42, %v11073_v18  ;;  %v6129_v18 = vadd.f32 %v6625_v14, %v6108_v21  ;;  %v6125_v25 = vadd.f32 %v6625_v14, %v6104_v41 }
0x156f   : > { %v7478_v55 = vpop.f32.mrf.mxu0  ;;  %v6121_v47 = vadd.f32 %v6625_v14, %v6100_v33  ;;  %7521 = vmatpush3.bf16.msra.mxu0 %v7764_v27 }
0x1570   : > { %v6113_v51 = vadd.f32 %v7478_v55, %v11076_v36  ;;  %v6131_v36 = vadd.f32 %v6625_v14, %v6110_v23  ;;  %7522 = vmatprep.subr.bf16.mxu0 %v8244_v44 }
0x1571   : > { %v6086_v45 = vpop.f32.mrf.mxu0 }
0x1572   : > { %v6134_v46 = vadd.f32 %v6625_v14, %v6113_v51  ;;  %v6111_v38 = vadd.f32 %v6086_v45, %v11081_v22  ;;  %v6107_v22 = vadd.f32 %v6070_v62, %v11040_v32  ;;  %v6126_v32 = vadd.f32 %v6625_v14, %v6105_v56 }
0x1573   : > { %7523 = vmatpush3.bf16.msra.mxu0 %v7765_v35 }
0x1574   : > { %7480 = vmatpush3.msra.mxu1 %v6134_v46  ;;  %v6132_v29 = vadd.f32 %v6625_v14, %v6111_v38  ;;  %v6128_v7 = vadd.f32 %v6625_v14, %v6107_v22  ;;  %7524 = vmatprep.subr.bf16.mxu0 %v8244_v44 }
0x1575   : > { %7481 = vmatprep.subr.mxu1 %v8244_v44 }
0x1576   : > { %7482 = vmatpush3.msra.mxu1 %v6133_v10 }
0x1577   : > { %7483 = vmatprep.subr.mxu1 %v8244_v44  ;;  %7525 = vmatpush3.bf16.msra.mxu0 %v7766_v6 }
0x1578   : > { %7484 = vmatpush3.msra.mxu1 %v6132_v29  ;;  %7526 = vmatprep.subr.bf16.mxu0 %v8244_v44 }
0x1579   : > { %7485 = vmatprep.subr.mxu1 %v8244_v44 }
0x157a   : > { %7486 = vmatpush3.msra.mxu1 %v6131_v36 }
0x157b   : > { %7487 = vmatprep.subr.mxu1 %v8244_v44  ;;  %7527 = vmatpush3.bf16.msra.mxu0 %v7767_v28 }
0x157c   : > { %7488 = vmatpush3.msra.mxu1 %v6130_v37  ;;  %7528 = vmatprep.subr.bf16.mxu0 %v8244_v44 }
0x157d   : > { %7489 = vmatprep.subr.mxu1 %v8244_v44 }
0x157e   : > { %7490 = vmatpush3.msra.mxu1 %v6129_v18 }
0x157f   : > { %7491 = vmatprep.subr.mxu1 %v8244_v44  ;;  %7529 = vmatpush3.bf16.msra.mxu0 %v7768_v31 }
0x1580   : > { %7492 = vmatpush3.msra.mxu1 %v6128_v7 }
0x1581   : > { %7493 = vmatprep.subr.mxu1 %v8244_v44 }
0x1582   : > { %7494 = vmatpush3.msra.mxu1 %v6127_v52 }
0x1583   : > { %7495 = vmatprep.subr.mxu1 %v8244_v44 }
0x1584   : > { %7496 = vmatpush3.msra.mxu1 %v6126_v32 }
0x1585   : > { %7497 = vmatprep.subr.mxu1 %v8244_v44 }
0x1586   : > { %7498 = vmatpush3.msra.mxu1 %v6125_v25 }
0x1587   : > { %7499 = vmatprep.subr.mxu1 %v8244_v44 }
0x1588   : > { %7500 = vmatpush3.msra.mxu1 %v6124_v54 }
0x1589   : > { %7501 = vmatprep.subr.mxu1 %v8244_v44 }
0x158a   : > { %7502 = vmatpush3.msra.mxu1 %v6123_v8 }
0x158b   : > { %7503 = vmatprep.subr.mxu1 %v8244_v44 }
0x158c   : > { %7504 = vmatpush3.msra.mxu1 %v6122_v5 }
0x158d   : > { %7505 = vmatprep.subr.mxu1 %v8244_v44 }
0x158e   : > { %7506 = vmatpush3.msra.mxu1 %v6121_v47 }
0x158f   : > { %7507 = vmatprep.subr.mxu1 %v8244_v44 }
0x1590   : > { %7508 = vmatpush3.msra.mxu1 %v6120_v24 }
0x1591   : > { %7509 = vmatprep.subr.mxu1 %v8244_v44  ;;  %v6626_v44 = vld [vmem:[%s11406_s3 + $0x120] ss:$0 sm:$0xff] }
0x1592   : > { %7510 = vmatpush3.msra.mxu1 %v6119_v19 }
0x1593   : > { %7512 = vmatmul.mubr.f32.vlgmr.msra.gmra.mxu1 %v215_v16 }
0x1653   : > { %v6201_v39 = vpop.f32.mrf.mxu1 }
0x1654   : > { %v6208_v48 = vmul.f32 %v6201_v39, %v6201_v39  ;;  %6205 = vadd.xlane.f32.xlu0 %v6201_v39 }
0x1655   : > { %v7513_v49 = vpop.f32.mrf.mxu1 }
0x1656   : > { %6209 = vadd.xlane.f32.xlu1 %v6208_v48 }
0x16dd   : > { %v6206_v50 = vpop.xlane.xlu0 %6205 }
0x16de   : > { %v6207_v0 = vmul.f32 0.03125, %v6206_v50 }
0x16df   : > { %v6210_v53 = vpop.xlane.xlu1 %6209 }
0x16e0   : > { %v6212_v15 = vmul.f32 %v6207_v0, %v6207_v0  ;;  %v6211_v9 = vmul.f32 0.03125, %v6210_v53  ;;  %v6215_v20 = vsub.f32 %v6201_v39, %v6207_v0 }
0x16e2   : > { %v6213_v58 = vsub.f32 %v6211_v9, %v6212_v15 }
0x16e4   : > { %v6214_v43 = vmax.f32 %v6213_v58, 0.0 }
0x16e6   : > { %v6216_v34 = vadd.f32 1e-12, %v6214_v43 }
0x16e8   : > { %8217 = vrsqrt.f32 %v6216_v34 }
0x16f5   : > { %v8218_v17 = vpop.eup %8217 }
0x16f6   : > { %v6218_v13 = vmul.f32 %v8218_v17, %v6215_v20 }
0x16f8   : > { %v6219_v57 = vpack.c.bf16 %v6218_v13, %v6218_v13 }
0x16fa   : > { %7531 = vmatmul.mubr.bf16.vlgmr.msra.gmra.mxu0 %v6219_v57 }
0x17ba   : > { %v6323_v59 = vpop.f32.mrf.mxu0 }
0x17bb   : > { %v6324_v62 = vadd.f32 %v6626_v44, %v6323_v59 }
0x17bc   : > { %v7532_v1 = vpop.f32.mrf.mxu0 }
0x17bd   : > { %6329 = vst [vmem:[%s197_s27] sm:$0xff] %v6324_v62 }
0x17be   : > { %v6326_v42 = vpop.f32.mrf.mxu0 }
0x17c0   : > { %v7533_v55 = vpop.f32.mrf.mxu0 }
0x17c1 PF: > { %s14_s15 = sadd.s32 1, %s8241_s15  }
0x17c2   : > { %p11_p5 = scmp.ge.s32.totalorder %s14_s15, 4  }
0x17c4   :  { %13 = sbr.rel (!%p11_p5) target bundleno = 1 (0x1), region = 67 }

</bundles_post_ra>
